<compile_context>
chip_gen: v7x
topology: tpu7x:2x2x1
jax: 0.10.0
libtpu: 0.0.40
codegen_flags: <defaults>
</compile_context>

<pallas_src>
import jax
import jax.numpy as jnp
from jax.experimental import pallas as pl
from jax.experimental.pallas import tpu as pltpu

# ---- small, module-consistent shapes -------------------------------------
H = W = 8        # fixed by the heads' Linear(128, ...) / Linear(64, ...)
CIN = 16         # input channels (small stand-in for 119)
CH = 32          # hidden channels (small stand-in for 256)
NBLOCKS = 2      # residual blocks (small stand-in for 19)
OUT_DIMS = 128   # policy output dims (small stand-in for 4672)
N = 2            # batch
EPS = 1e-5


# ============================ fused Pallas kernel ===========================

def _agent_kernel(x_ref, stem_w_ref, stem_s_ref, stem_b_ref,
                  res_w_ref, res_s_ref, res_b_ref,
                  pconv_w_ref, pconv_s_ref, pconv_b_ref, plin_w_ref, plin_b_ref,
                  vconv_w_ref, vconv_s_ref, vconv_b_ref,
                  vlin1_w_ref, vlin1_b_ref, vlin2_wt_ref, vlin2_b_ref,
                  value_ref, policy_ref,
                  xp_stem_ref, xp_hid_ref):
    nb = value_ref.shape[0]          # batch (static)
    hw = H * W

    # One-time zero of the padded scratch buffers: the halo is written exactly
    # once and reused by every conv layer (interiors are overwritten per layer).
    xp_stem_ref[...] = jnp.zeros(xp_stem_ref.shape, xp_stem_ref.dtype)
    xp_hid_ref[...] = jnp.zeros(xp_hid_ref.shape, xp_hid_ref.dtype)

    def conv3x3(xp_ref, a, w_ref, w_base, scale, bias):
        """3x3 'same' conv + folded BN affine; batch folded into matmul rows.

        xp_ref : (nb*(H+2), W+2, C) f32 scratch, halo already zero.
        a      : (nb*H*W, C) f32 activations.
        w_ref  : weight ref; w_ref[w_base + k] is the (C, Cout) bf16 tap weight.
        """
        c = xp_ref.shape[-1]
        cout = w_ref.shape[-1]
        # write interiors of the persistent zero-padded buffer
        for n in range(nb):
            r0 = n * (H + 2)
            xp_ref[r0 + 1:r0 + 1 + H, 1:1 + W, :] = (
                a[n * hw:(n + 1) * hw, :].reshape(H, W, c))
        xpv = xp_ref[...]                                   # single VMEM load
        acc = jnp.zeros((nb * hw, cout), jnp.float32)
        for k in range(9):                                  # 9 shifted taps
            ky, kx = k // 3, k % 3
            taps = [xpv[n * (H + 2) + ky:n * (H + 2) + ky + H,
                        kx:kx + W, :].reshape(hw, c)
                    for n in range(nb)]
            patch = jnp.concatenate(taps, axis=0).astype(jnp.bfloat16)
            acc = acc + jnp.dot(patch, w_ref[w_base + k],
                                preferred_element_type=jnp.float32)
        return acc * scale + bias                           # folded BatchNorm

    # ---- encoder: stem conv block + residual tower -------------------------
    h = jnp.maximum(conv3x3(xp_stem_ref, x_ref[...], stem_w_ref, 0,
                            stem_s_ref[...], stem_b_ref[...]), 0.0)
    for blk in range(NBLOCKS):                              # unrolled
        l1, l2 = 2 * blk, 2 * blk + 1
        mid = jnp.maximum(conv3x3(xp_hid_ref, h, res_w_ref, 9 * l1,
                                  res_s_ref[l1], res_b_ref[l1]), 0.0)
        out = conv3x3(xp_hid_ref, mid, res_w_ref, 9 * l2,
                      res_s_ref[l2], res_b_ref[l2])
        h = jnp.maximum(h + out, 0.0)                       # residual + ReLU

    h3 = h.reshape(nb, hw, CH)                              # (N, HW, C)

    # ---- value head: 1x1 conv (lane reduce) + BN + ReLU + MLP ---------------
    vplane = jnp.sum(h3 * vconv_w_ref[...], axis=-1)        # (N, HW)
    vflat = jnp.maximum(vplane * vconv_s_ref[...] + vconv_b_ref[...], 0.0)
    h1 = jnp.dot(vflat.astype(jnp.bfloat16), vlin1_w_ref[...],
                 preferred_element_type=jnp.float32) + vlin1_b_ref[...]
    h1 = jnp.maximum(h1, 0.0)
    v = jnp.sum(h1 * vlin2_wt_ref[...], axis=-1, keepdims=True) + vlin2_b_ref[...]
    value_ref[...] = jnp.tanh(v)

    # ---- policy head: 1x1 conv (2 channel planes) + BN + ReLU + Linear ------
    # NCHW flatten order is folded into the row-split of the Linear weight:
    #   logits = p0 @ W[c=0] + p1 @ W[c=1] + b
    logits = plin_b_ref[...]
    for c in range(2):
        pc = jnp.sum(h3 * pconv_w_ref[c], axis=-1)          # (N, HW)
        pc = jnp.maximum(pc * pconv_s_ref[c] + pconv_b_ref[c], 0.0)
        logits = logits + jnp.dot(pc.astype(jnp.bfloat16), plin_w_ref[c],
                                  preferred_element_type=jnp.float32)
    m = jnp.max(logits, axis=-1, keepdims=True)             # stable softmax
    e = jnp.exp(logits - m)
    policy_ref[...] = e / jnp.sum(e, axis=-1, keepdims=True)


# ============================ wrapper =======================================

@jax.jit
def agent_forward(x_nchw, params):
    n = x_nchw.shape[0]
    # One boundary transpose NCHW -> rows=(n,y,x), lanes=channels.
    x = jnp.transpose(x_nchw, (0, 2, 3, 1)).astype(jnp.float32).reshape(n * H * W, CIN)
    value, policy = pl.pallas_call(
        _agent_kernel,
        out_shape=(jax.ShapeDtypeStruct((n, 1), jnp.float32),
                   jax.ShapeDtypeStruct((n, OUT_DIMS), jnp.float32)),
        scratch_shapes=[
            pltpu.VMEM((n * (H + 2), W + 2, CIN), jnp.float32),   # stem padded buf
            pltpu.VMEM((n * (H + 2), W + 2, CH), jnp.float32),    # hidden padded buf
        ],
        compiler_params=pltpu.CompilerParams(vmem_limit_bytes=32 * 1024 * 1024),
    )(x,
      params["stem_w"], params["stem_s"], params["stem_b"],
      params["res_w"], params["res_s"], params["res_b"],
      params["pconv_w"], params["pconv_s"], params["pconv_b"],
      params["plin_w"], params["plin_b"],
      params["vconv_w"], params["vconv_s"], params["vconv_b"],
      params["vlin1_w"], params["vlin1_b"],
      params["vlin2_wt"], params["vlin2_b"])
    return value, policy


# ============================ parameters ====================================

def init_params(key):
    keys = jax.random.split(key, 64)
    ki = iter(keys)

    def nrm(shape, s=0.1):
        return s * jax.random.normal(next(ki), shape, jnp.float32)

    def bn_params(c):
        gamma = 1.0 + nrm((c,), 0.05)
        beta = nrm((c,), 0.05)
        mean = nrm((c,), 0.05)
        var = 1.0 + jnp.abs(nrm((c,), 0.05))
        return gamma, beta, mean, var

    def fold_bn(conv_bias, gamma, beta, mean, var):
        scale = gamma / jnp.sqrt(var + EPS)
        bias = (conv_bias - mean) * scale + beta
        return scale, bias

    p = {}
    # stem: Conv3x3(CIN->CH) + BN + ReLU   (weights HWIO -> (9, Cin, Cout), bf16)
    w = nrm((3, 3, CIN, CH)).reshape(9, CIN, CH)
    s, b = fold_bn(nrm((CH,)), *bn_params(CH))
    p["stem_w"] = w.astype(jnp.bfloat16)
    p["stem_s"] = s.reshape(1, CH)
    p["stem_b"] = b.reshape(1, CH)

    # residual blocks: 2*NBLOCKS conv layers stacked
    rw, rs, rb = [], [], []
    for _ in range(2 * NBLOCKS):
        rw.append(nrm((3, 3, CH, CH)).reshape(9, CH, CH))
        s_, b_ = fold_bn(nrm((CH,)), *bn_params(CH))
        rs.append(s_.reshape(1, CH))
        rb.append(b_.reshape(1, CH))
    p["res_w"] = jnp.concatenate(rw, axis=0).astype(jnp.bfloat16)  # (2*NB*9, CH, CH)
    p["res_s"] = jnp.stack(rs, axis=0)                              # (2*NB, 1, CH)
    p["res_b"] = jnp.stack(rb, axis=0)

    # policy head: Conv1x1(CH->2)+BN+ReLU, Flatten(NCHW), Linear(128->OUT), Softmax
    pw = nrm((2, CH))                                    # PyTorch (Cout, Cin) layout
    ps, pb = fold_bn(nrm((2,)), *bn_params(2))
    p["pconv_w"] = pw.reshape(2, 1, CH)                  # f32 (VPU lane-reduce path)
    p["pconv_s"] = ps.reshape(2, 1, 1)
    p["pconv_b"] = pb.reshape(2, 1, 1)
    plw = nrm((2 * H * W, OUT_DIMS))                     # rows in NCHW-flatten order
    p["plin_w"] = plw.reshape(2, H * W, OUT_DIMS).astype(jnp.bfloat16)
    p["plin_b"] = nrm((OUT_DIMS,)).reshape(1, OUT_DIMS)

    # value head: Conv1x1(CH->1)+BN+ReLU, Flatten, Lin(64->256)+ReLU, Lin(256->1)+Tanh
    vw = nrm((1, CH))
    vs, vb = fold_bn(nrm((1,)), *bn_params(1))
    p["vconv_w"] = vw.reshape(1, 1, CH)                  # f32 (VPU lane-reduce path)
    p["vconv_s"] = vs.reshape(1, 1)
    p["vconv_b"] = vb.reshape(1, 1)
    p["vlin1_w"] = nrm((H * W, 256)).astype(jnp.bfloat16)
    p["vlin1_b"] = nrm((256,)).reshape(1, 256)
    p["vlin2_wt"] = nrm((256, 1)).reshape(1, 256)        # transposed, f32 lane-reduce
    p["vlin2_b"] = nrm((1,)).reshape(1, 1)
    return p


# ============================ main ==========================================

if __name__ == "__main__":
    key = jax.random.PRNGKey(0)
    pkey, xkey = jax.random.split(key)
    params = init_params(pkey)
    x = jax.random.normal(xkey, (N, CIN, H, W), jnp.float32)   # NCHW like PyTorch
    value, policy = agent_forward(x, params)
    jax.block_until_ready((value, policy))
    assert value.shape == (N, 1)
    assert policy.shape == (N, OUT_DIMS)
    assert bool(jnp.all(jnp.isfinite(value)))
    assert bool(jnp.all(jnp.isfinite(policy)))
    print("KERNEL_OK")
</pallas_src>

<mosaic_0001>
module attributes {stable_mosaic.version = 11 : i64} {
  func.func @_agent_kernel(%arg0: memref<128x16xf32, #tpu.memory_space<vmem>>, %arg1: memref<9x16x32xbf16, #tpu.memory_space<vmem>>, %arg2: memref<1x32xf32, #tpu.memory_space<vmem>>, %arg3: memref<1x32xf32, #tpu.memory_space<vmem>>, %arg4: memref<36x32x32xbf16, #tpu.memory_space<vmem>>, %arg5: memref<4x1x32xf32, #tpu.memory_space<vmem>>, %arg6: memref<4x1x32xf32, #tpu.memory_space<vmem>>, %arg7: memref<2x1x32xf32, #tpu.memory_space<vmem>>, %arg8: memref<2x1x1xf32, #tpu.memory_space<vmem>>, %arg9: memref<2x1x1xf32, #tpu.memory_space<vmem>>, %arg10: memref<2x64x128xbf16, #tpu.memory_space<vmem>>, %arg11: memref<1x128xf32, #tpu.memory_space<vmem>>, %arg12: memref<1x1x32xf32, #tpu.memory_space<vmem>>, %arg13: memref<1x1xf32, #tpu.memory_space<vmem>>, %arg14: memref<1x1xf32, #tpu.memory_space<vmem>>, %arg15: memref<64x256xbf16, #tpu.memory_space<vmem>>, %arg16: memref<1x256xf32, #tpu.memory_space<vmem>>, %arg17: memref<1x256xf32, #tpu.memory_space<vmem>>, %arg18: memref<1x1xf32, #tpu.memory_space<vmem>>, %arg19: memref<2x1xf32, #tpu.memory_space<vmem>>, %arg20: memref<2x128xf32, #tpu.memory_space<vmem>>, %arg21: memref<20x10x16xf32, #tpu.memory_space<vmem>>, %arg22: memref<20x10x32xf32, #tpu.memory_space<vmem>>) attributes {dimension_semantics = [], scalar_prefetch = 0 : i64, scratch_operands = 2 : i64, tpu.core_type = #tpu.core_type<tc>} {
    %cst = arith.constant 0.000000e+00 : f32
    %0 = vector.broadcast %cst : f32 to vector<20x10x16xf32>
    %c0 = arith.constant 0 : index
    %c0_0 = arith.constant 0 : index
    %c0_1 = arith.constant 0 : index
    %1 = vector.load %arg21[%c0, %c0_0, %c0_1] : memref<20x10x16xf32, #tpu.memory_space<vmem>>, vector<20x10x16xf32>
    tpu.vector_store %arg21[%c0, %c0_0, %c0_1], %0 {strides = array<i32>} : memref<20x10x16xf32, #tpu.memory_space<vmem>>, vector<20x10x16xf32>,
    %cst_2 = arith.constant 0.000000e+00 : f32
    %2 = vector.broadcast %cst_2 : f32 to vector<20x10x32xf32>
    %c0_3 = arith.constant 0 : index
    %c0_4 = arith.constant 0 : index
    %c0_5 = arith.constant 0 : index
    %3 = vector.load %arg22[%c0_3, %c0_4, %c0_5] : memref<20x10x32xf32, #tpu.memory_space<vmem>>, vector<20x10x32xf32>
    tpu.vector_store %arg22[%c0_3, %c0_4, %c0_5], %2 {strides = array<i32>} : memref<20x10x32xf32, #tpu.memory_space<vmem>>, vector<20x10x32xf32>,
    %c0_6 = arith.constant 0 : index
    %c0_7 = arith.constant 0 : index
    %4 = vector.load %arg0[%c0_6, %c0_7] : memref<128x16xf32, #tpu.memory_space<vmem>>, vector<128x16xf32>
    %c0_8 = arith.constant 0 : index
    %c0_9 = arith.constant 0 : index
    %5 = vector.load %arg2[%c0_8, %c0_9] : memref<1x32xf32, #tpu.memory_space<vmem>>, vector<1x32xf32>
    %c0_10 = arith.constant 0 : index
    %c0_11 = arith.constant 0 : index
    %6 = vector.load %arg3[%c0_10, %c0_11] : memref<1x32xf32, #tpu.memory_space<vmem>>, vector<1x32xf32>
    %7 = vector.extract_strided_slice %4 {offsets = [0, 0], sizes = [64, 16], strides = [1, 1]} : vector<128x16xf32> to vector<64x16xf32>
    %8 = vector.shape_cast %7 : vector<64x16xf32> to vector<8x8x16xf32>
    %c1 = arith.constant 1 : index
    %c1_12 = arith.constant 1 : index
    %c0_13 = arith.constant 0 : index
    %9 = vector.load %arg21[%c1, %c1_12, %c0_13] : memref<20x10x16xf32, #tpu.memory_space<vmem>>, vector<8x8x16xf32>
    tpu.vector_store %arg21[%c1, %c1_12, %c0_13], %8 {strides = array<i32>} : memref<20x10x16xf32, #tpu.memory_space<vmem>>, vector<8x8x16xf32>,
    %10 = vector.extract_strided_slice %4 {offsets = [64, 0], sizes = [64, 16], strides = [1, 1]} : vector<128x16xf32> to vector<64x16xf32>
    %11 = vector.shape_cast %10 : vector<64x16xf32> to vector<8x8x16xf32>
    %c11 = arith.constant 11 : index
    %c1_14 = arith.constant 1 : index
    %c0_15 = arith.constant 0 : index
    %12 = vector.load %arg21[%c11, %c1_14, %c0_15] : memref<20x10x16xf32, #tpu.memory_space<vmem>>, vector<8x8x16xf32>
    tpu.vector_store %arg21[%c11, %c1_14, %c0_15], %11 {strides = array<i32>} : memref<20x10x16xf32, #tpu.memory_space<vmem>>, vector<8x8x16xf32>,
    %c0_16 = arith.constant 0 : index
    %c0_17 = arith.constant 0 : index
    %c0_18 = arith.constant 0 : index
    %13 = vector.load %arg21[%c0_16, %c0_17, %c0_18] : memref<20x10x16xf32, #tpu.memory_space<vmem>>, vector<20x10x16xf32>
    %cst_19 = arith.constant 0.000000e+00 : f32
    %14 = vector.broadcast %cst_19 : f32 to vector<128x32xf32>
    %15 = vector.extract_strided_slice %13 {offsets = [0, 0, 0], sizes = [8, 8, 16], strides = [1, 1, 1]} : vector<20x10x16xf32> to vector<8x8x16xf32>
    %16 = vector.shape_cast %15 : vector<8x8x16xf32> to vector<64x16xf32>
    %17 = vector.extract_strided_slice %13 {offsets = [10, 0, 0], sizes = [8, 8, 16], strides = [1, 1, 1]} : vector<20x10x16xf32> to vector<8x8x16xf32>
    %18 = vector.shape_cast %17 : vector<8x8x16xf32> to vector<64x16xf32>
    %19 = tpu.concatenate %16, %18 in 0 : vector<64x16xf32>, vector<64x16xf32> -> vector<128x16xf32>
    %20 = arith.truncf %19 : vector<128x16xf32> to vector<128x16xbf16>
    %c0_20 = arith.constant 0 : index
    %c0_21 = arith.constant 0 : index
    %c0_22 = arith.constant 0 : index
    %21 = vector.load %arg1[%c0_20, %c0_21, %c0_22] : memref<9x16x32xbf16, #tpu.memory_space<vmem>>, vector<1x16x32xbf16>
    %22 = vector.shape_cast %21 : vector<1x16x32xbf16> to vector<16x32xbf16>
    %cst_23 = arith.constant dense<0.000000e+00> : vector<128x32xf32>
    %23 = tpu.matmul %20, %22, %cst_23 {dimension_numbers = #tpu.dot_dimension_numbers<[1], [0], [0], [1], [0, 0, 1, 1], [], []>} : vector<128x16xbf16>, vector<16x32xbf16>, vector<128x32xf32> -> vector<128x32xf32>
    %24 = arith.addf %14, %23 : vector<128x32xf32>
    %25 = vector.extract_strided_slice %13 {offsets = [0, 1, 0], sizes = [8, 8, 16], strides = [1, 1, 1]} : vector<20x10x16xf32> to vector<8x8x16xf32>
    %26 = vector.shape_cast %25 : vector<8x8x16xf32> to vector<64x16xf32>
    %27 = vector.extract_strided_slice %13 {offsets = [10, 1, 0], sizes = [8, 8, 16], strides = [1, 1, 1]} : vector<20x10x16xf32> to vector<8x8x16xf32>
    %28 = vector.shape_cast %27 : vector<8x8x16xf32> to vector<64x16xf32>
    %29 = tpu.concatenate %26, %28 in 0 : vector<64x16xf32>, vector<64x16xf32> -> vector<128x16xf32>
    %30 = arith.truncf %29 : vector<128x16xf32> to vector<128x16xbf16>
    %c1_24 = arith.constant 1 : index
    %c0_25 = arith.constant 0 : index
    %c0_26 = arith.constant 0 : index
    %31 = vector.load %arg1[%c1_24, %c0_25, %c0_26] : memref<9x16x32xbf16, #tpu.memory_space<vmem>>, vector<1x16x32xbf16>
    %32 = vector.shape_cast %31 : vector<1x16x32xbf16> to vector<16x32xbf16>
    %cst_27 = arith.constant dense<0.000000e+00> : vector<128x32xf32>
    %33 = tpu.matmul %30, %32, %cst_27 {dimension_numbers = #tpu.dot_dimension_numbers<[1], [0], [0], [1], [0, 0, 1, 1], [], []>} : vector<128x16xbf16>, vector<16x32xbf16>, vector<128x32xf32> -> vector<128x32xf32>
    %34 = arith.addf %24, %33 : vector<128x32xf32>
    %35 = vector.extract_strided_slice %13 {offsets = [0, 2, 0], sizes = [8, 8, 16], strides = [1, 1, 1]} : vector<20x10x16xf32> to vector<8x8x16xf32>
    %36 = vector.shape_cast %35 : vector<8x8x16xf32> to vector<64x16xf32>
    %37 = vector.extract_strided_slice %13 {offsets = [10, 2, 0], sizes = [8, 8, 16], strides = [1, 1, 1]} : vector<20x10x16xf32> to vector<8x8x16xf32>
    %38 = vector.shape_cast %37 : vector<8x8x16xf32> to vector<64x16xf32>
    %39 = tpu.concatenate %36, %38 in 0 : vector<64x16xf32>, vector<64x16xf32> -> vector<128x16xf32>
    %40 = arith.truncf %39 : vector<128x16xf32> to vector<128x16xbf16>
    %c2 = arith.constant 2 : index
    %c0_28 = arith.constant 0 : index
    %c0_29 = arith.constant 0 : index
    %41 = vector.load %arg1[%c2, %c0_28, %c0_29] : memref<9x16x32xbf16, #tpu.memory_space<vmem>>, vector<1x16x32xbf16>
    %42 = vector.shape_cast %41 : vector<1x16x32xbf16> to vector<16x32xbf16>
    %cst_30 = arith.constant dense<0.000000e+00> : vector<128x32xf32>
    %43 = tpu.matmul %40, %42, %cst_30 {dimension_numbers = #tpu.dot_dimension_numbers<[1], [0], [0], [1], [0, 0, 1, 1], [], []>} : vector<128x16xbf16>, vector<16x32xbf16>, vector<128x32xf32> -> vector<128x32xf32>
    %44 = arith.addf %34, %43 : vector<128x32xf32>
    %45 = vector.extract_strided_slice %13 {offsets = [1, 0, 0], sizes = [8, 8, 16], strides = [1, 1, 1]} : vector<20x10x16xf32> to vector<8x8x16xf32>
    %46 = vector.shape_cast %45 : vector<8x8x16xf32> to vector<64x16xf32>
    %47 = vector.extract_strided_slice %13 {offsets = [11, 0, 0], sizes = [8, 8, 16], strides = [1, 1, 1]} : vector<20x10x16xf32> to vector<8x8x16xf32>
    %48 = vector.shape_cast %47 : vector<8x8x16xf32> to vector<64x16xf32>
    %49 = tpu.concatenate %46, %48 in 0 : vector<64x16xf32>, vector<64x16xf32> -> vector<128x16xf32>
    %50 = arith.truncf %49 : vector<128x16xf32> to vector<128x16xbf16>
    %c3 = arith.constant 3 : index
    %c0_31 = arith.constant 0 : index
    %c0_32 = arith.constant 0 : index
    %51 = vector.load %arg1[%c3, %c0_31, %c0_32] : memref<9x16x32xbf16, #tpu.memory_space<vmem>>, vector<1x16x32xbf16>
    %52 = vector.shape_cast %51 : vector<1x16x32xbf16> to vector<16x32xbf16>
    %cst_33 = arith.constant dense<0.000000e+00> : vector<128x32xf32>
    %53 = tpu.matmul %50, %52, %cst_33 {dimension_numbers = #tpu.dot_dimension_numbers<[1], [0], [0], [1], [0, 0, 1, 1], [], []>} : vector<128x16xbf16>, vector<16x32xbf16>, vector<128x32xf32> -> vector<128x32xf32>
    %54 = arith.addf %44, %53 : vector<128x32xf32>
    %55 = vector.extract_strided_slice %13 {offsets = [1, 1, 0], sizes = [8, 8, 16], strides = [1, 1, 1]} : vector<20x10x16xf32> to vector<8x8x16xf32>
    %56 = vector.shape_cast %55 : vector<8x8x16xf32> to vector<64x16xf32>
    %57 = vector.extract_strided_slice %13 {offsets = [11, 1, 0], sizes = [8, 8, 16], strides = [1, 1, 1]} : vector<20x10x16xf32> to vector<8x8x16xf32>
    %58 = vector.shape_cast %57 : vector<8x8x16xf32> to vector<64x16xf32>
    %59 = tpu.concatenate %56, %58 in 0 : vector<64x16xf32>, vector<64x16xf32> -> vector<128x16xf32>
    %60 = arith.truncf %59 : vector<128x16xf32> to vector<128x16xbf16>
    %c4 = arith.constant 4 : index
    %c0_34 = arith.constant 0 : index
    %c0_35 = arith.constant 0 : index
    %61 = vector.load %arg1[%c4, %c0_34, %c0_35] : memref<9x16x32xbf16, #tpu.memory_space<vmem>>, vector<1x16x32xbf16>
    %62 = vector.shape_cast %61 : vector<1x16x32xbf16> to vector<16x32xbf16>
    %cst_36 = arith.constant dense<0.000000e+00> : vector<128x32xf32>
    %63 = tpu.matmul %60, %62, %cst_36 {dimension_numbers = #tpu.dot_dimension_numbers<[1], [0], [0], [1], [0, 0, 1, 1], [], []>} : vector<128x16xbf16>, vector<16x32xbf16>, vector<128x32xf32> -> vector<128x32xf32>
    %64 = arith.addf %54, %63 : vector<128x32xf32>
    %65 = vector.extract_strided_slice %13 {offsets = [1, 2, 0], sizes = [8, 8, 16], strides = [1, 1, 1]} : vector<20x10x16xf32> to vector<8x8x16xf32>
    %66 = vector.shape_cast %65 : vector<8x8x16xf32> to vector<64x16xf32>
    %67 = vector.extract_strided_slice %13 {offsets = [11, 2, 0], sizes = [8, 8, 16], strides = [1, 1, 1]} : vector<20x10x16xf32> to vector<8x8x16xf32>
    %68 = vector.shape_cast %67 : vector<8x8x16xf32> to vector<64x16xf32>
    %69 = tpu.concatenate %66, %68 in 0 : vector<64x16xf32>, vector<64x16xf32> -> vector<128x16xf32>
    %70 = arith.truncf %69 : vector<128x16xf32> to vector<128x16xbf16>
    %c5 = arith.constant 5 : index
    %c0_37 = arith.constant 0 : index
    %c0_38 = arith.constant 0 : index
    %71 = vector.load %arg1[%c5, %c0_37, %c0_38] : memref<9x16x32xbf16, #tpu.memory_space<vmem>>, vector<1x16x32xbf16>
    %72 = vector.shape_cast %71 : vector<1x16x32xbf16> to vector<16x32xbf16>
    %cst_39 = arith.constant dense<0.000000e+00> : vector<128x32xf32>
    %73 = tpu.matmul %70, %72, %cst_39 {dimension_numbers = #tpu.dot_dimension_numbers<[1], [0], [0], [1], [0, 0, 1, 1], [], []>} : vector<128x16xbf16>, vector<16x32xbf16>, vector<128x32xf32> -> vector<128x32xf32>
    %74 = arith.addf %64, %73 : vector<128x32xf32>
    %75 = vector.extract_strided_slice %13 {offsets = [2, 0, 0], sizes = [8, 8, 16], strides = [1, 1, 1]} : vector<20x10x16xf32> to vector<8x8x16xf32>
    %76 = vector.shape_cast %75 : vector<8x8x16xf32> to vector<64x16xf32>
    %77 = vector.extract_strided_slice %13 {offsets = [12, 0, 0], sizes = [8, 8, 16], strides = [1, 1, 1]} : vector<20x10x16xf32> to vector<8x8x16xf32>
    %78 = vector.shape_cast %77 : vector<8x8x16xf32> to vector<64x16xf32>
    %79 = tpu.concatenate %76, %78 in 0 : vector<64x16xf32>, vector<64x16xf32> -> vector<128x16xf32>
    %80 = arith.truncf %79 : vector<128x16xf32> to vector<128x16xbf16>
    %c6 = arith.constant 6 : index
    %c0_40 = arith.constant 0 : index
    %c0_41 = arith.constant 0 : index
    %81 = vector.load %arg1[%c6, %c0_40, %c0_41] : memref<9x16x32xbf16, #tpu.memory_space<vmem>>, vector<1x16x32xbf16>
    %82 = vector.shape_cast %81 : vector<1x16x32xbf16> to vector<16x32xbf16>
    %cst_42 = arith.constant dense<0.000000e+00> : vector<128x32xf32>
    %83 = tpu.matmul %80, %82, %cst_42 {dimension_numbers = #tpu.dot_dimension_numbers<[1], [0], [0], [1], [0, 0, 1, 1], [], []>} : vector<128x16xbf16>, vector<16x32xbf16>, vector<128x32xf32> -> vector<128x32xf32>
    %84 = arith.addf %74, %83 : vector<128x32xf32>
    %85 = vector.extract_strided_slice %13 {offsets = [2, 1, 0], sizes = [8, 8, 16], strides = [1, 1, 1]} : vector<20x10x16xf32> to vector<8x8x16xf32>
    %86 = vector.shape_cast %85 : vector<8x8x16xf32> to vector<64x16xf32>
    %87 = vector.extract_strided_slice %13 {offsets = [12, 1, 0], sizes = [8, 8, 16], strides = [1, 1, 1]} : vector<20x10x16xf32> to vector<8x8x16xf32>
    %88 = vector.shape_cast %87 : vector<8x8x16xf32> to vector<64x16xf32>
    %89 = tpu.concatenate %86, %88 in 0 : vector<64x16xf32>, vector<64x16xf32> -> vector<128x16xf32>
    %90 = arith.truncf %89 : vector<128x16xf32> to vector<128x16xbf16>
    %c7 = arith.constant 7 : index
    %c0_43 = arith.constant 0 : index
    %c0_44 = arith.constant 0 : index
    %91 = vector.load %arg1[%c7, %c0_43, %c0_44] : memref<9x16x32xbf16, #tpu.memory_space<vmem>>, vector<1x16x32xbf16>
    %92 = vector.shape_cast %91 : vector<1x16x32xbf16> to vector<16x32xbf16>
    %cst_45 = arith.constant dense<0.000000e+00> : vector<128x32xf32>
    %93 = tpu.matmul %90, %92, %cst_45 {dimension_numbers = #tpu.dot_dimension_numbers<[1], [0], [0], [1], [0, 0, 1, 1], [], []>} : vector<128x16xbf16>, vector<16x32xbf16>, vector<128x32xf32> -> vector<128x32xf32>
    %94 = arith.addf %84, %93 : vector<128x32xf32>
    %95 = vector.extract_strided_slice %13 {offsets = [2, 2, 0], sizes = [8, 8, 16], strides = [1, 1, 1]} : vector<20x10x16xf32> to vector<8x8x16xf32>
    %96 = vector.shape_cast %95 : vector<8x8x16xf32> to vector<64x16xf32>
    %97 = vector.extract_strided_slice %13 {offsets = [12, 2, 0], sizes = [8, 8, 16], strides = [1, 1, 1]} : vector<20x10x16xf32> to vector<8x8x16xf32>
    %98 = vector.shape_cast %97 : vector<8x8x16xf32> to vector<64x16xf32>
    %99 = tpu.concatenate %96, %98 in 0 : vector<64x16xf32>, vector<64x16xf32> -> vector<128x16xf32>
    %100 = arith.truncf %99 : vector<128x16xf32> to vector<128x16xbf16>
    %c8 = arith.constant 8 : index
    %c0_46 = arith.constant 0 : index
    %c0_47 = arith.constant 0 : index
    %101 = vector.load %arg1[%c8, %c0_46, %c0_47] : memref<9x16x32xbf16, #tpu.memory_space<vmem>>, vector<1x16x32xbf16>
    %102 = vector.shape_cast %101 : vector<1x16x32xbf16> to vector<16x32xbf16>
    %cst_48 = arith.constant dense<0.000000e+00> : vector<128x32xf32>
    %103 = tpu.matmul %100, %102, %cst_48 {dimension_numbers = #tpu.dot_dimension_numbers<[1], [0], [0], [1], [0, 0, 1, 1], [], []>} : vector<128x16xbf16>, vector<16x32xbf16>, vector<128x32xf32> -> vector<128x32xf32>
    %104 = arith.addf %94, %103 : vector<128x32xf32>
    %105 = vector.broadcast %5 : vector<1x32xf32> to vector<128x32xf32>
    %106 = arith.mulf %104, %105 : vector<128x32xf32>
    %107 = vector.broadcast %6 : vector<1x32xf32> to vector<128x32xf32>
    %108 = arith.addf %106, %107 : vector<128x32xf32>
    %cst_49 = arith.constant 0.000000e+00 : f32
    %109 = vector.broadcast %cst_49 : f32 to vector<128x32xf32>
    %110 = arith.maximumf %108, %109 : vector<128x32xf32>
    %c0_50 = arith.constant 0 : index
    %c0_51 = arith.constant 0 : index
    %c0_52 = arith.constant 0 : index
    %111 = vector.load %arg5[%c0_50, %c0_51, %c0_52] : memref<4x1x32xf32, #tpu.memory_space<vmem>>, vector<1x1x32xf32>
    %112 = vector.shape_cast %111 : vector<1x1x32xf32> to vector<1x32xf32>
    %c0_53 = arith.constant 0 : index
    %c0_54 = arith.constant 0 : index
    %c0_55 = arith.constant 0 : index
    %113 = vector.load %arg6[%c0_53, %c0_54, %c0_55] : memref<4x1x32xf32, #tpu.memory_space<vmem>>, vector<1x1x32xf32>
    %114 = vector.shape_cast %113 : vector<1x1x32xf32> to vector<1x32xf32>
    %115 = vector.extract_strided_slice %110 {offsets = [0, 0], sizes = [64, 32], strides = [1, 1]} : vector<128x32xf32> to vector<64x32xf32>
    %116 = vector.shape_cast %115 : vector<64x32xf32> to vector<8x8x32xf32>
    %c1_56 = arith.constant 1 : index
    %c1_57 = arith.constant 1 : index
    %c0_58 = arith.constant 0 : index
    %117 = vector.load %arg22[%c1_56, %c1_57, %c0_58] : memref<20x10x32xf32, #tpu.memory_space<vmem>>, vector<8x8x32xf32>
    tpu.vector_store %arg22[%c1_56, %c1_57, %c0_58], %116 {strides = array<i32>} : memref<20x10x32xf32, #tpu.memory_space<vmem>>, vector<8x8x32xf32>,
    %118 = vector.extract_strided_slice %110 {offsets = [64, 0], sizes = [64, 32], strides = [1, 1]} : vector<128x32xf32> to vector<64x32xf32>
    %119 = vector.shape_cast %118 : vector<64x32xf32> to vector<8x8x32xf32>
    %c11_59 = arith.constant 11 : index
    %c1_60 = arith.constant 1 : index
    %c0_61 = arith.constant 0 : index
    %120 = vector.load %arg22[%c11_59, %c1_60, %c0_61] : memref<20x10x32xf32, #tpu.memory_space<vmem>>, vector<8x8x32xf32>
    tpu.vector_store %arg22[%c11_59, %c1_60, %c0_61], %119 {strides = array<i32>} : memref<20x10x32xf32, #tpu.memory_space<vmem>>, vector<8x8x32xf32>,
    %c0_62 = arith.constant 0 : index
    %c0_63 = arith.constant 0 : index
    %c0_64 = arith.constant 0 : index
    %121 = vector.load %arg22[%c0_62, %c0_63, %c0_64] : memref<20x10x32xf32, #tpu.memory_space<vmem>>, vector<20x10x32xf32>
    %cst_65 = arith.constant 0.000000e+00 : f32
    %122 = vector.broadcast %cst_65 : f32 to vector<128x32xf32>
    %123 = vector.extract_strided_slice %121 {offsets = [0, 0, 0], sizes = [8, 8, 32], strides = [1, 1, 1]} : vector<20x10x32xf32> to vector<8x8x32xf32>
    %124 = vector.shape_cast %123 : vector<8x8x32xf32> to vector<64x32xf32>
    %125 = vector.extract_strided_slice %121 {offsets = [10, 0, 0], sizes = [8, 8, 32], strides = [1, 1, 1]} : vector<20x10x32xf32> to vector<8x8x32xf32>
    %126 = vector.shape_cast %125 : vector<8x8x32xf32> to vector<64x32xf32>
    %127 = tpu.concatenate %124, %126 in 0 : vector<64x32xf32>, vector<64x32xf32> -> vector<128x32xf32>
    %128 = arith.truncf %127 : vector<128x32xf32> to vector<128x32xbf16>
    %c0_66 = arith.constant 0 : index
    %c0_67 = arith.constant 0 : index
    %c0_68 = arith.constant 0 : index
    %129 = vector.load %arg4[%c0_66, %c0_67, %c0_68] : memref<36x32x32xbf16, #tpu.memory_space<vmem>>, vector<1x32x32xbf16>
    %130 = vector.shape_cast %129 : vector<1x32x32xbf16> to vector<32x32xbf16>
    %cst_69 = arith.constant dense<0.000000e+00> : vector<128x32xf32>
    %131 = tpu.matmul %128, %130, %cst_69 {dimension_numbers = #tpu.dot_dimension_numbers<[1], [0], [0], [1], [0, 0, 1, 1], [], []>} : vector<128x32xbf16>, vector<32x32xbf16>, vector<128x32xf32> -> vector<128x32xf32>
    %132 = arith.addf %122, %131 : vector<128x32xf32>
    %133 = vector.extract_strided_slice %121 {offsets = [0, 1, 0], sizes = [8, 8, 32], strides = [1, 1, 1]} : vector<20x10x32xf32> to vector<8x8x32xf32>
    %134 = vector.shape_cast %133 : vector<8x8x32xf32> to vector<64x32xf32>
    %135 = vector.extract_strided_slice %121 {offsets = [10, 1, 0], sizes = [8, 8, 32], strides = [1, 1, 1]} : vector<20x10x32xf32> to vector<8x8x32xf32>
    %136 = vector.shape_cast %135 : vector<8x8x32xf32> to vector<64x32xf32>
    %137 = tpu.concatenate %134, %136 in 0 : vector<64x32xf32>, vector<64x32xf32> -> vector<128x32xf32>
    %138 = arith.truncf %137 : vector<128x32xf32> to vector<128x32xbf16>
    %c1_70 = arith.constant 1 : index
    %c0_71 = arith.constant 0 : index
    %c0_72 = arith.constant 0 : index
    %139 = vector.load %arg4[%c1_70, %c0_71, %c0_72] : memref<36x32x32xbf16, #tpu.memory_space<vmem>>, vector<1x32x32xbf16>
    %140 = vector.shape_cast %139 : vector<1x32x32xbf16> to vector<32x32xbf16>
    %cst_73 = arith.constant dense<0.000000e+00> : vector<128x32xf32>
    %141 = tpu.matmul %138, %140, %cst_73 {dimension_numbers = #tpu.dot_dimension_numbers<[1], [0], [0], [1], [0, 0, 1, 1], [], []>} : vector<128x32xbf16>, vector<32x32xbf16>, vector<128x32xf32> -> vector<128x32xf32>
    %142 = arith.addf %132, %141 : vector<128x32xf32>
    %143 = vector.extract_strided_slice %121 {offsets = [0, 2, 0], sizes = [8, 8, 32], strides = [1, 1, 1]} : vector<20x10x32xf32> to vector<8x8x32xf32>
    %144 = vector.shape_cast %143 : vector<8x8x32xf32> to vector<64x32xf32>
    %145 = vector.extract_strided_slice %121 {offsets = [10, 2, 0], sizes = [8, 8, 32], strides = [1, 1, 1]} : vector<20x10x32xf32> to vector<8x8x32xf32>
    %146 = vector.shape_cast %145 : vector<8x8x32xf32> to vector<64x32xf32>
    %147 = tpu.concatenate %144, %146 in 0 : vector<64x32xf32>, vector<64x32xf32> -> vector<128x32xf32>
    %148 = arith.truncf %147 : vector<128x32xf32> to vector<128x32xbf16>
    %c2_74 = arith.constant 2 : index
    %c0_75 = arith.constant 0 : index
    %c0_76 = arith.constant 0 : index
    %149 = vector.load %arg4[%c2_74, %c0_75, %c0_76] : memref<36x32x32xbf16, #tpu.memory_space<vmem>>, vector<1x32x32xbf16>
    %150 = vector.shape_cast %149 : vector<1x32x32xbf16> to vector<32x32xbf16>
    %cst_77 = arith.constant dense<0.000000e+00> : vector<128x32xf32>
    %151 = tpu.matmul %148, %150, %cst_77 {dimension_numbers = #tpu.dot_dimension_numbers<[1], [0], [0], [1], [0, 0, 1, 1], [], []>} : vector<128x32xbf16>, vector<32x32xbf16>, vector<128x32xf32> -> vector<128x32xf32>
    %152 = arith.addf %142, %151 : vector<128x32xf32>
    %153 = vector.extract_strided_slice %121 {offsets = [1, 0, 0], sizes = [8, 8, 32], strides = [1, 1, 1]} : vector<20x10x32xf32> to vector<8x8x32xf32>
    %154 = vector.shape_cast %153 : vector<8x8x32xf32> to vector<64x32xf32>
    %155 = vector.extract_strided_slice %121 {offsets = [11, 0, 0], sizes = [8, 8, 32], strides = [1, 1, 1]} : vector<20x10x32xf32> to vector<8x8x32xf32>
    %156 = vector.shape_cast %155 : vector<8x8x32xf32> to vector<64x32xf32>
    %157 = tpu.concatenate %154, %156 in 0 : vector<64x32xf32>, vector<64x32xf32> -> vector<128x32xf32>
    %158 = arith.truncf %157 : vector<128x32xf32> to vector<128x32xbf16>
    %c3_78 = arith.constant 3 : index
    %c0_79 = arith.constant 0 : index
    %c0_80 = arith.constant 0 : index
    %159 = vector.load %arg4[%c3_78, %c0_79, %c0_80] : memref<36x32x32xbf16, #tpu.memory_space<vmem>>, vector<1x32x32xbf16>
    %160 = vector.shape_cast %159 : vector<1x32x32xbf16> to vector<32x32xbf16>
    %cst_81 = arith.constant dense<0.000000e+00> : vector<128x32xf32>
    %161 = tpu.matmul %158, %160, %cst_81 {dimension_numbers = #tpu.dot_dimension_numbers<[1], [0], [0], [1], [0, 0, 1, 1], [], []>} : vector<128x32xbf16>, vector<32x32xbf16>, vector<128x32xf32> -> vector<128x32xf32>
    %162 = arith.addf %152, %161 : vector<128x32xf32>
    %163 = vector.extract_strided_slice %121 {offsets = [1, 1, 0], sizes = [8, 8, 32], strides = [1, 1, 1]} : vector<20x10x32xf32> to vector<8x8x32xf32>
    %164 = vector.shape_cast %163 : vector<8x8x32xf32> to vector<64x32xf32>
    %165 = vector.extract_strided_slice %121 {offsets = [11, 1, 0], sizes = [8, 8, 32], strides = [1, 1, 1]} : vector<20x10x32xf32> to vector<8x8x32xf32>
    %166 = vector.shape_cast %165 : vector<8x8x32xf32> to vector<64x32xf32>
    %167 = tpu.concatenate %164, %166 in 0 : vector<64x32xf32>, vector<64x32xf32> -> vector<128x32xf32>
    %168 = arith.truncf %167 : vector<128x32xf32> to vector<128x32xbf16>
    %c4_82 = arith.constant 4 : index
    %c0_83 = arith.constant 0 : index
    %c0_84 = arith.constant 0 : index
    %169 = vector.load %arg4[%c4_82, %c0_83, %c0_84] : memref<36x32x32xbf16, #tpu.memory_space<vmem>>, vector<1x32x32xbf16>
    %170 = vector.shape_cast %169 : vector<1x32x32xbf16> to vector<32x32xbf16>
    %cst_85 = arith.constant dense<0.000000e+00> : vector<128x32xf32>
    %171 = tpu.matmul %168, %170, %cst_85 {dimension_numbers = #tpu.dot_dimension_numbers<[1], [0], [0], [1], [0, 0, 1, 1], [], []>} : vector<128x32xbf16>, vector<32x32xbf16>, vector<128x32xf32> -> vector<128x32xf32>
    %172 = arith.addf %162, %171 : vector<128x32xf32>
    %173 = vector.extract_strided_slice %121 {offsets = [1, 2, 0], sizes = [8, 8, 32], strides = [1, 1, 1]} : vector<20x10x32xf32> to vector<8x8x32xf32>
    %174 = vector.shape_cast %173 : vector<8x8x32xf32> to vector<64x32xf32>
    %175 = vector.extract_strided_slice %121 {offsets = [11, 2, 0], sizes = [8, 8, 32], strides = [1, 1, 1]} : vector<20x10x32xf32> to vector<8x8x32xf32>
    %176 = vector.shape_cast %175 : vector<8x8x32xf32> to vector<64x32xf32>
    %177 = tpu.concatenate %174, %176 in 0 : vector<64x32xf32>, vector<64x32xf32> -> vector<128x32xf32>
    %178 = arith.truncf %177 : vector<128x32xf32> to vector<128x32xbf16>
    %c5_86 = arith.constant 5 : index
    %c0_87 = arith.constant 0 : index
    %c0_88 = arith.constant 0 : index
    %179 = vector.load %arg4[%c5_86, %c0_87, %c0_88] : memref<36x32x32xbf16, #tpu.memory_space<vmem>>, vector<1x32x32xbf16>
    %180 = vector.shape_cast %179 : vector<1x32x32xbf16> to vector<32x32xbf16>
    %cst_89 = arith.constant dense<0.000000e+00> : vector<128x32xf32>
    %181 = tpu.matmul %178, %180, %cst_89 {dimension_numbers = #tpu.dot_dimension_numbers<[1], [0], [0], [1], [0, 0, 1, 1], [], []>} : vector<128x32xbf16>, vector<32x32xbf16>, vector<128x32xf32> -> vector<128x32xf32>
    %182 = arith.addf %172, %181 : vector<128x32xf32>
    %183 = vector.extract_strided_slice %121 {offsets = [2, 0, 0], sizes = [8, 8, 32], strides = [1, 1, 1]} : vector<20x10x32xf32> to vector<8x8x32xf32>
    %184 = vector.shape_cast %183 : vector<8x8x32xf32> to vector<64x32xf32>
    %185 = vector.extract_strided_slice %121 {offsets = [12, 0, 0], sizes = [8, 8, 32], strides = [1, 1, 1]} : vector<20x10x32xf32> to vector<8x8x32xf32>
    %186 = vector.shape_cast %185 : vector<8x8x32xf32> to vector<64x32xf32>
    %187 = tpu.concatenate %184, %186 in 0 : vector<64x32xf32>, vector<64x32xf32> -> vector<128x32xf32>
    %188 = arith.truncf %187 : vector<128x32xf32> to vector<128x32xbf16>
    %c6_90 = arith.constant 6 : index
    %c0_91 = arith.constant 0 : index
    %c0_92 = arith.constant 0 : index
    %189 = vector.load %arg4[%c6_90, %c0_91, %c0_92] : memref<36x32x32xbf16, #tpu.memory_space<vmem>>, vector<1x32x32xbf16>
    %190 = vector.shape_cast %189 : vector<1x32x32xbf16> to vector<32x32xbf16>
    %cst_93 = arith.constant dense<0.000000e+00> : vector<128x32xf32>
    %191 = tpu.matmul %188, %190, %cst_93 {dimension_numbers = #tpu.dot_dimension_numbers<[1], [0], [0], [1], [0, 0, 1, 1], [], []>} : vector<128x32xbf16>, vector<32x32xbf16>, vector<128x32xf32> -> vector<128x32xf32>
    %192 = arith.addf %182, %191 : vector<128x32xf32>
    %193 = vector.extract_strided_slice %121 {offsets = [2, 1, 0], sizes = [8, 8, 32], strides = [1, 1, 1]} : vector<20x10x32xf32> to vector<8x8x32xf32>
    %194 = vector.shape_cast %193 : vector<8x8x32xf32> to vector<64x32xf32>
    %195 = vector.extract_strided_slice %121 {offsets = [12, 1, 0], sizes = [8, 8, 32], strides = [1, 1, 1]} : vector<20x10x32xf32> to vector<8x8x32xf32>
    %196 = vector.shape_cast %195 : vector<8x8x32xf32> to vector<64x32xf32>
    %197 = tpu.concatenate %194, %196 in 0 : vector<64x32xf32>, vector<64x32xf32> -> vector<128x32xf32>
    %198 = arith.truncf %197 : vector<128x32xf32> to vector<128x32xbf16>
    %c7_94 = arith.constant 7 : index
    %c0_95 = arith.constant 0 : index
    %c0_96 = arith.constant 0 : index
    %199 = vector.load %arg4[%c7_94, %c0_95, %c0_96] : memref<36x32x32xbf16, #tpu.memory_space<vmem>>, vector<1x32x32xbf16>
    %200 = vector.shape_cast %199 : vector<1x32x32xbf16> to vector<32x32xbf16>
    %cst_97 = arith.constant dense<0.000000e+00> : vector<128x32xf32>
    %201 = tpu.matmul %198, %200, %cst_97 {dimension_numbers = #tpu.dot_dimension_numbers<[1], [0], [0], [1], [0, 0, 1, 1], [], []>} : vector<128x32xbf16>, vector<32x32xbf16>, vector<128x32xf32> -> vector<128x32xf32>
    %202 = arith.addf %192, %201 : vector<128x32xf32>
    %203 = vector.extract_strided_slice %121 {offsets = [2, 2, 0], sizes = [8, 8, 32], strides = [1, 1, 1]} : vector<20x10x32xf32> to vector<8x8x32xf32>
    %204 = vector.shape_cast %203 : vector<8x8x32xf32> to vector<64x32xf32>
    %205 = vector.extract_strided_slice %121 {offsets = [12, 2, 0], sizes = [8, 8, 32], strides = [1, 1, 1]} : vector<20x10x32xf32> to vector<8x8x32xf32>
    %206 = vector.shape_cast %205 : vector<8x8x32xf32> to vector<64x32xf32>
    %207 = tpu.concatenate %204, %206 in 0 : vector<64x32xf32>, vector<64x32xf32> -> vector<128x32xf32>
    %208 = arith.truncf %207 : vector<128x32xf32> to vector<128x32xbf16>
    %c8_98 = arith.constant 8 : index
    %c0_99 = arith.constant 0 : index
    %c0_100 = arith.constant 0 : index
    %209 = vector.load %arg4[%c8_98, %c0_99, %c0_100] : memref<36x32x32xbf16, #tpu.memory_space<vmem>>, vector<1x32x32xbf16>
    %210 = vector.shape_cast %209 : vector<1x32x32xbf16> to vector<32x32xbf16>
    %cst_101 = arith.constant dense<0.000000e+00> : vector<128x32xf32>
    %211 = tpu.matmul %208, %210, %cst_101 {dimension_numbers = #tpu.dot_dimension_numbers<[1], [0], [0], [1], [0, 0, 1, 1], [], []>} : vector<128x32xbf16>, vector<32x32xbf16>, vector<128x32xf32> -> vector<128x32xf32>
    %212 = arith.addf %202, %211 : vector<128x32xf32>
    %213 = vector.broadcast %112 : vector<1x32xf32> to vector<128x32xf32>
    %214 = arith.mulf %212, %213 : vector<128x32xf32>
    %215 = vector.broadcast %114 : vector<1x32xf32> to vector<128x32xf32>
    %216 = arith.addf %214, %215 : vector<128x32xf32>
    %cst_102 = arith.constant 0.000000e+00 : f32
    %217 = vector.broadcast %cst_102 : f32 to vector<128x32xf32>
    %218 = arith.maximumf %216, %217 : vector<128x32xf32>
    %c1_103 = arith.constant 1 : index
    %c0_104 = arith.constant 0 : index
    %c0_105 = arith.constant 0 : index
    %219 = vector.load %arg5[%c1_103, %c0_104, %c0_105] : memref<4x1x32xf32, #tpu.memory_space<vmem>>, vector<1x1x32xf32>
    %220 = vector.shape_cast %219 : vector<1x1x32xf32> to vector<1x32xf32>
    %c1_106 = arith.constant 1 : index
    %c0_107 = arith.constant 0 : index
    %c0_108 = arith.constant 0 : index
    %221 = vector.load %arg6[%c1_106, %c0_107, %c0_108] : memref<4x1x32xf32, #tpu.memory_space<vmem>>, vector<1x1x32xf32>
    %222 = vector.shape_cast %221 : vector<1x1x32xf32> to vector<1x32xf32>
    %223 = vector.extract_strided_slice %218 {offsets = [0, 0], sizes = [64, 32], strides = [1, 1]} : vector<128x32xf32> to vector<64x32xf32>
    %224 = vector.shape_cast %223 : vector<64x32xf32> to vector<8x8x32xf32>
    %c1_109 = arith.constant 1 : index
    %c1_110 = arith.constant 1 : index
    %c0_111 = arith.constant 0 : index
    %225 = vector.load %arg22[%c1_109, %c1_110, %c0_111] : memref<20x10x32xf32, #tpu.memory_space<vmem>>, vector<8x8x32xf32>
    tpu.vector_store %arg22[%c1_109, %c1_110, %c0_111], %224 {strides = array<i32>} : memref<20x10x32xf32, #tpu.memory_space<vmem>>, vector<8x8x32xf32>,
    %226 = vector.extract_strided_slice %218 {offsets = [64, 0], sizes = [64, 32], strides = [1, 1]} : vector<128x32xf32> to vector<64x32xf32>
    %227 = vector.shape_cast %226 : vector<64x32xf32> to vector<8x8x32xf32>
    %c11_112 = arith.constant 11 : index
    %c1_113 = arith.constant 1 : index
    %c0_114 = arith.constant 0 : index
    %228 = vector.load %arg22[%c11_112, %c1_113, %c0_114] : memref<20x10x32xf32, #tpu.memory_space<vmem>>, vector<8x8x32xf32>
    tpu.vector_store %arg22[%c11_112, %c1_113, %c0_114], %227 {strides = array<i32>} : memref<20x10x32xf32, #tpu.memory_space<vmem>>, vector<8x8x32xf32>,
    %c0_115 = arith.constant 0 : index
    %c0_116 = arith.constant 0 : index
    %c0_117 = arith.constant 0 : index
    %229 = vector.load %arg22[%c0_115, %c0_116, %c0_117] : memref<20x10x32xf32, #tpu.memory_space<vmem>>, vector<20x10x32xf32>
    %cst_118 = arith.constant 0.000000e+00 : f32
    %230 = vector.broadcast %cst_118 : f32 to vector<128x32xf32>
    %231 = vector.extract_strided_slice %229 {offsets = [0, 0, 0], sizes = [8, 8, 32], strides = [1, 1, 1]} : vector<20x10x32xf32> to vector<8x8x32xf32>
    %232 = vector.shape_cast %231 : vector<8x8x32xf32> to vector<64x32xf32>
    %233 = vector.extract_strided_slice %229 {offsets = [10, 0, 0], sizes = [8, 8, 32], strides = [1, 1, 1]} : vector<20x10x32xf32> to vector<8x8x32xf32>
    %234 = vector.shape_cast %233 : vector<8x8x32xf32> to vector<64x32xf32>
    %235 = tpu.concatenate %232, %234 in 0 : vector<64x32xf32>, vector<64x32xf32> -> vector<128x32xf32>
    %236 = arith.truncf %235 : vector<128x32xf32> to vector<128x32xbf16>
    %c9 = arith.constant 9 : index
    %c0_119 = arith.constant 0 : index
    %c0_120 = arith.constant 0 : index
    %237 = vector.load %arg4[%c9, %c0_119, %c0_120] : memref<36x32x32xbf16, #tpu.memory_space<vmem>>, vector<1x32x32xbf16>
    %238 = vector.shape_cast %237 : vector<1x32x32xbf16> to vector<32x32xbf16>
    %cst_121 = arith.constant dense<0.000000e+00> : vector<128x32xf32>
    %239 = tpu.matmul %236, %238, %cst_121 {dimension_numbers = #tpu.dot_dimension_numbers<[1], [0], [0], [1], [0, 0, 1, 1], [], []>} : vector<128x32xbf16>, vector<32x32xbf16>, vector<128x32xf32> -> vector<128x32xf32>
    %240 = arith.addf %230, %239 : vector<128x32xf32>
    %241 = vector.extract_strided_slice %229 {offsets = [0, 1, 0], sizes = [8, 8, 32], strides = [1, 1, 1]} : vector<20x10x32xf32> to vector<8x8x32xf32>
    %242 = vector.shape_cast %241 : vector<8x8x32xf32> to vector<64x32xf32>
    %243 = vector.extract_strided_slice %229 {offsets = [10, 1, 0], sizes = [8, 8, 32], strides = [1, 1, 1]} : vector<20x10x32xf32> to vector<8x8x32xf32>
    %244 = vector.shape_cast %243 : vector<8x8x32xf32> to vector<64x32xf32>
    %245 = tpu.concatenate %242, %244 in 0 : vector<64x32xf32>, vector<64x32xf32> -> vector<128x32xf32>
    %246 = arith.truncf %245 : vector<128x32xf32> to vector<128x32xbf16>
    %c10 = arith.constant 10 : index
    %c0_122 = arith.constant 0 : index
    %c0_123 = arith.constant 0 : index
    %247 = vector.load %arg4[%c10, %c0_122, %c0_123] : memref<36x32x32xbf16, #tpu.memory_space<vmem>>, vector<1x32x32xbf16>
    %248 = vector.shape_cast %247 : vector<1x32x32xbf16> to vector<32x32xbf16>
    %cst_124 = arith.constant dense<0.000000e+00> : vector<128x32xf32>
    %249 = tpu.matmul %246, %248, %cst_124 {dimension_numbers = #tpu.dot_dimension_numbers<[1], [0], [0], [1], [0, 0, 1, 1], [], []>} : vector<128x32xbf16>, vector<32x32xbf16>, vector<128x32xf32> -> vector<128x32xf32>
    %250 = arith.addf %240, %249 : vector<128x32xf32>
    %251 = vector.extract_strided_slice %229 {offsets = [0, 2, 0], sizes = [8, 8, 32], strides = [1, 1, 1]} : vector<20x10x32xf32> to vector<8x8x32xf32>
    %252 = vector.shape_cast %251 : vector<8x8x32xf32> to vector<64x32xf32>
    %253 = vector.extract_strided_slice %229 {offsets = [10, 2, 0], sizes = [8, 8, 32], strides = [1, 1, 1]} : vector<20x10x32xf32> to vector<8x8x32xf32>
    %254 = vector.shape_cast %253 : vector<8x8x32xf32> to vector<64x32xf32>
    %255 = tpu.concatenate %252, %254 in 0 : vector<64x32xf32>, vector<64x32xf32> -> vector<128x32xf32>
    %256 = arith.truncf %255 : vector<128x32xf32> to vector<128x32xbf16>
    %c11_125 = arith.constant 11 : index
    %c0_126 = arith.constant 0 : index
    %c0_127 = arith.constant 0 : index
    %257 = vector.load %arg4[%c11_125, %c0_126, %c0_127] : memref<36x32x32xbf16, #tpu.memory_space<vmem>>, vector<1x32x32xbf16>
    %258 = vector.shape_cast %257 : vector<1x32x32xbf16> to vector<32x32xbf16>
    %cst_128 = arith.constant dense<0.000000e+00> : vector<128x32xf32>
    %259 = tpu.matmul %256, %258, %cst_128 {dimension_numbers = #tpu.dot_dimension_numbers<[1], [0], [0], [1], [0, 0, 1, 1], [], []>} : vector<128x32xbf16>, vector<32x32xbf16>, vector<128x32xf32> -> vector<128x32xf32>
    %260 = arith.addf %250, %259 : vector<128x32xf32>
    %261 = vector.extract_strided_slice %229 {offsets = [1, 0, 0], sizes = [8, 8, 32], strides = [1, 1, 1]} : vector<20x10x32xf32> to vector<8x8x32xf32>
    %262 = vector.shape_cast %261 : vector<8x8x32xf32> to vector<64x32xf32>
    %263 = vector.extract_strided_slice %229 {offsets = [11, 0, 0], sizes = [8, 8, 32], strides = [1, 1, 1]} : vector<20x10x32xf32> to vector<8x8x32xf32>
    %264 = vector.shape_cast %263 : vector<8x8x32xf32> to vector<64x32xf32>
    %265 = tpu.concatenate %262, %264 in 0 : vector<64x32xf32>, vector<64x32xf32> -> vector<128x32xf32>
    %266 = arith.truncf %265 : vector<128x32xf32> to vector<128x32xbf16>
    %c12 = arith.constant 12 : index
    %c0_129 = arith.constant 0 : index
    %c0_130 = arith.constant 0 : index
    %267 = vector.load %arg4[%c12, %c0_129, %c0_130] : memref<36x32x32xbf16, #tpu.memory_space<vmem>>, vector<1x32x32xbf16>
    %268 = vector.shape_cast %267 : vector<1x32x32xbf16> to vector<32x32xbf16>
    %cst_131 = arith.constant dense<0.000000e+00> : vector<128x32xf32>
    %269 = tpu.matmul %266, %268, %cst_131 {dimension_numbers = #tpu.dot_dimension_numbers<[1], [0], [0], [1], [0, 0, 1, 1], [], []>} : vector<128x32xbf16>, vector<32x32xbf16>, vector<128x32xf32> -> vector<128x32xf32>
    %270 = arith.addf %260, %269 : vector<128x32xf32>
    %271 = vector.extract_strided_slice %229 {offsets = [1, 1, 0], sizes = [8, 8, 32], strides = [1, 1, 1]} : vector<20x10x32xf32> to vector<8x8x32xf32>
    %272 = vector.shape_cast %271 : vector<8x8x32xf32> to vector<64x32xf32>
    %273 = vector.extract_strided_slice %229 {offsets = [11, 1, 0], sizes = [8, 8, 32], strides = [1, 1, 1]} : vector<20x10x32xf32> to vector<8x8x32xf32>
    %274 = vector.shape_cast %273 : vector<8x8x32xf32> to vector<64x32xf32>
    %275 = tpu.concatenate %272, %274 in 0 : vector<64x32xf32>, vector<64x32xf32> -> vector<128x32xf32>
    %276 = arith.truncf %275 : vector<128x32xf32> to vector<128x32xbf16>
    %c13 = arith.constant 13 : index
    %c0_132 = arith.constant 0 : index
    %c0_133 = arith.constant 0 : index
    %277 = vector.load %arg4[%c13, %c0_132, %c0_133] : memref<36x32x32xbf16, #tpu.memory_space<vmem>>, vector<1x32x32xbf16>
    %278 = vector.shape_cast %277 : vector<1x32x32xbf16> to vector<32x32xbf16>
    %cst_134 = arith.constant dense<0.000000e+00> : vector<128x32xf32>
    %279 = tpu.matmul %276, %278, %cst_134 {dimension_numbers = #tpu.dot_dimension_numbers<[1], [0], [0], [1], [0, 0, 1, 1], [], []>} : vector<128x32xbf16>, vector<32x32xbf16>, vector<128x32xf32> -> vector<128x32xf32>
    %280 = arith.addf %270, %279 : vector<128x32xf32>
    %281 = vector.extract_strided_slice %229 {offsets = [1, 2, 0], sizes = [8, 8, 32], strides = [1, 1, 1]} : vector<20x10x32xf32> to vector<8x8x32xf32>
    %282 = vector.shape_cast %281 : vector<8x8x32xf32> to vector<64x32xf32>
    %283 = vector.extract_strided_slice %229 {offsets = [11, 2, 0], sizes = [8, 8, 32], strides = [1, 1, 1]} : vector<20x10x32xf32> to vector<8x8x32xf32>
    %284 = vector.shape_cast %283 : vector<8x8x32xf32> to vector<64x32xf32>
    %285 = tpu.concatenate %282, %284 in 0 : vector<64x32xf32>, vector<64x32xf32> -> vector<128x32xf32>
    %286 = arith.truncf %285 : vector<128x32xf32> to vector<128x32xbf16>
    %c14 = arith.constant 14 : index
    %c0_135 = arith.constant 0 : index
    %c0_136 = arith.constant 0 : index
    %287 = vector.load %arg4[%c14, %c0_135, %c0_136] : memref<36x32x32xbf16, #tpu.memory_space<vmem>>, vector<1x32x32xbf16>
    %288 = vector.shape_cast %287 : vector<1x32x32xbf16> to vector<32x32xbf16>
    %cst_137 = arith.constant dense<0.000000e+00> : vector<128x32xf32>
    %289 = tpu.matmul %286, %288, %cst_137 {dimension_numbers = #tpu.dot_dimension_numbers<[1], [0], [0], [1], [0, 0, 1, 1], [], []>} : vector<128x32xbf16>, vector<32x32xbf16>, vector<128x32xf32> -> vector<128x32xf32>
    %290 = arith.addf %280, %289 : vector<128x32xf32>
    %291 = vector.extract_strided_slice %229 {offsets = [2, 0, 0], sizes = [8, 8, 32], strides = [1, 1, 1]} : vector<20x10x32xf32> to vector<8x8x32xf32>
    %292 = vector.shape_cast %291 : vector<8x8x32xf32> to vector<64x32xf32>
    %293 = vector.extract_strided_slice %229 {offsets = [12, 0, 0], sizes = [8, 8, 32], strides = [1, 1, 1]} : vector<20x10x32xf32> to vector<8x8x32xf32>
    %294 = vector.shape_cast %293 : vector<8x8x32xf32> to vector<64x32xf32>
    %295 = tpu.concatenate %292, %294 in 0 : vector<64x32xf32>, vector<64x32xf32> -> vector<128x32xf32>
    %296 = arith.truncf %295 : vector<128x32xf32> to vector<128x32xbf16>
    %c15 = arith.constant 15 : index
    %c0_138 = arith.constant 0 : index
    %c0_139 = arith.constant 0 : index
    %297 = vector.load %arg4[%c15, %c0_138, %c0_139] : memref<36x32x32xbf16, #tpu.memory_space<vmem>>, vector<1x32x32xbf16>
    %298 = vector.shape_cast %297 : vector<1x32x32xbf16> to vector<32x32xbf16>
    %cst_140 = arith.constant dense<0.000000e+00> : vector<128x32xf32>
    %299 = tpu.matmul %296, %298, %cst_140 {dimension_numbers = #tpu.dot_dimension_numbers<[1], [0], [0], [1], [0, 0, 1, 1], [], []>} : vector<128x32xbf16>, vector<32x32xbf16>, vector<128x32xf32> -> vector<128x32xf32>
    %300 = arith.addf %290, %299 : vector<128x32xf32>
    %301 = vector.extract_strided_slice %229 {offsets = [2, 1, 0], sizes = [8, 8, 32], strides = [1, 1, 1]} : vector<20x10x32xf32> to vector<8x8x32xf32>
    %302 = vector.shape_cast %301 : vector<8x8x32xf32> to vector<64x32xf32>
    %303 = vector.extract_strided_slice %229 {offsets = [12, 1, 0], sizes = [8, 8, 32], strides = [1, 1, 1]} : vector<20x10x32xf32> to vector<8x8x32xf32>
    %304 = vector.shape_cast %303 : vector<8x8x32xf32> to vector<64x32xf32>
    %305 = tpu.concatenate %302, %304 in 0 : vector<64x32xf32>, vector<64x32xf32> -> vector<128x32xf32>
    %306 = arith.truncf %305 : vector<128x32xf32> to vector<128x32xbf16>
    %c16 = arith.constant 16 : index
    %c0_141 = arith.constant 0 : index
    %c0_142 = arith.constant 0 : index
    %307 = vector.load %arg4[%c16, %c0_141, %c0_142] : memref<36x32x32xbf16, #tpu.memory_space<vmem>>, vector<1x32x32xbf16>
    %308 = vector.shape_cast %307 : vector<1x32x32xbf16> to vector<32x32xbf16>
    %cst_143 = arith.constant dense<0.000000e+00> : vector<128x32xf32>
    %309 = tpu.matmul %306, %308, %cst_143 {dimension_numbers = #tpu.dot_dimension_numbers<[1], [0], [0], [1], [0, 0, 1, 1], [], []>} : vector<128x32xbf16>, vector<32x32xbf16>, vector<128x32xf32> -> vector<128x32xf32>
    %310 = arith.addf %300, %309 : vector<128x32xf32>
    %311 = vector.extract_strided_slice %229 {offsets = [2, 2, 0], sizes = [8, 8, 32], strides = [1, 1, 1]} : vector<20x10x32xf32> to vector<8x8x32xf32>
    %312 = vector.shape_cast %311 : vector<8x8x32xf32> to vector<64x32xf32>
    %313 = vector.extract_strided_slice %229 {offsets = [12, 2, 0], sizes = [8, 8, 32], strides = [1, 1, 1]} : vector<20x10x32xf32> to vector<8x8x32xf32>
    %314 = vector.shape_cast %313 : vector<8x8x32xf32> to vector<64x32xf32>
    %315 = tpu.concatenate %312, %314 in 0 : vector<64x32xf32>, vector<64x32xf32> -> vector<128x32xf32>
    %316 = arith.truncf %315 : vector<128x32xf32> to vector<128x32xbf16>
    %c17 = arith.constant 17 : index
    %c0_144 = arith.constant 0 : index
    %c0_145 = arith.constant 0 : index
    %317 = vector.load %arg4[%c17, %c0_144, %c0_145] : memref<36x32x32xbf16, #tpu.memory_space<vmem>>, vector<1x32x32xbf16>
    %318 = vector.shape_cast %317 : vector<1x32x32xbf16> to vector<32x32xbf16>
    %cst_146 = arith.constant dense<0.000000e+00> : vector<128x32xf32>
    %319 = tpu.matmul %316, %318, %cst_146 {dimension_numbers = #tpu.dot_dimension_numbers<[1], [0], [0], [1], [0, 0, 1, 1], [], []>} : vector<128x32xbf16>, vector<32x32xbf16>, vector<128x32xf32> -> vector<128x32xf32>
    %320 = arith.addf %310, %319 : vector<128x32xf32>
    %321 = vector.broadcast %220 : vector<1x32xf32> to vector<128x32xf32>
    %322 = arith.mulf %320, %321 : vector<128x32xf32>
    %323 = vector.broadcast %222 : vector<1x32xf32> to vector<128x32xf32>
    %324 = arith.addf %322, %323 : vector<128x32xf32>
    %325 = arith.addf %110, %324 : vector<128x32xf32>
    %cst_147 = arith.constant 0.000000e+00 : f32
    %326 = vector.broadcast %cst_147 : f32 to vector<128x32xf32>
    %327 = arith.maximumf %325, %326 : vector<128x32xf32>
    %c2_148 = arith.constant 2 : index
    %c0_149 = arith.constant 0 : index
    %c0_150 = arith.constant 0 : index
    %328 = vector.load %arg5[%c2_148, %c0_149, %c0_150] : memref<4x1x32xf32, #tpu.memory_space<vmem>>, vector<1x1x32xf32>
    %329 = vector.shape_cast %328 : vector<1x1x32xf32> to vector<1x32xf32>
    %c2_151 = arith.constant 2 : index
    %c0_152 = arith.constant 0 : index
    %c0_153 = arith.constant 0 : index
    %330 = vector.load %arg6[%c2_151, %c0_152, %c0_153] : memref<4x1x32xf32, #tpu.memory_space<vmem>>, vector<1x1x32xf32>
    %331 = vector.shape_cast %330 : vector<1x1x32xf32> to vector<1x32xf32>
    %332 = vector.extract_strided_slice %327 {offsets = [0, 0], sizes = [64, 32], strides = [1, 1]} : vector<128x32xf32> to vector<64x32xf32>
    %333 = vector.shape_cast %332 : vector<64x32xf32> to vector<8x8x32xf32>
    %c1_154 = arith.constant 1 : index
    %c1_155 = arith.constant 1 : index
    %c0_156 = arith.constant 0 : index
    %334 = vector.load %arg22[%c1_154, %c1_155, %c0_156] : memref<20x10x32xf32, #tpu.memory_space<vmem>>, vector<8x8x32xf32>
    tpu.vector_store %arg22[%c1_154, %c1_155, %c0_156], %333 {strides = array<i32>} : memref<20x10x32xf32, #tpu.memory_space<vmem>>, vector<8x8x32xf32>,
    %335 = vector.extract_strided_slice %327 {offsets = [64, 0], sizes = [64, 32], strides = [1, 1]} : vector<128x32xf32> to vector<64x32xf32>
    %336 = vector.shape_cast %335 : vector<64x32xf32> to vector<8x8x32xf32>
    %c11_157 = arith.constant 11 : index
    %c1_158 = arith.constant 1 : index
    %c0_159 = arith.constant 0 : index
    %337 = vector.load %arg22[%c11_157, %c1_158, %c0_159] : memref<20x10x32xf32, #tpu.memory_space<vmem>>, vector<8x8x32xf32>
    tpu.vector_store %arg22[%c11_157, %c1_158, %c0_159], %336 {strides = array<i32>} : memref<20x10x32xf32, #tpu.memory_space<vmem>>, vector<8x8x32xf32>,
    %c0_160 = arith.constant 0 : index
    %c0_161 = arith.constant 0 : index
    %c0_162 = arith.constant 0 : index
    %338 = vector.load %arg22[%c0_160, %c0_161, %c0_162] : memref<20x10x32xf32, #tpu.memory_space<vmem>>, vector<20x10x32xf32>
    %cst_163 = arith.constant 0.000000e+00 : f32
    %339 = vector.broadcast %cst_163 : f32 to vector<128x32xf32>
    %340 = vector.extract_strided_slice %338 {offsets = [0, 0, 0], sizes = [8, 8, 32], strides = [1, 1, 1]} : vector<20x10x32xf32> to vector<8x8x32xf32>
    %341 = vector.shape_cast %340 : vector<8x8x32xf32> to vector<64x32xf32>
    %342 = vector.extract_strided_slice %338 {offsets = [10, 0, 0], sizes = [8, 8, 32], strides = [1, 1, 1]} : vector<20x10x32xf32> to vector<8x8x32xf32>
    %343 = vector.shape_cast %342 : vector<8x8x32xf32> to vector<64x32xf32>
    %344 = tpu.concatenate %341, %343 in 0 : vector<64x32xf32>, vector<64x32xf32> -> vector<128x32xf32>
    %345 = arith.truncf %344 : vector<128x32xf32> to vector<128x32xbf16>
    %c18 = arith.constant 18 : index
    %c0_164 = arith.constant 0 : index
    %c0_165 = arith.constant 0 : index
    %346 = vector.load %arg4[%c18, %c0_164, %c0_165] : memref<36x32x32xbf16, #tpu.memory_space<vmem>>, vector<1x32x32xbf16>
    %347 = vector.shape_cast %346 : vector<1x32x32xbf16> to vector<32x32xbf16>
    %cst_166 = arith.constant dense<0.000000e+00> : vector<128x32xf32>
    %348 = tpu.matmul %345, %347, %cst_166 {dimension_numbers = #tpu.dot_dimension_numbers<[1], [0], [0], [1], [0, 0, 1, 1], [], []>} : vector<128x32xbf16>, vector<32x32xbf16>, vector<128x32xf32> -> vector<128x32xf32>
    %349 = arith.addf %339, %348 : vector<128x32xf32>
    %350 = vector.extract_strided_slice %338 {offsets = [0, 1, 0], sizes = [8, 8, 32], strides = [1, 1, 1]} : vector<20x10x32xf32> to vector<8x8x32xf32>
    %351 = vector.shape_cast %350 : vector<8x8x32xf32> to vector<64x32xf32>
    %352 = vector.extract_strided_slice %338 {offsets = [10, 1, 0], sizes = [8, 8, 32], strides = [1, 1, 1]} : vector<20x10x32xf32> to vector<8x8x32xf32>
    %353 = vector.shape_cast %352 : vector<8x8x32xf32> to vector<64x32xf32>
    %354 = tpu.concatenate %351, %353 in 0 : vector<64x32xf32>, vector<64x32xf32> -> vector<128x32xf32>
    %355 = arith.truncf %354 : vector<128x32xf32> to vector<128x32xbf16>
    %c19 = arith.constant 19 : index
    %c0_167 = arith.constant 0 : index
    %c0_168 = arith.constant 0 : index
    %356 = vector.load %arg4[%c19, %c0_167, %c0_168] : memref<36x32x32xbf16, #tpu.memory_space<vmem>>, vector<1x32x32xbf16>
    %357 = vector.shape_cast %356 : vector<1x32x32xbf16> to vector<32x32xbf16>
    %cst_169 = arith.constant dense<0.000000e+00> : vector<128x32xf32>
    %358 = tpu.matmul %355, %357, %cst_169 {dimension_numbers = #tpu.dot_dimension_numbers<[1], [0], [0], [1], [0, 0, 1, 1], [], []>} : vector<128x32xbf16>, vector<32x32xbf16>, vector<128x32xf32> -> vector<128x32xf32>
    %359 = arith.addf %349, %358 : vector<128x32xf32>
    %360 = vector.extract_strided_slice %338 {offsets = [0, 2, 0], sizes = [8, 8, 32], strides = [1, 1, 1]} : vector<20x10x32xf32> to vector<8x8x32xf32>
    %361 = vector.shape_cast %360 : vector<8x8x32xf32> to vector<64x32xf32>
    %362 = vector.extract_strided_slice %338 {offsets = [10, 2, 0], sizes = [8, 8, 32], strides = [1, 1, 1]} : vector<20x10x32xf32> to vector<8x8x32xf32>
    %363 = vector.shape_cast %362 : vector<8x8x32xf32> to vector<64x32xf32>
    %364 = tpu.concatenate %361, %363 in 0 : vector<64x32xf32>, vector<64x32xf32> -> vector<128x32xf32>
    %365 = arith.truncf %364 : vector<128x32xf32> to vector<128x32xbf16>
    %c20 = arith.constant 20 : index
    %c0_170 = arith.constant 0 : index
    %c0_171 = arith.constant 0 : index
    %366 = vector.load %arg4[%c20, %c0_170, %c0_171] : memref<36x32x32xbf16, #tpu.memory_space<vmem>>, vector<1x32x32xbf16>
    %367 = vector.shape_cast %366 : vector<1x32x32xbf16> to vector<32x32xbf16>
    %cst_172 = arith.constant dense<0.000000e+00> : vector<128x32xf32>
    %368 = tpu.matmul %365, %367, %cst_172 {dimension_numbers = #tpu.dot_dimension_numbers<[1], [0], [0], [1], [0, 0, 1, 1], [], []>} : vector<128x32xbf16>, vector<32x32xbf16>, vector<128x32xf32> -> vector<128x32xf32>
    %369 = arith.addf %359, %368 : vector<128x32xf32>
    %370 = vector.extract_strided_slice %338 {offsets = [1, 0, 0], sizes = [8, 8, 32], strides = [1, 1, 1]} : vector<20x10x32xf32> to vector<8x8x32xf32>
    %371 = vector.shape_cast %370 : vector<8x8x32xf32> to vector<64x32xf32>
    %372 = vector.extract_strided_slice %338 {offsets = [11, 0, 0], sizes = [8, 8, 32], strides = [1, 1, 1]} : vector<20x10x32xf32> to vector<8x8x32xf32>
    %373 = vector.shape_cast %372 : vector<8x8x32xf32> to vector<64x32xf32>
    %374 = tpu.concatenate %371, %373 in 0 : vector<64x32xf32>, vector<64x32xf32> -> vector<128x32xf32>
    %375 = arith.truncf %374 : vector<128x32xf32> to vector<128x32xbf16>
    %c21 = arith.constant 21 : index
    %c0_173 = arith.constant 0 : index
    %c0_174 = arith.constant 0 : index
    %376 = vector.load %arg4[%c21, %c0_173, %c0_174] : memref<36x32x32xbf16, #tpu.memory_space<vmem>>, vector<1x32x32xbf16>
    %377 = vector.shape_cast %376 : vector<1x32x32xbf16> to vector<32x32xbf16>
    %cst_175 = arith.constant dense<0.000000e+00> : vector<128x32xf32>
    %378 = tpu.matmul %375, %377, %cst_175 {dimension_numbers = #tpu.dot_dimension_numbers<[1], [0], [0], [1], [0, 0, 1, 1], [], []>} : vector<128x32xbf16>, vector<32x32xbf16>, vector<128x32xf32> -> vector<128x32xf32>
    %379 = arith.addf %369, %378 : vector<128x32xf32>
    %380 = vector.extract_strided_slice %338 {offsets = [1, 1, 0], sizes = [8, 8, 32], strides = [1, 1, 1]} : vector<20x10x32xf32> to vector<8x8x32xf32>
    %381 = vector.shape_cast %380 : vector<8x8x32xf32> to vector<64x32xf32>
    %382 = vector.extract_strided_slice %338 {offsets = [11, 1, 0], sizes = [8, 8, 32], strides = [1, 1, 1]} : vector<20x10x32xf32> to vector<8x8x32xf32>
    %383 = vector.shape_cast %382 : vector<8x8x32xf32> to vector<64x32xf32>
    %384 = tpu.concatenate %381, %383 in 0 : vector<64x32xf32>, vector<64x32xf32> -> vector<128x32xf32>
    %385 = arith.truncf %384 : vector<128x32xf32> to vector<128x32xbf16>
    %c22 = arith.constant 22 : index
    %c0_176 = arith.constant 0 : index
    %c0_177 = arith.constant 0 : index
    %386 = vector.load %arg4[%c22, %c0_176, %c0_177] : memref<36x32x32xbf16, #tpu.memory_space<vmem>>, vector<1x32x32xbf16>
    %387 = vector.shape_cast %386 : vector<1x32x32xbf16> to vector<32x32xbf16>
    %cst_178 = arith.constant dense<0.000000e+00> : vector<128x32xf32>
    %388 = tpu.matmul %385, %387, %cst_178 {dimension_numbers = #tpu.dot_dimension_numbers<[1], [0], [0], [1], [0, 0, 1, 1], [], []>} : vector<128x32xbf16>, vector<32x32xbf16>, vector<128x32xf32> -> vector<128x32xf32>
    %389 = arith.addf %379, %388 : vector<128x32xf32>
    %390 = vector.extract_strided_slice %338 {offsets = [1, 2, 0], sizes = [8, 8, 32], strides = [1, 1, 1]} : vector<20x10x32xf32> to vector<8x8x32xf32>
    %391 = vector.shape_cast %390 : vector<8x8x32xf32> to vector<64x32xf32>
    %392 = vector.extract_strided_slice %338 {offsets = [11, 2, 0], sizes = [8, 8, 32], strides = [1, 1, 1]} : vector<20x10x32xf32> to vector<8x8x32xf32>
    %393 = vector.shape_cast %392 : vector<8x8x32xf32> to vector<64x32xf32>
    %394 = tpu.concatenate %391, %393 in 0 : vector<64x32xf32>, vector<64x32xf32> -> vector<128x32xf32>
    %395 = arith.truncf %394 : vector<128x32xf32> to vector<128x32xbf16>
    %c23 = arith.constant 23 : index
    %c0_179 = arith.constant 0 : index
    %c0_180 = arith.constant 0 : index
    %396 = vector.load %arg4[%c23, %c0_179, %c0_180] : memref<36x32x32xbf16, #tpu.memory_space<vmem>>, vector<1x32x32xbf16>
    %397 = vector.shape_cast %396 : vector<1x32x32xbf16> to vector<32x32xbf16>
    %cst_181 = arith.constant dense<0.000000e+00> : vector<128x32xf32>
    %398 = tpu.matmul %395, %397, %cst_181 {dimension_numbers = #tpu.dot_dimension_numbers<[1], [0], [0], [1], [0, 0, 1, 1], [], []>} : vector<128x32xbf16>, vector<32x32xbf16>, vector<128x32xf32> -> vector<128x32xf32>
    %399 = arith.addf %389, %398 : vector<128x32xf32>
    %400 = vector.extract_strided_slice %338 {offsets = [2, 0, 0], sizes = [8, 8, 32], strides = [1, 1, 1]} : vector<20x10x32xf32> to vector<8x8x32xf32>
    %401 = vector.shape_cast %400 : vector<8x8x32xf32> to vector<64x32xf32>
    %402 = vector.extract_strided_slice %338 {offsets = [12, 0, 0], sizes = [8, 8, 32], strides = [1, 1, 1]} : vector<20x10x32xf32> to vector<8x8x32xf32>
    %403 = vector.shape_cast %402 : vector<8x8x32xf32> to vector<64x32xf32>
    %404 = tpu.concatenate %401, %403 in 0 : vector<64x32xf32>, vector<64x32xf32> -> vector<128x32xf32>
    %405 = arith.truncf %404 : vector<128x32xf32> to vector<128x32xbf16>
    %c24 = arith.constant 24 : index
    %c0_182 = arith.constant 0 : index
    %c0_183 = arith.constant 0 : index
    %406 = vector.load %arg4[%c24, %c0_182, %c0_183] : memref<36x32x32xbf16, #tpu.memory_space<vmem>>, vector<1x32x32xbf16>
    %407 = vector.shape_cast %406 : vector<1x32x32xbf16> to vector<32x32xbf16>
    %cst_184 = arith.constant dense<0.000000e+00> : vector<128x32xf32>
    %408 = tpu.matmul %405, %407, %cst_184 {dimension_numbers = #tpu.dot_dimension_numbers<[1], [0], [0], [1], [0, 0, 1, 1], [], []>} : vector<128x32xbf16>, vector<32x32xbf16>, vector<128x32xf32> -> vector<128x32xf32>
    %409 = arith.addf %399, %408 : vector<128x32xf32>
    %410 = vector.extract_strided_slice %338 {offsets = [2, 1, 0], sizes = [8, 8, 32], strides = [1, 1, 1]} : vector<20x10x32xf32> to vector<8x8x32xf32>
    %411 = vector.shape_cast %410 : vector<8x8x32xf32> to vector<64x32xf32>
    %412 = vector.extract_strided_slice %338 {offsets = [12, 1, 0], sizes = [8, 8, 32], strides = [1, 1, 1]} : vector<20x10x32xf32> to vector<8x8x32xf32>
    %413 = vector.shape_cast %412 : vector<8x8x32xf32> to vector<64x32xf32>
    %414 = tpu.concatenate %411, %413 in 0 : vector<64x32xf32>, vector<64x32xf32> -> vector<128x32xf32>
    %415 = arith.truncf %414 : vector<128x32xf32> to vector<128x32xbf16>
    %c25 = arith.constant 25 : index
    %c0_185 = arith.constant 0 : index
    %c0_186 = arith.constant 0 : index
    %416 = vector.load %arg4[%c25, %c0_185, %c0_186] : memref<36x32x32xbf16, #tpu.memory_space<vmem>>, vector<1x32x32xbf16>
    %417 = vector.shape_cast %416 : vector<1x32x32xbf16> to vector<32x32xbf16>
    %cst_187 = arith.constant dense<0.000000e+00> : vector<128x32xf32>
    %418 = tpu.matmul %415, %417, %cst_187 {dimension_numbers = #tpu.dot_dimension_numbers<[1], [0], [0], [1], [0, 0, 1, 1], [], []>} : vector<128x32xbf16>, vector<32x32xbf16>, vector<128x32xf32> -> vector<128x32xf32>
    %419 = arith.addf %409, %418 : vector<128x32xf32>
    %420 = vector.extract_strided_slice %338 {offsets = [2, 2, 0], sizes = [8, 8, 32], strides = [1, 1, 1]} : vector<20x10x32xf32> to vector<8x8x32xf32>
    %421 = vector.shape_cast %420 : vector<8x8x32xf32> to vector<64x32xf32>
    %422 = vector.extract_strided_slice %338 {offsets = [12, 2, 0], sizes = [8, 8, 32], strides = [1, 1, 1]} : vector<20x10x32xf32> to vector<8x8x32xf32>
    %423 = vector.shape_cast %422 : vector<8x8x32xf32> to vector<64x32xf32>
    %424 = tpu.concatenate %421, %423 in 0 : vector<64x32xf32>, vector<64x32xf32> -> vector<128x32xf32>
    %425 = arith.truncf %424 : vector<128x32xf32> to vector<128x32xbf16>
    %c26 = arith.constant 26 : index
    %c0_188 = arith.constant 0 : index
    %c0_189 = arith.constant 0 : index
    %426 = vector.load %arg4[%c26, %c0_188, %c0_189] : memref<36x32x32xbf16, #tpu.memory_space<vmem>>, vector<1x32x32xbf16>
    %427 = vector.shape_cast %426 : vector<1x32x32xbf16> to vector<32x32xbf16>
    %cst_190 = arith.constant dense<0.000000e+00> : vector<128x32xf32>
    %428 = tpu.matmul %425, %427, %cst_190 {dimension_numbers = #tpu.dot_dimension_numbers<[1], [0], [0], [1], [0, 0, 1, 1], [], []>} : vector<128x32xbf16>, vector<32x32xbf16>, vector<128x32xf32> -> vector<128x32xf32>
    %429 = arith.addf %419, %428 : vector<128x32xf32>
    %430 = vector.broadcast %329 : vector<1x32xf32> to vector<128x32xf32>
    %431 = arith.mulf %429, %430 : vector<128x32xf32>
    %432 = vector.broadcast %331 : vector<1x32xf32> to vector<128x32xf32>
    %433 = arith.addf %431, %432 : vector<128x32xf32>
    %cst_191 = arith.constant 0.000000e+00 : f32
    %434 = vector.broadcast %cst_191 : f32 to vector<128x32xf32>
    %435 = arith.maximumf %433, %434 : vector<128x32xf32>
    %c3_192 = arith.constant 3 : index
    %c0_193 = arith.constant 0 : index
    %c0_194 = arith.constant 0 : index
    %436 = vector.load %arg5[%c3_192, %c0_193, %c0_194] : memref<4x1x32xf32, #tpu.memory_space<vmem>>, vector<1x1x32xf32>
    %437 = vector.shape_cast %436 : vector<1x1x32xf32> to vector<1x32xf32>
    %c3_195 = arith.constant 3 : index
    %c0_196 = arith.constant 0 : index
    %c0_197 = arith.constant 0 : index
    %438 = vector.load %arg6[%c3_195, %c0_196, %c0_197] : memref<4x1x32xf32, #tpu.memory_space<vmem>>, vector<1x1x32xf32>
    %439 = vector.shape_cast %438 : vector<1x1x32xf32> to vector<1x32xf32>
    %440 = vector.extract_strided_slice %435 {offsets = [0, 0], sizes = [64, 32], strides = [1, 1]} : vector<128x32xf32> to vector<64x32xf32>
    %441 = vector.shape_cast %440 : vector<64x32xf32> to vector<8x8x32xf32>
    %c1_198 = arith.constant 1 : index
    %c1_199 = arith.constant 1 : index
    %c0_200 = arith.constant 0 : index
    %442 = vector.load %arg22[%c1_198, %c1_199, %c0_200] : memref<20x10x32xf32, #tpu.memory_space<vmem>>, vector<8x8x32xf32>
    tpu.vector_store %arg22[%c1_198, %c1_199, %c0_200], %441 {strides = array<i32>} : memref<20x10x32xf32, #tpu.memory_space<vmem>>, vector<8x8x32xf32>,
    %443 = vector.extract_strided_slice %435 {offsets = [64, 0], sizes = [64, 32], strides = [1, 1]} : vector<128x32xf32> to vector<64x32xf32>
    %444 = vector.shape_cast %443 : vector<64x32xf32> to vector<8x8x32xf32>
    %c11_201 = arith.constant 11 : index
    %c1_202 = arith.constant 1 : index
    %c0_203 = arith.constant 0 : index
    %445 = vector.load %arg22[%c11_201, %c1_202, %c0_203] : memref<20x10x32xf32, #tpu.memory_space<vmem>>, vector<8x8x32xf32>
    tpu.vector_store %arg22[%c11_201, %c1_202, %c0_203], %444 {strides = array<i32>} : memref<20x10x32xf32, #tpu.memory_space<vmem>>, vector<8x8x32xf32>,
    %c0_204 = arith.constant 0 : index
    %c0_205 = arith.constant 0 : index
    %c0_206 = arith.constant 0 : index
    %446 = vector.load %arg22[%c0_204, %c0_205, %c0_206] : memref<20x10x32xf32, #tpu.memory_space<vmem>>, vector<20x10x32xf32>
    %cst_207 = arith.constant 0.000000e+00 : f32
    %447 = vector.broadcast %cst_207 : f32 to vector<128x32xf32>
    %448 = vector.extract_strided_slice %446 {offsets = [0, 0, 0], sizes = [8, 8, 32], strides = [1, 1, 1]} : vector<20x10x32xf32> to vector<8x8x32xf32>
    %449 = vector.shape_cast %448 : vector<8x8x32xf32> to vector<64x32xf32>
    %450 = vector.extract_strided_slice %446 {offsets = [10, 0, 0], sizes = [8, 8, 32], strides = [1, 1, 1]} : vector<20x10x32xf32> to vector<8x8x32xf32>
    %451 = vector.shape_cast %450 : vector<8x8x32xf32> to vector<64x32xf32>
    %452 = tpu.concatenate %449, %451 in 0 : vector<64x32xf32>, vector<64x32xf32> -> vector<128x32xf32>
    %453 = arith.truncf %452 : vector<128x32xf32> to vector<128x32xbf16>
    %c27 = arith.constant 27 : index
    %c0_208 = arith.constant 0 : index
    %c0_209 = arith.constant 0 : index
    %454 = vector.load %arg4[%c27, %c0_208, %c0_209] : memref<36x32x32xbf16, #tpu.memory_space<vmem>>, vector<1x32x32xbf16>
    %455 = vector.shape_cast %454 : vector<1x32x32xbf16> to vector<32x32xbf16>
    %cst_210 = arith.constant dense<0.000000e+00> : vector<128x32xf32>
    %456 = tpu.matmul %453, %455, %cst_210 {dimension_numbers = #tpu.dot_dimension_numbers<[1], [0], [0], [1], [0, 0, 1, 1], [], []>} : vector<128x32xbf16>, vector<32x32xbf16>, vector<128x32xf32> -> vector<128x32xf32>
    %457 = arith.addf %447, %456 : vector<128x32xf32>
    %458 = vector.extract_strided_slice %446 {offsets = [0, 1, 0], sizes = [8, 8, 32], strides = [1, 1, 1]} : vector<20x10x32xf32> to vector<8x8x32xf32>
    %459 = vector.shape_cast %458 : vector<8x8x32xf32> to vector<64x32xf32>
    %460 = vector.extract_strided_slice %446 {offsets = [10, 1, 0], sizes = [8, 8, 32], strides = [1, 1, 1]} : vector<20x10x32xf32> to vector<8x8x32xf32>
    %461 = vector.shape_cast %460 : vector<8x8x32xf32> to vector<64x32xf32>
    %462 = tpu.concatenate %459, %461 in 0 : vector<64x32xf32>, vector<64x32xf32> -> vector<128x32xf32>
    %463 = arith.truncf %462 : vector<128x32xf32> to vector<128x32xbf16>
    %c28 = arith.constant 28 : index
    %c0_211 = arith.constant 0 : index
    %c0_212 = arith.constant 0 : index
    %464 = vector.load %arg4[%c28, %c0_211, %c0_212] : memref<36x32x32xbf16, #tpu.memory_space<vmem>>, vector<1x32x32xbf16>
    %465 = vector.shape_cast %464 : vector<1x32x32xbf16> to vector<32x32xbf16>
    %cst_213 = arith.constant dense<0.000000e+00> : vector<128x32xf32>
    %466 = tpu.matmul %463, %465, %cst_213 {dimension_numbers = #tpu.dot_dimension_numbers<[1], [0], [0], [1], [0, 0, 1, 1], [], []>} : vector<128x32xbf16>, vector<32x32xbf16>, vector<128x32xf32> -> vector<128x32xf32>
    %467 = arith.addf %457, %466 : vector<128x32xf32>
    %468 = vector.extract_strided_slice %446 {offsets = [0, 2, 0], sizes = [8, 8, 32], strides = [1, 1, 1]} : vector<20x10x32xf32> to vector<8x8x32xf32>
    %469 = vector.shape_cast %468 : vector<8x8x32xf32> to vector<64x32xf32>
    %470 = vector.extract_strided_slice %446 {offsets = [10, 2, 0], sizes = [8, 8, 32], strides = [1, 1, 1]} : vector<20x10x32xf32> to vector<8x8x32xf32>
    %471 = vector.shape_cast %470 : vector<8x8x32xf32> to vector<64x32xf32>
    %472 = tpu.concatenate %469, %471 in 0 : vector<64x32xf32>, vector<64x32xf32> -> vector<128x32xf32>
    %473 = arith.truncf %472 : vector<128x32xf32> to vector<128x32xbf16>
    %c29 = arith.constant 29 : index
    %c0_214 = arith.constant 0 : index
    %c0_215 = arith.constant 0 : index
    %474 = vector.load %arg4[%c29, %c0_214, %c0_215] : memref<36x32x32xbf16, #tpu.memory_space<vmem>>, vector<1x32x32xbf16>
    %475 = vector.shape_cast %474 : vector<1x32x32xbf16> to vector<32x32xbf16>
    %cst_216 = arith.constant dense<0.000000e+00> : vector<128x32xf32>
    %476 = tpu.matmul %473, %475, %cst_216 {dimension_numbers = #tpu.dot_dimension_numbers<[1], [0], [0], [1], [0, 0, 1, 1], [], []>} : vector<128x32xbf16>, vector<32x32xbf16>, vector<128x32xf32> -> vector<128x32xf32>
    %477 = arith.addf %467, %476 : vector<128x32xf32>
    %478 = vector.extract_strided_slice %446 {offsets = [1, 0, 0], sizes = [8, 8, 32], strides = [1, 1, 1]} : vector<20x10x32xf32> to vector<8x8x32xf32>
    %479 = vector.shape_cast %478 : vector<8x8x32xf32> to vector<64x32xf32>
    %480 = vector.extract_strided_slice %446 {offsets = [11, 0, 0], sizes = [8, 8, 32], strides = [1, 1, 1]} : vector<20x10x32xf32> to vector<8x8x32xf32>
    %481 = vector.shape_cast %480 : vector<8x8x32xf32> to vector<64x32xf32>
    %482 = tpu.concatenate %479, %481 in 0 : vector<64x32xf32>, vector<64x32xf32> -> vector<128x32xf32>
    %483 = arith.truncf %482 : vector<128x32xf32> to vector<128x32xbf16>
    %c30 = arith.constant 30 : index
    %c0_217 = arith.constant 0 : index
    %c0_218 = arith.constant 0 : index
    %484 = vector.load %arg4[%c30, %c0_217, %c0_218] : memref<36x32x32xbf16, #tpu.memory_space<vmem>>, vector<1x32x32xbf16>
    %485 = vector.shape_cast %484 : vector<1x32x32xbf16> to vector<32x32xbf16>
    %cst_219 = arith.constant dense<0.000000e+00> : vector<128x32xf32>
    %486 = tpu.matmul %483, %485, %cst_219 {dimension_numbers = #tpu.dot_dimension_numbers<[1], [0], [0], [1], [0, 0, 1, 1], [], []>} : vector<128x32xbf16>, vector<32x32xbf16>, vector<128x32xf32> -> vector<128x32xf32>
    %487 = arith.addf %477, %486 : vector<128x32xf32>
    %488 = vector.extract_strided_slice %446 {offsets = [1, 1, 0], sizes = [8, 8, 32], strides = [1, 1, 1]} : vector<20x10x32xf32> to vector<8x8x32xf32>
    %489 = vector.shape_cast %488 : vector<8x8x32xf32> to vector<64x32xf32>
    %490 = vector.extract_strided_slice %446 {offsets = [11, 1, 0], sizes = [8, 8, 32], strides = [1, 1, 1]} : vector<20x10x32xf32> to vector<8x8x32xf32>
    %491 = vector.shape_cast %490 : vector<8x8x32xf32> to vector<64x32xf32>
    %492 = tpu.concatenate %489, %491 in 0 : vector<64x32xf32>, vector<64x32xf32> -> vector<128x32xf32>
    %493 = arith.truncf %492 : vector<128x32xf32> to vector<128x32xbf16>
    %c31 = arith.constant 31 : index
    %c0_220 = arith.constant 0 : index
    %c0_221 = arith.constant 0 : index
    %494 = vector.load %arg4[%c31, %c0_220, %c0_221] : memref<36x32x32xbf16, #tpu.memory_space<vmem>>, vector<1x32x32xbf16>
    %495 = vector.shape_cast %494 : vector<1x32x32xbf16> to vector<32x32xbf16>
    %cst_222 = arith.constant dense<0.000000e+00> : vector<128x32xf32>
    %496 = tpu.matmul %493, %495, %cst_222 {dimension_numbers = #tpu.dot_dimension_numbers<[1], [0], [0], [1], [0, 0, 1, 1], [], []>} : vector<128x32xbf16>, vector<32x32xbf16>, vector<128x32xf32> -> vector<128x32xf32>
    %497 = arith.addf %487, %496 : vector<128x32xf32>
    %498 = vector.extract_strided_slice %446 {offsets = [1, 2, 0], sizes = [8, 8, 32], strides = [1, 1, 1]} : vector<20x10x32xf32> to vector<8x8x32xf32>
    %499 = vector.shape_cast %498 : vector<8x8x32xf32> to vector<64x32xf32>
    %500 = vector.extract_strided_slice %446 {offsets = [11, 2, 0], sizes = [8, 8, 32], strides = [1, 1, 1]} : vector<20x10x32xf32> to vector<8x8x32xf32>
    %501 = vector.shape_cast %500 : vector<8x8x32xf32> to vector<64x32xf32>
    %502 = tpu.concatenate %499, %501 in 0 : vector<64x32xf32>, vector<64x32xf32> -> vector<128x32xf32>
    %503 = arith.truncf %502 : vector<128x32xf32> to vector<128x32xbf16>
    %c32 = arith.constant 32 : index
    %c0_223 = arith.constant 0 : index
    %c0_224 = arith.constant 0 : index
    %504 = vector.load %arg4[%c32, %c0_223, %c0_224] : memref<36x32x32xbf16, #tpu.memory_space<vmem>>, vector<1x32x32xbf16>
    %505 = vector.shape_cast %504 : vector<1x32x32xbf16> to vector<32x32xbf16>
    %cst_225 = arith.constant dense<0.000000e+00> : vector<128x32xf32>
    %506 = tpu.matmul %503, %505, %cst_225 {dimension_numbers = #tpu.dot_dimension_numbers<[1], [0], [0], [1], [0, 0, 1, 1], [], []>} : vector<128x32xbf16>, vector<32x32xbf16>, vector<128x32xf32> -> vector<128x32xf32>
    %507 = arith.addf %497, %506 : vector<128x32xf32>
    %508 = vector.extract_strided_slice %446 {offsets = [2, 0, 0], sizes = [8, 8, 32], strides = [1, 1, 1]} : vector<20x10x32xf32> to vector<8x8x32xf32>
    %509 = vector.shape_cast %508 : vector<8x8x32xf32> to vector<64x32xf32>
    %510 = vector.extract_strided_slice %446 {offsets = [12, 0, 0], sizes = [8, 8, 32], strides = [1, 1, 1]} : vector<20x10x32xf32> to vector<8x8x32xf32>
    %511 = vector.shape_cast %510 : vector<8x8x32xf32> to vector<64x32xf32>
    %512 = tpu.concatenate %509, %511 in 0 : vector<64x32xf32>, vector<64x32xf32> -> vector<128x32xf32>
    %513 = arith.truncf %512 : vector<128x32xf32> to vector<128x32xbf16>
    %c33 = arith.constant 33 : index
    %c0_226 = arith.constant 0 : index
    %c0_227 = arith.constant 0 : index
    %514 = vector.load %arg4[%c33, %c0_226, %c0_227] : memref<36x32x32xbf16, #tpu.memory_space<vmem>>, vector<1x32x32xbf16>
    %515 = vector.shape_cast %514 : vector<1x32x32xbf16> to vector<32x32xbf16>
    %cst_228 = arith.constant dense<0.000000e+00> : vector<128x32xf32>
    %516 = tpu.matmul %513, %515, %cst_228 {dimension_numbers = #tpu.dot_dimension_numbers<[1], [0], [0], [1], [0, 0, 1, 1], [], []>} : vector<128x32xbf16>, vector<32x32xbf16>, vector<128x32xf32> -> vector<128x32xf32>
    %517 = arith.addf %507, %516 : vector<128x32xf32>
    %518 = vector.extract_strided_slice %446 {offsets = [2, 1, 0], sizes = [8, 8, 32], strides = [1, 1, 1]} : vector<20x10x32xf32> to vector<8x8x32xf32>
    %519 = vector.shape_cast %518 : vector<8x8x32xf32> to vector<64x32xf32>
    %520 = vector.extract_strided_slice %446 {offsets = [12, 1, 0], sizes = [8, 8, 32], strides = [1, 1, 1]} : vector<20x10x32xf32> to vector<8x8x32xf32>
    %521 = vector.shape_cast %520 : vector<8x8x32xf32> to vector<64x32xf32>
    %522 = tpu.concatenate %519, %521 in 0 : vector<64x32xf32>, vector<64x32xf32> -> vector<128x32xf32>
    %523 = arith.truncf %522 : vector<128x32xf32> to vector<128x32xbf16>
    %c34 = arith.constant 34 : index
    %c0_229 = arith.constant 0 : index
    %c0_230 = arith.constant 0 : index
    %524 = vector.load %arg4[%c34, %c0_229, %c0_230] : memref<36x32x32xbf16, #tpu.memory_space<vmem>>, vector<1x32x32xbf16>
    %525 = vector.shape_cast %524 : vector<1x32x32xbf16> to vector<32x32xbf16>
    %cst_231 = arith.constant dense<0.000000e+00> : vector<128x32xf32>
    %526 = tpu.matmul %523, %525, %cst_231 {dimension_numbers = #tpu.dot_dimension_numbers<[1], [0], [0], [1], [0, 0, 1, 1], [], []>} : vector<128x32xbf16>, vector<32x32xbf16>, vector<128x32xf32> -> vector<128x32xf32>
    %527 = arith.addf %517, %526 : vector<128x32xf32>
    %528 = vector.extract_strided_slice %446 {offsets = [2, 2, 0], sizes = [8, 8, 32], strides = [1, 1, 1]} : vector<20x10x32xf32> to vector<8x8x32xf32>
    %529 = vector.shape_cast %528 : vector<8x8x32xf32> to vector<64x32xf32>
    %530 = vector.extract_strided_slice %446 {offsets = [12, 2, 0], sizes = [8, 8, 32], strides = [1, 1, 1]} : vector<20x10x32xf32> to vector<8x8x32xf32>
    %531 = vector.shape_cast %530 : vector<8x8x32xf32> to vector<64x32xf32>
    %532 = tpu.concatenate %529, %531 in 0 : vector<64x32xf32>, vector<64x32xf32> -> vector<128x32xf32>
    %533 = arith.truncf %532 : vector<128x32xf32> to vector<128x32xbf16>
    %c35 = arith.constant 35 : index
    %c0_232 = arith.constant 0 : index
    %c0_233 = arith.constant 0 : index
    %534 = vector.load %arg4[%c35, %c0_232, %c0_233] : memref<36x32x32xbf16, #tpu.memory_space<vmem>>, vector<1x32x32xbf16>
    %535 = vector.shape_cast %534 : vector<1x32x32xbf16> to vector<32x32xbf16>
    %cst_234 = arith.constant dense<0.000000e+00> : vector<128x32xf32>
    %536 = tpu.matmul %533, %535, %cst_234 {dimension_numbers = #tpu.dot_dimension_numbers<[1], [0], [0], [1], [0, 0, 1, 1], [], []>} : vector<128x32xbf16>, vector<32x32xbf16>, vector<128x32xf32> -> vector<128x32xf32>
    %537 = arith.addf %527, %536 : vector<128x32xf32>
    %538 = vector.broadcast %437 : vector<1x32xf32> to vector<128x32xf32>
    %539 = arith.mulf %537, %538 : vector<128x32xf32>
    %540 = vector.broadcast %439 : vector<1x32xf32> to vector<128x32xf32>
    %541 = arith.addf %539, %540 : vector<128x32xf32>
    %542 = arith.addf %327, %541 : vector<128x32xf32>
    %cst_235 = arith.constant 0.000000e+00 : f32
    %543 = vector.broadcast %cst_235 : f32 to vector<128x32xf32>
    %544 = arith.maximumf %542, %543 : vector<128x32xf32>
    %545 = vector.shape_cast %544 : vector<128x32xf32> to vector<2x64x32xf32>
    %c0_236 = arith.constant 0 : index
    %c0_237 = arith.constant 0 : index
    %c0_238 = arith.constant 0 : index
    %546 = vector.load %arg12[%c0_236, %c0_237, %c0_238] : memref<1x1x32xf32, #tpu.memory_space<vmem>>, vector<1x1x32xf32>
    %547 = vector.broadcast %546 : vector<1x1x32xf32> to vector<2x64x32xf32>
    %548 = arith.mulf %545, %547 : vector<2x64x32xf32>
    %cst_239 = arith.constant dense<0.000000e+00> : vector<2x64xf32>
    %549 = vector.multi_reduction <add>, %548, %cst_239 [2] : vector<2x64x32xf32> to vector<2x64xf32>
    %c0_240 = arith.constant 0 : index
    %c0_241 = arith.constant 0 : index
    %550 = vector.load %arg13[%c0_240, %c0_241] : memref<1x1xf32, #tpu.memory_space<vmem>>, vector<1x1xf32>
    %551 = vector.broadcast %550 : vector<1x1xf32> to vector<2x64xf32>
    %552 = arith.mulf %549, %551 : vector<2x64xf32>
    %c0_242 = arith.constant 0 : index
    %c0_243 = arith.constant 0 : index
    %553 = vector.load %arg14[%c0_242, %c0_243] : memref<1x1xf32, #tpu.memory_space<vmem>>, vector<1x1xf32>
    %554 = vector.broadcast %553 : vector<1x1xf32> to vector<2x64xf32>
    %555 = arith.addf %552, %554 : vector<2x64xf32>
    %cst_244 = arith.constant 0.000000e+00 : f32
    %556 = vector.broadcast %cst_244 : f32 to vector<2x64xf32>
    %557 = arith.maximumf %555, %556 : vector<2x64xf32>
    %558 = arith.truncf %557 : vector<2x64xf32> to vector<2x64xbf16>
    %c0_245 = arith.constant 0 : index
    %c0_246 = arith.constant 0 : index
    %559 = vector.load %arg15[%c0_245, %c0_246] : memref<64x256xbf16, #tpu.memory_space<vmem>>, vector<64x256xbf16>
    %cst_247 = arith.constant dense<0.000000e+00> : vector<2x256xf32>
    %560 = tpu.matmul %558, %559, %cst_247 {dimension_numbers = #tpu.dot_dimension_numbers<[1], [0], [0], [1], [0, 0, 1, 1], [], []>} : vector<2x64xbf16>, vector<64x256xbf16>, vector<2x256xf32> -> vector<2x256xf32>
    %c0_248 = arith.constant 0 : index
    %c0_249 = arith.constant 0 : index
    %561 = vector.load %arg16[%c0_248, %c0_249] : memref<1x256xf32, #tpu.memory_space<vmem>>, vector<1x256xf32>
    %562 = vector.broadcast %561 : vector<1x256xf32> to vector<2x256xf32>
    %563 = arith.addf %560, %562 : vector<2x256xf32>
    %cst_250 = arith.constant 0.000000e+00 : f32
    %564 = vector.broadcast %cst_250 : f32 to vector<2x256xf32>
    %565 = arith.maximumf %563, %564 : vector<2x256xf32>
    %c0_251 = arith.constant 0 : index
    %c0_252 = arith.constant 0 : index
    %566 = vector.load %arg17[%c0_251, %c0_252] : memref<1x256xf32, #tpu.memory_space<vmem>>, vector<1x256xf32>
    %567 = vector.broadcast %566 : vector<1x256xf32> to vector<2x256xf32>
    %568 = arith.mulf %565, %567 : vector<2x256xf32>
    %cst_253 = arith.constant dense<0.000000e+00> : vector<2xf32>
    %569 = vector.multi_reduction <add>, %568, %cst_253 [1] : vector<2x256xf32> to vector<2xf32>
    %570 = vector.shape_cast %569 : vector<2xf32> to vector<2x1xf32>
    %c0_254 = arith.constant 0 : index
    %c0_255 = arith.constant 0 : index
    %571 = vector.load %arg18[%c0_254, %c0_255] : memref<1x1xf32, #tpu.memory_space<vmem>>, vector<1x1xf32>
    %572 = vector.broadcast %571 : vector<1x1xf32> to vector<2x1xf32>
    %573 = arith.addf %570, %572 : vector<2x1xf32>
    %574 = math.tanh %573 : vector<2x1xf32>
    %c0_256 = arith.constant 0 : index
    %c0_257 = arith.constant 0 : index
    %575 = vector.load %arg19[%c0_256, %c0_257] : memref<2x1xf32, #tpu.memory_space<vmem>>, vector<2x1xf32>
    tpu.vector_store %arg19[%c0_256, %c0_257], %574 {strides = array<i32>} : memref<2x1xf32, #tpu.memory_space<vmem>>, vector<2x1xf32>,
    %c0_258 = arith.constant 0 : index
    %c0_259 = arith.constant 0 : index
    %576 = vector.load %arg11[%c0_258, %c0_259] : memref<1x128xf32, #tpu.memory_space<vmem>>, vector<1x128xf32>
    %c0_260 = arith.constant 0 : index
    %c0_261 = arith.constant 0 : index
    %c0_262 = arith.constant 0 : index
    %577 = vector.load %arg7[%c0_260, %c0_261, %c0_262] : memref<2x1x32xf32, #tpu.memory_space<vmem>>, vector<1x1x32xf32>
    %578 = vector.shape_cast %577 : vector<1x1x32xf32> to vector<1x32xf32>
    %579 = vector.shape_cast %578 : vector<1x32xf32> to vector<1x1x32xf32>
    %580 = vector.broadcast %579 : vector<1x1x32xf32> to vector<2x64x32xf32>
    %581 = arith.mulf %545, %580 : vector<2x64x32xf32>
    %cst_263 = arith.constant dense<0.000000e+00> : vector<2x64xf32>
    %582 = vector.multi_reduction <add>, %581, %cst_263 [2] : vector<2x64x32xf32> to vector<2x64xf32>
    %c0_264 = arith.constant 0 : index
    %c0_265 = arith.constant 0 : index
    %c0_266 = arith.constant 0 : index
    %583 = vector.load %arg8[%c0_264, %c0_265, %c0_266] : memref<2x1x1xf32, #tpu.memory_space<vmem>>, vector<1x1x1xf32>
    %584 = vector.shape_cast %583 : vector<1x1x1xf32> to vector<1x1xf32>
    %585 = vector.broadcast %584 : vector<1x1xf32> to vector<2x64xf32>
    %586 = arith.mulf %582, %585 : vector<2x64xf32>
    %c0_267 = arith.constant 0 : index
    %c0_268 = arith.constant 0 : index
    %c0_269 = arith.constant 0 : index
    %587 = vector.load %arg9[%c0_267, %c0_268, %c0_269] : memref<2x1x1xf32, #tpu.memory_space<vmem>>, vector<1x1x1xf32>
    %588 = vector.shape_cast %587 : vector<1x1x1xf32> to vector<1x1xf32>
    %589 = vector.broadcast %588 : vector<1x1xf32> to vector<2x64xf32>
    %590 = arith.addf %586, %589 : vector<2x64xf32>
    %cst_270 = arith.constant 0.000000e+00 : f32
    %591 = vector.broadcast %cst_270 : f32 to vector<2x64xf32>
    %592 = arith.maximumf %590, %591 : vector<2x64xf32>
    %593 = arith.truncf %592 : vector<2x64xf32> to vector<2x64xbf16>
    %c0_271 = arith.constant 0 : index
    %c0_272 = arith.constant 0 : index
    %c0_273 = arith.constant 0 : index
    %594 = vector.load %arg10[%c0_271, %c0_272, %c0_273] : memref<2x64x128xbf16, #tpu.memory_space<vmem>>, vector<1x64x128xbf16>
    %595 = vector.shape_cast %594 : vector<1x64x128xbf16> to vector<64x128xbf16>
    %cst_274 = arith.constant dense<0.000000e+00> : vector<2x128xf32>
    %596 = tpu.matmul %593, %595, %cst_274 {dimension_numbers = #tpu.dot_dimension_numbers<[1], [0], [0], [1], [0, 0, 1, 1], [], []>} : vector<2x64xbf16>, vector<64x128xbf16>, vector<2x128xf32> -> vector<2x128xf32>
    %597 = vector.broadcast %576 : vector<1x128xf32> to vector<2x128xf32>
    %598 = arith.addf %597, %596 : vector<2x128xf32>
    %c1_275 = arith.constant 1 : index
    %c0_276 = arith.constant 0 : index
    %c0_277 = arith.constant 0 : index
    %599 = vector.load %arg7[%c1_275, %c0_276, %c0_277] : memref<2x1x32xf32, #tpu.memory_space<vmem>>, vector<1x1x32xf32>
    %600 = vector.shape_cast %599 : vector<1x1x32xf32> to vector<1x32xf32>
    %601 = vector.shape_cast %600 : vector<1x32xf32> to vector<1x1x32xf32>
    %602 = vector.broadcast %601 : vector<1x1x32xf32> to vector<2x64x32xf32>
    %603 = arith.mulf %545, %602 : vector<2x64x32xf32>
    %cst_278 = arith.constant dense<0.000000e+00> : vector<2x64xf32>
    %604 = vector.multi_reduction <add>, %603, %cst_278 [2] : vector<2x64x32xf32> to vector<2x64xf32>
    %c1_279 = arith.constant 1 : index
    %c0_280 = arith.constant 0 : index
    %c0_281 = arith.constant 0 : index
    %605 = vector.load %arg8[%c1_279, %c0_280, %c0_281] : memref<2x1x1xf32, #tpu.memory_space<vmem>>, vector<1x1x1xf32>
    %606 = vector.shape_cast %605 : vector<1x1x1xf32> to vector<1x1xf32>
    %607 = vector.broadcast %606 : vector<1x1xf32> to vector<2x64xf32>
    %608 = arith.mulf %604, %607 : vector<2x64xf32>
    %c1_282 = arith.constant 1 : index
    %c0_283 = arith.constant 0 : index
    %c0_284 = arith.constant 0 : index
    %609 = vector.load %arg9[%c1_282, %c0_283, %c0_284] : memref<2x1x1xf32, #tpu.memory_space<vmem>>, vector<1x1x1xf32>
    %610 = vector.shape_cast %609 : vector<1x1x1xf32> to vector<1x1xf32>
    %611 = vector.broadcast %610 : vector<1x1xf32> to vector<2x64xf32>
    %612 = arith.addf %608, %611 : vector<2x64xf32>
    %cst_285 = arith.constant 0.000000e+00 : f32
    %613 = vector.broadcast %cst_285 : f32 to vector<2x64xf32>
    %614 = arith.maximumf %612, %613 : vector<2x64xf32>
    %615 = arith.truncf %614 : vector<2x64xf32> to vector<2x64xbf16>
    %c1_286 = arith.constant 1 : index
    %c0_287 = arith.constant 0 : index
    %c0_288 = arith.constant 0 : index
    %616 = vector.load %arg10[%c1_286, %c0_287, %c0_288] : memref<2x64x128xbf16, #tpu.memory_space<vmem>>, vector<1x64x128xbf16>
    %617 = vector.shape_cast %616 : vector<1x64x128xbf16> to vector<64x128xbf16>
    %cst_289 = arith.constant dense<0.000000e+00> : vector<2x128xf32>
    %618 = tpu.matmul %615, %617, %cst_289 {dimension_numbers = #tpu.dot_dimension_numbers<[1], [0], [0], [1], [0, 0, 1, 1], [], []>} : vector<2x64xbf16>, vector<64x128xbf16>, vector<2x128xf32> -> vector<2x128xf32>
    %619 = arith.addf %598, %618 : vector<2x128xf32>
    %cst_290 = arith.constant dense<0xFF800000> : vector<2xf32>
    %620 = vector.multi_reduction <maximumf>, %619, %cst_290 [1] : vector<2x128xf32> to vector<2xf32>
    %621 = vector.shape_cast %620 : vector<2xf32> to vector<2x1xf32>
    %622 = vector.broadcast %621 : vector<2x1xf32> to vector<2x128xf32>
    %623 = arith.subf %619, %622 : vector<2x128xf32>
    %624 = math.exp %623 : vector<2x128xf32>
    %cst_291 = arith.constant dense<0.000000e+00> : vector<2xf32>
    %625 = vector.multi_reduction <add>, %624, %cst_291 [1] : vector<2x128xf32> to vector<2xf32>
    %626 = vector.shape_cast %625 : vector<2xf32> to vector<2x1xf32>
    %627 = vector.broadcast %626 : vector<2x1xf32> to vector<2x128xf32>
    %628 = arith.divf %624, %627 : vector<2x128xf32>
    %c0_292 = arith.constant 0 : index
    %c0_293 = arith.constant 0 : index
    %629 = vector.load %arg20[%c0_292, %c0_293] : memref<2x128xf32, #tpu.memory_space<vmem>>, vector<2x128xf32>
    tpu.vector_store %arg20[%c0_292, %c0_293], %628 {strides = array<i32>} : memref<2x128xf32, #tpu.memory_space<vmem>>, vector<2x128xf32>,
    return
  }
}

</mosaic_0001>

<bundles_post_ra>
// kernel: agent_forward.1
= control target key start
LH: loop header
LB: loop body
LE: loop exit
PB: predicated region body
PF: predicated region fallthrough
CT: control target
= control target key end

     0   :  { %s16588_s0 = inlined_call_operand.vmem [shape: f32[128,16], index: 0, kind: input, shape index: {}]   ;;  %s16589_s1 = inlined_call_operand.vmem [shape: bf16[9,16,32], index: 1, kind: input, shape index: {}]   ;;  %s16590_s2 = inlined_call_operand.vmem [shape: f32[1,32], index: 2, kind: input, shape index: {}]   ;;  %s16591_s3 = inlined_call_operand.vmem [shape: f32[1,32], index: 3, kind: input, shape index: {}]   ;;  %s16592_s4 = inlined_call_operand.vmem [shape: bf16[36,32,32], index: 4, kind: input, shape index: {}]   ;;  %s16593_s5 = inlined_call_operand.vmem [shape: f32[4,1,32], index: 5, kind: input, shape index: {}]   ;;  %s16594_s6 = inlined_call_operand.vmem [shape: f32[4,1,32], index: 6, kind: input, shape index: {}]   ;;  %s16595_s7 = inlined_call_operand.vmem [shape: f32[2,1,32], index: 7, kind: input, shape index: {}]   ;;  %s16596_s8 = inlined_call_operand.vmem [shape: f32[2,1,1], index: 8, kind: input, shape index: {}]   ;;  %s16597_s9 = inlined_call_operand.vmem [shape: f32[2,1,1], index: 9, kind: input, shape index: {}]   ;;  %s16598_s10 = inlined_call_operand.vmem [shape: bf16[2,64,128], index: 10, kind: input, shape index: {}]   ;;  %s16599_s11 = inlined_call_operand.vmem [shape: f32[1,128], index: 11, kind: input, shape index: {}]   ;;  %s16600_s12 = inlined_call_operand.vmem [shape: f32[1,1,32], index: 12, kind: input, shape index: {}]   ;;  %s16601_s13 = inlined_call_operand.<no memory space> [shape: f32[1,1], index: 13, kind: input, shape index: {}]   ;;  %s16602_s15 = inlined_call_operand.vmem [shape: bf16[64,256], index: 15, kind: input, shape index: {}]   ;;  %s16603_s16 = inlined_call_operand.vmem [shape: f32[1,256], index: 16, kind: input, shape index: {}]   ;;  %s16604_s17 = inlined_call_operand.vmem [shape: f32[1,256], index: 17, kind: input, shape index: {}]   ;;  %s16605_s19 = inlined_call_operand.vmem [shape: f32[2,1], index: 19, kind: output, shape index: {0}]   ;;  %s16606_s20 = inlined_call_operand.hbm [shape: f32[2,128], index: 20, kind: output, shape index: {1}]   ;;  %s16607_s14 = inlined_call_operand.<no memory space> [shape: f32[1,1], index: 14, kind: input, shape index: {}]   ;;  %s16608_s18 = inlined_call_operand.<no memory space> [shape: f32[1,1], index: 18, kind: input, shape index: {}]  }
   0x1   :  { %16724 = sst [smem:[#allocation34_spill]] %s16588_s0  ;;  %v26_v0 = vstv %s16601_s13  ;;  %v28_v1 = vstv %s16607_s14  ;;  %v30_v2 = vstv %s16608_s18 }
   0x2   :  { %16725 = sst [smem:[#allocation35_spill]] %s16589_s1  ;;  %27 = vst [vmem:[#allocation4] sm:$0x1] %v26_v0  ;;  %29 = vst [vmem:[#allocation5] sm:$0x1] %v28_v1 }
   0x3   :  { %16726 = sst [smem:[#allocation36_spill]] %s16590_s2  ;;  %31 = vst [vmem:[#allocation6] sm:$0x1] %v30_v2 }
   0x4   :  { %16727 = sst [smem:[#allocation37_spill]] %s16591_s3 }
   0x5   :  { %16728 = sst [smem:[#allocation38_spill]] %s16592_s4 }
   0x6   :  { %s16729_s27 = sld [smem:[#allocation35_spill]]  ;;  %vm72_vm0 = vcmask 130048   ;;  %v16612_v5 = vmov 0.0   ;;  %vm74_vm1 = vcmask 123904   ;;  %s16730_s18 = sld [smem:[#allocation34_spill]]  ;;  %vm258_vm2 = vcmask 1046528  }
   0x7   :  { %73 = vst.msk [vmem:[#allocation2] sm:$0xff] %vm72_vm0, %v16612_v5  ;;  %76 = vst.msk [vmem:[#allocation2 + $0x10] sm:$0xff] %vm72_vm0, %v16612_v5  ;;  %vm604_vm3 = vcmask 1045504  }
   0x8   :  { %78 = vst.msk [vmem:[#allocation2 + $0x20] sm:$0xff] %vm72_vm0, %v16612_v5  ;;  %80 = vst.msk [vmem:[#allocation2 + $0x30] sm:$0xff] %vm72_vm0, %v16612_v5 }
   0x9   :  { %82 = vst.msk [vmem:[#allocation2 + $0x40] sm:$0xff] %vm72_vm0, %v16612_v5  ;;  %84 = vst.msk [vmem:[#allocation2 + $0x50] sm:$0xff] %vm72_vm0, %v16612_v5 }
   0xa   :  { %86 = vst.msk [vmem:[#allocation2 + $0x60] sm:$0xff] %vm72_vm0, %v16612_v5  ;;  %88 = vst.msk [vmem:[#allocation2 + $0x70] sm:$0xff] %vm72_vm0, %v16612_v5 }
   0xb   :  { %90 = vst.msk [vmem:[#allocation2 + $0x80] sm:$0xff] %vm72_vm0, %v16612_v5  ;;  %92 = vst.msk [vmem:[#allocation2 + $0x90] sm:$0xff] %vm72_vm0, %v16612_v5 }
   0xc   :  { %v12265_v3 = vld [vmem:[%s16729_s27 + $0x20] sm:$0xff]   ;;  %v12266_v4 = vld [vmem:[%s16729_s27 + $0x8] sm:$0xff]   ;;  %94 = vst.msk [vmem:[#allocation2 + $0xa0] sm:$0xff] %vm72_vm0, %v16612_v5  ;;  %96 = vst.msk [vmem:[#allocation2 + $0xb0] sm:$0xff] %vm72_vm0, %v16612_v5 }
   0xd   :  { %10780 = vmatprep.subr.bf16.mxu0 %v12265_v3  ;;  %v156_v6 = vld [vmem:[%s16730_s18] sm:$0xff]  ;;  %98 = vst.msk [vmem:[#allocation2 + $0xc0] sm:$0xff] %vm72_vm0, %v16612_v5  ;;  %100 = vst.msk [vmem:[#allocation2 + $0xd0] sm:$0xff] %vm72_vm0, %v16612_v5  ;;  %v157_v7 = vld [vmem:[%s16730_s18 + $0x8] sm:$0xff]  ;;  %10708 = vmatprep.subr.bf16.mxu1 %v12266_v4 }
   0xe   :  { %102 = vst.msk [vmem:[#allocation2 + $0xe0] sm:$0xff] %vm72_vm0, %v16612_v5  ;;  %104 = vst.msk [vmem:[#allocation2 + $0xf0] sm:$0xff] %vm72_vm0, %v16612_v5  ;;  %v158_v8 = vld [vmem:[%s16730_s18 + $0x10] sm:$0xff]  ;;  %10781 = vmatpush3.bf16.msra.mxu0 %v12265_v3  ;;  %v159_v9 = vld [vmem:[%s16730_s18 + $0x18] sm:$0xff]  ;;  %10709 = vmatpush3.bf16.msra.mxu1 %v12266_v4 }
   0xf   :  { %106 = vst.msk [vmem:[#allocation2 + $0x100] sm:$0xff] %vm72_vm0, %v16612_v5  ;;  %108 = vst.msk [vmem:[#allocation2 + $0x110] sm:$0xff] %vm72_vm0, %v16612_v5  ;;  %v12623_v10 = vld [vmem:[%s16729_s27 + $0x28] sm:$0xff]   ;;  %v160_v11 = vld [vmem:[%s16730_s18 + $0x20] sm:$0xff] }
  0x10   :  { %110 = vst.msk [vmem:[#allocation2 + $0x120] sm:$0xff] %vm72_vm0, %v16612_v5  ;;  %112 = vst.msk [vmem:[#allocation2 + $0x130] sm:$0xff] %vm72_vm0, %v16612_v5  ;;  %v161_v12 = vld [vmem:[%s16730_s18 + $0x28] sm:$0xff]  ;;  %v162_v13 = vld [vmem:[%s16730_s18 + $0x30] sm:$0xff]  ;;  %10798 = vmatprep.subr.bf16.mxu0 %v12623_v10 }
  0x11   :  { %75 = vst.msk [vmem:[#allocation2 + $0x8] sm:$0x3] %vm74_vm1, %v16612_v5  ;;  %77 = vst.msk [vmem:[#allocation2 + $0x18] sm:$0x3] %vm74_vm1, %v16612_v5  ;;  %v163_v14 = vld [vmem:[%s16730_s18 + $0x38] sm:$0xff]  ;;  %v164_v15 = vld [vmem:[%s16730_s18 + $0x40] sm:$0xff] }
  0x12   :  { %79 = vst.msk [vmem:[#allocation2 + $0x28] sm:$0x3] %vm74_vm1, %v16612_v5  ;;  %81 = vst.msk [vmem:[#allocation2 + $0x38] sm:$0x3] %vm74_vm1, %v16612_v5  ;;  %v165_v16 = vld [vmem:[%s16730_s18 + $0x48] sm:$0xff]  ;;  %v166_v17 = vld [vmem:[%s16730_s18 + $0x50] sm:$0xff] }
  0x13   :  { %83 = vst.msk [vmem:[#allocation2 + $0x48] sm:$0x3] %vm74_vm1, %v16612_v5  ;;  %85 = vst.msk [vmem:[#allocation2 + $0x58] sm:$0x3] %vm74_vm1, %v16612_v5  ;;  %v167_v18 = vld [vmem:[%s16730_s18 + $0x58] sm:$0xff]  ;;  %v168_v19 = vld [vmem:[%s16730_s18 + $0x60] sm:$0xff] }
  0x14   :  { %87 = vst.msk [vmem:[#allocation2 + $0x68] sm:$0x3] %vm74_vm1, %v16612_v5  ;;  %89 = vst.msk [vmem:[#allocation2 + $0x78] sm:$0x3] %vm74_vm1, %v16612_v5  ;;  %v169_v20 = vld [vmem:[%s16730_s18 + $0x68] sm:$0xff]  ;;  %v170_v21 = vld [vmem:[%s16730_s18 + $0x70] sm:$0xff] }
  0x15   :  { %91 = vst.msk [vmem:[#allocation2 + $0x88] sm:$0x3] %vm74_vm1, %v16612_v5  ;;  %93 = vst.msk [vmem:[#allocation2 + $0x98] sm:$0x3] %vm74_vm1, %v16612_v5  ;;  %v171_v22 = vld [vmem:[%s16730_s18 + $0x78] sm:$0xff]  ;;  %v12673_v23 = vld [vmem:[#allocation2] sm:$0xff] }
  0x16   :  { %95 = vst.msk [vmem:[#allocation2 + $0xa8] sm:$0x3] %vm74_vm1, %v16612_v5  ;;  %97 = vst.msk [vmem:[#allocation2 + $0xb8] sm:$0x3] %vm74_vm1, %v16612_v5  ;;  %v12268_v24 = vld [vmem:[%s16729_s27] sm:$0xff]   ;;  %v259_v26 = vrot.slane %v12673_v23, 1 }
  0x17   :  { %99 = vst.msk [vmem:[#allocation2 + $0xc8] sm:$0x3] %vm74_vm1, %v16612_v5  ;;  %101 = vst.msk [vmem:[#allocation2 + $0xd8] sm:$0x3] %vm74_vm1, %v16612_v5  ;;  %10726 = vmatprep.subr.bf16.mxu1 %v12268_v24  ;;  %v12733_v61 = vld [vmem:[#allocation2 + $0xa0] sm:$0xff] }
  0x18   :  { %103 = vst.msk [vmem:[#allocation2 + $0xe8] sm:$0x3] %vm74_vm1, %v16612_v5  ;;  %105 = vst.msk [vmem:[#allocation2 + $0xf8] sm:$0x3] %vm74_vm1, %v16612_v5  ;;  %v12679_v25 = vld [vmem:[#allocation2 + $0x8] sm:$0x3] }
  0x19   :  { %107 = vst.msk [vmem:[#allocation2 + $0x108] sm:$0x3] %vm74_vm1, %v16612_v5  ;;  %109 = vst.msk [vmem:[#allocation2 + $0x118] sm:$0x3] %vm74_vm1, %v16612_v5  ;;  %v260_v29 = vrot.slane %v12679_v25, 1 }
  0x1a   :  { %111 = vst.msk [vmem:[#allocation2 + $0x128] sm:$0x3] %vm74_vm1, %v16612_v5  ;;  %113 = vst.msk [vmem:[#allocation2 + $0x138] sm:$0x3] %vm74_vm1, %v16612_v5 }
  0x1b   :  { %175 = vst.msk [vmem:[#allocation2 + $0x11] sm:$0xff] %vm72_vm0, %v156_v6  ;;  %176 = vst.msk [vmem:[#allocation2 + $0x21] sm:$0xff] %vm72_vm0, %v157_v7  ;;  %v261_v35 = vsel %vm258_vm2, %v259_v26, %v260_v29 }
  0x1c   :  { %177 = vst.msk [vmem:[#allocation2 + $0x31] sm:$0xff] %vm72_vm0, %v158_v8  ;;  %178 = vst.msk [vmem:[#allocation2 + $0x41] sm:$0xff] %vm72_vm0, %v159_v9 }
  0x1d   :  { %179 = vst.msk [vmem:[#allocation2 + $0x51] sm:$0xff] %vm72_vm0, %v160_v11  ;;  %180 = vst.msk [vmem:[#allocation2 + $0x61] sm:$0xff] %vm72_vm0, %v161_v12  ;;  %v12735_v62 = vld [vmem:[#allocation2 + $0xa8] sm:$0x3] }
  0x1e   :  { %181 = vst.msk [vmem:[#allocation2 + $0x71] sm:$0xff] %vm72_vm0, %v162_v13  ;;  %182 = vst.msk [vmem:[#allocation2 + $0x81] sm:$0xff] %vm72_vm0, %v163_v14  ;;  %v307_v14 = vrot.slane %v12733_v61, 1 }
  0x1f   :  { %184 = vst.msk [vmem:[#allocation2 + $0xb1] sm:$0xff] %vm72_vm0, %v164_v15  ;;  %185 = vst.msk [vmem:[#allocation2 + $0xc1] sm:$0xff] %vm72_vm0, %v165_v16  ;;  %v308_v15 = vrot.slane %v12735_v62, 1 }
  0x20   :  { %186 = vst.msk [vmem:[#allocation2 + $0xd1] sm:$0xff] %vm72_vm0, %v166_v17  ;;  %187 = vst.msk [vmem:[#allocation2 + $0xe1] sm:$0xff] %vm72_vm0, %v167_v18 }
  0x21   :  { %188 = vst.msk [vmem:[#allocation2 + $0xf1] sm:$0xff] %vm72_vm0, %v168_v19  ;;  %189 = vst.msk [vmem:[#allocation2 + $0x101] sm:$0xff] %vm72_vm0, %v169_v20 }
  0x22   :  { %190 = vst.msk [vmem:[#allocation2 + $0x111] sm:$0xff] %vm72_vm0, %v170_v21  ;;  %191 = vst.msk [vmem:[#allocation2 + $0x121] sm:$0xff] %vm72_vm0, %v171_v22  ;;  %v12682_v27 = vld [vmem:[#allocation2 + $0x10] sm:$0xff]  ;;  %v12684_v28 = vld [vmem:[#allocation2 + $0x18] sm:$0x3] }
  0x23   :  { %v12687_v30 = vld [vmem:[#allocation2 + $0x20] sm:$0xff]  ;;  %v262_v31 = vrot.slane %v12682_v27, 1  ;;  %v263_v32 = vrot.slane %v12684_v28, 1  ;;  %v12691_v33 = vld [vmem:[#allocation2 + $0x28] sm:$0x3]  ;;  %v12693_v34 = vld [vmem:[#allocation2 + $0x30] sm:$0xff] }
  0x24   :  { %v12696_v36 = vld [vmem:[#allocation2 + $0x38] sm:$0x3]  ;;  %v12698_v37 = vld [vmem:[#allocation2 + $0x40] sm:$0xff]  ;;  %v12700_v38 = vld [vmem:[#allocation2 + $0x48] sm:$0x3]  ;;  %v265_v39 = vrot.slane %v12687_v30, 1 }
  0x25   :  { %v264_v40 = vsel %vm258_vm2, %v262_v31, %v263_v32  ;;  %v266_v41 = vrot.slane %v12691_v33, 1  ;;  %v268_v42 = vrot.slane %v12693_v34, 1  ;;  %v269_v43 = vrot.slane %v12696_v36, 1  ;;  %v12707_v44 = vld [vmem:[#allocation2 + $0x58] sm:$0x3]  ;;  %v12711_v48 = vld [vmem:[#allocation2 + $0x50] sm:$0xff] }
  0x26   :  { %v339_v45 = vpack.c.bf16 %v264_v40, %v261_v35  ;;  %v271_v46 = vrot.slane %v12698_v37, 1  ;;  %v272_v47 = vrot.slane %v12700_v38, 1  ;;  %v12713_v49 = vld [vmem:[#allocation2 + $0x60] sm:$0xff]  ;;  %v12715_v50 = vld [vmem:[#allocation2 + $0x68] sm:$0x3]  ;;  %v12719_v53 = vld [vmem:[#allocation2 + $0x70] sm:$0xff] }
  0x27   :  { %v267_v51 = vsel %vm258_vm2, %v265_v39, %v266_v41  ;;  %v270_v52 = vsel %vm258_vm2, %v268_v42, %v269_v43  ;;  %v12721_v54 = vld [vmem:[#allocation2 + $0x78] sm:$0x3]  ;;  %v12723_v55 = vld [vmem:[#allocation2 + $0x80] sm:$0xff]  ;;  %v12731_v60 = vld [vmem:[#allocation2 + $0x88] sm:$0x3]  ;;  %v274_v0 = vrot.slane %v12711_v48, 1 }
  0x28   :  { %10710 = vmatprep.mubr.msk.bf16.mxu1 %vm72_vm0, %v339_v45  ;;  %v273_v56 = vsel %vm258_vm2, %v271_v46, %v272_v47  ;;  %v12727_v57 = vpack.c.bf16 %v270_v52, %v267_v51  ;;  %v989_v59 = vpack.c.bf16 %v267_v51, %v264_v40  ;;  %v275_v1 = vrot.slane %v12707_v44, 1  ;;  %v12740_v3 = vld [vmem:[#allocation2 + $0xb0] sm:$0xff]  ;;  %v12742_v4 = vld [vmem:[#allocation2 + $0xb8] sm:$0x3]  ;;  %v12751_v11 = vld [vmem:[#allocation2 + $0xc0] sm:$0xff] }
  0x29   :  { %v990_v63 = vpack.c.bf16 %v273_v56, %v270_v52  ;;  %v277_v2 = vrot.slane %v12713_v49, 1  ;;  %v278_v6 = vrot.slane %v12715_v50, 1  ;;  %v280_v7 = vrot.slane %v12719_v53, 1  ;;  %v12758_v16 = vld [vmem:[#allocation2 + $0xc8] sm:$0x3]  ;;  %v12760_v17 = vld [vmem:[#allocation2 + $0xd0] sm:$0xff] }
  0x2a   :  { %10782 = vmatprep.mubr.msk.bf16.mxu0 %vm72_vm0, %v989_v59  ;;  %10711 = vmatmul.mubr.msk.bf16.vlgmr.msra.gmra.mrb[0].mxu1 %vm72_vm0, %v12727_v57  ;;  %v281_v8 = vrot.slane %v12721_v54, 1  ;;  %v979_v9 = vrot.slane %v12723_v55, 1  ;;  %v276_v12 = vsel %vm258_vm2, %v274_v0, %v275_v1  ;;  %v980_v13 = vrot.slane %v12731_v60, 1  ;;  %v12768_v22 = vld [vmem:[#allocation2 + $0xd8] sm:$0x3]  ;;  %v12770_v26 = vld [vmem:[#allocation2 + $0xe0] sm:$0xff] }
  0x2b   :  { %10783 = vmatmul.mubr.msk.bf16.vlgmr.msra.gmra.mrb[0].mxu0 %vm72_vm0, %v990_v63  ;;  %10727 = vmatpush3.bf16.msra.mxu1 %v12268_v24  ;;  %v12763_v18 = vpack.c.bf16 %v276_v12, %v273_v56  ;;  %v279_v19 = vsel %vm258_vm2, %v277_v2, %v278_v6  ;;  %v310_v21 = vrot.slane %v12740_v3, 1  ;;  %v12772_v29 = vld [vmem:[#allocation2 + $0xe8] sm:$0x3]  ;;  %v12780_v35 = vld [vmem:[#allocation2 + $0xf0] sm:$0xff]  ;;  %v12782_v39 = vld [vmem:[#allocation2 + $0xf8] sm:$0x3] }
  0x2c   :  { %10799 = vmatpush3.bf16.msra.mxu0 %v12623_v10  ;;  %v282_v20 = vsel %vm258_vm2, %v280_v7, %v281_v8  ;;  %v991_v31 = vpack.c.bf16 %v279_v19, %v276_v12  ;;  %v12777_v24 = vsel %vm258_vm2, %v979_v9, %v980_v13  ;;  %v309_v10 = vsel %vm258_vm2, %v307_v14, %v308_v15  ;;  %v12790_v45 = vld [vmem:[#allocation2 + $0x100] sm:$0xff]  ;;  %v12792_v46 = vld [vmem:[#allocation2 + $0x108] sm:$0x3]  ;;  %v12806_v2 = vld [vmem:[%s16729_s27 + $0x30] sm:$0xff]  }
  0x2d   :  { %v12774_v32 = vpack.c.bf16 %v282_v20, %v279_v19  ;;  %10714 = vmatprep.mubr.msk.bf16.mxu1 %vm72_vm0, %v12763_v18  ;;  %v992_v40 = vpack.c.bf16 %v12777_v24, %v282_v20  ;;  %v311_v41 = vrot.slane %v12742_v4, 1  ;;  %v313_v42 = vrot.slane %v12751_v11, 1  ;;  %v12811_v6 = vld [vmem:[%s16729_s27 + $0x10] sm:$0xff]   ;;  %v12819_v14 = vld [vmem:[#allocation2 + $0x118] sm:$0x3]  ;;  %10816 = vmatprep.subr.bf16.mxu0 %v12806_v2  ;;  %v12825_v19 = vld [vmem:[#allocation2 + $0x120] sm:$0xff] }
  0x2e   :  { %v314_v43 = vrot.slane %v12758_v16, 1  ;;  %10786 = vmatprep.mubr.msk.bf16.mxu0 %vm72_vm0, %v991_v31  ;;  %v316_v47 = vrot.slane %v12760_v17, 1  ;;  %v317_v51 = vrot.slane %v12768_v22, 1  ;;  %v319_v52 = vrot.slane %v12770_v26, 1  ;;  %v12817_v13 = vld [vmem:[#allocation2 + $0x110] sm:$0xff]  ;;  %10744 = vmatprep.subr.bf16.mxu1 %v12811_v6 }
  0x2f   :  { %v320_v56 = vrot.slane %v12772_v29, 1  ;;  %v312_v59 = vsel %vm258_vm2, %v310_v21, %v311_v41  ;;  %v322_v0 = vrot.slane %v12780_v35, 1  ;;  %v323_v1 = vrot.slane %v12782_v39, 1  ;;  %v12827_v20 = vld [vmem:[#allocation2 + $0x128] sm:$0x3] }
  0x30   :  { %v315_v63 = vsel %vm258_vm2, %v313_v42, %v314_v43  ;;  %v343_v7 = vpack.c.bf16 %v312_v59, %v309_v10  ;;  %v318_v9 = vsel %vm258_vm2, %v316_v47, %v317_v51  ;;  %v325_v12 = vrot.slane %v12790_v45, 1 }
  0x31   :  { %v993_v8 = vpack.c.bf16 %v315_v63, %v312_v59  ;;  %v326_v15 = vrot.slane %v12792_v46, 1  ;;  %v321_v21 = vsel %vm258_vm2, %v319_v52, %v320_v56  ;;  %v324_v31 = vsel %vm258_vm2, %v322_v0, %v323_v1 }
  0x32   :  { %10715 = vmatmul.mubr.msk.bf16.gmra.mrb[4].mxu1 %vm72_vm0, %v12774_v32  ;;  %v12835_v41 = vpack.c.bf16 %v318_v9, %v315_v63  ;;  %v328_v43 = vrot.slane %v12817_v13, 1  ;;  %v329_v47 = vrot.slane %v12819_v14, 1  ;;  %v985_v51 = vrot.slane %v12825_v19, 1 }
  0x33   :  { %10787 = vmatmul.mubr.msk.bf16.gmra.mrb[4].mxu0 %vm72_vm0, %v992_v40  ;;  %10718 = vmatprep.mubr.msk.bf16.mxu1 %vm72_vm0, %v343_v7  ;;  %v327_v42 = vsel %vm258_vm2, %v325_v12, %v326_v15  ;;  %v986_v52 = vrot.slane %v12827_v20, 1  ;;  %v994_v56 = vpack.c.bf16 %v321_v21, %v318_v9  ;;  %v12842_v59 = vpack.c.bf16 %v324_v31, %v321_v21 }
  0x34   :  { %10790 = vmatprep.mubr.msk.bf16.mxu0 %vm72_vm0, %v993_v8  ;;  %v995_v0 = vpack.c.bf16 %v327_v42, %v324_v31  ;;  %v609_v1 = vrot.slane %v12684_v28, 2  ;;  %v612_v7 = vrot.slane %v12691_v33, 2  ;;  %v608_v63 = vrot.slane %v12682_v27, 2 }
  0x35   :  { %16731 = vst [vmem:[#allocation10_spill] sm:$0xff] %v12842_v59  ;;  %v611_v8 = vrot.slane %v12687_v30, 2  ;;  %v615_v12 = vrot.slane %v12696_v36, 2  ;;  %v618_v15 = vrot.slane %v12700_v38, 2  ;;  %v614_v9 = vrot.slane %v12693_v34, 2 }
  0x36   :  { %v330_v28 = vsel %vm258_vm2, %v328_v43, %v329_v47  ;;  %v617_v33 = vrot.slane %v12698_v37, 2  ;;  %v12860_v36 = vsel %vm258_vm2, %v985_v51, %v986_v52  ;;  %v620_v38 = vrot.slane %v12711_v48, 2 }
  0x37   :  { %16732 = vst [vmem:[#allocation11_spill] sm:$0xff] %v12860_v36  ;;  %v621_v21 = vrot.slane %v12707_v44, 2  ;;  %v12865_v31 = vsel %vm604_vm3, %v608_v63, %v609_v1  ;;  %v623_v5 = vrot.slane %v12713_v49, 2  ;;  %v624_v43 = vrot.slane %v12715_v50, 2 }
  0x38   :  { %v12872_v47 = vpack.c.bf16 %v330_v28, %v327_v42  ;;  %v627_v51 = vrot.slane %v12721_v54, 2  ;;  %v996_v52 = vpack.c.bf16 %v12860_v36, %v330_v28  ;;  %v232_v44 = vpack.c.bf16 %v12682_v27, %v12673_v23 }
  0x39   :  { %v1143_v1 = vrot.slane %v12723_v55, 2  ;;  %v640_v50 = vrot.slane %v12740_v3, 2  ;;  %v641_v42 = vrot.slane %v12742_v4, 2  ;;  %v644_v54 = vrot.slane %v12758_v16, 2 }
  0x3a   :  { %10719 = vmatmul.mubr.msk.bf16.gmra.mrb[8].mxu1 %vm72_vm0, %v12835_v41  ;;  %16733 = vst [vmem:[#allocation12_spill] sm:$0xff] %v12872_v47  ;;  %v646_v28 = vrot.slane %v12760_v17, 2  ;;  %v647_v58 = vrot.slane %v12768_v22, 2  ;;  %v650_v10 = vrot.slane %v12772_v29, 2  ;;  %v12896_v4 = vsel %vm604_vm3, %v614_v9, %v615_v12 }
  0x3b   :  { %10791 = vmatmul.mubr.msk.bf16.gmra.mrb[8].mxu0 %vm72_vm0, %v994_v56  ;;  %10722 = vmatprep.mubr.msk.bf16.mxu1 %vm72_vm0, %v12842_v59  ;;  %v12868_v56 = vsel %vm604_vm3, %v611_v8, %v612_v7  ;;  %v1144_v7 = vrot.slane %v12731_v60, 2  ;;  %v643_v8 = vrot.slane %v12751_v11, 2  ;;  %v649_v60 = vrot.slane %v12770_v26, 2 }
  0x3c   :  { %10794 = vmatprep.mubr.msk.bf16.mxu0 %vm72_vm0, %v995_v0  ;;  %v626_v0 = vrot.slane %v12719_v53, 2  ;;  %v1151_v63 = vpack.c.bf16 %v12868_v56, %v12865_v31  ;;  %v12899_v16 = vsel %vm604_vm3, %v617_v33, %v618_v15  ;;  %v12903_v40 = vsel %vm604_vm3, %v620_v38, %v621_v21  ;;  %v12928_v38 = vld [vmem:[%s16729_s27 + $0x38] sm:$0xff]  }
  0x3d   :  { %v12906_v22 = vsel %vm604_vm3, %v623_v5, %v624_v43  ;;  %v12912_v29 = vpack.c.bf16 %v12693_v34, %v12687_v30  ;;  %v637_v12 = vrot.slane %v12733_v61, 2  ;;  %v638_v15 = vrot.slane %v12735_v62, 2  ;;  %v12937_v43 = vld [vmem:[%s16729_s27 + $0x18] sm:$0xff]  }
  0x3e   :  { %v1152_v9 = vpack.c.bf16 %v12899_v16, %v12896_v4  ;;  %v12920_v33 = vpack.c.bf16 %v12711_v48, %v12698_v37  ;;  %v1153_v5 = vpack.c.bf16 %v12906_v22, %v12903_v40  ;;  %v656_v21 = vrot.slane %v12792_v46, 2 }
  0x3f   :  { %v12932_v62 = vsel %vm604_vm3, %v637_v12, %v638_v15  ;;  %v659_v12 = vrot.slane %v12819_v14, 2  ;;  %v828_v15 = vpack.c.bf16 %v12770_v26, %v12760_v17  ;;  %v1147_v46 = vrot.slane %v12825_v19, 2 }
  0x40   :  { %v1148_v59 = vrot.slane %v12827_v20, 2  ;;  %v628_v14 = vsel %vm604_vm3, %v626_v0, %v627_v51  ;;  %v642_v36 = vsel %vm604_vm3, %v640_v50, %v641_v42  ;;  %v235_v20 = vpack.c.bf16 %v12719_v53, %v12713_v49 }
  0x41   :  { %v236_v0 = vpack.c.bf16 %v12740_v3, %v12733_v61  ;;  %v237_v61 = vpack.c.bf16 %v12760_v17, %v12751_v11 }
  0x42   :  { %10723 = vmatmul.mubr.msk.bf16.gmra.mrb[12].mxu1 %vm72_vm0, %v12872_v47  ;;  %v658_v47 = vrot.slane %v12817_v13, 2 }
  0x43   :  { %10795 = vmatmul.mubr.msk.bf16.gmra.mrb[12].mxu0 %vm72_vm0, %v996_v52  ;;  %10728 = vmatprep.mubr.msk.bf16.mxu1 %vm72_vm0, %v232_v44  ;;  %v652_v52 = vrot.slane %v12780_v35, 2  ;;  %v653_v44 = vrot.slane %v12782_v39, 2  ;;  %v655_v39 = vrot.slane %v12790_v45, 2 }
  0x44   :  { %10800 = vmatprep.mubr.msk.bf16.mxu0 %vm72_vm0, %v1151_v63  ;;  %v12966_v63 = vsel %vm604_vm3, %v1143_v1, %v1144_v7  ;;  %v651_v1 = vsel %vm604_vm3, %v649_v60, %v650_v10  ;;  %v12996_v10 = vsel %vm604_vm3, %v1147_v46, %v1148_v59  ;;  %v16735_v60 = vrot.slane %v12673_v23, 2  ;;  %v12273_v59 = vld [vmem:[%s16729_s27 + $0x40] sm:$0xff]  }
  0x45   :  { %v654_v7 = vsel %vm604_vm3, %v652_v52, %v653_v44  ;;  %v657_v50 = vsel %vm604_vm3, %v655_v39, %v656_v21  ;;  %v239_v44 = vpack.c.bf16 %v12817_v13, %v12790_v45  ;;  %v670_v23 = vpack.c.bf16 %v12896_v4, %v12868_v56 }
  0x4a   :  { %10729 = vmatmul.mubr.msk.bf16.vlgmr.msra.gmra.mrb[0].mxu1 %vm72_vm0, %v12912_v29 }
  0x4b   :  { %10801 = vmatmul.mubr.msk.bf16.vlgmr.msra.gmra.mrb[0].mxu0 %vm72_vm0, %v1152_v9  ;;  %10732 = vmatprep.mubr.msk.bf16.mxu1 %vm72_vm0, %v12920_v33  ;;  %v645_v9 = vsel %vm604_vm3, %v643_v8, %v644_v54  ;;  %v238_v8 = vpack.c.bf16 %v12780_v35, %v12770_v26  ;;  %v1157_v54 = vpack.c.bf16 %v657_v50, %v654_v7 }
  0x4c   :  { %10817 = vmatpush3.bf16.msra.mxu0 %v12806_v2  ;;  %10804 = vmatprep.mubr.msk.bf16.mxu0 %vm72_vm0, %v1153_v5  ;;  %v1154_v2 = vpack.c.bf16 %v12966_v63, %v628_v14  ;;  %v1155_v51 = vpack.c.bf16 %v645_v9, %v642_v36 }
  0x4d   :  { %10745 = vmatpush3.bf16.msra.mxu1 %v12811_v6  ;;  %10834 = vmatprep.subr.bf16.mxu0 %v12928_v38  ;;  %v648_v6 = vsel %vm604_vm3, %v646_v28, %v647_v58  ;;  %v660_v58 = vsel %vm604_vm3, %v658_v47, %v659_v12  ;;  %v16734_v28 = vrot.slane %v12679_v25, 2  ;;  %v671_v25 = vpack.c.bf16 %v12903_v40, %v12899_v16 }
  0x4e   :  { %10762 = vmatprep.subr.bf16.mxu1 %v12937_v43  ;;  %v1156_v42 = vpack.c.bf16 %v651_v1, %v648_v6  ;;  %v1158_v5 = vpack.c.bf16 %v12996_v10, %v660_v58  ;;  %v672_v40 = vpack.c.bf16 %v628_v14, %v12906_v22  ;;  %v673_v47 = vpack.c.bf16 %v642_v36, %v12932_v62 }
  0x4f   :  { %v607_v52 = vsel %vm604_vm3, %v16735_v60, %v16734_v28 }
  0x50   :  { %v669_v39 = vpack.c.bf16 %v12865_v31, %v607_v52  ;;  %v210_v31 = vld [vmem:[#allocation2 + $0x90] sm:$0xff] }
  0x51   :  { %v1305_v56 = vpack.c.bf16 %v210_v31, %v12723_v55 }
  0x52   :  { %10733 = vmatmul.mubr.msk.bf16.gmra.mrb[4].mxu1 %vm72_vm0, %v235_v20 }
  0x53   :  { %10805 = vmatmul.mubr.msk.bf16.gmra.mrb[4].mxu0 %vm72_vm0, %v1154_v2  ;;  %10736 = vmatprep.mubr.msk.bf16.mxu1 %vm72_vm0, %v236_v0 }
  0x54   :  { %10808 = vmatprep.mubr.msk.bf16.mxu0 %vm72_vm0, %v1155_v51 }
  0x5a   :  { %10737 = vmatmul.mubr.msk.bf16.gmra.mrb[8].mxu1 %vm72_vm0, %v237_v61 }
  0x5b   :  { %10809 = vmatmul.mubr.msk.bf16.gmra.mrb[8].mxu0 %vm72_vm0, %v1156_v42  ;;  %10740 = vmatprep.mubr.msk.bf16.mxu1 %vm72_vm0, %v238_v8 }
  0x5c   :  { %10812 = vmatprep.mubr.msk.bf16.mxu0 %vm72_vm0, %v1157_v54 }
  0x62   :  { %10741 = vmatmul.mubr.msk.bf16.gmra.mrb[12].mxu1 %vm72_vm0, %v239_v44 }
  0x63   :  { %10813 = vmatmul.mubr.msk.bf16.gmra.mrb[12].mxu0 %vm72_vm0, %v1158_v5  ;;  %10746 = vmatprep.mubr.msk.bf16.mxu1 %vm72_vm0, %v669_v39 }
  0x64   :  { %10818 = vmatprep.mubr.msk.bf16.mxu0 %vm72_vm0, %v12912_v29 }
  0x6a   :  { %10747 = vmatmul.mubr.msk.bf16.vlgmr.msra.gmra.mrb[0].mxu1 %vm72_vm0, %v670_v23 }
  0x6b   :  { %10819 = vmatmul.mubr.msk.bf16.vlgmr.msra.gmra.mrb[0].mxu0 %vm72_vm0, %v12920_v33  ;;  %10750 = vmatprep.mubr.msk.bf16.mxu1 %vm72_vm0, %v671_v25 }
  0x6c   :  { %10835 = vmatpush3.bf16.msra.mxu0 %v12928_v38  ;;  %10822 = vmatprep.mubr.msk.bf16.mxu0 %vm72_vm0, %v235_v20 }
  0x6d   :  { %10763 = vmatpush3.bf16.msra.mxu1 %v12937_v43  ;;  %10852 = vmatprep.subr.bf16.mxu0 %v12273_v59 }
  0x72   :  { %10751 = vmatmul.mubr.msk.bf16.gmra.mrb[4].mxu1 %vm72_vm0, %v672_v40 }
  0x73   :  { %10823 = vmatmul.mubr.msk.bf16.gmra.mrb[4].mxu0 %vm72_vm0, %v1305_v56  ;;  %10754 = vmatprep.mubr.msk.bf16.mxu1 %vm72_vm0, %v673_v47 }
  0x74   :  { %32 = vsyncpa [#allocation8], 0  ;;  %10826 = vmatprep.mubr.msk.bf16.mxu0 %vm72_vm0, %v237_v61  ;;  %v674_v4 = vpack.c.bf16 %v648_v6, %v645_v9  ;;  %v675_v16 = vpack.c.bf16 %v654_v7, %v651_v1  ;;  %v230_v36 = vld [vmem:[#allocation2 + $0x130] sm:$0xff]  ;;  %v676_v22 = vpack.c.bf16 %v660_v58, %v657_v50  ;;  %v16736_v33 = vpack.c.bf16 %v12687_v30, %v12682_v27  ;;  %v211_v38 = vld [vmem:[#allocation2 + $0x98] sm:$0x3]  ;;  %s16746_s28 = sld [smem:[#allocation38_spill]] }
  0x75   :  { %v1306_v29 = vpack.c.bf16 %v230_v36, %v12825_v19  ;;  %v1437_v21 = vrot.slane %v210_v31, 1  ;;  %v1438_v62 = vrot.slane %v211_v38, 1  ;;  %v16737_v43 = vpack.c.bf16 %v12698_v37, %v12693_v34  ;;  %s16748_s0 = sld [smem:[#allocation36_spill]]  ;;  %s16749_s22 = sld [smem:[#allocation37_spill]] }
  0x76   :  { %v16738_v46 = vpack.c.bf16 %v12713_v49, %v12711_v48  ;;  %v16739_v34 = vpack.c.bf16 %v12723_v55, %v12719_v53  ;;  %v16740_v37 = vpack.c.bf16 %v12751_v11, %v12740_v3  ;;  %v231_v48 = vld [vmem:[#allocation2 + $0x138] sm:$0x3]  ;;  %v1443_v49 = vrot.slane %v230_v36, 1  ;;  %v16741_v53 = vld [vmem:[#allocation10_spill] sm:$0xff] }
  0x77   :  { %v1439_v27 = vsel %vm258_vm2, %v1437_v21, %v1438_v62  ;;  %v16742_v55 = vpack.c.bf16 %v12790_v45, %v12780_v35  ;;  %v16743_v3 = vld [vmem:[#allocation12_spill] sm:$0xff]  ;;  %v16745_v17 = vpack.c.bf16 %v12825_v19, %v12817_v13  ;;  %v1577_v26 = vrot.slane %v210_v31, 2 }
  0x78   :  { %v1447_v30 = vpack.c.bf16 %v1439_v27, %v12777_v24  ;;  %v1578_v24 = vrot.slane %v211_v38, 2  ;;  %v1581_v13 = vrot.slane %v230_v36, 2  ;;  %v1582_v19 = vrot.slane %v231_v48, 2 }
  0x79   :  { %vm114_vm4 = vcmask 261120   ;;  %vm116_vm5 = vcmask 254976   ;;  %vm8704_vm6 = vcmask 130112   ;;  %vm8711_vm7 = vcmask 195712  }
  0x7a   :  { %10755 = vmatmul.mubr.msk.bf16.gmra.mrb[8].mxu1 %vm72_vm0, %v674_v4  ;;  %v1579_v35 = vsel %vm604_vm3, %v1577_v26, %v1578_v24  ;;  %v12275_v14 = vld [vmem:[%s16746_s28 + $0x18] sm:$0xff]   ;;  %v13191_v9 = vld [vmem:[%s16746_s28] sm:$0xff]   ;;  %vm8718_vm8 = vcmask 261312   ;;  %vm8725_vm9 = vcmask 326912   ;;  %vm8732_vm10 = vcmask 392512  }
  0x7b   :  { %10827 = vmatmul.mubr.msk.bf16.gmra.mrb[8].mxu0 %vm72_vm0, %v238_v8  ;;  %10758 = vmatprep.mubr.msk.bf16.mxu1 %vm72_vm0, %v675_v16  ;;  %v1585_v45 = vpack.c.bf16 %v1579_v35, %v12966_v63  ;;  %v12274_v63 = vld [vmem:[%s16746_s28 + $0x10] sm:$0xff]   ;;  %v13211_v52 = vld [vmem:[%s16748_s0] ss:$0 sm:$0xff]  ;;  %vm8739_vm11 = vcmask 458112   ;;  %vm8746_vm12 = vcmask 523712   ;;  %vm8787_vm13 = vcmask 1041409  }
  0x7c   :  { %10830 = vmatprep.mubr.msk.bf16.mxu0 %vm72_vm0, %v239_v44  ;;  %10870 = vmatprep.subr.bf16.mxu1 %v12274_v63  ;;  %vm8830_vm14 = vcmask 523264   ;;  %vm12402_vm15 = vmmov 0   ;;  %vm8906_vm1 = vcmask 1024  }
  0x82   :  { %10759 = vmatmul.mubr.msk.bf16.gmra.mrb[12].mxu1 %vm72_vm0, %v676_v22 }
  0x83   :  { %10831 = vmatmul.mubr.msk.bf16.gmra.mrb[12].mxu0 %vm72_vm0, %v1306_v29  ;;  %10764 = vmatprep.mubr.msk.bf16.mxu1 %vm72_vm0, %v16736_v33 }
  0x84   :  { %10836 = vmatprep.mubr.msk.bf16.mxu0 %vm72_vm0, %v12727_v57  ;;  %v1444_v57 = vrot.slane %v231_v48, 1 }
  0x86   :  { %v1445_v11 = vsel %vm258_vm2, %v1443_v49, %v1444_v57 }
  0x8a   :  { %10765 = vmatmul.mubr.msk.bf16.vlgmr.msra.gmra.mrb[0].mxu1 %vm72_vm0, %v16737_v43 }
  0x8b   :  { %10837 = vmatmul.mubr.msk.bf16.vlgmr.msra.gmra.mrb[0].mxu0 %vm72_vm0, %v12763_v18  ;;  %10768 = vmatprep.mubr.msk.bf16.mxu1 %vm72_vm0, %v16738_v46  ;;  %v16744_v18 = vld [vmem:[#allocation11_spill] sm:$0xff] }
  0x8c   :  { %10853 = vmatpush3.bf16.msra.mxu0 %v12273_v59  ;;  %10840 = vmatprep.mubr.msk.bf16.mxu0 %vm72_vm0, %v12774_v32  ;;  %v1448_v32 = vpack.c.bf16 %v1445_v11, %v16744_v18 }
  0x8d   :  { %10871 = vmatpush3.bf16.msra.mxu1 %v12274_v63 }
  0x8e   :  { %10872 = vmatprep.subr.bf16.mxu1 %v12275_v14 }
  0x91   :  { %10873 = vmatpush3.bf16.msra.mxu1 %v12275_v14 }
  0x92   :  { %10769 = vmatmul.mubr.msk.bf16.gmra.mrb[4].mxu1 %vm72_vm0, %v16739_v34  ;;  %10890 = vmatprep.subr.bf16.mxu1 %v13191_v9 }
  0x93   :  { %10841 = vmatmul.mubr.msk.bf16.gmra.mrb[4].mxu0 %vm72_vm0, %v1447_v30  ;;  %10772 = vmatprep.mubr.msk.bf16.mxu1 %vm72_vm0, %v16740_v37 }
  0x94   :  { %10844 = vmatprep.mubr.msk.bf16.mxu0 %vm72_vm0, %v12835_v41  ;;  %v1583_v41 = vsel %vm604_vm3, %v1581_v13, %v1582_v19 }
  0x95   :  { %v1586_v12 = vpack.c.bf16 %v1583_v41, %v12996_v10 }
  0x9a   :  { %10773 = vmatmul.mubr.msk.bf16.gmra.mrb[8].mxu1 %vm72_vm0, %v828_v15  ;;  %v16747_v15 = vmov 0.0  }
  0x9b   :  { %10845 = vmatmul.mubr.msk.bf16.gmra.mrb[8].mxu0 %vm72_vm0, %v16741_v53  ;;  %10776 = vmatprep.mubr.msk.bf16.mxu1 %vm72_vm0, %v16742_v55  ;;  %122 = vst.msk [vmem:[#allocation3 + $0x30] sm:$0xff] %vm114_vm4, %v16747_v15  ;;  %115 = vst.msk [vmem:[#allocation3] sm:$0xff] %vm114_vm4, %v16747_v15 }
  0x9c   :  { %10848 = vmatprep.mubr.msk.bf16.mxu0 %vm72_vm0, %v16743_v3  ;;  %123 = vst.msk [vmem:[#allocation3 + $0x38] sm:$0x3] %vm116_vm5, %v16747_v15  ;;  %117 = vst.msk [vmem:[#allocation3 + $0x8] sm:$0x3] %vm116_vm5, %v16747_v15 }
  0x9d   :  { %118 = vst.msk [vmem:[#allocation3 + $0x10] sm:$0xff] %vm114_vm4, %v16747_v15  ;;  %120 = vst.msk [vmem:[#allocation3 + $0x20] sm:$0xff] %vm114_vm4, %v16747_v15 }
  0x9e   :  { %119 = vst.msk [vmem:[#allocation3 + $0x18] sm:$0x3] %vm116_vm5, %v16747_v15  ;;  %121 = vst.msk [vmem:[#allocation3 + $0x28] sm:$0x3] %vm116_vm5, %v16747_v15 }
  0x9f   :  { %124 = vst.msk [vmem:[#allocation3 + $0x40] sm:$0xff] %vm114_vm4, %v16747_v15  ;;  %126 = vst.msk [vmem:[#allocation3 + $0x50] sm:$0xff] %vm114_vm4, %v16747_v15 }
  0xa0   :  { %125 = vst.msk [vmem:[#allocation3 + $0x48] sm:$0x3] %vm116_vm5, %v16747_v15  ;;  %127 = vst.msk [vmem:[#allocation3 + $0x58] sm:$0x3] %vm116_vm5, %v16747_v15 }
  0xa1   :  { %128 = vst.msk [vmem:[#allocation3 + $0x60] sm:$0xff] %vm114_vm4, %v16747_v15  ;;  %130 = vst.msk [vmem:[#allocation3 + $0x70] sm:$0xff] %vm114_vm4, %v16747_v15 }
  0xa2   :  { %10777 = vmatmul.mubr.msk.bf16.gmra.mrb[12].mxu1 %vm72_vm0, %v16745_v17  ;;  %129 = vst.msk [vmem:[#allocation3 + $0x68] sm:$0x3] %vm116_vm5, %v16747_v15  ;;  %131 = vst.msk [vmem:[#allocation3 + $0x78] sm:$0x3] %vm116_vm5, %v16747_v15  ;;  %v13244_v49 = vld [vmem:[#allocation3] sm:$0xff] }
  0xa3   :  { %10849 = vmatmul.mubr.msk.bf16.gmra.mrb[12].mxu0 %vm72_vm0, %v1448_v32  ;;  %132 = vst.msk [vmem:[#allocation3 + $0x80] sm:$0xff] %vm114_vm4, %v16747_v15  ;;  %134 = vst.msk [vmem:[#allocation3 + $0x90] sm:$0xff] %vm114_vm4, %v16747_v15  ;;  %v13246_v57 = vld [vmem:[#allocation3 + $0x8] sm:$0x3]  ;;  %v16632_v26 = vrot.slane %v13244_v49, 1 }
  0xa4   :  { %10854 = vmatprep.mubr.msk.bf16.mxu0 %vm72_vm0, %v670_v23  ;;  %133 = vst.msk [vmem:[#allocation3 + $0x88] sm:$0x3] %vm116_vm5, %v16747_v15  ;;  %135 = vst.msk [vmem:[#allocation3 + $0x98] sm:$0x3] %vm116_vm5, %v16747_v15  ;;  %v13216_v23 = vld [vmem:[%s16749_s22] ss:$0 sm:$0xff] }
  0xa5   :  { %136 = vst.msk [vmem:[#allocation3 + $0xa0] sm:$0xff] %vm114_vm4, %v16747_v15  ;;  %138 = vst.msk [vmem:[#allocation3 + $0xb0] sm:$0xff] %vm114_vm4, %v16747_v15  ;;  %v1864_v24 = vrot.slane %v13246_v57, 1 }
  0xa6   :  { %137 = vst.msk [vmem:[#allocation3 + $0xa8] sm:$0x3] %vm116_vm5, %v16747_v15  ;;  %139 = vst.msk [vmem:[#allocation3 + $0xb8] sm:$0x3] %vm116_vm5, %v16747_v15 }
  0xa7   :  { %140 = vst.msk [vmem:[#allocation3 + $0xc0] sm:$0xff] %vm114_vm4, %v16747_v15  ;;  %142 = vst.msk [vmem:[#allocation3 + $0xd0] sm:$0xff] %vm114_vm4, %v16747_v15 }
  0xa8   :  { %141 = vst.msk [vmem:[#allocation3 + $0xc8] sm:$0x3] %vm116_vm5, %v16747_v15  ;;  %143 = vst.msk [vmem:[#allocation3 + $0xd8] sm:$0x3] %vm116_vm5, %v16747_v15 }
  0xa9   :  { %144 = vst.msk [vmem:[#allocation3 + $0xe0] sm:$0xff] %vm114_vm4, %v16747_v15  ;;  %146 = vst.msk [vmem:[#allocation3 + $0xf0] sm:$0xff] %vm114_vm4, %v16747_v15 }
  0xaa   :  { %145 = vst.msk [vmem:[#allocation3 + $0xe8] sm:$0x3] %vm116_vm5, %v16747_v15  ;;  %147 = vst.msk [vmem:[#allocation3 + $0xf8] sm:$0x3] %vm116_vm5, %v16747_v15 }
  0xab   :  { %10855 = vmatmul.mubr.msk.bf16.vlgmr.msra.gmra.mrb[0].mxu0 %vm72_vm0, %v671_v25  ;;  %148 = vst.msk [vmem:[#allocation3 + $0x100] sm:$0xff] %vm114_vm4, %v16747_v15  ;;  %150 = vst.msk [vmem:[#allocation3 + $0x110] sm:$0xff] %vm114_vm4, %v16747_v15 }
  0xac   :  { %10858 = vmatprep.mubr.msk.bf16.mxu0 %vm72_vm0, %v672_v40  ;;  %149 = vst.msk [vmem:[#allocation3 + $0x108] sm:$0x3] %vm116_vm5, %v16747_v15  ;;  %151 = vst.msk [vmem:[#allocation3 + $0x118] sm:$0x3] %vm116_vm5, %v16747_v15 }
  0xad   :  { %152 = vst.msk [vmem:[#allocation3 + $0x120] sm:$0xff] %vm114_vm4, %v16747_v15  ;;  %154 = vst.msk [vmem:[#allocation3 + $0x130] sm:$0xff] %vm114_vm4, %v16747_v15 }
  0xae   :  { %153 = vst.msk [vmem:[#allocation3 + $0x128] sm:$0x3] %vm116_vm5, %v16747_v15  ;;  %155 = vst.msk [vmem:[#allocation3 + $0x138] sm:$0x3] %vm116_vm5, %v16747_v15 }
  0xb3   :  { %10859 = vmatmul.mubr.msk.bf16.gmra.mrb[4].mxu0 %vm72_vm0, %v1585_v45 }
  0xb4   :  { %10862 = vmatprep.mubr.msk.bf16.mxu0 %vm72_vm0, %v674_v4 }
  0xbb   :  { %10863 = vmatmul.mubr.msk.bf16.gmra.mrb[8].mxu0 %vm72_vm0, %v675_v16 }
  0xbc   :  { %10866 = vmatprep.mubr.msk.bf16.mxu0 %vm72_vm0, %v676_v22 }
  0xc3   :  { %10867 = vmatmul.mubr.msk.bf16.gmra.mrb[12].mxu0 %vm72_vm0, %v1586_v12  ;;  %vm8891_vm0 = vcmask 1041408  }
 0x15d   :  { %v10766_v20 = vpop.f32.mrb[0].mxu1 }
 0x15e   :  { %v898_v2 = vpop.f32.mrb[1].mxu1 }
 0x15f   :  { %v10767_v0 = vpop.f32.mrb[2].mxu1 }
 0x160   :  { %v901_v51 = vpop.f32.mrb[3].mxu1 }
 0x165   :  { %v10770_v6 = vpop.f32.mrb[4].mxu1 }
 0x166   :  { %v914_v1 = vpop.f32.mrb[5].mxu1 }
 0x167   :  { %v10771_v7 = vpop.f32.mrb[6].mxu1 }
 0x168   :  { %v917_v50 = vpop.f32.mrb[7].mxu1 }
 0x16d   :  { %v10774_v61 = vpop.f32.mrb[8].mxu1 }
 0x16e   :  { %v13194_v42 = vpop.f32.mrb[9].mxu1 }
 0x16f   :  { %v13196_v8 = vpop.f32.mrb[10].mxu1 }
 0x170   :  { %v13198_v54 = vpop.f32.mrb[11].mxu1 }
 0x175   :  { %v13200_v58 = vpop.f32.mrb[12].mxu1 }
 0x176   :  { %v13202_v10 = vpop.f32.mrb[13].mxu1 }
 0x177   :  { %v13204_v28 = vpop.f32.mrb[14].mxu1 }
 0x178   :  { %v13206_v60 = vpop.f32.mrb[15].mxu1 }
 0x17e   :  { %v10856_v44 = vpop.f32.mrb[0].mxu0 }
 0x17f   :  { %v11614_v5 = vadd.f32 %v10856_v44, %v10766_v20  ;;  %v1636_v39 = vpop.f32.mrb[1].mxu0 }
 0x180   :  { %v11615_v25 = vadd.f32 %v1636_v39, %v898_v2  ;;  %v10857_v59 = vpop.f32.mrb[2].mxu0 }
 0x181   :  { %v1723_v31 = vmul.f32 %v11614_v5, %v13211_v52  ;;  %v11616_v40 = vadd.f32 %v10857_v59, %v10767_v0  ;;  %v1639_v56 = vpop.f32.mrb[3].mxu0 }
 0x182   :  { %v1721_v47 = vmul.f32 %v11615_v25, %v13211_v52  ;;  %v11617_v4 = vadd.f32 %v1639_v56, %v901_v51 }
 0x183   :  { %v13221_v16 = vadd.f32 %v13216_v23, %v1723_v31  ;;  %v1724_v36 = vmul.f32 %v11616_v40, %v13211_v52  ;;  %v13299_v31 = vld [vmem:[#allocation3 + $0xa0] sm:$0xff] }
 0x184   :  { %v13225_v22 = vadd.f32 %v13216_v23, %v1721_v47  ;;  %v1722_v29 = vmul.f32 %v11617_v4, %v13211_v52 }
 0x185   :  { %16750 = vst [vmem:[#allocation10_spill] sm:$0xff] %v13221_v16  ;;  %v16630_v33 = vmax.f32 %v13221_v16, 0.0  ;;  %v13230_v38 = vadd.f32 %v13216_v23, %v1724_v36 }
 0x186   :  { %16751 = vst [vmem:[#allocation12_spill] sm:$0xff] %v13225_v22  ;;  %v16628_v21 = vmax.f32 %v13225_v22, 0.0  ;;  %v13234_v62 = vadd.f32 %v13216_v23, %v1722_v29  ;;  %v10860_v43 = vpop.f32.mrb[4].mxu0 }
 0x187   :  { %16752 = vst [vmem:[#allocation11_spill] sm:$0xff] %v13230_v38  ;;  %1780 = vst.msk [vmem:[#allocation3 + $0x31] sm:$0xff] %vm114_vm4, %v16630_v33  ;;  %v16627_v46 = vmax.f32 %v13230_v38, 0.0  ;;  %v11618_v27 = vadd.f32 %v10860_v43, %v10770_v6  ;;  %v1652_v30 = vpop.f32.mrb[5].mxu0 }
 0x188   :  { %16753 = vst [vmem:[#allocation13_spill] sm:$0xff] %v13234_v62  ;;  %1778 = vst.msk [vmem:[#allocation3 + $0x11] sm:$0xff] %vm114_vm4, %v16628_v21  ;;  %v16625_v34 = vmax.f32 %v13234_v62, 0.0  ;;  %v11619_v37 = vadd.f32 %v1652_v30, %v914_v1  ;;  %v10861_v48 = vpop.f32.mrb[6].mxu0 }
 0x189   :  { %1781 = vst.msk [vmem:[#allocation3 + $0x41] sm:$0xff] %vm114_vm4, %v16627_v46  ;;  %v1727_v53 = vmul.f32 %v11618_v27, %v13211_v52  ;;  %v11620_v55 = vadd.f32 %v10861_v48, %v10771_v7  ;;  %v1655_v3 = vpop.f32.mrb[7].mxu0  ;;  %v1865_v7 = vsel %vm258_vm2, %v16632_v26, %v1864_v24  ;;  %v16631_v24 = vrot.slane %v13299_v31, 1 }
 0x18a   :  { %1779 = vst.msk [vmem:[#allocation3 + $0x21] sm:$0xff] %vm114_vm4, %v16625_v34  ;;  %v1725_v11 = vmul.f32 %v11619_v37, %v13211_v52  ;;  %v11621_v18 = vadd.f32 %v1655_v3, %v917_v50 }
 0x18b   :  { %v13257_v32 = vadd.f32 %v13216_v23, %v1727_v53  ;;  %v1728_v17 = vmul.f32 %v11620_v55, %v13211_v52 }
 0x18c   :  { %v13263_v35 = vadd.f32 %v13216_v23, %v1725_v11  ;;  %v1726_v45 = vmul.f32 %v11621_v18, %v13211_v52 }
 0x18d   :  { %16754 = vst [vmem:[#allocation14_spill] sm:$0xff] %v13257_v32  ;;  %v16624_v13 = vmax.f32 %v13257_v32, 0.0  ;;  %v13268_v19 = vadd.f32 %v13216_v23, %v1728_v17  ;;  %v13334_v17 = vld [vmem:[#allocation3 + $0xa8] sm:$0x3] }
 0x18e   :  { %16755 = vst [vmem:[#allocation15_spill] sm:$0xff] %v13263_v35  ;;  %v16622_v41 = vmax.f32 %v13263_v35, 0.0  ;;  %v13272_v12 = vadd.f32 %v13216_v23, %v1726_v45  ;;  %v10864_v63 = vpop.f32.mrb[8].mxu0  ;;  %v13274_v14 = vld [vmem:[#allocation3 + $0x30] sm:$0xff]  ;;  %v13276_v20 = vld [vmem:[#allocation3 + $0x38] sm:$0x3] }
 0x18f   :  { %16756 = vst [vmem:[#allocation16_spill] sm:$0xff] %v13268_v19  ;;  %1784 = vst.msk [vmem:[#allocation3 + $0x71] sm:$0xff] %vm114_vm4, %v16624_v13  ;;  %v16620_v2 = vmax.f32 %v13268_v19, 0.0  ;;  %v11622_v0 = vadd.f32 %v10864_v63, %v10774_v61  ;;  %v1668_v51 = vpop.f32.mrb[9].mxu0  ;;  %v13282_v6 = vld [vmem:[#allocation3 + $0x10] sm:$0xff]  ;;  %v1872_v50 = vrot.slane %v13274_v14, 1 }
 0x190   :  { %16757 = vst [vmem:[#allocation17_spill] sm:$0xff] %v13272_v12  ;;  %v13284_v1 = vld [vmem:[#allocation3 + $0x18] sm:$0x3]  ;;  %1782 = vst.msk [vmem:[#allocation3 + $0x51] sm:$0xff] %vm114_vm4, %v16622_v41  ;;  %v16619_v44 = vmax.f32 %v13272_v12, 0.0  ;;  %v11623_v5 = vadd.f32 %v1668_v51, %v13194_v42  ;;  %v10865_v61 = vpop.f32.mrb[10].mxu0 }
 0x191   :  { %v1866_v39 = vrot.slane %v13282_v6, 1  ;;  %v1867_v25 = vrot.slane %v13284_v1, 1  ;;  %v13297_v59 = vld [vmem:[#allocation3 + $0x40] sm:$0xff]  ;;  %1785 = vst.msk [vmem:[#allocation3 + $0x81] sm:$0xff] %vm114_vm4, %v16620_v2  ;;  %v1731_v40 = vmul.f32 %v11622_v0, %v13211_v52  ;;  %v11624_v56 = vadd.f32 %v10865_v61, %v13196_v8  ;;  %v1671_v47 = vpop.f32.mrb[11].mxu0 }
 0x192   :  { %v13306_v4 = vld [vmem:[#allocation3 + $0x20] sm:$0xff]  ;;  %v13308_v42 = vld [vmem:[#allocation3 + $0x28] sm:$0x3]  ;;  %v1873_v36 = vrot.slane %v13276_v20, 1  ;;  %v1875_v29 = vrot.slane %v13297_v59, 1  ;;  %1783 = vst.msk [vmem:[#allocation3 + $0x61] sm:$0xff] %vm114_vm4, %v16619_v44  ;;  %v1729_v43 = vmul.f32 %v11623_v5, %v13211_v52  ;;  %v11625_v27 = vadd.f32 %v1671_v47, %v13198_v54 }
 0x193   :  { %v13318_v30 = vsel %vm258_vm2, %v1866_v39, %v1867_v25  ;;  %v1869_v8 = vrot.slane %v13306_v4, 1  ;;  %v13321_v37 = vld [vmem:[#allocation3 + $0x48] sm:$0x3]  ;;  %v13324_v48 = vadd.f32 %v13216_v23, %v1731_v40  ;;  %v1732_v53 = vmul.f32 %v11624_v56, %v13211_v52 }
 0x194   :  { %v1943_v55 = vpack.c.bf16 %v13318_v30, %v1865_v7  ;;  %v1870_v3 = vrot.slane %v13308_v42, 1  ;;  %v13330_v11 = vadd.f32 %v13216_v23, %v1729_v43  ;;  %v1730_v54 = vmul.f32 %v11625_v27, %v13211_v52 }
 0x195   :  { %16758 = vst [vmem:[#allocation18_spill] sm:$0xff] %v13324_v48  ;;  %v1876_v18 = vrot.slane %v13321_v37, 1  ;;  %v16618_v45 = vmax.f32 %v13324_v48, 0.0  ;;  %v13339_v63 = vadd.f32 %v13216_v23, %v1732_v53  ;;  %v13346_v51 = vsel %vm258_vm2, %v1872_v50, %v1873_v36  ;;  %v12277_v50 = vld [vmem:[%s16746_s28 + $0x8] sm:$0xff]  }
 0x196   :  { %16759 = vst [vmem:[#allocation19_spill] sm:$0xff] %v13330_v11  ;;  %10874 = vmatprep.mubr.msk.bf16.mxu1 %vm114_vm4, %v1943_v55  ;;  %v13343_v0 = vsel %vm258_vm2, %v1869_v8, %v1870_v3  ;;  %v16617_v7 = vmax.f32 %v13330_v11, 0.0  ;;  %v13350_v5 = vadd.f32 %v13216_v23, %v1730_v54  ;;  %v10868_v61 = vpop.f32.mrb[12].mxu0  ;;  %v13359_v40 = vld [vmem:[#allocation3 + $0x70] sm:$0xff]  ;;  %v13361_v56 = vld [vmem:[#allocation3 + $0x78] sm:$0x3] }
 0x197   :  { %16760 = vst [vmem:[#allocation20_spill] sm:$0xff] %v13339_v63  ;;  %v13354_v39 = vpack.c.bf16 %v13346_v51, %v13343_v0  ;;  %v13357_v25 = vsel %vm258_vm2, %v1875_v29, %v1876_v18  ;;  %1789 = vst.msk [vmem:[#allocation3 + $0xd1] sm:$0xff] %vm114_vm4, %v16618_v45  ;;  %v16621_v47 = vmax.f32 %v13339_v63, 0.0  ;;  %v11626_v36 = vadd.f32 %v10868_v61, %v13200_v58  ;;  %v1684_v43 = vpop.f32.mrb[13].mxu0  ;;  %v13371_v27 = vld [vmem:[#allocation3 + $0x50] sm:$0xff] }
 0x198   :  { %16761 = vst [vmem:[#allocation21_spill] sm:$0xff] %v13350_v5  ;;  %v13373_v29 = vld [vmem:[#allocation3 + $0x58] sm:$0x3]  ;;  %v1912_v53 = vrot.slane %v13334_v17, 1  ;;  %1787 = vst.msk [vmem:[#allocation3 + $0xb1] sm:$0xff] %vm114_vm4, %v16617_v7  ;;  %v16623_v55 = vmax.f32 %v13350_v5, 0.0  ;;  %v11627_v3 = vadd.f32 %v1684_v43, %v13202_v10 }
 0x199   :  { %10875 = vmatmul.mubr.msk.bf16.vlgmr.msra.gmra.mrb[16].mxu1 %vm114_vm4, %v13354_v39  ;;  %v10869_v58 = vpop.f32.mrb[14].mxu0  ;;  %v1878_v54 = vrot.slane %v13371_v27, 1  ;;  %v1879_v18 = vrot.slane %v13373_v29, 1  ;;  %1790 = vst.msk [vmem:[#allocation3 + $0xe1] sm:$0xff] %vm114_vm4, %v16621_v47  ;;  %v1735_v61 = vmul.f32 %v11626_v36, %v13211_v52  ;;  %v13393_v10 = vld [vmem:[#allocation3 + $0x60] sm:$0xff]  ;;  %v1884_v44 = vrot.slane %v13359_v40, 1 }
 0x19a   :  { %10891 = vmatpush3.bf16.msra.mxu1 %v13191_v9  ;;  %v11628_v7 = vadd.f32 %v10869_v58, %v13204_v28  ;;  %v1687_v45 = vpop.f32.mrb[15].mxu0  ;;  %v13395_v43 = vld [vmem:[#allocation3 + $0x68] sm:$0x3]  ;;  %v1885_v2 = vrot.slane %v13361_v56, 1  ;;  %1788 = vst.msk [vmem:[#allocation3 + $0xc1] sm:$0xff] %vm114_vm4, %v16623_v55  ;;  %v1733_v47 = vmul.f32 %v11627_v3, %v13211_v52  ;;  %v1881_v28 = vrot.slane %v13393_v10, 1 }
 0x19b   :  { %v11629_v36 = vadd.f32 %v1687_v45, %v13206_v60  ;;  %v13405_v9 = vsel %vm258_vm2, %v1878_v54, %v1879_v18  ;;  %10892 = vmatprep.subr.bf16.mxu1 %v12277_v50  ;;  %v13411_v58 = vld [vmem:[%s16746_s28 + $0x20] sm:$0xff]   ;;  %v13414_v41 = vadd.f32 %v13216_v23, %v1735_v61  ;;  %v1882_v60 = vrot.slane %v13395_v43, 1 }
 0x19c   :  { %v1736_v55 = vmul.f32 %v11628_v7, %v13211_v52  ;;  %v13419_v3 = vpack.c.bf16 %v13405_v9, %v13357_v25  ;;  %v13423_v45 = vadd.f32 %v13216_v23, %v1733_v47  ;;  %v13436_v61 = vsel %vm258_vm2, %v1884_v44, %v1885_v2 }
 0x19d   :  { %16762 = vst [vmem:[#allocation22_spill] sm:$0xff] %v13414_v41  ;;  %v1734_v54 = vmul.f32 %v11629_v36, %v13211_v52  ;;  %v16626_v18 = vmax.f32 %v13414_v41, 0.0  ;;  %v13433_v7 = vsel %vm258_vm2, %v1881_v28, %v1882_v60  ;;  %v2229_v19 = vrot.slane %v13308_v42, 2 }
 0x19e   :  { %16763 = vst [vmem:[#allocation23_spill] sm:$0xff] %v13419_v3  ;;  %16764 = vst [vmem:[#allocation24_spill] sm:$0xff] %v13423_v45  ;;  %v13428_v13 = vadd.f32 %v13216_v23, %v1736_v55  ;;  %10878 = vmatprep.mubr.msk.bf16.mxu1 %vm114_vm4, %v13419_v3  ;;  %10893 = vmatpush3.bf16.msra.mxu1 %v12277_v50  ;;  %v16629_v47 = vmax.f32 %v13423_v45, 0.0  ;;  %v13444_v52 = vpack.c.bf16 %v13436_v61, %v13433_v7  ;;  %v13446_v55 = vld [vmem:[#allocation3 + $0xd0] sm:$0xff]  ;;  %v13448_v36 = vld [vmem:[#allocation3 + $0xd8] sm:$0x3] }
 0x19f   :  { %v13440_v34 = vadd.f32 %v13216_v23, %v1734_v54  ;;  %10910 = vmatprep.subr.bf16.mxu1 %v13411_v58  ;;  %1793 = vst.msk [vmem:[#allocation3 + $0x111] sm:$0xff] %vm114_vm4, %v16626_v18  ;;  %v13455_v44 = vld [vmem:[#allocation3 + $0xb0] sm:$0xff]  ;;  %v13457_v23 = vld [vmem:[#allocation3 + $0xb8] sm:$0x3]  ;;  %v1913_v50 = vsel %vm258_vm2, %v16631_v24, %v1912_v53  ;;  %v1920_v28 = vrot.slane %v13446_v55, 1  ;;  %v1921_v46 = vrot.slane %v13448_v36, 1 }
 0x1a0   :  { %16765 = vst [vmem:[#allocation25_spill] sm:$0xff] %v13428_v13  ;;  %16767 = vst [vmem:[#allocation27_spill] sm:$0xff] %v13444_v52  ;;  %v16633_v2 = vmax.f32 %v13428_v13, 0.0  ;;  %v1914_v54 = vrot.slane %v13455_v44, 1  ;;  %v1915_v18 = vrot.slane %v13457_v23, 1  ;;  %v13488_v8 = vld [vmem:[#allocation3 + $0xe0] sm:$0xff]  ;;  %v13573_v42 = vpack.c.bf16 %v13274_v14, %v13306_v4 }
 0x1a1   :  { %16766 = vst [vmem:[#allocation26_spill] sm:$0xff] %v13440_v34  ;;  %1791 = vst.msk [vmem:[#allocation3 + $0xf1] sm:$0xff] %vm114_vm4, %v16629_v47  ;;  %v16636_v60 = vmax.f32 %v13440_v34, 0.0  ;;  %10879 = vmatmul.mubr.msk.bf16.gmra.mrb[20].mxu1 %vm114_vm4, %v13444_v52  ;;  %v13475_v53 = vld [vmem:[#allocation3 + $0xc0] sm:$0xff]  ;;  %v13477_v21 = vld [vmem:[#allocation3 + $0xc8] sm:$0x3]  ;;  %v13496_v34 = vsel %vm258_vm2, %v1920_v28, %v1921_v46 }
 0x1a2   :  { %1794 = vst.msk [vmem:[#allocation3 + $0x121] sm:$0xff] %vm114_vm4, %v16633_v2  ;;  %v13483_v47 = vsel %vm258_vm2, %v1914_v54, %v1915_v18  ;;  %v1917_v33 = vrot.slane %v13475_v53, 1  ;;  %v1918_v24 = vrot.slane %v13477_v21, 1  ;;  %v13490_v2 = vld [vmem:[#allocation3 + $0xe8] sm:$0x3]  ;;  %v2234_v54 = vrot.slane %v13297_v59, 2 }
 0x1a3   :  { %1792 = vst.msk [vmem:[#allocation3 + $0x101] sm:$0xff] %vm114_vm4, %v16636_v60  ;;  %v1947_v26 = vpack.c.bf16 %v13483_v47, %v1913_v50  ;;  %v2231_v60 = vrot.slane %v13274_v14, 2  ;;  %v2232_v50 = vrot.slane %v13276_v20, 2  ;;  %v2235_v13 = vrot.slane %v13321_v37, 2 }
 0x1a4   :  { %v13493_v15 = vsel %vm258_vm2, %v1917_v33, %v1918_v24  ;;  %v1923_v33 = vrot.slane %v13488_v8, 1  ;;  %v1924_v24 = vrot.slane %v13490_v2, 1  ;;  %v2241_v38 = vrot.slane %v13395_v43, 2 }
 0x1a5   :  { %10882 = vmatprep.mubr.msk.bf16.mxu1 %vm114_vm4, %v1947_v26  ;;  %v13502_v18 = vpack.c.bf16 %v13496_v34, %v13493_v15  ;;  %v13519_v20 = vsel %vm604_vm3, %v2234_v54, %v2235_v13  ;;  %v13527_v11 = vsel %vm604_vm3, %v2231_v60, %v2232_v50  ;;  %v2261_v22 = vrot.slane %v13477_v21, 2 }
 0x1a6   :  { %v13509_v46 = vld [vmem:[#allocation3 + $0x110] sm:$0xff]  ;;  %v13511_v28 = vld [vmem:[#allocation3 + $0x118] sm:$0x3]  ;;  %v13534_v13 = vsel %vm258_vm2, %v1923_v33, %v1924_v24  ;;  %v2225_v33 = vrot.slane %v13282_v6, 2  ;;  %v2226_v24 = vrot.slane %v13284_v1, 2  ;;  %v2260_v1 = vrot.slane %v13475_v53, 2 }
 0x1a7   :  { %16768 = vst [vmem:[#allocation28_spill] sm:$0xff] %v13502_v18  ;;  %v1932_v41 = vrot.slane %v13509_v46, 1  ;;  %v1933_v63 = vrot.slane %v13511_v28, 1  ;;  %v2266_v21 = vrot.slane %v13488_v8, 2 }
 0x1a8   :  { %v13513_v45 = vld [vmem:[#allocation3 + $0xf0] sm:$0xff]  ;;  %v13515_v26 = vld [vmem:[#allocation3 + $0xf8] sm:$0x3]  ;;  %v13580_v16 = vsel %vm604_vm3, %v2225_v33, %v2226_v24  ;;  %v2263_v24 = vrot.slane %v13446_v55, 2 }
 0x1a9   :  { %10883 = vmatmul.mubr.msk.bf16.gmra.mrb[24].mxu1 %vm114_vm4, %v13502_v18  ;;  %v1926_v37 = vrot.slane %v13513_v45, 1  ;;  %v1927_v5 = vrot.slane %v13515_v26, 1  ;;  %v13548_v50 = vsel %vm258_vm2, %v1932_v41, %v1933_v63  ;;  %v1835_v41 = vpack.c.bf16 %v13282_v6, %v13244_v49 }
 0x1aa   :  { %v13529_v48 = vld [vmem:[#allocation3 + $0x100] sm:$0xff]  ;;  %v1828_v12 = vld [vmem:[#allocation3 + $0x108] sm:$0x3]  ;;  %v2240_v63 = vrot.slane %v13393_v10, 2  ;;  %v2258_v18 = vrot.slane %v13457_v23, 2  ;;  %v2622_v23 = vpack.c.bf16 %v13343_v0, %v13318_v30 }
 0x1ab   :  { %v13537_v54 = vsel %vm258_vm2, %v1926_v37, %v1927_v5  ;;  %v1929_v35 = vrot.slane %v13529_v48, 1  ;;  %v1930_v32 = vrot.slane %v1828_v12, 1  ;;  %v2228_v37 = vrot.slane %v13306_v4, 2  ;;  %v12286_v30 = vld [vmem:[%s16746_s28 + $0x60] sm:$0xff]  }
 0x1ac   :  { %v13542_v62 = vpack.c.bf16 %v13537_v54, %v13534_v13  ;;  %v2272_v52 = vrot.slane %v13529_v48, 2  ;;  %v2273_v3 = vrot.slane %v1828_v12, 2  ;;  %v13594_v33 = vsel %vm604_vm3, %v2240_v63, %v2241_v38  ;;  %v12279_v38 = vld [vmem:[%s16746_s28 + $0x28] sm:$0xff]   ;;  %v12282_v12 = vld [vmem:[%s16746_s28 + $0x40] sm:$0xff]  }
 0x1ad   :  { %v13545_v60 = vsel %vm258_vm2, %v1929_v35, %v1930_v32  ;;  %v2237_v32 = vrot.slane %v13371_v27, 2  ;;  %v2238_v35 = vrot.slane %v13373_v29, 2  ;;  %v13577_v29 = vpack.c.bf16 %v13371_v27, %v13297_v59 }
 0x1ae   :  { %16769 = vst [vmem:[#allocation29_spill] sm:$0xff] %v13542_v62  ;;  %10886 = vmatprep.mubr.msk.bf16.mxu1 %vm114_vm4, %v13542_v62  ;;  %v13554_v5 = vpack.c.bf16 %v13548_v50, %v13545_v60  ;;  %v2257_v62 = vrot.slane %v13455_v44, 2 }
 0x1af   :  { %v13586_v43 = vsel %vm604_vm3, %v2237_v32, %v2238_v35  ;;  %v2269_v32 = vrot.slane %v13513_v45, 2 }
 0x1b0   :  { %16770 = vst [vmem:[#allocation30_spill] sm:$0xff] %v13554_v5  ;;  %v13620_v63 = vsel %vm604_vm3, %v2257_v62, %v2258_v18  ;;  %v13677_v18 = vpack.c.bf16 %v13509_v46, %v13529_v48 }
 0x1b1   :  { %10887 = vmatmul.mubr.msk.bf16.gmra.mrb[28].mxu1 %vm114_vm4, %v13554_v5  ;;  %v13583_v5 = vsel %vm604_vm3, %v2228_v37, %v2229_v19  ;;  %v13597_v19 = vsel %vm604_vm3, %v2260_v1, %v2261_v22  ;;  %v2264_v37 = vrot.slane %v13448_v36, 2  ;;  %v13623_v1 = vsel %vm604_vm3, %v2272_v52, %v2273_v3  ;;  %v12280_v52 = vld [vmem:[%s16746_s28 + $0x30] sm:$0xff]  }
 0x1b2   :  { %10894 = vmatprep.mubr.msk.bf16.mxu1 %vm114_vm4, %v1835_v41  ;;  %v2267_v41 = vrot.slane %v13490_v2, 2  ;;  %v2270_v2 = vrot.slane %v13515_v26, 2  ;;  %v12281_v26 = vld [vmem:[%s16746_s28 + $0x38] sm:$0xff]  }
 0x1b4   :  { %v13611_v22 = vsel %vm604_vm3, %v2266_v21, %v2267_v41  ;;  %v13632_v41 = vsel %vm604_vm3, %v2263_v24, %v2264_v37  ;;  %v13640_v62 = vsel %vm604_vm3, %v2269_v32, %v2270_v2  ;;  %v1839_v24 = vpack.c.bf16 %v13455_v44, %v13299_v31 }
 0x1b5   :  { %v13660_v37 = vpack.c.bf16 %v13446_v55, %v13475_v53  ;;  %v13664_v32 = vpack.c.bf16 %v13513_v45, %v13488_v8  ;;  %v16657_v2 = vrot.slane %v13244_v49, 2  ;;  %v2244_v21 = vrot.slane %v13361_v56, 2 }
 0x1b9   :  { %10895 = vmatmul.mubr.msk.bf16.vlgmr.msra.gmra.mrb[16].mxu1 %vm114_vm4, %v13573_v42 }
 0x1ba   :  { %10911 = vmatpush3.bf16.msra.mxu1 %v13411_v58  ;;  %10898 = vmatprep.mubr.msk.bf16.mxu1 %vm114_vm4, %v13577_v29  ;;  %v13651_v58 = vpack.c.bf16 %v13359_v40, %v13393_v10 }
 0x1bb   :  { %10912 = vmatprep.subr.bf16.mxu1 %v12279_v38 }
 0x1be   :  { %10913 = vmatpush3.bf16.msra.mxu1 %v12279_v38  ;;  %v2223_v38 = vrot.slane %v13246_v57, 2  ;;  %v13685_v57 = vpack.c.bf16 %v13527_v11, %v13583_v5 }
 0x1bf   :  { %10930 = vmatprep.subr.bf16.mxu1 %v12280_v52 }
 0x1c1   :  { %10899 = vmatmul.mubr.msk.bf16.gmra.mrb[20].mxu1 %vm114_vm4, %v13651_v58 }
 0x1c2   :  { %10902 = vmatprep.mubr.msk.bf16.mxu1 %vm114_vm4, %v1839_v24  ;;  %v2224_v24 = vsel %vm604_vm3, %v16657_v2, %v2223_v38  ;;  %v13692_v38 = vpack.c.bf16 %v13586_v43, %v13519_v20  ;;  %v2255_v2 = vrot.slane %v13334_v17, 2 }
 0x1c3   :  { %v2286_v3 = vpack.c.bf16 %v13580_v16, %v2224_v24  ;;  %v16658_v24 = vrot.slane %v13299_v31, 2 }
 0x1c5   :  { %v2256_v35 = vsel %vm604_vm3, %v16658_v24, %v2255_v2  ;;  %v2449_v24 = vpack.c.bf16 %v13297_v59, %v13274_v14  ;;  %v2452_v59 = vpack.c.bf16 %v13475_v53, %v13455_v44  ;;  %v16771_v44 = vpack.c.bf16 %v13357_v25, %v13346_v51 }
 0x1c6   :  { %v2290_v56 = vpack.c.bf16 %v13620_v63, %v2256_v35  ;;  %v2275_v35 = vrot.slane %v13509_v46, 2  ;;  %v16772_v53 = vpack.c.bf16 %v13433_v7, %v13405_v9  ;;  %v16773_v25 = vpack.c.bf16 %v13493_v15, %v13483_v47  ;;  %v1832_v9 = vld [vmem:[#allocation3 + $0x128] sm:$0x3]  ;;  %v12292_v47 = vld [vmem:[%s16746_s28 + $0xa0] sm:$0xff]  }
 0x1c7   :  { %11050 = vmatprep.subr.bf16.mxu0 %v12292_v47 }
 0x1c8   :  { %11051 = vmatpush3.bf16.msra.mxu0 %v12292_v47 }
 0x1c9   :  { %10903 = vmatmul.mubr.msk.bf16.gmra.mrb[24].mxu1 %vm114_vm4, %v13660_v37 }
 0x1ca   :  { %10906 = vmatprep.mubr.msk.bf16.mxu1 %vm114_vm4, %v13664_v32 }
 0x1d1   :  { %10907 = vmatmul.mubr.msk.bf16.gmra.mrb[28].mxu1 %vm114_vm4, %v13677_v18 }
 0x1d2   :  { %10914 = vmatprep.mubr.msk.bf16.mxu1 %vm114_vm4, %v2286_v3  ;;  %v2243_v3 = vrot.slane %v13359_v40, 2 }
 0x1d4   :  { %v13709_v36 = vsel %vm604_vm3, %v2243_v3, %v2244_v21  ;;  %v13725_v21 = vpack.c.bf16 %v13640_v62, %v13611_v22 }
 0x1d5   :  { %v13713_v17 = vpack.c.bf16 %v13709_v36, %v13594_v33 }
 0x1d9   :  { %10915 = vmatmul.mubr.msk.bf16.vlgmr.msra.gmra.mrb[16].mxu1 %vm114_vm4, %v13685_v57 }
 0x1da   :  { %10931 = vmatpush3.bf16.msra.mxu1 %v12280_v52  ;;  %10918 = vmatprep.mubr.msk.bf16.mxu1 %vm114_vm4, %v13692_v38  ;;  %v13721_v52 = vpack.c.bf16 %v13632_v41, %v13597_v19 }
 0x1db   :  { %10932 = vmatprep.subr.bf16.mxu1 %v12281_v26 }
 0x1de   :  { %10933 = vmatpush3.bf16.msra.mxu1 %v12281_v26  ;;  %v2276_v26 = vrot.slane %v13511_v28, 2  ;;  %v12283_v28 = vld [vmem:[%s16746_s28 + $0x48] sm:$0xff]  }
 0x1df   :  { %10950 = vmatprep.subr.bf16.mxu1 %v12282_v12 }
 0x1e0   :  { %v13734_v2 = vsel %vm604_vm3, %v2275_v35, %v2276_v26  ;;  %v2450_v35 = vpack.c.bf16 %v13393_v10, %v13371_v27  ;;  %v2453_v27 = vpack.c.bf16 %v13488_v8, %v13446_v55  ;;  %v2454_v10 = vpack.c.bf16 %v13529_v48, %v13513_v45  ;;  %v1812_v8 = vld [vmem:[#allocation3 + $0x88] sm:$0x3]  ;;  %v12285_v48 = vld [vmem:[%s16746_s28 + $0x58] sm:$0xff]  }
 0x1e1   :  { %10919 = vmatmul.mubr.msk.bf16.gmra.mrb[20].mxu1 %vm114_vm4, %v13713_v17  ;;  %v13738_v3 = vpack.c.bf16 %v13734_v2, %v13623_v1  ;;  %v2613_v55 = vrot.slane %v1812_v8, 1 }
 0x1e2   :  { %10922 = vmatprep.mubr.msk.bf16.mxu1 %vm114_vm4, %v2290_v56  ;;  %v2448_v56 = vpack.c.bf16 %v13306_v4, %v13282_v6  ;;  %v12284_v6 = vld [vmem:[%s16746_s28 + $0x50] sm:$0xff]   ;;  %v13757_v4 = vld [vmem:[#allocation3 + $0x80] sm:$0xff] }
 0x1e3   :  { %v2451_v14 = vpack.c.bf16 %v13757_v4, %v13359_v40  ;;  %v2612_v45 = vrot.slane %v13757_v4, 1 }
 0x1e5   :  { %v13796_v0 = vsel %vm258_vm2, %v2612_v45, %v2613_v55 }
 0x1e6   :  { %v2625_v51 = vpack.c.bf16 %v13796_v0, %v13436_v61  ;;  %v16775_v61 = vpack.c.bf16 %v13545_v60, %v13537_v54  ;;  %v2784_v54 = vrot.slane %v13757_v4, 2  ;;  %v2785_v60 = vrot.slane %v1812_v8, 2 }
 0x1e8   :  { %v2786_v26 = vsel %vm604_vm3, %v2784_v54, %v2785_v60 }
 0x1e9   :  { %10923 = vmatmul.mubr.msk.bf16.gmra.mrb[24].mxu1 %vm114_vm4, %v13721_v52 }
 0x1ea   :  { %10926 = vmatprep.mubr.msk.bf16.mxu1 %vm114_vm4, %v13725_v21 }
 0x1f1   :  { %10927 = vmatmul.mubr.msk.bf16.gmra.mrb[28].mxu1 %vm114_vm4, %v13738_v3 }
 0x1f2   :  { %10934 = vmatprep.mubr.msk.bf16.mxu1 %vm114_vm4, %v2448_v56  ;;  %v2795_v56 = vpack.c.bf16 %v2786_v26, %v13709_v36 }
 0x1f9   :  { %10935 = vmatmul.mubr.msk.bf16.vlgmr.msra.gmra.mrb[16].mxu1 %vm114_vm4, %v2449_v24 }
 0x1fa   :  { %10951 = vmatpush3.bf16.msra.mxu1 %v12282_v12  ;;  %10938 = vmatprep.mubr.msk.bf16.mxu1 %vm114_vm4, %v2450_v35  ;;  %v13771_v12 = vld [vmem:[#allocation3 + $0x120] sm:$0xff] }
 0x1fb   :  { %10952 = vmatprep.subr.bf16.mxu1 %v12283_v28  ;;  %v2455_v40 = vpack.c.bf16 %v13771_v12, %v13509_v46  ;;  %v2618_v7 = vrot.slane %v13771_v12, 1  ;;  %v2619_v46 = vrot.slane %v1832_v9, 1 }
 0x1fd   :  { %v13815_v24 = vsel %vm258_vm2, %v2618_v7, %v2619_v46 }
 0x1fe   :  { %10953 = vmatpush3.bf16.msra.mxu1 %v12283_v28  ;;  %v2629_v15 = vpack.c.bf16 %v13815_v24, %v13548_v50  ;;  %v16777_v50 = vpack.c.bf16 %v13519_v20, %v13527_v11  ;;  %v16779_v11 = vpack.c.bf16 %v13597_v19, %v13620_v63  ;;  %v2788_v20 = vrot.slane %v13771_v12, 2  ;;  %v12289_v19 = vld [vmem:[%s16746_s28 + $0x78] sm:$0xff]   ;;  %v13873_v63 = vld [vmem:[#allocation3 + $0x90] sm:$0xff] }
 0x1ff   :  { %10970 = vmatprep.subr.bf16.mxu1 %v12284_v6  ;;  %v16781_v28 = vpack.c.bf16 %v13623_v1, %v13640_v62  ;;  %v12291_v62 = vld [vmem:[%s16746_s28 + $0x88] sm:$0xff]   ;;  %v16660_v8 = vrot.slane %v13873_v63, 2 }
 0x201   :  { %10939 = vmatmul.mubr.msk.bf16.gmra.mrb[20].mxu1 %vm114_vm4, %v2451_v14 }
 0x202   :  { %10942 = vmatprep.mubr.msk.bf16.mxu1 %vm114_vm4, %v2452_v59 }
 0x209   :  { %10943 = vmatmul.mubr.msk.bf16.gmra.mrb[24].mxu1 %vm114_vm4, %v2453_v27  ;;  %v16785_v27 = vld [vmem:[#allocation29_spill] sm:$0xff] }
 0x20a   :  { %10946 = vmatprep.mubr.msk.bf16.mxu1 %vm114_vm4, %v2454_v10  ;;  %v16786_v10 = vld [vmem:[#allocation30_spill] sm:$0xff] }
 0x211   :  { %10947 = vmatmul.mubr.msk.bf16.gmra.mrb[28].mxu1 %vm114_vm4, %v2455_v40 }
 0x212   :  { %10954 = vmatprep.mubr.msk.bf16.mxu1 %vm114_vm4, %v2622_v23  ;;  %v16774_v23 = vpack.c.bf16 %v13534_v13, %v13496_v34  ;;  %v16776_v34 = vpack.c.bf16 %v13583_v5, %v13580_v16  ;;  %v12287_v13 = vld [vmem:[%s16746_s28 + $0x68] sm:$0xff]   ;;  %v16778_v16 = vpack.c.bf16 %v13594_v33, %v13586_v43  ;;  %v12288_v5 = vld [vmem:[%s16746_s28 + $0x70] sm:$0xff]   ;;  %v2789_v43 = vrot.slane %v1832_v9, 2 }
 0x213   :  { %v16780_v33 = vpack.c.bf16 %v13611_v22, %v13632_v41  ;;  %v12290_v22 = vld [vmem:[%s16746_s28 + $0x80] sm:$0xff]   ;;  %v1814_v41 = vld [vmem:[#allocation3 + $0x98] sm:$0x3] }
 0x214   :  { %v2790_v36 = vsel %vm604_vm3, %v2788_v20, %v2789_v43 }
 0x215   :  { %v2799_v35 = vpack.c.bf16 %v2790_v36, %v13734_v2 }
 0x219   :  { %10955 = vmatmul.mubr.msk.bf16.vlgmr.msra.gmra.mrb[16].mxu1 %vm114_vm4, %v16771_v44 }
 0x21a   :  { %10971 = vmatpush3.bf16.msra.mxu1 %v12284_v6  ;;  %10958 = vmatprep.mubr.msk.bf16.mxu1 %vm114_vm4, %v16772_v53  ;;  %v16784_v6 = vld [vmem:[#allocation28_spill] sm:$0xff]  ;;  %v13955_v53 = vld [vmem:[%s16594_s6] ss:$0 sm:$0xff] }
 0x21b   :  { %10972 = vmatprep.subr.bf16.mxu1 %v12285_v48 }
 0x21e   :  { %10973 = vmatpush3.bf16.msra.mxu1 %v12285_v48  ;;  %v3243_v48 = vrot.slane %v1814_v41, 2 }
 0x21f   :  { %10990 = vmatprep.subr.bf16.mxu1 %v12286_v30 }
 0x220   :  { %v3244_v45 = vsel %vm604_vm3, %v16660_v8, %v3243_v48 }
 0x221   :  { %10959 = vmatmul.mubr.msk.bf16.gmra.mrb[20].mxu1 %vm114_vm4, %v2625_v51  ;;  %v3250_v55 = vpack.c.bf16 %v3244_v45, %v2786_v26  ;;  %v13969_v26 = vld [vmem:[#allocation3 + $0x8] sm:$0x3] }
 0x222   :  { %10962 = vmatprep.mubr.msk.bf16.mxu1 %vm114_vm4, %v16773_v25 }
 0x229   :  { %10963 = vmatmul.mubr.msk.bf16.gmra.mrb[24].mxu1 %vm114_vm4, %v16774_v23 }
 0x22a   :  { %10966 = vmatprep.mubr.msk.bf16.mxu1 %vm114_vm4, %v16775_v61 }
 0x231   :  { %10967 = vmatmul.mubr.msk.bf16.gmra.mrb[28].mxu1 %vm114_vm4, %v2629_v15 }
 0x232   :  { %10974 = vmatprep.mubr.msk.bf16.mxu1 %vm114_vm4, %v16776_v34 }
 0x239   :  { %10975 = vmatmul.mubr.msk.bf16.vlgmr.msra.gmra.mrb[16].mxu1 %vm114_vm4, %v16777_v50 }
 0x23a   :  { %10991 = vmatpush3.bf16.msra.mxu1 %v12286_v30  ;;  %10978 = vmatprep.mubr.msk.bf16.mxu1 %vm114_vm4, %v16778_v16 }
 0x23b   :  { %10992 = vmatprep.subr.bf16.mxu1 %v12287_v13 }
 0x23e   :  { %10993 = vmatpush3.bf16.msra.mxu1 %v12287_v13 }
 0x23f   :  { %11010 = vmatprep.subr.bf16.mxu1 %v12288_v5 }
 0x241   :  { %10979 = vmatmul.mubr.msk.bf16.gmra.mrb[20].mxu1 %vm114_vm4, %v2795_v56 }
 0x242   :  { %10982 = vmatprep.mubr.msk.bf16.mxu1 %vm114_vm4, %v16779_v11 }
 0x249   :  { %10983 = vmatmul.mubr.msk.bf16.gmra.mrb[24].mxu1 %vm114_vm4, %v16780_v33 }
 0x24a   :  { %10986 = vmatprep.mubr.msk.bf16.mxu1 %vm114_vm4, %v16781_v28 }
 0x251   :  { %10987 = vmatmul.mubr.msk.bf16.gmra.mrb[28].mxu1 %vm114_vm4, %v2799_v35  ;;  %v3538_v35 = vrot.slane %v13969_v26, 1 }
 0x252   :  { %10994 = vmatprep.mubr.msk.bf16.mxu1 %vm114_vm4, %v13573_v42  ;;  %v2954_v42 = vpack.c.bf16 %v13873_v63, %v13757_v4  ;;  %v1834_v4 = vld [vmem:[#allocation3 + $0x138] sm:$0x3] }
 0x253   :  { %v3101_v59 = vrot.slane %v1834_v4, 1  ;;  %v3247_v44 = vrot.slane %v1834_v4, 2 }
 0x259   :  { %10995 = vmatmul.mubr.msk.bf16.vlgmr.msra.gmra.mrb[16].mxu1 %vm114_vm4, %v13577_v29  ;;  %v13884_v29 = vld [vmem:[#allocation3 + $0x130] sm:$0xff] }
 0x25a   :  { %11011 = vmatpush3.bf16.msra.mxu1 %v12288_v5  ;;  %10998 = vmatprep.mubr.msk.bf16.mxu1 %vm114_vm4, %v13651_v58  ;;  %v2955_v1 = vpack.c.bf16 %v13884_v29, %v13771_v12  ;;  %v16662_v58 = vrot.slane %v13873_v63, 1  ;;  %v16661_v14 = vrot.slane %v13884_v29, 1 }
 0x25b   :  { %11012 = vmatprep.subr.bf16.mxu1 %v12289_v19 }
 0x25c   :  { %v3102_v12 = vsel %vm258_vm2, %v16661_v14, %v3101_v59  ;;  %v16787_v59 = vrot.slane %v13244_v49, 1 }
 0x25d   :  { %v3105_v40 = vpack.c.bf16 %v3102_v12, %v13815_v24 }
 0x25e   :  { %11013 = vmatpush3.bf16.msra.mxu1 %v12289_v19 }
 0x25f   :  { %11030 = vmatprep.subr.bf16.mxu1 %v12290_v22 }
 0x261   :  { %10999 = vmatmul.mubr.msk.bf16.gmra.mrb[20].mxu1 %vm114_vm4, %v2954_v42 }
 0x262   :  { %11002 = vmatprep.mubr.msk.bf16.mxu1 %vm114_vm4, %v13660_v37  ;;  %v3095_v37 = vrot.slane %v1814_v41, 1 }
 0x269   :  { %11003 = vmatmul.mubr.msk.bf16.gmra.mrb[24].mxu1 %vm114_vm4, %v13664_v32  ;;  %v16782_v32 = vld [vmem:[#allocation23_spill] sm:$0xff] }
 0x26a   :  { %11006 = vmatprep.mubr.msk.bf16.mxu1 %vm114_vm4, %v13677_v18  ;;  %v16783_v18 = vld [vmem:[#allocation27_spill] sm:$0xff] }
 0x271   :  { %11007 = vmatmul.mubr.msk.bf16.gmra.mrb[28].mxu1 %vm114_vm4, %v2955_v1 }
 0x272   :  { %11014 = vmatprep.mubr.msk.bf16.mxu1 %vm114_vm4, %v13354_v39  ;;  %v3096_v39 = vsel %vm258_vm2, %v16662_v58, %v3095_v37 }
 0x273   :  { %v3104_v2 = vpack.c.bf16 %v3096_v39, %v13796_v0 }
 0x279   :  { %11015 = vmatmul.mubr.msk.bf16.vlgmr.msra.gmra.mrb[16].mxu1 %vm114_vm4, %v16782_v32 }
 0x27a   :  { %11031 = vmatpush3.bf16.msra.mxu1 %v12290_v22  ;;  %11018 = vmatprep.mubr.msk.bf16.mxu1 %vm114_vm4, %v16783_v18 }
 0x27b   :  { %11032 = vmatprep.subr.bf16.mxu1 %v12291_v62 }
 0x27e   :  { %11033 = vmatpush3.bf16.msra.mxu1 %v12291_v62 }
 0x281   :  { %11019 = vmatmul.mubr.msk.bf16.gmra.mrb[20].mxu1 %vm114_vm4, %v3104_v2 }
 0x282   :  { %11022 = vmatprep.mubr.msk.bf16.mxu1 %vm114_vm4, %v16784_v6 }
 0x289   :  { %11023 = vmatmul.mubr.msk.bf16.gmra.mrb[24].mxu1 %vm114_vm4, %v16785_v27  ;;  %v3539_v27 = vsel %vm258_vm2, %v16787_v59, %v3538_v35 }
 0x28a   :  { %11026 = vmatprep.mubr.msk.bf16.mxu1 %vm114_vm4, %v16786_v10 }
 0x291   :  { %11027 = vmatmul.mubr.msk.bf16.gmra.mrb[28].mxu1 %vm114_vm4, %v3105_v40 }
 0x292   :  { %11034 = vmatprep.mubr.msk.bf16.mxu1 %vm114_vm4, %v13685_v57  ;;  %v16659_v57 = vrot.slane %v13884_v29, 2 }
 0x299   :  { %11035 = vmatmul.mubr.msk.bf16.vlgmr.msra.gmra.mrb[16].mxu1 %vm114_vm4, %v13692_v38  ;;  %v3248_v38 = vsel %vm604_vm3, %v16659_v57, %v3247_v44 }
 0x29a   :  { %11038 = vmatprep.mubr.msk.bf16.mxu1 %vm114_vm4, %v13713_v17  ;;  %v3251_v17 = vpack.c.bf16 %v3248_v38, %v2790_v36 }
 0x2a1   :  { %11039 = vmatmul.mubr.msk.bf16.gmra.mrb[20].mxu1 %vm114_vm4, %v3250_v55 }
 0x2a2   :  { %11042 = vmatprep.mubr.msk.bf16.mxu1 %vm114_vm4, %v13721_v52  ;;  %v12293_v52 = vld [vmem:[%s16746_s28 + $0xa8] sm:$0xff]  }
 0x2a3   :  { %11052 = vmatprep.subr.bf16.mxu0 %v12293_v52 }
 0x2a4   :  { %11053 = vmatpush3.bf16.msra.mxu0 %v12293_v52 }
 0x2a9   :  { %11043 = vmatmul.mubr.msk.bf16.gmra.mrb[24].mxu1 %vm114_vm4, %v13725_v21  ;;  %v13944_v21 = vld [vmem:[%s16746_s28 + $0x90] sm:$0xff]  }
 0x2aa   :  { %11046 = vmatprep.mubr.msk.bf16.mxu1 %vm114_vm4, %v13738_v3  ;;  %11070 = vmatprep.subr.bf16.mxu0 %v13944_v21  ;;  %v13950_v3 = vld [vmem:[%s16593_s5] ss:$0 sm:$0xff] }
 0x2b1   :  { %11047 = vmatmul.mubr.msk.bf16.gmra.mrb[28].mxu1 %vm114_vm4, %v3251_v17 }
 0x36c   :  { %v11036_v30 = vpop.f32.mrb[16].mxu1 }
 0x36d   :  { %v3396_v0 = vmul.f32 %v11036_v30, %v13950_v3  ;;  %v3309_v51 = vpop.f32.mrb[17].mxu1 }
 0x36e   :  { %v3394_v25 = vmul.f32 %v13950_v3, %v3309_v51  ;;  %v11037_v9 = vpop.f32.mrb[18].mxu1 }
 0x36f   :  { %v3418_v7 = vadd.f32 %v13955_v53, %v3396_v0  ;;  %v3397_v46 = vmul.f32 %v11037_v9, %v13950_v3  ;;  %v3312_v23 = vpop.f32.mrb[19].mxu1 }
 0x370   :  { %v3416_v61 = vadd.f32 %v13955_v53, %v3394_v25  ;;  %v3395_v24 = vmul.f32 %v13950_v3, %v3312_v23 }
 0x371   :  { %v3434_v15 = vmax.f32 %v3418_v7, 0.0  ;;  %v3419_v47 = vadd.f32 %v13955_v53, %v3397_v46 }
 0x372   :  { %v3432_v34 = vmax.f32 %v3416_v61, 0.0  ;;  %v3417_v13 = vadd.f32 %v13955_v53, %v3395_v24 }
 0x373   :  { %3454 = vst.msk [vmem:[#allocation3 + $0x31] sm:$0xff] %vm114_vm4, %v3434_v15  ;;  %v3435_v54 = vmax.f32 %v3419_v47, 0.0 }
 0x374   :  { %3452 = vst.msk [vmem:[#allocation3 + $0x11] sm:$0xff] %vm114_vm4, %v3432_v34  ;;  %v3433_v60 = vmax.f32 %v3417_v13, 0.0  ;;  %v11040_v50 = vpop.f32.mrb[20].mxu1 }
 0x375   :  { %3455 = vst.msk [vmem:[#allocation3 + $0x41] sm:$0xff] %vm114_vm4, %v3435_v54  ;;  %v3400_v16 = vmul.f32 %v11040_v50, %v13950_v3  ;;  %v3325_v5 = vpop.f32.mrb[21].mxu1  ;;  %v12295_v50 = vld [vmem:[%s16746_s28 + $0x98] sm:$0xff]  }
 0x376   :  { %3453 = vst.msk [vmem:[#allocation3 + $0x21] sm:$0xff] %vm114_vm4, %v3433_v60  ;;  %v3398_v56 = vmul.f32 %v13950_v3, %v3325_v5  ;;  %v11041_v11 = vpop.f32.mrb[22].mxu1 }
 0x377   :  { %v3422_v20 = vadd.f32 %v13955_v53, %v3400_v16  ;;  %v3401_v43 = vmul.f32 %v11041_v11, %v13950_v3  ;;  %v3328_v33 = vpop.f32.mrb[23].mxu1 }
 0x378   :  { %v3420_v28 = vadd.f32 %v13955_v53, %v3398_v56  ;;  %v3399_v36 = vmul.f32 %v13950_v3, %v3328_v33 }
 0x379   :  { %v3438_v19 = vmax.f32 %v3422_v20, 0.0  ;;  %v3423_v22 = vadd.f32 %v13955_v53, %v3401_v43  ;;  %v14044_v43 = vld [vmem:[#allocation3 + $0xa8] sm:$0x3] }
 0x37a   :  { %v3436_v42 = vmax.f32 %v3420_v28, 0.0  ;;  %v3421_v1 = vadd.f32 %v13955_v53, %v3399_v36  ;;  %v13980_v41 = vld [vmem:[#allocation3 + $0x30] sm:$0xff]  ;;  %v13982_v62 = vld [vmem:[#allocation3 + $0x38] sm:$0x3] }
 0x37b   :  { %3458 = vst.msk [vmem:[#allocation3 + $0x71] sm:$0xff] %vm114_vm4, %v3438_v19  ;;  %v3439_v37 = vmax.f32 %v3423_v22, 0.0  ;;  %v13985_v32 = vld [vmem:[#allocation3 + $0x10] sm:$0xff]  ;;  %v13987_v18 = vld [vmem:[#allocation3 + $0x18] sm:$0x3]  ;;  %v3546_v39 = vrot.slane %v13980_v41, 1 }
 0x37c   :  { %v3547_v2 = vrot.slane %v13982_v62, 1  ;;  %3456 = vst.msk [vmem:[#allocation3 + $0x51] sm:$0xff] %vm114_vm4, %v3436_v42  ;;  %v3437_v6 = vmax.f32 %v3421_v1, 0.0  ;;  %v11044_v4 = vpop.f32.mrb[24].mxu1  ;;  %v3540_v10 = vrot.slane %v13985_v32, 1  ;;  %v3541_v12 = vrot.slane %v13987_v18, 1 }
 0x37d   :  { %v13997_v40 = vld [vmem:[#allocation3 + $0x40] sm:$0xff]  ;;  %3459 = vst.msk [vmem:[#allocation3 + $0x81] sm:$0xff] %vm114_vm4, %v3439_v37  ;;  %v3404_v48 = vmul.f32 %v11044_v4, %v13950_v3  ;;  %v3341_v45 = vpop.f32.mrb[25].mxu1  ;;  %v14003_v44 = vld [vmem:[#allocation3 + $0x28] sm:$0x3]  ;;  %v3900_v58 = vrot.slane %v13987_v18, 2 }
 0x37e   :  { %v14001_v55 = vld [vmem:[#allocation3 + $0x20] sm:$0xff]  ;;  %v14006_v38 = vsel %vm258_vm2, %v3546_v39, %v3547_v2  ;;  %v14008_v17 = vld [vmem:[#allocation3 + $0x48] sm:$0x3]  ;;  %3457 = vst.msk [vmem:[#allocation3 + $0x61] sm:$0xff] %vm114_vm4, %v3437_v6  ;;  %v3402_v52 = vmul.f32 %v13950_v3, %v3341_v45  ;;  %v11045_v30 = vpop.f32.mrb[26].mxu1  ;;  %v14013_v0 = vsel %vm258_vm2, %v3540_v10, %v3541_v12  ;;  %v3544_v25 = vrot.slane %v14003_v44, 1 }
 0x37f   :  { %v3543_v51 = vrot.slane %v14001_v55, 1  ;;  %v3426_v9 = vadd.f32 %v13955_v53, %v3404_v48  ;;  %v3405_v7 = vmul.f32 %v11045_v30, %v13950_v3  ;;  %v3344_v46 = vpop.f32.mrb[27].mxu1  ;;  %v3617_v23 = vpack.c.bf16 %v14013_v0, %v3539_v27 }
 0x380   :  { %v3549_v61 = vrot.slane %v13997_v40, 1  ;;  %v3424_v24 = vadd.f32 %v13955_v53, %v3402_v52  ;;  %v3403_v15 = vmul.f32 %v13950_v3, %v3344_v46  ;;  %v3550_v34 = vrot.slane %v14008_v17, 1 }
 0x381   :  { %v14024_v47 = vsel %vm258_vm2, %v3543_v51, %v3544_v25  ;;  %v3442_v13 = vmax.f32 %v3426_v9, 0.0  ;;  %v3427_v54 = vadd.f32 %v13955_v53, %v3405_v7  ;;  %11054 = vmatprep.mubr.msk.bf16.mxu0 %vm114_vm4, %v3617_v23  ;;  %v3586_v9 = vrot.slane %v14044_v43, 1 }
 0x382   :  { %v14031_v60 = vpack.c.bf16 %v14006_v38, %v14024_v47  ;;  %v3440_v16 = vmax.f32 %v3424_v24, 0.0  ;;  %v3425_v5 = vadd.f32 %v13955_v53, %v3403_v15  ;;  %v14038_v56 = vsel %vm258_vm2, %v3549_v61, %v3550_v34  ;;  %v14040_v11 = vld [vmem:[#allocation3 + $0x70] sm:$0xff]  ;;  %v14042_v20 = vld [vmem:[#allocation3 + $0x78] sm:$0x3] }
 0x383   :  { %3462 = vst.msk [vmem:[#allocation3 + $0xd1] sm:$0xff] %vm114_vm4, %v3442_v13  ;;  %v3443_v33 = vmax.f32 %v3427_v54, 0.0  ;;  %v14049_v28 = vld [vmem:[#allocation3 + $0x50] sm:$0xff]  ;;  %v14051_v36 = vld [vmem:[#allocation3 + $0x58] sm:$0x3]  ;;  %v3558_v19 = vrot.slane %v14040_v11, 1 }
 0x384   :  { %16788 = vst [vmem:[#allocation23_spill] sm:$0xff] %v14031_v60  ;;  %11055 = vmatmul.mubr.msk.bf16.vlgmr.msra.gmra.mrb[16].mxu0 %vm114_vm4, %v14031_v60  ;;  %3460 = vst.msk [vmem:[#allocation3 + $0xb1] sm:$0xff] %vm114_vm4, %v3440_v16  ;;  %v3441_v22 = vmax.f32 %v3425_v5, 0.0  ;;  %v11048_v42 = vpop.f32.mrb[28].mxu1  ;;  %v3552_v1 = vrot.slane %v14049_v28, 1  ;;  %v3553_v37 = vrot.slane %v14051_v36, 1 }
 0x385   :  { %11071 = vmatpush3.bf16.msra.mxu0 %v13944_v21  ;;  %v3559_v39 = vrot.slane %v14042_v20, 1  ;;  %3463 = vst.msk [vmem:[#allocation3 + $0xe1] sm:$0xff] %vm114_vm4, %v3443_v33  ;;  %v3408_v2 = vmul.f32 %v11048_v42, %v13950_v3  ;;  %v3357_v6 = vpop.f32.mrb[29].mxu1  ;;  %v14063_v4 = vld [vmem:[#allocation3 + $0x60] sm:$0xff]  ;;  %v14065_v59 = vld [vmem:[#allocation3 + $0x68] sm:$0x3] }
 0x386   :  { %11072 = vmatprep.subr.bf16.mxu0 %v12295_v50  ;;  %v14070_v21 = vld [vmem:[%s16746_s28 + $0xb0] sm:$0xff]   ;;  %3461 = vst.msk [vmem:[#allocation3 + $0xc1] sm:$0xff] %vm114_vm4, %v3441_v22  ;;  %v3406_v27 = vmul.f32 %v13950_v3, %v3357_v6  ;;  %v11049_v10 = vpop.f32.mrb[30].mxu1  ;;  %v14075_v12 = vsel %vm258_vm2, %v3552_v1, %v3553_v37  ;;  %v3555_v48 = vrot.slane %v14063_v4, 1  ;;  %v3556_v45 = vrot.slane %v14065_v59, 1 }
 0x387   :  { %v3430_v52 = vadd.f32 %v13955_v53, %v3408_v2  ;;  %v3409_v30 = vmul.f32 %v11049_v10, %v13950_v3  ;;  %v3360_v51 = vpop.f32.mrb[31].mxu1  ;;  %v14083_v25 = vpack.c.bf16 %v14075_v12, %v14038_v56  ;;  %v14092_v61 = vsel %vm258_vm2, %v3558_v19, %v3559_v39 }
 0x388   :  { %v3428_v7 = vadd.f32 %v13955_v53, %v3406_v27  ;;  %v3407_v46 = vmul.f32 %v13950_v3, %v3360_v51  ;;  %v14089_v23 = vsel %vm258_vm2, %v3555_v48, %v3556_v45  ;;  %v16791_v19 = vrot.slane %v13299_v31, 1 }
 0x389   :  { %16789 = vst [vmem:[#allocation27_spill] sm:$0xff] %v14083_v25  ;;  %11073 = vmatpush3.bf16.msra.mxu0 %v12295_v50  ;;  %v3446_v24 = vmax.f32 %v3430_v52, 0.0  ;;  %v3431_v15 = vadd.f32 %v13955_v53, %v3409_v30  ;;  %11058 = vmatprep.mubr.msk.bf16.mxu0 %vm114_vm4, %v14083_v25  ;;  %v14099_v34 = vpack.c.bf16 %v14092_v61, %v14089_v23  ;;  %v3905_v45 = vrot.slane %v13980_v41, 2 }
 0x38a   :  { %11090 = vmatprep.subr.bf16.mxu0 %v14070_v21  ;;  %v3444_v3 = vmax.f32 %v3428_v7, 0.0  ;;  %v3429_v13 = vadd.f32 %v13955_v53, %v3407_v46  ;;  %v14103_v54 = vld [vmem:[#allocation3 + $0xd0] sm:$0xff]  ;;  %v14105_v16 = vld [vmem:[#allocation3 + $0xd8] sm:$0x3]  ;;  %v3587_v22 = vsel %vm258_vm2, %v16791_v19, %v3586_v9  ;;  %v3906_v9 = vrot.slane %v13982_v62, 2 }
 0x38b   :  { %16790 = vst [vmem:[#allocation28_spill] sm:$0xff] %v14099_v34  ;;  %3466 = vst.msk [vmem:[#allocation3 + $0x111] sm:$0xff] %vm114_vm4, %v3446_v24  ;;  %v3447_v50 = vmax.f32 %v3431_v15, 0.0  ;;  %v14110_v5 = vld [vmem:[#allocation3 + $0xb0] sm:$0xff]  ;;  %v14112_v33 = vld [vmem:[#allocation3 + $0xb8] sm:$0x3] }
 0x38c   :  { %11059 = vmatmul.mubr.msk.bf16.gmra.mrb[20].mxu0 %vm114_vm4, %v14099_v34  ;;  %v3594_v53 = vrot.slane %v14103_v54, 1  ;;  %3464 = vst.msk [vmem:[#allocation3 + $0xf1] sm:$0xff] %vm114_vm4, %v3444_v3  ;;  %v3445_v42 = vmax.f32 %v3429_v13, 0.0  ;;  %v3588_v1 = vrot.slane %v14110_v5, 1  ;;  %v3589_v37 = vrot.slane %v14112_v33, 1  ;;  %v14135_v30 = vld [vmem:[#allocation3 + $0xe0] sm:$0xff] }
 0x38d   :  { %v3595_v39 = vrot.slane %v14105_v16, 1  ;;  %3467 = vst.msk [vmem:[#allocation3 + $0x121] sm:$0xff] %vm114_vm4, %v3447_v50  ;;  %v14123_v2 = vld [vmem:[#allocation3 + $0xc0] sm:$0xff]  ;;  %v14125_v6 = vld [vmem:[#allocation3 + $0xc8] sm:$0x3]  ;;  %v3908_v7 = vrot.slane %v13997_v40, 2 }
 0x38e   :  { %3465 = vst.msk [vmem:[#allocation3 + $0x101] sm:$0xff] %vm114_vm4, %v3445_v42  ;;  %v14129_v27 = vsel %vm258_vm2, %v3588_v1, %v3589_v37  ;;  %v3591_v10 = vrot.slane %v14123_v2, 1  ;;  %v3592_v48 = vrot.slane %v14125_v6, 1  ;;  %v14137_v51 = vld [vmem:[#allocation3 + $0xe8] sm:$0x3]  ;;  %v3909_v15 = vrot.slane %v14008_v17, 2 }
 0x38f   :  { %v3621_v52 = vpack.c.bf16 %v14129_v27, %v3587_v22  ;;  %v14145_v24 = vsel %vm258_vm2, %v3594_v53, %v3595_v39  ;;  %v3597_v13 = vrot.slane %v14135_v30, 1  ;;  %v3598_v62 = vrot.slane %v14137_v51, 1 }
 0x390   :  { %v14142_v46 = vsel %vm258_vm2, %v3591_v10, %v3592_v48  ;;  %v14160_v22 = vsel %vm604_vm3, %v3905_v45, %v3906_v9  ;;  %v14163_v53 = vsel %vm604_vm3, %v3908_v7, %v3909_v15  ;;  %v3899_v9 = vrot.slane %v13985_v32, 2 }
 0x391   :  { %11062 = vmatprep.mubr.msk.bf16.mxu0 %vm114_vm4, %v3621_v52  ;;  %v14151_v3 = vpack.c.bf16 %v14145_v24, %v14142_v46  ;;  %v14181_v7 = vsel %vm258_vm2, %v3597_v13, %v3598_v62  ;;  %v3902_v1 = vrot.slane %v14001_v55, 2  ;;  %v3903_v35 = vrot.slane %v14003_v44, 2 }
 0x392   :  { %v14155_v50 = vld [vmem:[#allocation3 + $0x110] sm:$0xff]  ;;  %v14157_v19 = vld [vmem:[#allocation3 + $0x118] sm:$0x3]  ;;  %v3915_v18 = vrot.slane %v14065_v59, 2  ;;  %v3934_v59 = vrot.slane %v14123_v2, 2  ;;  %v3912_v34 = vrot.slane %v14051_v36, 2 }
 0x393   :  { %16792 = vst [vmem:[#allocation29_spill] sm:$0xff] %v14151_v3  ;;  %v14167_v17 = vld [vmem:[#allocation3 + $0xf0] sm:$0xff]  ;;  %v14169_v42 = vld [vmem:[#allocation3 + $0xf8] sm:$0x3]  ;;  %v3606_v10 = vrot.slane %v14155_v50, 1  ;;  %v3607_v48 = vrot.slane %v14157_v19, 1 }
 0x394   :  { %11063 = vmatmul.mubr.msk.bf16.gmra.mrb[24].mxu0 %vm114_vm4, %v14151_v3  ;;  %v3600_v37 = vrot.slane %v14167_v17, 1  ;;  %v3601_v39 = vrot.slane %v14169_v42, 1  ;;  %v3937_v25 = vrot.slane %v14103_v54, 2  ;;  %v3943_v60 = vrot.slane %v14167_v17, 2 }
 0x395   :  { %v14177_v45 = vld [vmem:[#allocation3 + $0x100] sm:$0xff]  ;;  %v3501_v52 = vld [vmem:[#allocation3 + $0x108] sm:$0x3]  ;;  %v14198_v13 = vsel %vm258_vm2, %v3606_v10, %v3607_v48  ;;  %v14219_v10 = vsel %vm604_vm3, %v3902_v1, %v3903_v35  ;;  %v3911_v48 = vrot.slane %v14049_v28, 2 }
 0x396   :  { %v14184_v15 = vsel %vm258_vm2, %v3600_v37, %v3601_v39  ;;  %v3603_v57 = vrot.slane %v14177_v45, 1  ;;  %v3604_v8 = vrot.slane %v3501_v52, 1  ;;  %v3914_v37 = vrot.slane %v14063_v4, 2  ;;  %v12372_v39 = vld [vmem:[#allocation3] sm:$0xff] }
 0x397   :  { %v14189_v14 = vpack.c.bf16 %v14184_v15, %v14181_v7  ;;  %v3508_v44 = vpack.c.bf16 %v13985_v32, %v12372_v39  ;;  %v3935_v39 = vrot.slane %v14125_v6, 2  ;;  %v3946_v35 = vrot.slane %v14177_v45, 2 }
 0x398   :  { %v14195_v3 = vsel %vm258_vm2, %v3603_v57, %v3604_v8  ;;  %v14213_v8 = vpack.c.bf16 %v13980_v41, %v14001_v55  ;;  %v14216_v57 = vsel %vm604_vm3, %v3899_v9, %v3900_v58  ;;  %v14229_v58 = vsel %vm604_vm3, %v3914_v37, %v3915_v18 }
 0x399   :  { %16793 = vst [vmem:[#allocation30_spill] sm:$0xff] %v14189_v14  ;;  %11066 = vmatprep.mubr.msk.bf16.mxu0 %vm114_vm4, %v14189_v14  ;;  %v14204_v62 = vpack.c.bf16 %v14198_v13, %v14195_v3  ;;  %v3941_v14 = vrot.slane %v14137_v51, 2  ;;  %v3947_v1 = vrot.slane %v3501_v52, 2  ;;  %v3931_v9 = vrot.slane %v14110_v5, 2 }
 0x39a   :  { %v3938_v6 = vrot.slane %v14105_v16, 2  ;;  %v3944_v51 = vrot.slane %v14169_v42, 2  ;;  %v14243_v52 = vsel %vm604_vm3, %v3934_v59, %v3935_v39  ;;  %v12297_v42 = vld [vmem:[%s16746_s28 + $0xb8] sm:$0xff]   ;;  %v14256_v36 = vsel %vm604_vm3, %v3911_v48, %v3912_v34 }
 0x39b   :  { %16794 = vst [vmem:[#allocation31_spill] sm:$0xff] %v14204_v62  ;;  %v14259_v37 = vsel %vm604_vm3, %v3946_v35, %v3947_v1  ;;  %v14267_v59 = vpack.c.bf16 %v14049_v28, %v13997_v40  ;;  %v12300_v35 = vld [vmem:[%s16746_s28 + $0xd0] sm:$0xff]   ;;  %v16796_v34 = vrot.slane %v13299_v31, 2 }
 0x39c   :  { %11067 = vmatmul.mubr.msk.bf16.gmra.mrb[28].mxu0 %vm114_vm4, %v14204_v62  ;;  %v3940_v62 = vrot.slane %v14135_v30, 2  ;;  %v14273_v16 = vsel %vm604_vm3, %v3937_v25, %v3938_v6  ;;  %v14280_v48 = vsel %vm604_vm3, %v3943_v60, %v3944_v51  ;;  %v12298_v60 = vld [vmem:[%s16746_s28 + $0xc0] sm:$0xff]   ;;  %v14304_v6 = vpack.c.bf16 %v14103_v54, %v14123_v2 }
 0x39d   :  { %11074 = vmatprep.mubr.msk.bf16.mxu0 %vm114_vm4, %v3508_v44  ;;  %v3932_v44 = vrot.slane %v14112_v33, 2  ;;  %v4300_v33 = vpack.c.bf16 %v14142_v46, %v14129_v27  ;;  %v14308_v51 = vpack.c.bf16 %v14167_v17, %v14135_v30  ;;  %v14320_v25 = vpack.c.bf16 %v14155_v50, %v14177_v45  ;;  %v12310_v46 = vld [vmem:[%s16746_s28 + $0x130] sm:$0xff]  }
 0x39e   :  { %v14246_v18 = vsel %vm604_vm3, %v3940_v62, %v3941_v14  ;;  %v14363_v31 = vpack.c.bf16 %v14273_v16, %v14243_v52  ;;  %11230 = vmatprep.subr.bf16.mxu1 %v12310_v46 }
 0x39f   :  { %v14270_v39 = vsel %vm604_vm3, %v3931_v9, %v3932_v44  ;;  %v14296_v9 = vpack.c.bf16 %v14040_v11, %v14063_v4  ;;  %v12373_v44 = vld [vmem:[#allocation3 + $0xa0] sm:$0xff]  ;;  %11231 = vmatpush3.bf16.msra.mxu1 %v12310_v46  ;;  %v16821_v46 = vld [vmem:[#allocation12_spill] sm:$0xff] }
 0x3a4   :  { %11075 = vmatmul.mubr.msk.bf16.vlgmr.msra.gmra.mrb[16].mxu0 %vm114_vm4, %v14213_v8 }
 0x3a5   :  { %11091 = vmatpush3.bf16.msra.mxu0 %v14070_v21  ;;  %11078 = vmatprep.mubr.msk.bf16.mxu0 %vm114_vm4, %v14267_v59  ;;  %v3512_v21 = vpack.c.bf16 %v14110_v5, %v12373_v44  ;;  %v16795_v44 = vrot.slane %v13244_v49, 2  ;;  %v12299_v49 = vld [vmem:[%s16746_s28 + $0xc8] sm:$0xff]  }
 0x3a6   :  { %11092 = vmatprep.subr.bf16.mxu0 %v12297_v42 }
 0x3a9   :  { %11093 = vmatpush3.bf16.msra.mxu0 %v12297_v42  ;;  %v3897_v42 = vrot.slane %v13969_v26, 2  ;;  %v14328_v26 = vpack.c.bf16 %v14160_v22, %v14219_v10 }
 0x3aa   :  { %11110 = vmatprep.subr.bf16.mxu0 %v12298_v60 }
 0x3ac   :  { %11079 = vmatmul.mubr.msk.bf16.gmra.mrb[20].mxu0 %vm114_vm4, %v14296_v9 }
 0x3ad   :  { %11082 = vmatprep.mubr.msk.bf16.mxu0 %vm114_vm4, %v3512_v21  ;;  %v3898_v21 = vsel %vm604_vm3, %v16795_v44, %v3897_v42  ;;  %v14335_v42 = vpack.c.bf16 %v14256_v36, %v14163_v53  ;;  %v3929_v44 = vrot.slane %v14044_v43, 2 }
 0x3ae   :  { %v3960_v1 = vpack.c.bf16 %v14216_v57, %v3898_v21  ;;  %v3918_v21 = vrot.slane %v14042_v20, 2 }
 0x3af   :  { %v3930_v62 = vsel %vm604_vm3, %v16796_v34, %v3929_v44  ;;  %v14367_v34 = vpack.c.bf16 %v14280_v48, %v14246_v18 }
 0x3b0   :  { %v3964_v20 = vpack.c.bf16 %v14270_v39, %v3930_v62  ;;  %v3949_v62 = vrot.slane %v14155_v50, 2 }
 0x3b4   :  { %11083 = vmatmul.mubr.msk.bf16.gmra.mrb[24].mxu0 %vm114_vm4, %v14304_v6 }
 0x3b5   :  { %11086 = vmatprep.mubr.msk.bf16.mxu0 %vm114_vm4, %v14308_v51 }
 0x3bc   :  { %11087 = vmatmul.mubr.msk.bf16.gmra.mrb[28].mxu0 %vm114_vm4, %v14320_v25 }
 0x3bd   :  { %11094 = vmatprep.mubr.msk.bf16.mxu0 %vm114_vm4, %v3960_v1  ;;  %v3917_v1 = vrot.slane %v14040_v11, 2 }
 0x3bf   :  { %v14351_v14 = vsel %vm604_vm3, %v3917_v1, %v3918_v21  ;;  %v4122_v1 = vpack.c.bf16 %v14001_v55, %v13985_v32  ;;  %v4123_v21 = vpack.c.bf16 %v13997_v40, %v13980_v41  ;;  %v12302_v32 = vld [vmem:[%s16746_s28 + $0xe0] sm:$0xff]   ;;  %v4126_v40 = vpack.c.bf16 %v14123_v2, %v14110_v5  ;;  %v12303_v2 = vld [vmem:[%s16746_s28 + $0xe8] sm:$0xff]  }
 0x3c0   :  { %v14355_v43 = vpack.c.bf16 %v14351_v14, %v14229_v58  ;;  %v14399_v55 = vld [vmem:[#allocation3 + $0x80] sm:$0xff]  ;;  %v16797_v5 = vpack.c.bf16 %v14024_v47, %v14013_v0  ;;  %v12304_v0 = vld [vmem:[%s16746_s28 + $0xf0] sm:$0xff]  }
 0x3c1   :  { %v4125_v41 = vpack.c.bf16 %v14399_v55, %v14040_v11 }
 0x3c4   :  { %11095 = vmatmul.mubr.msk.bf16.vlgmr.msra.gmra.mrb[16].mxu0 %vm114_vm4, %v14328_v26 }
 0x3c5   :  { %11111 = vmatpush3.bf16.msra.mxu0 %v12298_v60  ;;  %11098 = vmatprep.mubr.msk.bf16.mxu0 %vm114_vm4, %v14335_v42  ;;  %v3950_v60 = vrot.slane %v14157_v19, 2  ;;  %v12301_v19 = vld [vmem:[%s16746_s28 + $0xd8] sm:$0xff]  }
 0x3c6   :  { %11112 = vmatprep.subr.bf16.mxu0 %v12299_v49 }
 0x3c9   :  { %11113 = vmatpush3.bf16.msra.mxu0 %v12299_v49  ;;  %v14376_v49 = vsel %vm604_vm3, %v3949_v62, %v3950_v60  ;;  %v16800_v62 = vpack.c.bf16 %v14181_v7, %v14145_v24  ;;  %v16802_v24 = vpack.c.bf16 %v14219_v10, %v14216_v57  ;;  %v4458_v7 = vrot.slane %v14399_v55, 2  ;;  %v12306_v10 = vld [vmem:[%s16746_s28 + $0x100] sm:$0xff]  }
 0x3ca   :  { %11130 = vmatprep.subr.bf16.mxu0 %v12300_v35  ;;  %v14380_v44 = vpack.c.bf16 %v14376_v49, %v14259_v37  ;;  %v16804_v57 = vpack.c.bf16 %v14229_v58, %v14256_v36  ;;  %v16806_v36 = vpack.c.bf16 %v14246_v18, %v14273_v16  ;;  %v16808_v16 = vld [vmem:[#allocation23_spill] sm:$0xff] }
 0x3cc   :  { %11099 = vmatmul.mubr.msk.bf16.gmra.mrb[20].mxu0 %vm114_vm4, %v14355_v43 }
 0x3cd   :  { %11102 = vmatprep.mubr.msk.bf16.mxu0 %vm114_vm4, %v3964_v20  ;;  %v4124_v20 = vpack.c.bf16 %v14063_v4, %v14049_v28  ;;  %v4127_v28 = vpack.c.bf16 %v14135_v30, %v14103_v54  ;;  %v4128_v4 = vpack.c.bf16 %v14177_v45, %v14167_v17  ;;  %v3485_v54 = vld [vmem:[#allocation3 + $0x88] sm:$0x3]  ;;  %v4286_v30 = vrot.slane %v14399_v55, 1 }
 0x3ce   :  { %v4287_v17 = vrot.slane %v3485_v54, 1  ;;  %v16798_v45 = vpack.c.bf16 %v14038_v56, %v14006_v38  ;;  %v3505_v56 = vld [vmem:[#allocation3 + $0x128] sm:$0x3] }
 0x3cf   :  { %v4463_v58 = vrot.slane %v3505_v56, 2 }
 0x3d0   :  { %v14438_v47 = vsel %vm258_vm2, %v4286_v30, %v4287_v17 }
 0x3d1   :  { %v4299_v38 = vpack.c.bf16 %v14438_v47, %v14092_v61  ;;  %v16801_v61 = vpack.c.bf16 %v14195_v3, %v14184_v15  ;;  %v12305_v3 = vld [vmem:[%s16746_s28 + $0xf8] sm:$0xff]   ;;  %v4459_v15 = vrot.slane %v3485_v54, 2 }
 0x3d4   :  { %11103 = vmatmul.mubr.msk.bf16.gmra.mrb[24].mxu0 %vm114_vm4, %v14363_v31 }
 0x3d5   :  { %11106 = vmatprep.mubr.msk.bf16.mxu0 %vm114_vm4, %v14367_v34 }
 0x3dc   :  { %11107 = vmatmul.mubr.msk.bf16.gmra.mrb[28].mxu0 %vm114_vm4, %v14380_v44 }
 0x3dd   :  { %11114 = vmatprep.mubr.msk.bf16.mxu0 %vm114_vm4, %v4122_v1 }
 0x3e4   :  { %11115 = vmatmul.mubr.msk.bf16.vlgmr.msra.gmra.mrb[16].mxu0 %vm114_vm4, %v4123_v21  ;;  %v16807_v21 = vpack.c.bf16 %v14259_v37, %v14280_v48  ;;  %v12308_v37 = vld [vmem:[%s16746_s28 + $0x110] sm:$0xff]  }
 0x3e5   :  { %11131 = vmatpush3.bf16.msra.mxu0 %v12300_v35  ;;  %11118 = vmatprep.mubr.msk.bf16.mxu0 %vm114_vm4, %v4124_v20  ;;  %v14413_v35 = vld [vmem:[#allocation3 + $0x120] sm:$0xff] }
 0x3e6   :  { %11132 = vmatprep.subr.bf16.mxu0 %v12301_v19  ;;  %v4129_v11 = vpack.c.bf16 %v14413_v35, %v14155_v50  ;;  %v16799_v50 = vpack.c.bf16 %v14089_v23, %v14075_v12  ;;  %v4292_v12 = vrot.slane %v14413_v35, 1  ;;  %v4293_v23 = vrot.slane %v3505_v56, 1  ;;  %v16812_v20 = vld [vmem:[#allocation29_spill] sm:$0xff] }
 0x3e7   :  { %v4629_v18 = vpack.c.bf16 %v13884_v29, %v14413_v35 }
 0x3e8   :  { %v14457_v60 = vsel %vm258_vm2, %v4292_v12, %v4293_v23 }
 0x3e9   :  { %11133 = vmatpush3.bf16.msra.mxu0 %v12301_v19  ;;  %v4303_v27 = vpack.c.bf16 %v14457_v60, %v14198_v13  ;;  %v16803_v13 = vpack.c.bf16 %v14163_v53, %v14160_v22  ;;  %v16805_v22 = vpack.c.bf16 %v14243_v52, %v14270_v39  ;;  %v4462_v53 = vrot.slane %v14413_v35, 2  ;;  %v12307_v52 = vld [vmem:[%s16746_s28 + $0x108] sm:$0xff]   ;;  %v12309_v39 = vld [vmem:[%s16746_s28 + $0x118] sm:$0xff]  }
 0x3ea   :  { %11150 = vmatprep.subr.bf16.mxu0 %v12302_v32 }
 0x3ec   :  { %11119 = vmatmul.mubr.msk.bf16.gmra.mrb[20].mxu0 %vm114_vm4, %v4125_v41  ;;  %v16813_v41 = vld [vmem:[#allocation30_spill] sm:$0xff] }
 0x3ed   :  { %11122 = vmatprep.mubr.msk.bf16.mxu0 %vm114_vm4, %v4126_v40  ;;  %v16814_v40 = vld [vmem:[#allocation31_spill] sm:$0xff] }
 0x3f4   :  { %11123 = vmatmul.mubr.msk.bf16.gmra.mrb[24].mxu0 %vm114_vm4, %v4127_v28  ;;  %v16815_v28 = vrot.slane %v13884_v29, 1 }
 0x3f5   :  { %11126 = vmatprep.mubr.msk.bf16.mxu0 %vm114_vm4, %v4128_v4 }
 0x3fc   :  { %11127 = vmatmul.mubr.msk.bf16.gmra.mrb[28].mxu0 %vm114_vm4, %v4129_v11 }
 0x3fd   :  { %11134 = vmatprep.mubr.msk.bf16.mxu0 %vm114_vm4, %v16797_v5  ;;  %v16816_v5 = vrot.slane %v13873_v63, 2 }
 0x404   :  { %11135 = vmatmul.mubr.msk.bf16.vlgmr.msra.gmra.mrb[16].mxu0 %vm114_vm4, %v16798_v45 }
 0x405   :  { %11151 = vmatpush3.bf16.msra.mxu0 %v12302_v32  ;;  %11138 = vmatprep.mubr.msk.bf16.mxu0 %vm114_vm4, %v16799_v50  ;;  %v3507_v32 = vld [vmem:[#allocation3 + $0x138] sm:$0x3] }
 0x406   :  { %11152 = vmatprep.subr.bf16.mxu0 %v12303_v2  ;;  %v4921_v30 = vrot.slane %v3507_v32, 2 }
 0x409   :  { %11153 = vmatpush3.bf16.msra.mxu0 %v12303_v2 }
 0x40a   :  { %11170 = vmatprep.subr.bf16.mxu0 %v12304_v0 }
 0x40c   :  { %11139 = vmatmul.mubr.msk.bf16.gmra.mrb[20].mxu0 %vm114_vm4, %v4299_v38 }
 0x40d   :  { %11142 = vmatprep.mubr.msk.bf16.mxu0 %vm114_vm4, %v4300_v33  ;;  %v4460_v33 = vsel %vm604_vm3, %v4458_v7, %v4459_v15 }
 0x40e   :  { %v4469_v1 = vpack.c.bf16 %v4460_v33, %v14351_v14  ;;  %v4464_v14 = vsel %vm604_vm3, %v4462_v53, %v4463_v58 }
 0x40f   :  { %v4473_v19 = vpack.c.bf16 %v4464_v14, %v14376_v49 }
 0x414   :  { %11143 = vmatmul.mubr.msk.bf16.gmra.mrb[24].mxu0 %vm114_vm4, %v16800_v62  ;;  %v16818_v62 = vld [vmem:[#allocation10_spill] sm:$0xff] }
 0x415   :  { %11146 = vmatprep.mubr.msk.bf16.mxu0 %vm114_vm4, %v16801_v61  ;;  %v16819_v61 = vmax.f32 %v16818_v62, 0.0 }
 0x41c   :  { %11147 = vmatmul.mubr.msk.bf16.gmra.mrb[28].mxu0 %vm114_vm4, %v4303_v27 }
 0x41d   :  { %11154 = vmatprep.mubr.msk.bf16.mxu0 %vm114_vm4, %v16802_v24  ;;  %v16822_v24 = vmax.f32 %v16821_v46, 0.0  ;;  %v14689_v46 = vld [vmem:[#allocation3 + $0xa0] sm:$0xff] }
 0x424   :  { %11155 = vmatmul.mubr.msk.bf16.vlgmr.msra.gmra.mrb[16].mxu0 %vm114_vm4, %v16803_v13  ;;  %v16824_v13 = vld [vmem:[#allocation11_spill] sm:$0xff] }
 0x425   :  { %11171 = vmatpush3.bf16.msra.mxu0 %v12304_v0  ;;  %11158 = vmatprep.mubr.msk.bf16.mxu0 %vm114_vm4, %v16804_v57  ;;  %v16825_v57 = vmax.f32 %v16824_v13, 0.0 }
 0x426   :  { %11172 = vmatprep.subr.bf16.mxu0 %v12305_v3 }
 0x429   :  { %11173 = vmatpush3.bf16.msra.mxu0 %v12305_v3 }
 0x42a   :  { %11190 = vmatprep.subr.bf16.mxu0 %v12306_v10 }
 0x42c   :  { %11159 = vmatmul.mubr.msk.bf16.gmra.mrb[20].mxu0 %vm114_vm4, %v4469_v1  ;;  %v16827_v1 = vld [vmem:[#allocation13_spill] sm:$0xff] }
 0x42d   :  { %11162 = vmatprep.mubr.msk.bf16.mxu0 %vm114_vm4, %v16805_v22  ;;  %v16828_v22 = vmax.f32 %v16827_v1, 0.0 }
 0x434   :  { %11163 = vmatmul.mubr.msk.bf16.gmra.mrb[24].mxu0 %vm114_vm4, %v16806_v36 }
 0x435   :  { %11166 = vmatprep.mubr.msk.bf16.mxu0 %vm114_vm4, %v16807_v21 }
 0x43c   :  { %11167 = vmatmul.mubr.msk.bf16.gmra.mrb[28].mxu0 %vm114_vm4, %v4473_v19 }
 0x43d   :  { %11174 = vmatprep.mubr.msk.bf16.mxu0 %vm114_vm4, %v14213_v8  ;;  %v4628_v8 = vpack.c.bf16 %v13873_v63, %v14399_v55  ;;  %v4775_v55 = vrot.slane %v3507_v32, 1 }
 0x43f   :  { %v4776_v4 = vsel %vm258_vm2, %v16815_v28, %v4775_v55  ;;  %v16833_v55 = vld [vmem:[#allocation15_spill] sm:$0xff] }
 0x440   :  { %v4779_v35 = vpack.c.bf16 %v4776_v4, %v14457_v60 }
 0x444   :  { %11175 = vmatmul.mubr.msk.bf16.vlgmr.msra.gmra.mrb[16].mxu0 %vm114_vm4, %v14267_v59  ;;  %v3487_v59 = vld [vmem:[#allocation3 + $0x98] sm:$0x3] }
 0x445   :  { %11191 = vmatpush3.bf16.msra.mxu0 %v12306_v10  ;;  %11178 = vmatprep.mubr.msk.bf16.mxu0 %vm114_vm4, %v14296_v9  ;;  %v4769_v48 = vrot.slane %v3487_v59, 1  ;;  %v16809_v9 = vld [vmem:[#allocation27_spill] sm:$0xff]  ;;  %v4917_v11 = vrot.slane %v3487_v59, 2 }
 0x446   :  { %11192 = vmatprep.subr.bf16.mxu0 %v12307_v52 }
 0x447   :  { %v4918_v54 = vsel %vm604_vm3, %v16816_v5, %v4917_v11 }
 0x448   :  { %v4924_v2 = vpack.c.bf16 %v4918_v54, %v4460_v33 }
 0x449   :  { %11193 = vmatpush3.bf16.msra.mxu0 %v12307_v52 }
 0x44a   :  { %11210 = vmatprep.subr.bf16.mxu0 %v12308_v37 }
 0x44c   :  { %11179 = vmatmul.mubr.msk.bf16.gmra.mrb[20].mxu0 %vm114_vm4, %v4628_v8  ;;  %v14627_v8 = vld [vmem:[#allocation3] sm:$0xff] }
 0x44d   :  { %11182 = vmatprep.mubr.msk.bf16.mxu0 %vm114_vm4, %v14304_v6  ;;  %v16810_v6 = vld [vmem:[#allocation28_spill] sm:$0xff] }
 0x454   :  { %11183 = vmatmul.mubr.msk.bf16.gmra.mrb[24].mxu0 %vm114_vm4, %v14308_v51 }
 0x455   :  { %11186 = vmatprep.mubr.msk.bf16.mxu0 %vm114_vm4, %v14320_v25  ;;  %v16811_v25 = vrot.slane %v13873_v63, 1 }
 0x457   :  { %v4770_v51 = vsel %vm258_vm2, %v16811_v25, %v4769_v48 }
 0x458   :  { %v4778_v49 = vpack.c.bf16 %v4770_v51, %v14438_v47 }
 0x45c   :  { %11187 = vmatmul.mubr.msk.bf16.gmra.mrb[28].mxu0 %vm114_vm4, %v4629_v18  ;;  %v14629_v18 = vld [vmem:[#allocation3 + $0x8] sm:$0x3] }
 0x45d   :  { %11194 = vmatprep.mubr.msk.bf16.mxu0 %vm114_vm4, %v16808_v16  ;;  %v5228_v32 = vrot.slane %v14629_v18, 1 }
 0x464   :  { %11195 = vmatmul.mubr.msk.bf16.vlgmr.msra.gmra.mrb[16].mxu0 %vm114_vm4, %v16809_v9 }
 0x465   :  { %11211 = vmatpush3.bf16.msra.mxu0 %v12308_v37  ;;  %11198 = vmatprep.mubr.msk.bf16.mxu0 %vm114_vm4, %v16810_v6  ;;  %v16830_v6 = vld [vmem:[#allocation14_spill] sm:$0xff] }
 0x466   :  { %11212 = vmatprep.subr.bf16.mxu0 %v12309_v39  ;;  %v16831_v25 = vmax.f32 %v16830_v6, 0.0 }
 0x469   :  { %11213 = vmatpush3.bf16.msra.mxu0 %v12309_v39 }
 0x46c   :  { %11199 = vmatmul.mubr.msk.bf16.gmra.mrb[20].mxu0 %vm114_vm4, %v4778_v49 }
 0x46d   :  { %11202 = vmatprep.mubr.msk.bf16.mxu0 %vm114_vm4, %v16812_v20  ;;  %v16684_v20 = vrot.slane %v14627_v8, 1 }
 0x474   :  { %11203 = vmatmul.mubr.msk.bf16.gmra.mrb[24].mxu0 %vm114_vm4, %v16813_v41  ;;  %v16834_v41 = vmax.f32 %v16833_v55, 0.0 }
 0x475   :  { %11206 = vmatprep.mubr.msk.bf16.mxu0 %vm114_vm4, %v16814_v40 }
 0x47c   :  { %11207 = vmatmul.mubr.msk.bf16.gmra.mrb[28].mxu0 %vm114_vm4, %v4779_v35  ;;  %v16836_v35 = vld [vmem:[#allocation16_spill] sm:$0xff] }
 0x47d   :  { %11214 = vmatprep.mubr.msk.bf16.mxu0 %vm114_vm4, %v14328_v26  ;;  %v16817_v26 = vrot.slane %v13884_v29, 2  ;;  %v14584_v29 = vld [vmem:[%s16593_s5 + $0x1] ss:$0 sm:$0xff]  ;;  %v16837_v11 = vmax.f32 %v16836_v35, 0.0  ;;  %v14726_v35 = vld [vmem:[#allocation3 + $0xa8] sm:$0x3] }
 0x484   :  { %11215 = vmatmul.mubr.msk.bf16.vlgmr.msra.gmra.mrb[16].mxu0 %vm114_vm4, %v14335_v42  ;;  %v4922_v42 = vsel %vm604_vm3, %v16817_v26, %v4921_v30 }
 0x485   :  { %11218 = vmatprep.mubr.msk.bf16.mxu0 %vm114_vm4, %v14355_v43  ;;  %v4925_v63 = vpack.c.bf16 %v4922_v42, %v4464_v14  ;;  %v12311_v43 = vld [vmem:[%s16746_s28 + $0x138] sm:$0xff]  }
 0x486   :  { %11232 = vmatprep.subr.bf16.mxu1 %v12311_v43 }
 0x487   :  { %11233 = vmatpush3.bf16.msra.mxu1 %v12311_v43 }
 0x48c   :  { %11219 = vmatmul.mubr.msk.bf16.gmra.mrb[20].mxu0 %vm114_vm4, %v4924_v2  ;;  %v16839_v2 = vld [vmem:[#allocation17_spill] sm:$0xff] }
 0x48d   :  { %11222 = vmatprep.mubr.msk.bf16.mxu0 %vm114_vm4, %v14363_v31  ;;  %v14578_v31 = vld [vmem:[%s16746_s28 + $0x120] sm:$0xff]   ;;  %v16840_v30 = vmax.f32 %v16839_v2, 0.0 }
 0x48e   :  { %11250 = vmatprep.subr.bf16.mxu1 %v14578_v31 }
 0x494   :  { %11223 = vmatmul.mubr.msk.bf16.gmra.mrb[24].mxu0 %vm114_vm4, %v14367_v34  ;;  %v14589_v34 = vld [vmem:[%s16594_s6 + $0x1] ss:$0 sm:$0xff] }
 0x495   :  { %11226 = vmatprep.mubr.msk.bf16.mxu0 %vm114_vm4, %v14380_v44 }
 0x49c   :  { %11227 = vmatmul.mubr.msk.bf16.gmra.mrb[28].mxu0 %vm114_vm4, %v4925_v63 }
 0x557   :  { %v11216_v44 = vpop.f32.mrb[16].mxu0 }
 0x558   :  { %v5070_v17 = vmul.f32 %v11216_v44, %v14584_v29  ;;  %v4983_v45 = vpop.f32.mrb[17].mxu0 }
 0x559   :  { %v5068_v50 = vmul.f32 %v14584_v29, %v4983_v45  ;;  %v11217_v0 = vpop.f32.mrb[18].mxu0 }
 0x55a   :  { %v5092_v47 = vadd.f32 %v14589_v34, %v5070_v17  ;;  %v5071_v38 = vmul.f32 %v11217_v0, %v14584_v29  ;;  %v4986_v56 = vpop.f32.mrb[19].mxu0 }
 0x55b   :  { %v5090_v12 = vadd.f32 %v14589_v34, %v5068_v50  ;;  %v5069_v23 = vmul.f32 %v14584_v29, %v4986_v56 }
 0x55c   :  { %v14599_v60 = vadd.f32 %v5092_v47, %v16819_v61  ;;  %v5093_v27 = vadd.f32 %v14589_v34, %v5071_v38  ;;  %v5229_v47 = vsel %vm258_vm2, %v16684_v20, %v5228_v32 }
 0x55d   :  { %v14604_v3 = vadd.f32 %v5090_v12, %v16822_v24  ;;  %v5091_v7 = vadd.f32 %v14589_v34, %v5069_v23 }
 0x55e   :  { %16820 = vst [vmem:[#allocation23_spill] sm:$0xff] %v14599_v60  ;;  %v16682_v15 = vmax.f32 %v14599_v60, 0.0  ;;  %v14610_v10 = vadd.f32 %v5093_v27, %v16825_v57 }
 0x55f   :  { %16823 = vst [vmem:[#allocation27_spill] sm:$0xff] %v14604_v3  ;;  %v16681_v33 = vmax.f32 %v14604_v3, 0.0  ;;  %v14615_v53 = vadd.f32 %v5091_v7, %v16828_v22  ;;  %v11220_v58 = vpop.f32.mrb[20].mxu0 }
 0x560   :  { %16826 = vst [vmem:[#allocation28_spill] sm:$0xff] %v14610_v10  ;;  %5144 = vst.msk [vmem:[#allocation3 + $0x31] sm:$0xff] %vm114_vm4, %v16682_v15  ;;  %v16678_v36 = vmax.f32 %v14610_v10, 0.0  ;;  %v5074_v21 = vmul.f32 %v11220_v58, %v14584_v29  ;;  %v4999_v14 = vpop.f32.mrb[21].mxu0 }
 0x561   :  { %16829 = vst [vmem:[#allocation29_spill] sm:$0xff] %v14615_v53  ;;  %5142 = vst.msk [vmem:[#allocation3 + $0x11] sm:$0xff] %vm114_vm4, %v16681_v33  ;;  %v16677_v19 = vmax.f32 %v14615_v53, 0.0  ;;  %v5072_v52 = vmul.f32 %v14584_v29, %v4999_v14  ;;  %v11221_v37 = vpop.f32.mrb[22].mxu0 }
 0x562   :  { %5145 = vst.msk [vmem:[#allocation3 + $0x41] sm:$0xff] %vm114_vm4, %v16678_v36  ;;  %v5096_v16 = vadd.f32 %v14589_v34, %v5074_v21  ;;  %v5075_v59 = vmul.f32 %v11221_v37, %v14584_v29  ;;  %v5002_v39 = vpop.f32.mrb[23].mxu0  ;;  %v16861_v36 = vld [vmem:[#allocation25_spill] sm:$0xff] }
 0x563   :  { %5143 = vst.msk [vmem:[#allocation3 + $0x21] sm:$0xff] %vm114_vm4, %v16677_v19  ;;  %v5094_v48 = vadd.f32 %v14589_v34, %v5072_v52  ;;  %v5073_v9 = vmul.f32 %v14584_v29, %v5002_v39 }
 0x564   :  { %v14643_v51 = vadd.f32 %v5096_v16, %v16831_v25  ;;  %v5097_v49 = vadd.f32 %v14589_v34, %v5075_v59  ;;  %v16842_v59 = vld [vmem:[#allocation18_spill] sm:$0xff] }
 0x565   :  { %v14650_v40 = vadd.f32 %v5094_v48, %v16834_v41  ;;  %v5095_v28 = vadd.f32 %v14589_v34, %v5073_v9  ;;  %v16843_v39 = vmax.f32 %v16842_v59, 0.0 }
 0x566   :  { %16832 = vst [vmem:[#allocation30_spill] sm:$0xff] %v14643_v51  ;;  %v16676_v4 = vmax.f32 %v14643_v51, 0.0  ;;  %v14656_v5 = vadd.f32 %v5097_v49, %v16837_v11  ;;  %v16845_v49 = vld [vmem:[#allocation19_spill] sm:$0xff]  ;;  %v16683_v11 = vrot.slane %v14689_v46, 1 }
 0x567   :  { %16835 = vst [vmem:[#allocation31_spill] sm:$0xff] %v14650_v40  ;;  %v16672_v54 = vmax.f32 %v14650_v40, 0.0  ;;  %v14661_v26 = vadd.f32 %v5095_v28, %v16840_v30  ;;  %v11224_v42 = vpop.f32.mrb[24].mxu0  ;;  %v14663_v63 = vld [vmem:[#allocation3 + $0x30] sm:$0xff]  ;;  %v14665_v43 = vld [vmem:[#allocation3 + $0x38] sm:$0x3] }
 0x568   :  { %16838 = vst [vmem:[#allocation10_spill] sm:$0xff] %v14656_v5  ;;  %5148 = vst.msk [vmem:[#allocation3 + $0x71] sm:$0xff] %vm114_vm4, %v16676_v4  ;;  %v16674_v44 = vmax.f32 %v14656_v5, 0.0  ;;  %v5078_v17 = vmul.f32 %v11224_v42, %v14584_v29  ;;  %v5015_v45 = vpop.f32.mrb[25].mxu0  ;;  %v14672_v50 = vld [vmem:[#allocation3 + $0x10] sm:$0xff]  ;;  %v5236_v38 = vrot.slane %v14663_v63, 1 }
 0x569   :  { %16841 = vst [vmem:[#allocation12_spill] sm:$0xff] %v14661_v26  ;;  %v14674_v0 = vld [vmem:[#allocation3 + $0x18] sm:$0x3]  ;;  %5146 = vst.msk [vmem:[#allocation3 + $0x51] sm:$0xff] %vm114_vm4, %v16672_v54  ;;  %v16671_v56 = vmax.f32 %v14661_v26, 0.0  ;;  %v5076_v12 = vmul.f32 %v14584_v29, %v5015_v45  ;;  %v11225_v23 = vpop.f32.mrb[26].mxu0 }
 0x56a   :  { %v5230_v62 = vrot.slane %v14672_v50, 1  ;;  %v5231_v61 = vrot.slane %v14674_v0, 1  ;;  %v14687_v27 = vld [vmem:[#allocation3 + $0x40] sm:$0xff]  ;;  %5149 = vst.msk [vmem:[#allocation3 + $0x81] sm:$0xff] %vm114_vm4, %v16674_v44  ;;  %v5100_v24 = vadd.f32 %v14589_v34, %v5078_v17  ;;  %v5079_v7 = vmul.f32 %v11225_v23, %v14584_v29  ;;  %v5018_v13 = vpop.f32.mrb[27].mxu0  ;;  %v16848_v30 = vld [vmem:[#allocation20_spill] sm:$0xff] }
 0x56b   :  { %v14696_v57 = vld [vmem:[#allocation3 + $0x20] sm:$0xff]  ;;  %v14698_v1 = vld [vmem:[#allocation3 + $0x28] sm:$0x3]  ;;  %v5237_v22 = vrot.slane %v14665_v43, 1  ;;  %v5239_v58 = vrot.slane %v14687_v27, 1  ;;  %5147 = vst.msk [vmem:[#allocation3 + $0x61] sm:$0xff] %vm114_vm4, %v16671_v56  ;;  %v5098_v21 = vadd.f32 %v14589_v34, %v5076_v12  ;;  %v5077_v14 = vmul.f32 %v14584_v29, %v5018_v13 }
 0x56c   :  { %v14708_v52 = vsel %vm258_vm2, %v5230_v62, %v5231_v61  ;;  %v5233_v37 = vrot.slane %v14696_v57, 1  ;;  %v14711_v16 = vld [vmem:[#allocation3 + $0x48] sm:$0x3]  ;;  %v14715_v48 = vadd.f32 %v5100_v24, %v16843_v39  ;;  %v5101_v9 = vadd.f32 %v14589_v34, %v5079_v7  ;;  %v16851_v23 = vld [vmem:[#allocation21_spill] sm:$0xff] }
 0x56d   :  { %v5307_v6 = vpack.c.bf16 %v14708_v52, %v5229_v47  ;;  %v5234_v25 = vrot.slane %v14698_v1, 1  ;;  %v16846_v32 = vmax.f32 %v16845_v49, 0.0  ;;  %v5099_v41 = vadd.f32 %v14589_v34, %v5077_v14  ;;  %v14805_v56 = vld [vmem:[%s16746_s28 + $0x140] sm:$0xff]  }
 0x56e   :  { %16844 = vst [vmem:[#allocation11_spill] sm:$0xff] %v14715_v48  ;;  %v5240_v28 = vrot.slane %v14711_v16, 1  ;;  %v16670_v2 = vmax.f32 %v14715_v48, 0.0  ;;  %v16849_v42 = vmax.f32 %v16848_v30, 0.0  ;;  %v14739_v47 = vsel %vm258_vm2, %v5236_v38, %v5237_v22  ;;  %v12313_v38 = vld [vmem:[%s16746_s28 + $0x128] sm:$0xff]  }
 0x56f   :  { %v14722_v55 = vadd.f32 %v5098_v21, %v16846_v32  ;;  %11234 = vmatprep.mubr.msk.bf16.mxu1 %vm114_vm4, %v5307_v6  ;;  %v14736_v45 = vsel %vm258_vm2, %v5233_v37, %v5234_v25  ;;  %v16852_v62 = vmax.f32 %v16851_v23, 0.0  ;;  %v11228_v24 = vpop.f32.mrb[28].mxu0  ;;  %v14753_v21 = vld [vmem:[#allocation3 + $0x70] sm:$0xff]  ;;  %v14755_v14 = vld [vmem:[#allocation3 + $0x78] sm:$0x3]  ;;  %v5276_v6 = vrot.slane %v14726_v35, 1 }
 0x570   :  { %v14732_v17 = vadd.f32 %v5101_v9, %v16849_v42  ;;  %v14748_v7 = vpack.c.bf16 %v14739_v47, %v14736_v45  ;;  %v14751_v13 = vsel %vm258_vm2, %v5239_v58, %v5240_v28  ;;  %5152 = vst.msk [vmem:[#allocation3 + $0xd1] sm:$0xff] %vm114_vm4, %v16670_v2  ;;  %v5082_v37 = vmul.f32 %v11228_v24, %v14584_v29  ;;  %v5031_v59 = vpop.f32.mrb[29].mxu0  ;;  %v14765_v39 = vld [vmem:[#allocation3 + $0x50] sm:$0xff]  ;;  %v14767_v58 = vld [vmem:[#allocation3 + $0x58] sm:$0x3]  ;;  %v16854_v54 = vld [vmem:[#allocation22_spill] sm:$0xff] }
 0x571   :  { %16847 = vst [vmem:[#allocation13_spill] sm:$0xff] %v14722_v55  ;;  %v16669_v12 = vmax.f32 %v14722_v55, 0.0  ;;  %v14744_v61 = vadd.f32 %v5099_v41, %v16852_v62  ;;  %v5080_v49 = vmul.f32 %v14584_v29, %v5031_v59  ;;  %v11229_v32 = vpop.f32.mrb[30].mxu0  ;;  %v5242_v41 = vrot.slane %v14765_v39, 1 }
 0x572   :  { %16850 = vst [vmem:[#allocation14_spill] sm:$0xff] %v14732_v17  ;;  %v16673_v22 = vmax.f32 %v14732_v17, 0.0  ;;  %11235 = vmatmul.mubr.msk.bf16.vlgmr.msra.gmra.mrb[32].mxu1 %vm114_vm4, %v14748_v7  ;;  %v5243_v28 = vrot.slane %v14767_v58, 1  ;;  %v5104_v30 = vadd.f32 %v14589_v34, %v5082_v37  ;;  %v5083_v42 = vmul.f32 %v11229_v32, %v14584_v29  ;;  %v5034_v23 = vpop.f32.mrb[31].mxu0  ;;  %v14787_v62 = vld [vmem:[#allocation3 + $0x60] sm:$0xff] }
 0x573   :  { %16853 = vst [vmem:[#allocation15_spill] sm:$0xff] %v14744_v61  ;;  %5150 = vst.msk [vmem:[#allocation3 + $0xb1] sm:$0xff] %vm114_vm4, %v16669_v12  ;;  %v16675_v25 = vmax.f32 %v14744_v61, 0.0  ;;  %11251 = vmatpush3.bf16.msra.mxu1 %v14578_v31  ;;  %v14789_v24 = vld [vmem:[#allocation3 + $0x68] sm:$0x3]  ;;  %v5248_v59 = vrot.slane %v14753_v21, 1  ;;  %v5102_v2 = vadd.f32 %v14589_v34, %v5080_v49  ;;  %v5081_v37 = vmul.f32 %v14584_v29, %v5034_v23 }
 0x574   :  { %5153 = vst.msk [vmem:[#allocation3 + $0xe1] sm:$0xff] %vm114_vm4, %v16673_v22  ;;  %v5249_v12 = vrot.slane %v14755_v14, 1  ;;  %v14799_v31 = vsel %vm258_vm2, %v5242_v41, %v5243_v28  ;;  %v5245_v32 = vrot.slane %v14787_v62, 1  ;;  %11252 = vmatprep.subr.bf16.mxu1 %v12313_v38  ;;  %v16855_v22 = vmax.f32 %v16854_v54, 0.0  ;;  %v16858_v41 = vld [vmem:[#allocation24_spill] sm:$0xff] }
 0x575   :  { %5151 = vst.msk [vmem:[#allocation3 + $0xc1] sm:$0xff] %vm114_vm4, %v16675_v25  ;;  %v5105_v25 = vadd.f32 %v14589_v34, %v5083_v42  ;;  %v14814_v29 = vpack.c.bf16 %v14799_v31, %v14751_v13  ;;  %v5246_v49 = vrot.slane %v14789_v24, 1  ;;  %v16859_v28 = vmax.f32 %v16858_v41, 0.0  ;;  %v16864_v41 = vld [vmem:[#allocation26_spill] sm:$0xff] }
 0x576   :  { %v14809_v44 = vadd.f32 %v5104_v30, %v16855_v22  ;;  %v5103_v4 = vadd.f32 %v14589_v34, %v5081_v37  ;;  %v16862_v54 = vmax.f32 %v16861_v36, 0.0  ;;  %v14833_v42 = vsel %vm258_vm2, %v5248_v59, %v5249_v12 }
 0x577   :  { %16857 = vst [vmem:[#allocation17_spill] sm:$0xff] %v14814_v29  ;;  %v14819_v23 = vadd.f32 %v5102_v2, %v16859_v28  ;;  %11238 = vmatprep.mubr.msk.bf16.mxu1 %vm114_vm4, %v14814_v29  ;;  %v14830_v30 = vsel %vm258_vm2, %v5245_v32, %v5246_v49  ;;  %11253 = vmatpush3.bf16.msra.mxu1 %v12313_v38  ;;  %v16865_v34 = vmax.f32 %v16864_v41, 0.0  ;;  %v14846_v28 = vld [vmem:[#allocation3 + $0xd8] sm:$0x3]  ;;  %v5599_v48 = vrot.slane %v14711_v16, 2 }
 0x578   :  { %16856 = vst [vmem:[#allocation16_spill] sm:$0xff] %v14809_v44  ;;  %v16679_v19 = vmax.f32 %v14809_v44, 0.0  ;;  %v14825_v22 = vadd.f32 %v5105_v25, %v16862_v54  ;;  %v14842_v36 = vpack.c.bf16 %v14833_v42, %v14830_v30  ;;  %v14844_v25 = vld [vmem:[#allocation3 + $0xd0] sm:$0xff]  ;;  %11270 = vmatprep.subr.bf16.mxu1 %v14805_v56  ;;  %v5277_v59 = vsel %vm258_vm2, %v16683_v11, %v5276_v6 }
 0x579   :  { %16860 = vst [vmem:[#allocation18_spill] sm:$0xff] %v14819_v23  ;;  %v16680_v2 = vmax.f32 %v14819_v23, 0.0  ;;  %v14838_v37 = vadd.f32 %v5103_v4, %v16865_v34  ;;  %v5284_v32 = vrot.slane %v14844_v25, 1  ;;  %v5285_v34 = vrot.slane %v14846_v28, 1 }
 0x57a   :  { %16863 = vst [vmem:[#allocation19_spill] sm:$0xff] %v14825_v22  ;;  %16867 = vst [vmem:[#allocation21_spill] sm:$0xff] %v14842_v36  ;;  %v16685_v12 = vmax.f32 %v14825_v22, 0.0  ;;  %v14853_v38 = vld [vmem:[#allocation3 + $0xb0] sm:$0xff]  ;;  %v14855_v4 = vld [vmem:[#allocation3 + $0xb8] sm:$0x3]  ;;  %11239 = vmatmul.mubr.msk.bf16.gmra.mrb[36].mxu1 %vm114_vm4, %v14842_v36 }
 0x57b   :  { %16866 = vst [vmem:[#allocation20_spill] sm:$0xff] %v14838_v37  ;;  %5156 = vst.msk [vmem:[#allocation3 + $0x111] sm:$0xff] %vm114_vm4, %v16679_v19  ;;  %v16687_v49 = vmax.f32 %v14838_v37, 0.0  ;;  %v5278_v54 = vrot.slane %v14853_v38, 1  ;;  %v5279_v41 = vrot.slane %v14855_v4, 1  ;;  %v14886_v20 = vld [vmem:[#allocation3 + $0xe0] sm:$0xff]  ;;  %v14894_v55 = vsel %vm258_vm2, %v5284_v32, %v5285_v34 }
 0x57c   :  { %5154 = vst.msk [vmem:[#allocation3 + $0xf1] sm:$0xff] %vm114_vm4, %v16680_v2  ;;  %5157 = vst.msk [vmem:[#allocation3 + $0x121] sm:$0xff] %vm114_vm4, %v16685_v12  ;;  %v14873_v6 = vld [vmem:[#allocation3 + $0xc0] sm:$0xff]  ;;  %v14875_v19 = vld [vmem:[#allocation3 + $0xc8] sm:$0x3]  ;;  %v5593_v17 = vrot.slane %v14698_v1, 2  ;;  %v14971_v1 = vpack.c.bf16 %v14663_v63, %v14696_v57 }
 0x57d   :  { %5155 = vst.msk [vmem:[#allocation3 + $0x101] sm:$0xff] %vm114_vm4, %v16687_v49  ;;  %v14881_v2 = vsel %vm258_vm2, %v5278_v54, %v5279_v41  ;;  %v5281_v33 = vrot.slane %v14873_v6, 1  ;;  %v5282_v15 = vrot.slane %v14875_v19, 1  ;;  %v14888_v12 = vld [vmem:[#allocation3 + $0xe8] sm:$0x3]  ;;  %v5595_v49 = vrot.slane %v14663_v63, 2 }
 0x57e   :  { %v5311_v11 = vpack.c.bf16 %v14881_v2, %v5277_v59  ;;  %v5596_v59 = vrot.slane %v14665_v43, 2  ;;  %v5598_v41 = vrot.slane %v14687_v27, 2  ;;  %v5605_v10 = vrot.slane %v14789_v24, 2 }
 0x57f   :  { %v14891_v9 = vsel %vm258_vm2, %v5281_v33, %v5282_v15  ;;  %v5287_v15 = vrot.slane %v14886_v20, 1  ;;  %v5288_v33 = vrot.slane %v14888_v12, 1  ;;  %v5625_v3 = vrot.slane %v14875_v19, 2 }
 0x580   :  { %11242 = vmatprep.mubr.msk.bf16.mxu1 %vm114_vm4, %v5311_v11  ;;  %v14900_v54 = vpack.c.bf16 %v14894_v55, %v14891_v9  ;;  %v14917_v43 = vsel %vm604_vm3, %v5598_v41, %v5599_v48  ;;  %v14925_v23 = vsel %vm604_vm3, %v5595_v49, %v5596_v59  ;;  %v5630_v19 = vrot.slane %v14886_v20, 2 }
 0x581   :  { %v14932_v48 = vsel %vm258_vm2, %v5287_v15, %v5288_v33  ;;  %v5589_v15 = vrot.slane %v14672_v50, 2  ;;  %v5590_v33 = vrot.slane %v14674_v0, 2  ;;  %v5624_v0 = vrot.slane %v14873_v6, 2 }
 0x582   :  { %16868 = vst [vmem:[#allocation22_spill] sm:$0xff] %v14900_v54  ;;  %v14907_v32 = vld [vmem:[#allocation3 + $0x110] sm:$0xff]  ;;  %v14909_v34 = vld [vmem:[#allocation3 + $0x118] sm:$0x3]  ;;  %11243 = vmatmul.mubr.msk.bf16.gmra.mrb[40].mxu1 %vm114_vm4, %v14900_v54  ;;  %v5622_v54 = vrot.slane %v14855_v4, 2  ;;  %v5986_v4 = vpack.c.bf16 %v14736_v45, %v14708_v52  ;;  %v12322_v52 = vld [vmem:[%s16746_s28 + $0x180] sm:$0xff]  }
 0x583   :  { %v14911_v37 = vld [vmem:[#allocation3 + $0xf0] sm:$0xff]  ;;  %v14913_v11 = vld [vmem:[#allocation3 + $0xf8] sm:$0x3]  ;;  %v5296_v22 = vrot.slane %v14907_v32, 1  ;;  %v5297_v40 = vrot.slane %v14909_v34, 1  ;;  %v14978_v60 = vsel %vm604_vm3, %v5589_v15, %v5590_v33  ;;  %v5627_v33 = vrot.slane %v14844_v25, 2 }
 0x584   :  { %v5290_v16 = vrot.slane %v14911_v37, 1  ;;  %v5291_v26 = vrot.slane %v14913_v11, 1  ;;  %v14927_v61 = vld [vmem:[#allocation3 + $0x100] sm:$0xff]  ;;  %v5191_v44 = vld [vmem:[#allocation3 + $0x108] sm:$0x3] }
 0x585   :  { %v5293_v5 = vrot.slane %v14927_v61, 1  ;;  %v5294_v51 = vrot.slane %v5191_v44, 1  ;;  %v14946_v59 = vsel %vm258_vm2, %v5296_v22, %v5297_v40  ;;  %v5602_v40 = vrot.slane %v14767_v58, 2 }
 0x586   :  { %v14935_v41 = vsel %vm258_vm2, %v5290_v16, %v5291_v26  ;;  %v5592_v16 = vrot.slane %v14696_v57, 2  ;;  %v5604_v22 = vrot.slane %v14787_v62, 2  ;;  %v14975_v58 = vpack.c.bf16 %v14765_v39, %v14687_v27 }
 0x587   :  { %v14940_v53 = vpack.c.bf16 %v14935_v41, %v14932_v48  ;;  %v14943_v49 = vsel %vm258_vm2, %v5293_v5, %v5294_v51  ;;  %v5601_v51 = vrot.slane %v14765_v39, 2  ;;  %v5198_v5 = vpack.c.bf16 %v14672_v50, %v14627_v8 }
 0x588   :  { %v14952_v26 = vpack.c.bf16 %v14946_v59, %v14943_v49  ;;  %v5636_v36 = vrot.slane %v14927_v61, 2  ;;  %v5637_v29 = vrot.slane %v5191_v44, 2  ;;  %v14992_v15 = vsel %vm604_vm3, %v5604_v22, %v5605_v10  ;;  %v12315_v10 = vld [vmem:[%s16746_s28 + $0x148] sm:$0xff]   ;;  %v12318_v44 = vld [vmem:[%s16746_s28 + $0x160] sm:$0xff]  }
 0x589   :  { %16869 = vst [vmem:[#allocation24_spill] sm:$0xff] %v14940_v53  ;;  %11246 = vmatprep.mubr.msk.bf16.mxu1 %vm114_vm4, %v14940_v53  ;;  %v14984_v24 = vsel %vm604_vm3, %v5601_v51, %v5602_v40  ;;  %v5621_v53 = vrot.slane %v14853_v38, 2  ;;  %v5633_v51 = vrot.slane %v14911_v37, 2 }
 0x58a   :  { %16870 = vst [vmem:[#allocation25_spill] sm:$0xff] %v14952_v26  ;;  %11247 = vmatmul.mubr.msk.bf16.gmra.mrb[44].mxu1 %vm114_vm4, %v14952_v26  ;;  %v14981_v26 = vsel %vm604_vm3, %v5592_v16, %v5593_v17  ;;  %v14995_v17 = vsel %vm604_vm3, %v5624_v0, %v5625_v3  ;;  %v5628_v16 = vrot.slane %v14846_v28, 2  ;;  %v15021_v0 = vsel %vm604_vm3, %v5636_v36, %v5637_v29  ;;  %v12316_v36 = vld [vmem:[%s16746_s28 + $0x150] sm:$0xff]  }
 0x58b   :  { %11254 = vmatprep.mubr.msk.bf16.mxu1 %vm114_vm4, %v5198_v5  ;;  %v5631_v5 = vrot.slane %v14888_v12, 2  ;;  %v5634_v12 = vrot.slane %v14913_v11, 2  ;;  %v15018_v22 = vsel %vm604_vm3, %v5621_v53, %v5622_v54  ;;  %v15075_v54 = vpack.c.bf16 %v14907_v32, %v14927_v61  ;;  %v12317_v11 = vld [vmem:[%s16746_s28 + $0x158] sm:$0xff]  }
 0x58d   :  { %v15009_v3 = vsel %vm604_vm3, %v5630_v19, %v5631_v5  ;;  %v15030_v5 = vsel %vm604_vm3, %v5627_v33, %v5628_v16  ;;  %v15038_v53 = vsel %vm604_vm3, %v5633_v51, %v5634_v12  ;;  %v5202_v33 = vpack.c.bf16 %v14853_v38, %v14689_v46 }
 0x58e   :  { %v15058_v16 = vpack.c.bf16 %v14844_v25, %v14873_v6  ;;  %v15062_v51 = vpack.c.bf16 %v14911_v37, %v14886_v20  ;;  %v16708_v12 = vrot.slane %v14627_v8, 2  ;;  %v5608_v19 = vrot.slane %v14755_v14, 2 }
 0x592   :  { %11255 = vmatmul.mubr.msk.bf16.vlgmr.msra.gmra.mrb[32].mxu1 %vm114_vm4, %v14971_v1 }
 0x593   :  { %11271 = vmatpush3.bf16.msra.mxu1 %v14805_v56  ;;  %11258 = vmatprep.mubr.msk.bf16.mxu1 %vm114_vm4, %v14975_v58  ;;  %v15049_v56 = vpack.c.bf16 %v14753_v21, %v14787_v62 }
 0x594   :  { %11272 = vmatprep.subr.bf16.mxu1 %v12315_v10 }
 0x597   :  { %11273 = vmatpush3.bf16.msra.mxu1 %v12315_v10  ;;  %v5587_v10 = vrot.slane %v14629_v18, 2  ;;  %v15083_v18 = vpack.c.bf16 %v14925_v23, %v14981_v26 }
 0x598   :  { %11290 = vmatprep.subr.bf16.mxu1 %v12316_v36 }
 0x59a   :  { %11259 = vmatmul.mubr.msk.bf16.gmra.mrb[36].mxu1 %vm114_vm4, %v15049_v56 }
 0x59b   :  { %11262 = vmatprep.mubr.msk.bf16.mxu1 %vm114_vm4, %v5202_v33  ;;  %v5588_v33 = vsel %vm604_vm3, %v16708_v12, %v5587_v10  ;;  %v15090_v10 = vpack.c.bf16 %v14984_v24, %v14917_v43  ;;  %v5619_v12 = vrot.slane %v14726_v35, 2 }
 0x59c   :  { %v5650_v29 = vpack.c.bf16 %v14978_v60, %v5588_v33  ;;  %v16709_v33 = vrot.slane %v14689_v46, 2 }
 0x59e   :  { %v5620_v40 = vsel %vm604_vm3, %v16709_v33, %v5619_v12  ;;  %v5813_v33 = vpack.c.bf16 %v14687_v27, %v14663_v63  ;;  %v5816_v27 = vpack.c.bf16 %v14873_v6, %v14853_v38  ;;  %v16871_v38 = vpack.c.bf16 %v14751_v13, %v14739_v47 }
 0x59f   :  { %v5654_v14 = vpack.c.bf16 %v15018_v22, %v5620_v40  ;;  %v5639_v40 = vrot.slane %v14907_v32, 2  ;;  %v16872_v6 = vpack.c.bf16 %v14830_v30, %v14799_v31  ;;  %v16873_v13 = vpack.c.bf16 %v14891_v9, %v14881_v2  ;;  %v5195_v31 = vld [vmem:[#allocation3 + $0x128] sm:$0x3]  ;;  %v12328_v2 = vld [vmem:[%s16746_s28 + $0x1c0] sm:$0xff]  }
 0x5a0   :  { %11410 = vmatprep.subr.bf16.mxu0 %v12328_v2 }
 0x5a1   :  { %11411 = vmatpush3.bf16.msra.mxu0 %v12328_v2 }
 0x5a2   :  { %11263 = vmatmul.mubr.msk.bf16.gmra.mrb[40].mxu1 %vm114_vm4, %v15058_v16 }
 0x5a3   :  { %11266 = vmatprep.mubr.msk.bf16.mxu1 %vm114_vm4, %v15062_v51 }
 0x5aa   :  { %11267 = vmatmul.mubr.msk.bf16.gmra.mrb[44].mxu1 %vm114_vm4, %v15075_v54 }
 0x5ab   :  { %11274 = vmatprep.mubr.msk.bf16.mxu1 %vm114_vm4, %v5650_v29  ;;  %v5607_v29 = vrot.slane %v14753_v21, 2 }
 0x5ad   :  { %v15107_v28 = vsel %vm604_vm3, %v5607_v29, %v5608_v19  ;;  %v15123_v19 = vpack.c.bf16 %v15038_v53, %v15009_v3 }
 0x5ae   :  { %v15111_v35 = vpack.c.bf16 %v15107_v28, %v14992_v15 }
 0x5b2   :  { %11275 = vmatmul.mubr.msk.bf16.vlgmr.msra.gmra.mrb[32].mxu1 %vm114_vm4, %v15083_v18 }
 0x5b3   :  { %11291 = vmatpush3.bf16.msra.mxu1 %v12316_v36  ;;  %11278 = vmatprep.mubr.msk.bf16.mxu1 %vm114_vm4, %v15090_v10  ;;  %v15119_v36 = vpack.c.bf16 %v15030_v5, %v14995_v17 }
 0x5b4   :  { %11292 = vmatprep.subr.bf16.mxu1 %v12317_v11 }
 0x5b7   :  { %11293 = vmatpush3.bf16.msra.mxu1 %v12317_v11  ;;  %v5640_v11 = vrot.slane %v14909_v34, 2  ;;  %v12319_v34 = vld [vmem:[%s16746_s28 + $0x168] sm:$0xff]  }
 0x5b8   :  { %11310 = vmatprep.subr.bf16.mxu1 %v12318_v44 }
 0x5b9   :  { %v15132_v12 = vsel %vm604_vm3, %v5639_v40, %v5640_v11  ;;  %v5814_v40 = vpack.c.bf16 %v14787_v62, %v14765_v39  ;;  %v5817_v39 = vpack.c.bf16 %v14886_v20, %v14844_v25  ;;  %v5818_v62 = vpack.c.bf16 %v14927_v61, %v14911_v37  ;;  %v5175_v20 = vld [vmem:[#allocation3 + $0x88] sm:$0x3]  ;;  %v12321_v61 = vld [vmem:[%s16746_s28 + $0x178] sm:$0xff]  }
 0x5ba   :  { %11279 = vmatmul.mubr.msk.bf16.gmra.mrb[36].mxu1 %vm114_vm4, %v15111_v35  ;;  %v15136_v29 = vpack.c.bf16 %v15132_v12, %v15021_v0  ;;  %v5977_v25 = vrot.slane %v5175_v20, 1 }
 0x5bb   :  { %11282 = vmatprep.mubr.msk.bf16.mxu1 %vm114_vm4, %v5654_v14  ;;  %v5812_v14 = vpack.c.bf16 %v14696_v57, %v14672_v50  ;;  %v12320_v50 = vld [vmem:[%s16746_s28 + $0x170] sm:$0xff]   ;;  %v15155_v57 = vld [vmem:[#allocation3 + $0x80] sm:$0xff] }
 0x5bc   :  { %v5815_v63 = vpack.c.bf16 %v15155_v57, %v14753_v21  ;;  %v5976_v37 = vrot.slane %v15155_v57, 1 }
 0x5be   :  { %v15194_v45 = vsel %vm258_vm2, %v5976_v37, %v5977_v25 }
 0x5bf   :  { %v5989_v47 = vpack.c.bf16 %v15194_v45, %v14833_v42  ;;  %v16875_v42 = vpack.c.bf16 %v14943_v49, %v14935_v41  ;;  %v6148_v41 = vrot.slane %v15155_v57, 2  ;;  %v6149_v49 = vrot.slane %v5175_v20, 2 }
 0x5c1   :  { %v6150_v11 = vsel %vm604_vm3, %v6148_v41, %v6149_v49 }
 0x5c2   :  { %11283 = vmatmul.mubr.msk.bf16.gmra.mrb[40].mxu1 %vm114_vm4, %v15119_v36 }
 0x5c3   :  { %11286 = vmatprep.mubr.msk.bf16.mxu1 %vm114_vm4, %v15123_v19 }
 0x5ca   :  { %11287 = vmatmul.mubr.msk.bf16.gmra.mrb[44].mxu1 %vm114_vm4, %v15136_v29 }
 0x5cb   :  { %11294 = vmatprep.mubr.msk.bf16.mxu1 %vm114_vm4, %v5812_v14  ;;  %v6159_v14 = vpack.c.bf16 %v6150_v11, %v15107_v28 }
 0x5d2   :  { %11295 = vmatmul.mubr.msk.bf16.vlgmr.msra.gmra.mrb[32].mxu1 %vm114_vm4, %v5813_v33 }
 0x5d3   :  { %11311 = vmatpush3.bf16.msra.mxu1 %v12318_v44  ;;  %11298 = vmatprep.mubr.msk.bf16.mxu1 %vm114_vm4, %v5814_v40  ;;  %v15169_v44 = vld [vmem:[#allocation3 + $0x120] sm:$0xff] }
 0x5d4   :  { %11312 = vmatprep.subr.bf16.mxu1 %v12319_v34  ;;  %v5819_v21 = vpack.c.bf16 %v15169_v44, %v14907_v32  ;;  %v5982_v30 = vrot.slane %v15169_v44, 1  ;;  %v5983_v32 = vrot.slane %v5195_v31, 1 }
 0x5d6   :  { %v15213_v33 = vsel %vm258_vm2, %v5982_v30, %v5983_v32 }
 0x5d7   :  { %11313 = vmatpush3.bf16.msra.mxu1 %v12319_v34  ;;  %v5993_v9 = vpack.c.bf16 %v15213_v33, %v14946_v59  ;;  %v16877_v59 = vpack.c.bf16 %v14917_v43, %v14925_v23  ;;  %v16879_v23 = vpack.c.bf16 %v14995_v17, %v15018_v22  ;;  %v6152_v43 = vrot.slane %v15169_v44, 2  ;;  %v12325_v17 = vld [vmem:[%s16746_s28 + $0x198] sm:$0xff]   ;;  %v15271_v22 = vld [vmem:[#allocation3 + $0x90] sm:$0xff] }
 0x5d8   :  { %11330 = vmatprep.subr.bf16.mxu1 %v12320_v50  ;;  %v16881_v34 = vpack.c.bf16 %v15021_v0, %v15038_v53  ;;  %16882 = vst [vmem:[#allocation26_spill] sm:$0xff] %v15271_v22  ;;  %v12327_v53 = vld [vmem:[%s16746_s28 + $0x1a8] sm:$0xff]   ;;  %v16711_v20 = vrot.slane %v15271_v22, 2 }
 0x5da   :  { %11299 = vmatmul.mubr.msk.bf16.gmra.mrb[36].mxu1 %vm114_vm4, %v5815_v63 }
 0x5db   :  { %11302 = vmatprep.mubr.msk.bf16.mxu1 %vm114_vm4, %v5816_v27 }
 0x5e2   :  { %11303 = vmatmul.mubr.msk.bf16.gmra.mrb[40].mxu1 %vm114_vm4, %v5817_v39  ;;  %v16887_v39 = vld [vmem:[#allocation24_spill] sm:$0xff] }
 0x5e3   :  { %11306 = vmatprep.mubr.msk.bf16.mxu1 %vm114_vm4, %v5818_v62  ;;  %v16888_v62 = vld [vmem:[#allocation25_spill] sm:$0xff] }
 0x5ea   :  { %11307 = vmatmul.mubr.msk.bf16.gmra.mrb[44].mxu1 %vm114_vm4, %v5819_v21 }
 0x5eb   :  { %11314 = vmatprep.mubr.msk.bf16.mxu1 %vm114_vm4, %v5986_v4  ;;  %v16874_v4 = vpack.c.bf16 %v14932_v48, %v14894_v55  ;;  %v16876_v55 = vpack.c.bf16 %v14981_v26, %v14978_v60  ;;  %v12323_v48 = vld [vmem:[%s16746_s28 + $0x188] sm:$0xff]   ;;  %v16878_v60 = vpack.c.bf16 %v14992_v15, %v14984_v24  ;;  %v12324_v26 = vld [vmem:[%s16746_s28 + $0x190] sm:$0xff]   ;;  %v6153_v24 = vrot.slane %v5195_v31, 2 }
 0x5ec   :  { %v16880_v15 = vpack.c.bf16 %v15009_v3, %v15030_v5  ;;  %v12326_v3 = vld [vmem:[%s16746_s28 + $0x1a0] sm:$0xff]   ;;  %v5177_v5 = vld [vmem:[#allocation3 + $0x98] sm:$0x3] }
 0x5ed   :  { %v6154_v28 = vsel %vm604_vm3, %v6152_v43, %v6153_v24 }
 0x5ee   :  { %v6163_v40 = vpack.c.bf16 %v6154_v28, %v15132_v12 }
 0x5f2   :  { %11315 = vmatmul.mubr.msk.bf16.vlgmr.msra.gmra.mrb[32].mxu1 %vm114_vm4, %v16871_v38 }
 0x5f3   :  { %11331 = vmatpush3.bf16.msra.mxu1 %v12320_v50  ;;  %11318 = vmatprep.mubr.msk.bf16.mxu1 %vm114_vm4, %v16872_v6  ;;  %v16886_v50 = vld [vmem:[#allocation22_spill] sm:$0xff]  ;;  %v15353_v6 = vld [vmem:[%s16594_s6 + $0x2] ss:$0 sm:$0xff] }
 0x5f4   :  { %11332 = vmatprep.subr.bf16.mxu1 %v12321_v61 }
 0x5f7   :  { %11333 = vmatpush3.bf16.msra.mxu1 %v12321_v61  ;;  %v6607_v61 = vrot.slane %v5177_v5, 2 }
 0x5f8   :  { %11350 = vmatprep.subr.bf16.mxu1 %v12322_v52 }
 0x5f9   :  { %v6608_v37 = vsel %vm604_vm3, %v16711_v20, %v6607_v61 }
 0x5fa   :  { %11319 = vmatmul.mubr.msk.bf16.gmra.mrb[36].mxu1 %vm114_vm4, %v5989_v47  ;;  %v6614_v25 = vpack.c.bf16 %v6608_v37, %v6150_v11  ;;  %v15367_v11 = vld [vmem:[#allocation3 + $0x8] sm:$0x3] }
 0x5fb   :  { %11322 = vmatprep.mubr.msk.bf16.mxu1 %vm114_vm4, %v16873_v13 }
 0x602   :  { %11323 = vmatmul.mubr.msk.bf16.gmra.mrb[40].mxu1 %vm114_vm4, %v16874_v4 }
 0x603   :  { %11326 = vmatprep.mubr.msk.bf16.mxu1 %vm114_vm4, %v16875_v42 }
 0x60a   :  { %11327 = vmatmul.mubr.msk.bf16.gmra.mrb[44].mxu1 %vm114_vm4, %v5993_v9 }
 0x60b   :  { %11334 = vmatprep.mubr.msk.bf16.mxu1 %vm114_vm4, %v16876_v55 }
 0x612   :  { %11335 = vmatmul.mubr.msk.bf16.vlgmr.msra.gmra.mrb[32].mxu1 %vm114_vm4, %v16877_v59 }
 0x613   :  { %11351 = vmatpush3.bf16.msra.mxu1 %v12322_v52  ;;  %11338 = vmatprep.mubr.msk.bf16.mxu1 %vm114_vm4, %v16878_v60 }
 0x614   :  { %11352 = vmatprep.subr.bf16.mxu1 %v12323_v48 }
 0x617   :  { %11353 = vmatpush3.bf16.msra.mxu1 %v12323_v48 }
 0x618   :  { %11370 = vmatprep.subr.bf16.mxu1 %v12324_v26 }
 0x61a   :  { %11339 = vmatmul.mubr.msk.bf16.gmra.mrb[36].mxu1 %vm114_vm4, %v6159_v14 }
 0x61b   :  { %11342 = vmatprep.mubr.msk.bf16.mxu1 %vm114_vm4, %v16879_v23 }
 0x622   :  { %11343 = vmatmul.mubr.msk.bf16.gmra.mrb[40].mxu1 %vm114_vm4, %v16880_v15 }
 0x623   :  { %11346 = vmatprep.mubr.msk.bf16.mxu1 %vm114_vm4, %v16881_v34 }
 0x62a   :  { %11347 = vmatmul.mubr.msk.bf16.gmra.mrb[44].mxu1 %vm114_vm4, %v6163_v40  ;;  %v6902_v40 = vrot.slane %v15367_v11, 1 }
 0x62b   :  { %11354 = vmatprep.mubr.msk.bf16.mxu1 %vm114_vm4, %v14971_v1  ;;  %v6318_v1 = vpack.c.bf16 %v15271_v22, %v15155_v57  ;;  %v5197_v57 = vld [vmem:[#allocation3 + $0x138] sm:$0x3] }
 0x62c   :  { %v6465_v27 = vrot.slane %v5197_v57, 1  ;;  %v6611_v38 = vrot.slane %v5197_v57, 2 }
 0x632   :  { %11355 = vmatmul.mubr.msk.bf16.vlgmr.msra.gmra.mrb[32].mxu1 %vm114_vm4, %v14975_v58  ;;  %v15282_v58 = vld [vmem:[#allocation3 + $0x130] sm:$0xff] }
 0x633   :  { %11371 = vmatpush3.bf16.msra.mxu1 %v12324_v26  ;;  %11358 = vmatprep.mubr.msk.bf16.mxu1 %vm114_vm4, %v15049_v56  ;;  %16883 = vst [vmem:[#allocation32_spill] sm:$0xff] %v15282_v58  ;;  %v6319_v0 = vpack.c.bf16 %v15282_v58, %v15169_v44  ;;  %v16713_v56 = vrot.slane %v15271_v22, 1  ;;  %v16712_v63 = vrot.slane %v15282_v58, 1 }
 0x634   :  { %11372 = vmatprep.subr.bf16.mxu1 %v12325_v17 }
 0x635   :  { %v6466_v44 = vsel %vm258_vm2, %v16712_v63, %v6465_v27  ;;  %v16889_v27 = vrot.slane %v14627_v8, 1 }
 0x636   :  { %v6469_v21 = vpack.c.bf16 %v6466_v44, %v15213_v33 }
 0x637   :  { %11373 = vmatpush3.bf16.msra.mxu1 %v12325_v17 }
 0x638   :  { %11390 = vmatprep.subr.bf16.mxu1 %v12326_v3 }
 0x63a   :  { %11359 = vmatmul.mubr.msk.bf16.gmra.mrb[36].mxu1 %vm114_vm4, %v6318_v1 }
 0x63b   :  { %11362 = vmatprep.mubr.msk.bf16.mxu1 %vm114_vm4, %v15058_v16  ;;  %v6459_v16 = vrot.slane %v5177_v5, 1 }
 0x642   :  { %11363 = vmatmul.mubr.msk.bf16.gmra.mrb[40].mxu1 %vm114_vm4, %v15062_v51  ;;  %v16884_v51 = vld [vmem:[#allocation17_spill] sm:$0xff] }
 0x643   :  { %11366 = vmatprep.mubr.msk.bf16.mxu1 %vm114_vm4, %v15075_v54  ;;  %v16885_v54 = vld [vmem:[#allocation21_spill] sm:$0xff] }
 0x64a   :  { %11367 = vmatmul.mubr.msk.bf16.gmra.mrb[44].mxu1 %vm114_vm4, %v6319_v0 }
 0x64b   :  { %11374 = vmatprep.mubr.msk.bf16.mxu1 %vm114_vm4, %v14748_v7  ;;  %v6460_v7 = vsel %vm258_vm2, %v16713_v56, %v6459_v16  ;;  %v12374_v56 = vld [vmem:[#allocation3] sm:$0xff] }
 0x64c   :  { %v6468_v12 = vpack.c.bf16 %v6460_v7, %v15194_v45 }
 0x652   :  { %11375 = vmatmul.mubr.msk.bf16.vlgmr.msra.gmra.mrb[32].mxu1 %vm114_vm4, %v16884_v51 }
 0x653   :  { %11391 = vmatpush3.bf16.msra.mxu1 %v12326_v3  ;;  %11378 = vmatprep.mubr.msk.bf16.mxu1 %vm114_vm4, %v16885_v54 }
 0x654   :  { %11392 = vmatprep.subr.bf16.mxu1 %v12327_v53 }
 0x657   :  { %11393 = vmatpush3.bf16.msra.mxu1 %v12327_v53 }
 0x65a   :  { %11379 = vmatmul.mubr.msk.bf16.gmra.mrb[36].mxu1 %vm114_vm4, %v6468_v12 }
 0x65b   :  { %11382 = vmatprep.mubr.msk.bf16.mxu1 %vm114_vm4, %v16886_v50 }
 0x662   :  { %11383 = vmatmul.mubr.msk.bf16.gmra.mrb[40].mxu1 %vm114_vm4, %v16887_v39  ;;  %v6903_v39 = vsel %vm258_vm2, %v16889_v27, %v6902_v40 }
 0x663   :  { %11386 = vmatprep.mubr.msk.bf16.mxu1 %vm114_vm4, %v16888_v62 }
 0x66a   :  { %11387 = vmatmul.mubr.msk.bf16.gmra.mrb[44].mxu1 %vm114_vm4, %v6469_v21 }
 0x66b   :  { %11394 = vmatprep.mubr.msk.bf16.mxu1 %vm114_vm4, %v15083_v18  ;;  %v16710_v18 = vrot.slane %v15282_v58, 2 }
 0x672   :  { %11395 = vmatmul.mubr.msk.bf16.vlgmr.msra.gmra.mrb[32].mxu1 %vm114_vm4, %v15090_v10  ;;  %v6612_v10 = vsel %vm604_vm3, %v16710_v18, %v6611_v38 }
 0x673   :  { %11398 = vmatprep.mubr.msk.bf16.mxu1 %vm114_vm4, %v15111_v35  ;;  %v6615_v35 = vpack.c.bf16 %v6612_v10, %v6154_v28 }
 0x67a   :  { %11399 = vmatmul.mubr.msk.bf16.gmra.mrb[36].mxu1 %vm114_vm4, %v6614_v25 }
 0x67b   :  { %11402 = vmatprep.mubr.msk.bf16.mxu1 %vm114_vm4, %v15119_v36  ;;  %v12329_v36 = vld [vmem:[%s16746_s28 + $0x1c8] sm:$0xff]  }
 0x67c   :  { %11412 = vmatprep.subr.bf16.mxu0 %v12329_v36 }
 0x67d   :  { %11413 = vmatpush3.bf16.msra.mxu0 %v12329_v36 }
 0x682   :  { %11403 = vmatmul.mubr.msk.bf16.gmra.mrb[40].mxu1 %vm114_vm4, %v15123_v19  ;;  %v15342_v19 = vld [vmem:[%s16746_s28 + $0x1b0] sm:$0xff]  }
 0x683   :  { %11406 = vmatprep.mubr.msk.bf16.mxu1 %vm114_vm4, %v15136_v29  ;;  %11430 = vmatprep.subr.bf16.mxu0 %v15342_v19  ;;  %v15348_v29 = vld [vmem:[%s16593_s5 + $0x2] ss:$0 sm:$0xff] }
 0x68a   :  { %11407 = vmatmul.mubr.msk.bf16.gmra.mrb[44].mxu1 %vm114_vm4, %v6615_v35 }
 0x745   :  { %v11396_v52 = vpop.f32.mrb[32].mxu1 }
 0x746   :  { %v6760_v45 = vmul.f32 %v11396_v52, %v15348_v29  ;;  %v6673_v47 = vpop.f32.mrb[33].mxu1 }
 0x747   :  { %v6758_v13 = vmul.f32 %v15348_v29, %v6673_v47  ;;  %v11397_v31 = vpop.f32.mrb[34].mxu1 }
 0x748   :  { %v6782_v30 = vadd.f32 %v15353_v6, %v6760_v45  ;;  %v6761_v32 = vmul.f32 %v11397_v31, %v15348_v29  ;;  %v6676_v4 = vpop.f32.mrb[35].mxu1 }
 0x749   :  { %v6780_v42 = vadd.f32 %v15353_v6, %v6758_v13  ;;  %v6759_v33 = vmul.f32 %v15348_v29, %v6676_v4 }
 0x74a   :  { %v6798_v9 = vmax.f32 %v6782_v30, 0.0  ;;  %v6783_v2 = vadd.f32 %v15353_v6, %v6761_v32 }
 0x74b   :  { %v6796_v55 = vmax.f32 %v6780_v42, 0.0  ;;  %v6781_v48 = vadd.f32 %v15353_v6, %v6759_v33 }
 0x74c   :  { %6818 = vst.msk [vmem:[#allocation3 + $0x31] sm:$0xff] %vm114_vm4, %v6798_v9  ;;  %v6799_v41 = vmax.f32 %v6783_v2, 0.0 }
 0x74d   :  { %6816 = vst.msk [vmem:[#allocation3 + $0x11] sm:$0xff] %vm114_vm4, %v6796_v55  ;;  %v6797_v49 = vmax.f32 %v6781_v48, 0.0  ;;  %v11400_v59 = vpop.f32.mrb[36].mxu1 }
 0x74e   :  { %6819 = vst.msk [vmem:[#allocation3 + $0x41] sm:$0xff] %vm114_vm4, %v6799_v41  ;;  %v6764_v60 = vmul.f32 %v11400_v59, %v15348_v29  ;;  %v6689_v26 = vpop.f32.mrb[37].mxu1 }
 0x74f   :  { %6817 = vst.msk [vmem:[#allocation3 + $0x21] sm:$0xff] %vm114_vm4, %v6797_v49  ;;  %v6762_v14 = vmul.f32 %v15348_v29, %v6689_v26  ;;  %v11401_v23 = vpop.f32.mrb[38].mxu1 }
 0x750   :  { %v6786_v43 = vadd.f32 %v15353_v6, %v6764_v60  ;;  %v6765_v24 = vmul.f32 %v11401_v23, %v15348_v29  ;;  %v6692_v15 = vpop.f32.mrb[39].mxu1  ;;  %v12331_v60 = vld [vmem:[%s16746_s28 + $0x1b8] sm:$0xff]  }
 0x751   :  { %v6784_v34 = vadd.f32 %v15353_v6, %v6762_v14  ;;  %v6763_v28 = vmul.f32 %v15348_v29, %v6692_v15  ;;  %v15444_v15 = vld [vmem:[#allocation3 + $0xa8] sm:$0x3] }
 0x752   :  { %v6802_v17 = vmax.f32 %v6786_v43, 0.0  ;;  %v6787_v3 = vadd.f32 %v15353_v6, %v6765_v24 }
 0x753   :  { %v6800_v1 = vmax.f32 %v6784_v34, 0.0  ;;  %v6785_v0 = vadd.f32 %v15353_v6, %v6763_v28  ;;  %v15378_v5 = vld [vmem:[#allocation3 + $0x30] sm:$0xff]  ;;  %v15380_v53 = vld [vmem:[#allocation3 + $0x38] sm:$0x3] }
 0x754   :  { %6822 = vst.msk [vmem:[#allocation3 + $0x71] sm:$0xff] %vm114_vm4, %v6802_v17  ;;  %v6803_v16 = vmax.f32 %v6787_v3, 0.0  ;;  %v15383_v51 = vld [vmem:[#allocation3 + $0x10] sm:$0xff]  ;;  %v15385_v54 = vld [vmem:[#allocation3 + $0x18] sm:$0x3]  ;;  %v6910_v7 = vrot.slane %v15378_v5, 1 }
 0x755   :  { %v6911_v12 = vrot.slane %v15380_v53, 1  ;;  %6820 = vst.msk [vmem:[#allocation3 + $0x51] sm:$0xff] %vm114_vm4, %v6800_v1  ;;  %v6801_v50 = vmax.f32 %v6785_v0, 0.0  ;;  %v11404_v57 = vpop.f32.mrb[40].mxu1  ;;  %v6904_v62 = vrot.slane %v15383_v51, 1  ;;  %v6905_v44 = vrot.slane %v15385_v54, 1 }
 0x756   :  { %v15395_v21 = vld [vmem:[#allocation3 + $0x40] sm:$0xff]  ;;  %6823 = vst.msk [vmem:[#allocation3 + $0x81] sm:$0xff] %vm114_vm4, %v6803_v16  ;;  %v6768_v61 = vmul.f32 %v11404_v57, %v15348_v29  ;;  %v6705_v37 = vpop.f32.mrb[41].mxu1  ;;  %v15401_v38 = vld [vmem:[#allocation3 + $0x28] sm:$0x3]  ;;  %v6872_v17 = vpack.c.bf16 %v15383_v51, %v12374_v56 }
 0x757   :  { %v15399_v25 = vld [vmem:[#allocation3 + $0x20] sm:$0xff]  ;;  %v15404_v10 = vsel %vm258_vm2, %v6910_v7, %v6911_v12  ;;  %v15406_v35 = vld [vmem:[#allocation3 + $0x48] sm:$0x3]  ;;  %6821 = vst.msk [vmem:[#allocation3 + $0x61] sm:$0xff] %vm114_vm4, %v6801_v50  ;;  %v6766_v52 = vmul.f32 %v15348_v29, %v6705_v37  ;;  %v11405_v45 = vpop.f32.mrb[42].mxu1  ;;  %v15413_v47 = vsel %vm258_vm2, %v6904_v62, %v6905_v44  ;;  %v6908_v31 = vrot.slane %v15401_v38, 1 }
 0x758   :  { %v6907_v13 = vrot.slane %v15399_v25, 1  ;;  %v6790_v30 = vadd.f32 %v15353_v6, %v6768_v61  ;;  %v6769_v32 = vmul.f32 %v11405_v45, %v15348_v29  ;;  %v6708_v4 = vpop.f32.mrb[43].mxu1  ;;  %v6981_v42 = vpack.c.bf16 %v15413_v47, %v6903_v39 }
 0x759   :  { %v6913_v33 = vrot.slane %v15395_v21, 1  ;;  %v6788_v9 = vadd.f32 %v15353_v6, %v6766_v52  ;;  %v6767_v2 = vmul.f32 %v15348_v29, %v6708_v4  ;;  %v6914_v48 = vrot.slane %v15406_v35, 1 }
 0x75a   :  { %v15424_v55 = vsel %vm258_vm2, %v6907_v13, %v6908_v31  ;;  %v6806_v41 = vmax.f32 %v6790_v30, 0.0  ;;  %v6791_v49 = vadd.f32 %v15353_v6, %v6769_v32  ;;  %11414 = vmatprep.mubr.msk.bf16.mxu0 %vm114_vm4, %v6981_v42  ;;  %v6950_v32 = vrot.slane %v15444_v15, 1 }
 0x75b   :  { %v15431_v59 = vpack.c.bf16 %v15404_v10, %v15424_v55  ;;  %v6804_v26 = vmax.f32 %v6788_v9, 0.0  ;;  %v6789_v14 = vadd.f32 %v15353_v6, %v6767_v2  ;;  %v15438_v23 = vsel %vm258_vm2, %v6913_v33, %v6914_v48  ;;  %v15440_v43 = vld [vmem:[#allocation3 + $0x70] sm:$0xff]  ;;  %v15442_v24 = vld [vmem:[#allocation3 + $0x78] sm:$0x3] }
 0x75c   :  { %6826 = vst.msk [vmem:[#allocation3 + $0xd1] sm:$0xff] %vm114_vm4, %v6806_v41  ;;  %v6807_v34 = vmax.f32 %v6791_v49, 0.0  ;;  %v15449_v28 = vld [vmem:[#allocation3 + $0x50] sm:$0xff]  ;;  %v15451_v40 = vld [vmem:[#allocation3 + $0x58] sm:$0x3]  ;;  %v6922_v3 = vrot.slane %v15440_v43, 1  ;;  %v15688_v22 = vpack.c.bf16 %v15378_v5, %v15399_v25 }
 0x75d   :  { %16890 = vst [vmem:[#allocation17_spill] sm:$0xff] %v15431_v59  ;;  %11415 = vmatmul.mubr.msk.bf16.vlgmr.msra.gmra.mrb[32].mxu0 %vm114_vm4, %v15431_v59  ;;  %6824 = vst.msk [vmem:[#allocation3 + $0xb1] sm:$0xff] %vm114_vm4, %v6804_v26  ;;  %v6805_v1 = vmax.f32 %v6789_v14, 0.0  ;;  %v11408_v0 = vpop.f32.mrb[44].mxu1  ;;  %v6916_v16 = vrot.slane %v15449_v28, 1  ;;  %v6917_v7 = vrot.slane %v15451_v40, 1 }
 0x75e   :  { %11431 = vmatpush3.bf16.msra.mxu0 %v15342_v19  ;;  %v6923_v12 = vrot.slane %v15442_v24, 1  ;;  %6827 = vst.msk [vmem:[#allocation3 + $0xe1] sm:$0xff] %vm114_vm4, %v6807_v34  ;;  %v6772_v50 = vmul.f32 %v11408_v0, %v15348_v29  ;;  %v6721_v57 = vpop.f32.mrb[45].mxu1  ;;  %v15463_v27 = vld [vmem:[#allocation3 + $0x60] sm:$0xff]  ;;  %v15465_v39 = vld [vmem:[#allocation3 + $0x68] sm:$0x3] }
 0x75f   :  { %11432 = vmatprep.subr.bf16.mxu0 %v12331_v60  ;;  %v15470_v19 = vld [vmem:[%s16746_s28 + $0x1d0] sm:$0xff]   ;;  %6825 = vst.msk [vmem:[#allocation3 + $0xc1] sm:$0xff] %vm114_vm4, %v6805_v1  ;;  %v6770_v62 = vmul.f32 %v15348_v29, %v6721_v57  ;;  %v11409_v44 = vpop.f32.mrb[46].mxu1  ;;  %v15475_v61 = vsel %vm258_vm2, %v6916_v16, %v6917_v7  ;;  %v6919_v37 = vrot.slane %v15463_v27, 1  ;;  %v6920_v52 = vrot.slane %v15465_v39, 1 }
 0x760   :  { %v6794_v45 = vadd.f32 %v15353_v6, %v6772_v50  ;;  %v6773_v13 = vmul.f32 %v11409_v44, %v15348_v29  ;;  %v6724_v31 = vpop.f32.mrb[47].mxu1  ;;  %v15483_v30 = vpack.c.bf16 %v15475_v61, %v15438_v23  ;;  %v15492_v9 = vsel %vm258_vm2, %v6922_v3, %v6923_v12 }
 0x761   :  { %v6792_v4 = vadd.f32 %v15353_v6, %v6770_v62  ;;  %v6771_v42 = vmul.f32 %v15348_v29, %v6724_v31  ;;  %v15489_v33 = vsel %vm258_vm2, %v6919_v37, %v6920_v52  ;;  %v7266_v29 = vrot.slane %v15399_v25, 2 }
 0x762   :  { %16891 = vst [vmem:[#allocation21_spill] sm:$0xff] %v15483_v30  ;;  %11433 = vmatpush3.bf16.msra.mxu0 %v12331_v60  ;;  %v6810_v2 = vmax.f32 %v6794_v45, 0.0  ;;  %v6795_v48 = vadd.f32 %v15353_v6, %v6773_v13  ;;  %11418 = vmatprep.mubr.msk.bf16.mxu0 %vm114_vm4, %v15483_v30  ;;  %v15499_v41 = vpack.c.bf16 %v15492_v9, %v15489_v33  ;;  %v7267_v34 = vrot.slane %v15401_v38, 2 }
 0x763   :  { %11450 = vmatprep.subr.bf16.mxu0 %v15470_v19  ;;  %v6808_v49 = vmax.f32 %v6792_v4, 0.0  ;;  %v6793_v26 = vadd.f32 %v15353_v6, %v6771_v42  ;;  %v15504_v14 = vld [vmem:[#allocation3 + $0xd0] sm:$0xff]  ;;  %v15506_v60 = vld [vmem:[#allocation3 + $0xd8] sm:$0x3]  ;;  %v16893_v16 = vrot.slane %v14689_v46, 1  ;;  %v7269_v45 = vrot.slane %v15378_v5, 2 }
 0x764   :  { %16892 = vst [vmem:[#allocation22_spill] sm:$0xff] %v15499_v41  ;;  %6830 = vst.msk [vmem:[#allocation3 + $0x111] sm:$0xff] %vm114_vm4, %v6810_v2  ;;  %v6811_v3 = vmax.f32 %v6795_v48, 0.0  ;;  %v15512_v1 = vld [vmem:[#allocation3 + $0xb0] sm:$0xff]  ;;  %v15514_v0 = vld [vmem:[#allocation3 + $0xb8] sm:$0x3]  ;;  %v15532_v52 = vsel %vm604_vm3, %v7266_v29, %v7267_v34 }
 0x765   :  { %11419 = vmatmul.mubr.msk.bf16.gmra.mrb[36].mxu0 %vm114_vm4, %v15499_v41  ;;  %v6951_v6 = vsel %vm258_vm2, %v16893_v16, %v6950_v32  ;;  %v6958_v7 = vrot.slane %v15504_v14, 1  ;;  %6828 = vst.msk [vmem:[#allocation3 + $0xf1] sm:$0xff] %vm114_vm4, %v6808_v49  ;;  %v6809_v38 = vmax.f32 %v6793_v26, 0.0  ;;  %v6952_v50 = vrot.slane %v15512_v1, 1  ;;  %v15542_v42 = vld [vmem:[#allocation3 + $0xe0] sm:$0xff] }
 0x766   :  { %v6953_v57 = vrot.slane %v15514_v0, 1  ;;  %v6959_v62 = vrot.slane %v15506_v60, 1  ;;  %6831 = vst.msk [vmem:[#allocation3 + $0x121] sm:$0xff] %vm114_vm4, %v6811_v3  ;;  %v15527_v44 = vld [vmem:[#allocation3 + $0xc0] sm:$0xff]  ;;  %v15529_v37 = vld [vmem:[#allocation3 + $0xc8] sm:$0x3] }
 0x767   :  { %6829 = vst.msk [vmem:[#allocation3 + $0x101] sm:$0xff] %vm114_vm4, %v6809_v38  ;;  %v6955_v31 = vrot.slane %v15527_v44, 1  ;;  %v6956_v32 = vrot.slane %v15529_v37, 1  ;;  %v15544_v2 = vld [vmem:[#allocation3 + $0xe8] sm:$0x3]  ;;  %v7270_v48 = vrot.slane %v15380_v53, 2 }
 0x768   :  { %v15537_v13 = vsel %vm258_vm2, %v6952_v50, %v6953_v57  ;;  %v7272_v29 = vrot.slane %v15395_v21, 2  ;;  %v15552_v26 = vsel %vm258_vm2, %v6958_v7, %v6959_v62  ;;  %v7273_v34 = vrot.slane %v15406_v35, 2 }
 0x769   :  { %v6985_v4 = vpack.c.bf16 %v15537_v13, %v6951_v6  ;;  %v15549_v49 = vsel %vm258_vm2, %v6955_v31, %v6956_v32  ;;  %v15561_v16 = vsel %vm604_vm3, %v7269_v45, %v7270_v48  ;;  %v7278_v53 = vrot.slane %v15463_v27, 2 }
 0x76a   :  { %v15558_v3 = vpack.c.bf16 %v15552_v26, %v15549_v49  ;;  %v7279_v6 = vrot.slane %v15465_v39, 2  ;;  %v6961_v38 = vrot.slane %v15542_v42, 1  ;;  %v6962_v7 = vrot.slane %v15544_v2, 1 }
 0x76b   :  { %11422 = vmatprep.mubr.msk.bf16.mxu0 %vm114_vm4, %v6985_v4  ;;  %v15567_v50 = vld [vmem:[#allocation3 + $0x110] sm:$0xff]  ;;  %v6867_v35 = vld [vmem:[#allocation3 + $0x118] sm:$0x3]  ;;  %v15571_v57 = vpack.c.bf16 %v15561_v16, %v15532_v52  ;;  %v15574_v62 = vsel %vm604_vm3, %v7272_v29, %v7273_v34  ;;  %v7281_v4 = vrot.slane %v15440_v43, 2  ;;  %v7282_v36 = vrot.slane %v15442_v24, 2 }
 0x76c   :  { %16894 = vst [vmem:[#allocation24_spill] sm:$0xff] %v15558_v3  ;;  %v15578_v45 = vld [vmem:[#allocation3 + $0xf0] sm:$0xff]  ;;  %v15580_v39 = vld [vmem:[#allocation3 + $0xf8] sm:$0x3]  ;;  %v6970_v31 = vrot.slane %v15567_v50, 1  ;;  %v6971_v29 = vrot.slane %v6867_v35, 1  ;;  %v15589_v34 = vsel %vm604_vm3, %v7278_v53, %v7279_v6  ;;  %v15596_v32 = vsel %vm258_vm2, %v6961_v38, %v6962_v7 }
 0x76d   :  { %11423 = vmatmul.mubr.msk.bf16.gmra.mrb[40].mxu0 %vm114_vm4, %v15558_v3  ;;  %v6964_v48 = vrot.slane %v15578_v45, 1  ;;  %v6965_v18 = vrot.slane %v15580_v39, 1  ;;  %v7263_v6 = vrot.slane %v15383_v51, 2  ;;  %v15608_v30 = vsel %vm604_vm3, %v7281_v4, %v7282_v36 }
 0x76e   :  { %v15591_v20 = vld [vmem:[#allocation3 + $0x100] sm:$0xff]  ;;  %v6865_v63 = vld [vmem:[#allocation3 + $0x108] sm:$0x3]  ;;  %v7298_v56 = vrot.slane %v15527_v44, 2  ;;  %v15619_v38 = vpack.c.bf16 %v15608_v30, %v15589_v34  ;;  %v7299_v7 = vrot.slane %v15529_v37, 2  ;;  %v7264_v4 = vrot.slane %v15385_v54, 2 }
 0x76f   :  { %v15599_v12 = vsel %vm258_vm2, %v6964_v48, %v6965_v18  ;;  %v6967_v3 = vrot.slane %v15591_v20, 1  ;;  %v6968_v41 = vrot.slane %v6865_v63, 1  ;;  %v15615_v18 = vsel %vm258_vm2, %v6970_v31, %v6971_v29 }
 0x770   :  { %v15604_v53 = vpack.c.bf16 %v15599_v12, %v15596_v32  ;;  %v7275_v31 = vrot.slane %v15449_v28, 2  ;;  %v7276_v48 = vrot.slane %v15451_v40, 2  ;;  %v7295_v29 = vrot.slane %v15512_v1, 2 }
 0x771   :  { %v15612_v24 = vsel %vm258_vm2, %v6967_v3, %v6968_v41  ;;  %v7301_v41 = vrot.slane %v15504_v14, 2  ;;  %v7302_v3 = vrot.slane %v15506_v60, 2  ;;  %v15635_v37 = vsel %vm604_vm3, %v7298_v56, %v7299_v7 }
 0x772   :  { %16895 = vst [vmem:[#allocation25_spill] sm:$0xff] %v15604_v53  ;;  %11426 = vmatprep.mubr.msk.bf16.mxu0 %vm114_vm4, %v15604_v53  ;;  %v15626_v36 = vpack.c.bf16 %v15615_v18, %v15612_v24  ;;  %v7310_v54 = vrot.slane %v15591_v20, 2  ;;  %v7311_v59 = vrot.slane %v6865_v63, 2  ;;  %v7313_v60 = vrot.slane %v15567_v50, 2 }
 0x773   :  { %v15640_v53 = vsel %vm604_vm3, %v7301_v41, %v7302_v3  ;;  %v7304_v56 = vrot.slane %v15542_v42, 2  ;;  %v7305_v7 = vrot.slane %v15544_v2, 2  ;;  %v7314_v58 = vrot.slane %v6867_v35, 2 }
 0x774   :  { %16896 = vst [vmem:[#allocation33_spill] sm:$0xff] %v15626_v36  ;;  %v15647_v40 = vpack.c.bf16 %v15640_v53, %v15635_v37  ;;  %v7307_v41 = vrot.slane %v15578_v45, 2  ;;  %v15654_v3 = vsel %vm604_vm3, %v7310_v54, %v7311_v59  ;;  %v7488_v63 = vpack.c.bf16 %v15463_v27, %v15449_v28 }
 0x775   :  { %11427 = vmatmul.mubr.msk.bf16.gmra.mrb[44].mxu0 %vm114_vm4, %v15626_v36  ;;  %v7296_v36 = vrot.slane %v15514_v0, 2  ;;  %v7308_v35 = vrot.slane %v15580_v39, 2  ;;  %v7660_v54 = vpack.c.bf16 %v15424_v55, %v15413_v47  ;;  %v15680_v2 = vsel %vm604_vm3, %v7304_v56, %v7305_v7  ;;  %v12340_v47 = vld [vmem:[%s16746_s28 + $0x210] sm:$0xff]  }
 0x776   :  { %11434 = vmatprep.mubr.msk.bf16.mxu0 %vm114_vm4, %v6872_v17  ;;  %v15659_v17 = vsel %vm604_vm3, %v7313_v60, %v7314_v58  ;;  %v15677_v60 = vsel %vm604_vm3, %v7263_v6, %v7264_v4  ;;  %v12333_v58 = vld [vmem:[%s16746_s28 + $0x1d8] sm:$0xff]   ;;  %v15694_v6 = vsel %vm604_vm3, %v7275_v31, %v7276_v48  ;;  %v15702_v7 = vpack.c.bf16 %v15449_v28, %v15395_v21 }
 0x777   :  { %v15670_v59 = vpack.c.bf16 %v15659_v17, %v15654_v3  ;;  %v15705_v39 = vsel %vm604_vm3, %v7295_v29, %v7296_v36  ;;  %v15712_v31 = vsel %vm604_vm3, %v7307_v41, %v7308_v35  ;;  %v12334_v29 = vld [vmem:[%s16746_s28 + $0x1e0] sm:$0xff]   ;;  %v15728_v41 = vpack.c.bf16 %v15440_v43, %v15463_v27 }
 0x778   :  { %v12375_v35 = vld [vmem:[#allocation3 + $0xa0] sm:$0xff]  ;;  %v15736_v36 = vpack.c.bf16 %v15504_v14, %v15527_v44  ;;  %v7261_v56 = vrot.slane %v15367_v11, 2  ;;  %v15752_v48 = vpack.c.bf16 %v15567_v50, %v15591_v20  ;;  %v12335_v11 = vld [vmem:[%s16746_s28 + $0x1e8] sm:$0xff]   ;;  %v16903_v28 = vpack.c.bf16 %v15591_v20, %v15578_v45 }
 0x779   :  { %v15825_v27 = vld [vmem:[#allocation3 + $0x120] sm:$0xff] }
 0x77d   :  { %11435 = vmatmul.mubr.msk.bf16.vlgmr.msra.gmra.mrb[32].mxu0 %vm114_vm4, %v15688_v22 }
 0x77e   :  { %11451 = vmatpush3.bf16.msra.mxu0 %v15470_v19  ;;  %11438 = vmatprep.mubr.msk.bf16.mxu0 %vm114_vm4, %v15702_v7  ;;  %v6876_v19 = vpack.c.bf16 %v15512_v1, %v12375_v35  ;;  %v16897_v35 = vrot.slane %v14627_v8, 2  ;;  %v15763_v8 = vpack.c.bf16 %v15694_v6, %v15574_v62 }
 0x77f   :  { %11452 = vmatprep.subr.bf16.mxu0 %v12333_v58 }
 0x782   :  { %11453 = vmatpush3.bf16.msra.mxu0 %v12333_v58  ;;  %v15740_v58 = vpack.c.bf16 %v15578_v45, %v15542_v42 }
 0x783   :  { %11470 = vmatprep.subr.bf16.mxu0 %v12334_v29 }
 0x785   :  { %11439 = vmatmul.mubr.msk.bf16.gmra.mrb[36].mxu0 %vm114_vm4, %v15728_v41 }
 0x786   :  { %11442 = vmatprep.mubr.msk.bf16.mxu0 %vm114_vm4, %v6876_v19  ;;  %v7262_v19 = vsel %vm604_vm3, %v16897_v35, %v7261_v56  ;;  %v7293_v56 = vrot.slane %v15444_v15, 2  ;;  %v16898_v35 = vrot.slane %v14689_v46, 2  ;;  %v15782_v15 = vpack.c.bf16 %v15712_v31, %v15680_v2 }
 0x787   :  { %v7324_v0 = vpack.c.bf16 %v15677_v60, %v7262_v19  ;;  %v16899_v46 = vpack.c.bf16 %v15399_v25, %v15383_v51  ;;  %v12338_v51 = vld [vmem:[%s16746_s28 + $0x200] sm:$0xff]  }
 0x788   :  { %v7294_v19 = vsel %vm604_vm3, %v16898_v35, %v7293_v56  ;;  %v15808_v25 = vld [vmem:[#allocation3 + $0x80] sm:$0xff]  ;;  %v16909_v56 = vpack.c.bf16 %v15532_v52, %v15677_v60  ;;  %v12341_v52 = vld [vmem:[%s16746_s28 + $0x218] sm:$0xff]   ;;  %v16911_v35 = vpack.c.bf16 %v15589_v34, %v15694_v6  ;;  %v16913_v6 = vpack.c.bf16 %v15680_v2, %v15640_v53  ;;  %v12343_v53 = vld [vmem:[%s16746_s28 + $0x228] sm:$0xff]  }
 0x789   :  { %v7328_v4 = vpack.c.bf16 %v15705_v39, %v7294_v19  ;;  %v7650_v20 = vrot.slane %v15808_v25, 1  ;;  %v12342_v19 = vld [vmem:[%s16746_s28 + $0x220] sm:$0xff]  }
 0x78d   :  { %11443 = vmatmul.mubr.msk.bf16.gmra.mrb[40].mxu0 %vm114_vm4, %v15736_v36 }
 0x78e   :  { %11446 = vmatprep.mubr.msk.bf16.mxu0 %vm114_vm4, %v15740_v58 }
 0x795   :  { %11447 = vmatmul.mubr.msk.bf16.gmra.mrb[44].mxu0 %vm114_vm4, %v15752_v48 }
 0x796   :  { %11454 = vmatprep.mubr.msk.bf16.mxu0 %vm114_vm4, %v7324_v0  ;;  %v12336_v0 = vld [vmem:[%s16746_s28 + $0x1f0] sm:$0xff]  }
 0x79d   :  { %11455 = vmatmul.mubr.msk.bf16.vlgmr.msra.gmra.mrb[32].mxu0 %vm114_vm4, %v15571_v57 }
 0x79e   :  { %11471 = vmatpush3.bf16.msra.mxu0 %v12334_v29  ;;  %11458 = vmatprep.mubr.msk.bf16.mxu0 %vm114_vm4, %v15763_v8  ;;  %v16900_v29 = vpack.c.bf16 %v15395_v21, %v15378_v5  ;;  %v16901_v5 = vpack.c.bf16 %v15527_v44, %v15512_v1  ;;  %v16902_v21 = vpack.c.bf16 %v15542_v42, %v15504_v14  ;;  %v6849_v14 = vld [vmem:[#allocation3 + $0x88] sm:$0x3] }
 0x79f   :  { %11472 = vmatprep.subr.bf16.mxu0 %v12335_v11  ;;  %v12339_v1 = vld [vmem:[%s16746_s28 + $0x208] sm:$0xff]   ;;  %v7651_v44 = vrot.slane %v6849_v14, 1  ;;  %v16904_v42 = vpack.c.bf16 %v15438_v23, %v15404_v10  ;;  %v16906_v23 = vpack.c.bf16 %v15549_v49, %v15537_v13  ;;  %v10218_v49 = vld [vmem:[#allocation5] ss:$0 sm:$0xff]  ;;  %v7823_v60 = vrot.slane %v6849_v14, 2 }
 0x7a1   :  { %v15850_v55 = vsel %vm258_vm2, %v7650_v20, %v7651_v44 }
 0x7a2   :  { %11473 = vmatpush3.bf16.msra.mxu0 %v12335_v11  ;;  %v7489_v11 = vpack.c.bf16 %v15808_v25, %v15440_v43  ;;  %v7493_v43 = vpack.c.bf16 %v15825_v27, %v15567_v50  ;;  %v16905_v50 = vpack.c.bf16 %v15489_v33, %v15475_v61  ;;  %v7663_v10 = vpack.c.bf16 %v15850_v55, %v15492_v9  ;;  %v6869_v61 = vld [vmem:[#allocation3 + $0x128] sm:$0x3] }
 0x7a3   :  { %11490 = vmatprep.subr.bf16.mxu0 %v12336_v0  ;;  %v7656_v33 = vrot.slane %v15825_v27, 1  ;;  %v7657_v45 = vrot.slane %v6869_v61, 1  ;;  %v16908_v9 = vpack.c.bf16 %v15612_v24, %v15599_v12  ;;  %v10231_v12 = vld [vmem:[%s16597_s9] ss:$0 sm:$0xff]  ;;  %v7827_v34 = vrot.slane %v6869_v61, 2 }
 0x7a4   :  { %v10230_v24 = vld [vmem:[%s16596_s8] ss:$0 sm:$0xff] }
 0x7a5   :  { %11459 = vmatmul.mubr.msk.bf16.gmra.mrb[36].mxu0 %vm114_vm4, %v15619_v38 }
 0x7a6   :  { %11462 = vmatprep.mubr.msk.bf16.mxu0 %vm114_vm4, %v7328_v4  ;;  %v12337_v4 = vld [vmem:[%s16746_s28 + $0x1f8] sm:$0xff]  }
 0x7ad   :  { %11463 = vmatmul.mubr.msk.bf16.gmra.mrb[40].mxu0 %vm114_vm4, %v15647_v40 }
 0x7ae   :  { %11466 = vmatprep.mubr.msk.bf16.mxu0 %vm114_vm4, %v15782_v15 }
 0x7b5   :  { %11467 = vmatmul.mubr.msk.bf16.gmra.mrb[44].mxu0 %vm114_vm4, %v15670_v59 }
 0x7b6   :  { %11474 = vmatprep.mubr.msk.bf16.mxu0 %vm114_vm4, %v16899_v46 }
 0x7bd   :  { %11475 = vmatmul.mubr.msk.bf16.vlgmr.msra.gmra.mrb[32].mxu0 %vm114_vm4, %v16900_v29  ;;  %v16914_v29 = vpack.c.bf16 %v15654_v3, %v15712_v31  ;;  %v16915_v3 = vld [vmem:[#allocation26_spill] sm:$0xff]  ;;  %v12345_v31 = vld [vmem:[%s16746_s28 + $0x238] sm:$0xff]  }
 0x7be   :  { %11491 = vmatpush3.bf16.msra.mxu0 %v12336_v0  ;;  %11478 = vmatprep.mubr.msk.bf16.mxu0 %vm114_vm4, %v7488_v63  ;;  %v16907_v63 = vpack.c.bf16 %v15596_v32, %v15552_v26  ;;  %v12401_v26 = vmov 0   ;;  %v10217_v32 = vld [vmem:[#allocation4] ss:$0 sm:$0xff]  ;;  %v16910_v0 = vpack.c.bf16 %v15574_v62, %v15561_v16  ;;  %v16912_v16 = vpack.c.bf16 %v15635_v37, %v15705_v39  ;;  %v12344_v37 = vld [vmem:[%s16746_s28 + $0x230] sm:$0xff]  }
 0x7bf   :  { %11492 = vmatprep.subr.bf16.mxu0 %v12337_v4  ;;  %12264 = vset.pattern.permute.xlu1 %v12401_v26  ;;  %v7826_v62 = vrot.slane %v15825_v27, 2  ;;  %v16917_v39 = vld [vmem:[#allocation17_spill] sm:$0xff] }
 0x7c0   :  { %8606 = vperm.xlu1 %12264, %v10218_v49   ;;  %12263 = vset.pattern.permute.xlu0 %v12401_v26  ;;  %v16927_v49 = vld [vmem:[#allocation23_spill] sm:$0xff] }
 0x7c1   :  { %8580 = vperm.xlu0 %12263, %v10217_v32   ;;  %8866 = vmatprep.mubr.bf16.mxu1 %v12401_v26  ;;  %v16929_v32 = vld [vmem:[#allocation27_spill] sm:$0xff] }
 0x7c2   :  { %11493 = vmatpush3.bf16.msra.mxu0 %v12337_v4 }
 0x7c3   :  { %11510 = vmatprep.subr.bf16.mxu0 %v12338_v51 }
 0x7c4   :  { %9013 = vperm.xlu1 %12264, %v10231_v12   ;;  %v16930_v12 = vmax.f32 %v16929_v32, 0.0 }
 0x7c5   :  { %11479 = vmatmul.mubr.msk.bf16.gmra.mrb[36].mxu0 %vm114_vm4, %v7489_v11  ;;  %8987 = vperm.xlu0 %12263, %v10230_v24  }
 0x7c6   :  { %11482 = vmatprep.mubr.msk.bf16.mxu0 %vm114_vm4, %v16901_v5  ;;  %v16921_v5 = vld [vmem:[#allocation24_spill] sm:$0xff] }
 0x7cd   :  { %11483 = vmatmul.mubr.msk.bf16.gmra.mrb[40].mxu0 %vm114_vm4, %v16902_v21  ;;  %v6871_v21 = vld [vmem:[#allocation3 + $0x138] sm:$0x3] }
 0x7ce   :  { %11486 = vmatprep.mubr.msk.bf16.mxu0 %vm114_vm4, %v16903_v28  ;;  %v8139_v28 = vrot.slane %v6871_v21, 1 }
 0x7d5   :  { %11487 = vmatmul.mubr.msk.bf16.gmra.mrb[44].mxu0 %vm114_vm4, %v7493_v43  ;;  %v16923_v43 = vld [vmem:[#allocation33_spill] sm:$0xff] }
 0x7d6   :  { %11494 = vmatprep.mubr.msk.bf16.mxu0 %vm114_vm4, %v7660_v54  ;;  %v15869_v54 = vsel %vm258_vm2, %v7656_v33, %v7657_v45 }
 0x7d7   :  { %v7667_v13 = vpack.c.bf16 %v15869_v54, %v15615_v18  ;;  %v7822_v18 = vrot.slane %v15808_v25, 2 }
 0x7d9   :  { %v7824_v46 = vsel %vm604_vm3, %v7822_v18, %v7823_v60  ;;  %v16012_v60 = vld [vmem:[%s16595_s7] ss:$0 sm:$0xff] }
 0x7da   :  { %v7833_v4 = vpack.c.bf16 %v7824_v46, %v15608_v30  ;;  %v7828_v30 = vsel %vm604_vm3, %v7826_v62, %v7827_v34 }
 0x7dd   :  { %11495 = vmatmul.mubr.msk.bf16.vlgmr.msra.gmra.mrb[32].mxu0 %vm114_vm4, %v16904_v42  ;;  %v16925_v42 = vrot.slane %v16915_v3, 2 }
 0x7de   :  { %11511 = vmatpush3.bf16.msra.mxu0 %v12338_v51  ;;  %11498 = vmatprep.mubr.msk.bf16.mxu0 %vm114_vm4, %v16905_v50  ;;  %v7837_v51 = vpack.c.bf16 %v7828_v30, %v15659_v17  ;;  %v16916_v17 = vld [vmem:[#allocation32_spill] sm:$0xff] }
 0x7df   :  { %11512 = vmatprep.subr.bf16.mxu0 %v12339_v1  ;;  %v7993_v2 = vpack.c.bf16 %v16916_v17, %v15825_v27  ;;  %v16922_v27 = vld [vmem:[#allocation25_spill] sm:$0xff]  ;;  %v16924_v14 = vrot.slane %v16916_v17, 1 }
 0x7e2   :  { %11513 = vmatpush3.bf16.msra.mxu0 %v12339_v1  ;;  %v8140_v1 = vsel %vm258_vm2, %v16924_v14, %v8139_v28 }
 0x7e3   :  { %11530 = vmatprep.subr.bf16.mxu0 %v12340_v47  ;;  %v8143_v20 = vpack.c.bf16 %v8140_v1, %v15869_v54 }
 0x7e5   :  { %11499 = vmatmul.mubr.msk.bf16.gmra.mrb[36].mxu0 %vm114_vm4, %v7663_v10  ;;  %v15990_v10 = vld [vmem:[%s16593_s5 + $0x3] ss:$0 sm:$0xff] }
 0x7e6   :  { %11502 = vmatprep.mubr.msk.bf16.mxu0 %vm114_vm4, %v16906_v23 }
 0x7ed   :  { %11503 = vmatmul.mubr.msk.bf16.gmra.mrb[40].mxu0 %vm114_vm4, %v16907_v63 }
 0x7ee   :  { %11506 = vmatprep.mubr.msk.bf16.mxu0 %vm114_vm4, %v16908_v9 }
 0x7f5   :  { %11507 = vmatmul.mubr.msk.bf16.gmra.mrb[44].mxu0 %vm114_vm4, %v7667_v13 }
 0x7f6   :  { %11514 = vmatprep.mubr.msk.bf16.mxu0 %vm114_vm4, %v16909_v56  ;;  %v16928_v56 = vmax.f32 %v16927_v49, 0.0 }
 0x7fd   :  { %11515 = vmatmul.mubr.msk.bf16.vlgmr.msra.gmra.mrb[32].mxu0 %vm114_vm4, %v16910_v0  ;;  %v16017_v0 = vld [vmem:[%s16600_s12] ss:$0 sm:$0xff] }
 0x7fe   :  { %11531 = vmatpush3.bf16.msra.mxu0 %v12340_v47  ;;  %11518 = vmatprep.mubr.msk.bf16.mxu0 %vm114_vm4, %v16911_v35 }
 0x7ff   :  { %11532 = vmatprep.subr.bf16.mxu0 %v12341_v52 }
 0x802   :  { %11533 = vmatpush3.bf16.msra.mxu0 %v12341_v52 }
 0x803   :  { %11550 = vmatprep.subr.bf16.mxu0 %v12342_v19 }
 0x805   :  { %11519 = vmatmul.mubr.msk.bf16.gmra.mrb[36].mxu0 %vm114_vm4, %v7833_v4  ;;  %v16022_v4 = vld [vmem:[%s16595_s7 + $0x1] ss:$0 sm:$0xff] }
 0x806   :  { %11522 = vmatprep.mubr.msk.bf16.mxu0 %vm114_vm4, %v16912_v16 }
 0x80d   :  { %11523 = vmatmul.mubr.msk.bf16.gmra.mrb[40].mxu0 %vm114_vm4, %v16913_v6  ;;  %v16931_v6 = vld [vmem:[#allocation28_spill] sm:$0xff] }
 0x80e   :  { %11526 = vmatprep.mubr.msk.bf16.mxu0 %vm114_vm4, %v16914_v29  ;;  %v16932_v29 = vmax.f32 %v16931_v6, 0.0 }
 0x815   :  { %11527 = vmatmul.mubr.msk.bf16.gmra.mrb[44].mxu0 %vm114_vm4, %v7837_v51  ;;  %v16933_v51 = vld [vmem:[#allocation29_spill] sm:$0xff] }
 0x816   :  { %11534 = vmatprep.mubr.msk.bf16.mxu0 %vm114_vm4, %v15688_v22  ;;  %v7992_v22 = vpack.c.bf16 %v16915_v3, %v15808_v25 }
 0x81d   :  { %11535 = vmatmul.mubr.msk.bf16.vlgmr.msra.gmra.mrb[32].mxu0 %vm114_vm4, %v15702_v7  ;;  %v6851_v7 = vld [vmem:[#allocation3 + $0x98] sm:$0x3] }
 0x81e   :  { %11551 = vmatpush3.bf16.msra.mxu0 %v12342_v19  ;;  %11538 = vmatprep.mubr.msk.bf16.mxu0 %vm114_vm4, %v15728_v41  ;;  %v16918_v41 = vld [vmem:[#allocation21_spill] sm:$0xff]  ;;  %v8281_v44 = vrot.slane %v6851_v7, 2 }
 0x81f   :  { %11552 = vmatprep.subr.bf16.mxu0 %v12343_v53 }
 0x820   :  { %v8282_v50 = vsel %vm604_vm3, %v16925_v42, %v8281_v44 }
 0x821   :  { %v8288_v47 = vpack.c.bf16 %v8282_v50, %v7824_v46 }
 0x822   :  { %11553 = vmatpush3.bf16.msra.mxu0 %v12343_v53  ;;  %v16934_v53 = vmax.f32 %v16933_v51, 0.0 }
 0x823   :  { %11570 = vmatprep.subr.bf16.mxu0 %v12344_v37 }
 0x825   :  { %11539 = vmatmul.mubr.msk.bf16.gmra.mrb[36].mxu0 %vm114_vm4, %v7992_v22 }
 0x826   :  { %11542 = vmatprep.mubr.msk.bf16.mxu0 %vm114_vm4, %v15736_v36  ;;  %v8133_v36 = vrot.slane %v6851_v7, 1 }
 0x82d   :  { %11543 = vmatmul.mubr.msk.bf16.gmra.mrb[40].mxu0 %vm114_vm4, %v15740_v58  ;;  %v16919_v58 = vld [vmem:[#allocation22_spill] sm:$0xff] }
 0x82e   :  { %11546 = vmatprep.mubr.msk.bf16.mxu0 %vm114_vm4, %v15752_v48  ;;  %v16920_v48 = vrot.slane %v16915_v3, 1 }
 0x830   :  { %v8134_v25 = vsel %vm258_vm2, %v16920_v48, %v8133_v36 }
 0x831   :  { %v8142_v11 = vpack.c.bf16 %v8134_v25, %v15850_v55  ;;  %v8285_v55 = vrot.slane %v6871_v21, 2 }
 0x835   :  { %11547 = vmatmul.mubr.msk.bf16.gmra.mrb[44].mxu0 %vm114_vm4, %v7993_v2 }
 0x836   :  { %11554 = vmatprep.mubr.msk.bf16.mxu0 %vm114_vm4, %v16917_v39 }
 0x83d   :  { %11555 = vmatmul.mubr.msk.bf16.vlgmr.msra.gmra.mrb[32].mxu0 %vm114_vm4, %v16918_v41 }
 0x83e   :  { %11571 = vmatpush3.bf16.msra.mxu0 %v12344_v37  ;;  %11558 = vmatprep.mubr.msk.bf16.mxu0 %vm114_vm4, %v16919_v58 }
 0x83f   :  { %11572 = vmatprep.subr.bf16.mxu0 %v12345_v31 }
 0x842   :  { %11573 = vmatpush3.bf16.msra.mxu0 %v12345_v31 }
 0x845   :  { %11559 = vmatmul.mubr.msk.bf16.gmra.mrb[36].mxu0 %vm114_vm4, %v8142_v11 }
 0x846   :  { %11562 = vmatprep.mubr.msk.bf16.mxu0 %vm114_vm4, %v16921_v5 }
 0x84d   :  { %11563 = vmatmul.mubr.msk.bf16.gmra.mrb[40].mxu0 %vm114_vm4, %v16922_v27 }
 0x84e   :  { %11566 = vmatprep.mubr.msk.bf16.mxu0 %vm114_vm4, %v16923_v43 }
 0x855   :  { %11567 = vmatmul.mubr.msk.bf16.gmra.mrb[44].mxu0 %vm114_vm4, %v8143_v20 }
 0x856   :  { %11574 = vmatprep.mubr.msk.bf16.mxu0 %vm114_vm4, %v15571_v57  ;;  %v16926_v57 = vrot.slane %v16916_v17, 2 }
 0x85d   :  { %11575 = vmatmul.mubr.msk.bf16.vlgmr.msra.gmra.mrb[32].mxu0 %vm114_vm4, %v15763_v8 }
 0x85e   :  { %11578 = vmatprep.mubr.msk.bf16.mxu0 %vm114_vm4, %v15619_v38  ;;  %v8286_v38 = vsel %vm604_vm3, %v16926_v57, %v8285_v55  ;;  %v16935_v55 = vld [vmem:[#allocation30_spill] sm:$0xff] }
 0x85f   :  { %v8289_v8 = vpack.c.bf16 %v8286_v38, %v7828_v30  ;;  %v16936_v57 = vmax.f32 %v16935_v55, 0.0 }
 0x865   :  { %11579 = vmatmul.mubr.msk.bf16.gmra.mrb[36].mxu0 %vm114_vm4, %v8288_v47 }
 0x866   :  { %11582 = vmatprep.mubr.msk.bf16.mxu0 %vm114_vm4, %v15647_v40  ;;  %v15995_v40 = vld [vmem:[%s16594_s6 + $0x3] ss:$0 sm:$0xff] }
 0x86d   :  { %11583 = vmatmul.mubr.msk.bf16.gmra.mrb[40].mxu0 %vm114_vm4, %v15782_v15 }
 0x86e   :  { %11586 = vmatprep.mubr.msk.bf16.mxu0 %vm114_vm4, %v15670_v59 }
 0x875   :  { %11587 = vmatmul.mubr.msk.bf16.gmra.mrb[44].mxu0 %vm114_vm4, %v8289_v8 }
 0x930   :  { %v11576_v15 = vpop.f32.mrb[32].mxu0 }
 0x931   :  { %v8434_v59 = vmul.f32 %v11576_v15, %v15990_v10  ;;  %v8347_v23 = vpop.f32.mrb[33].mxu0 }
 0x932   :  { %v8432_v61 = vmul.f32 %v15990_v10, %v8347_v23  ;;  %v11577_v33 = vpop.f32.mrb[34].mxu0 }
 0x933   :  { %v8456_v45 = vadd.f32 %v15995_v40, %v8434_v59  ;;  %v8435_v63 = vmul.f32 %v11577_v33, %v15990_v10  ;;  %v8350_v9 = vpop.f32.mrb[35].mxu0  ;;  %v16937_v59 = vld [vmem:[#allocation10_spill] sm:$0xff] }
 0x934   :  { %v8454_v54 = vadd.f32 %v15995_v40, %v8432_v61  ;;  %v8433_v13 = vmul.f32 %v15990_v10, %v8350_v9  ;;  %v16938_v23 = vmax.f32 %v16937_v59, 0.0 }
 0x935   :  { %v8472_v26 = vadd.f32 %v8456_v45, %v16928_v56  ;;  %v8457_v52 = vadd.f32 %v15995_v40, %v8435_v63 }
 0x936   :  { %v8470_v24 = vadd.f32 %v8454_v54, %v16930_v12  ;;  %v8455_v18 = vadd.f32 %v15995_v40, %v8433_v13 }
 0x937   :  { %v8488_v35 = vmax.f32 %v8472_v26, 0.0  ;;  %v8473_v30 = vadd.f32 %v8457_v52, %v16932_v29 }
 0x938   :  { %v8486_v19 = vmax.f32 %v8470_v24, 0.0  ;;  %v11580_v46 = vpop.f32.mrb[36].mxu0  ;;  %v8471_v37 = vadd.f32 %v8455_v18, %v16934_v53 }
 0x939   :  { %v8363_v16 = vpop.f32.mrb[37].mxu0  ;;  %v8918_v62 = vmul.f32 %v16012_v60, %v8488_v35  ;;  %v8511_v34 = vmul.f32 %v16017_v0, %v8488_v35  ;;  %v9252_v39 = vmul.f32 %v16022_v4, %v8488_v35  ;;  %v8438_v31 = vmul.f32 %v11580_v46, %v15990_v10 }
 0x93a   :  { %v11581_v3 = vpop.f32.mrb[38].mxu0  ;;  %v8916_v7 = vmul.f32 %v16012_v60, %v8486_v19  ;;  %v8489_v36 = vmax.f32 %v8473_v30, 0.0  ;;  %v8487_v41 = vmax.f32 %v8471_v37, 0.0  ;;  %v9250_v11 = vmul.f32 %v16022_v4, %v8486_v19  ;;  %v16939_v37 = vld [vmem:[#allocation14_spill] sm:$0xff] }
 0x93b   :  { %v8366_v22 = vpop.f32.mrb[39].mxu0  ;;  %v8938_v17 = vsel %vm114_vm4, %v8918_v62, 0.0  ;;  %v8531_v2 = vsel %vm114_vm4, %v8511_v34, 0.0  ;;  %v8439_v58 = vmul.f32 %v11581_v3, %v15990_v10  ;;  %v9272_v48 = vsel %vm114_vm4, %v9252_v39, 0.0 }
 0x93c   :  { %8939 = vadd.xlane.f32.xlu1 %v8938_v17  ;;  %8532 = vadd.xlane.f32.xlu0 %v8531_v2  ;;  %v8932_v25 = vsel %vm114_vm4, %v8916_v7, 0.0  ;;  %v8509_v5 = vmul.f32 %v16017_v0, %v8486_v19  ;;  %v8460_v28 = vadd.f32 %v15995_v40, %v8438_v31  ;;  %v9266_v20 = vsel %vm114_vm4, %v9250_v11, 0.0  ;;  %v16941_v17 = vld [vmem:[#allocation16_spill] sm:$0xff]  ;;  %v16943_v31 = vld [vmem:[#allocation15_spill] sm:$0xff] }
 0x93d   :  { %v8461_v43 = vadd.f32 %v15995_v40, %v8439_v58  ;;  %v8512_v42 = vmul.f32 %v16017_v0, %v8489_v36  ;;  %v8510_v50 = vmul.f32 %v16017_v0, %v8487_v41  ;;  %v8436_v8 = vmul.f32 %v15990_v10, %v8363_v16  ;;  %v16945_v58 = vld [vmem:[#allocation18_spill] sm:$0xff] }
 0x93e   :  { %v8525_v44 = vsel %vm114_vm4, %v8509_v5, 0.0  ;;  %v8476_v38 = vadd.f32 %v8460_v28, %v16936_v57  ;;  %v8919_v9 = vmul.f32 %v16012_v60, %v8489_v36  ;;  %v8917_v54 = vmul.f32 %v16012_v60, %v8487_v41 }
 0x93f   :  { %v8477_v61 = vadd.f32 %v8461_v43, %v16938_v23  ;;  %v8534_v45 = vsel %vm114_vm4, %v8512_v42, 0.0  ;;  %v8528_v63 = vsel %vm114_vm4, %v8510_v50, 0.0  ;;  %v8437_v13 = vmul.f32 %v15990_v10, %v8366_v22  ;;  %v16949_v42 = vld [vmem:[#allocation12_spill] sm:$0xff] }
 0x940   :  { %9273 = vadd.xlane.f32.xlu0 %v9272_v48  ;;  %8933 = vadd.xlane.f32.xlu1 %v8932_v25  ;;  %v16040_v21 = vpop.f32.mrb[40].mxu0  ;;  %v8492_v56 = vmax.f32 %v8476_v38, 0.0  ;;  %v8458_v26 = vadd.f32 %v15995_v40, %v8436_v8  ;;  %v9253_v19 = vmul.f32 %v16022_v4, %v8489_v36  ;;  %v9251_v46 = vmul.f32 %v16022_v4, %v8487_v41  ;;  %v16951_v8 = vld [vmem:[#allocation19_spill] sm:$0xff] }
 0x941   :  { %v16043_v27 = vpop.f32.mrb[41].mxu0  ;;  %v8493_v52 = vmax.f32 %v8477_v61, 0.0  ;;  %v8941_v6 = vsel %vm114_vm4, %v8919_v9, 0.0  ;;  %v8935_v29 = vsel %vm114_vm4, %v8917_v54, 0.0  ;;  %v8459_v30 = vadd.f32 %v15995_v40, %v8437_v13 }
 0x942   :  { %v11585_v14 = vpop.f32.mrb[42].mxu0  ;;  %v16940_v3 = vmax.f32 %v16939_v37, 0.0  ;;  %v16942_v2 = vmax.f32 %v16941_v17, 0.0  ;;  %v16944_v36 = vmax.f32 %v16943_v31, 0.0  ;;  %v16946_v48 = vmax.f32 %v16945_v58, 0.0 }
 0x943   :  { %v8382_v1 = vpop.f32.mrb[43].mxu0  ;;  %v8443_v15 = vmul.f32 %v11585_v14, %v15990_v10  ;;  %v9275_v5 = vsel %vm114_vm4, %v9253_v19, 0.0  ;;  %v9269_v28 = vsel %vm114_vm4, %v9251_v46, 0.0  ;;  %v8515_v43 = vmul.f32 %v16017_v0, %v8492_v56 }
 0x944   :  { %v8441_v47 = vmul.f32 %v15990_v10, %v8382_v1  ;;  %9267 = vadd.xlane.f32.xlu1 %v9266_v20  ;;  %8526 = vadd.xlane.f32.xlu0 %v8525_v44  ;;  %v8516_v14 = vmul.f32 %v16017_v0, %v8493_v52  ;;  %v16947_v1 = vld [vmem:[#allocation31_spill] sm:$0xff]  ;;  %v16950_v50 = vmax.f32 %v16949_v42, 0.0  ;;  %v8922_v55 = vmul.f32 %v16012_v60, %v8492_v56 }
 0x945   :  { %v8465_v32 = vadd.f32 %v15995_v40, %v8443_v15  ;;  %v16948_v20 = vmax.f32 %v16947_v1, 0.0  ;;  %v16952_v15 = vmax.f32 %v16951_v8, 0.0  ;;  %v8543_v9 = vsel %vm114_vm4, %v8515_v43, 0.0  ;;  %v16957_v1 = vld [vmem:[#allocation13_spill] sm:$0xff] }
 0x946   :  { %v8463_v33 = vadd.f32 %v15995_v40, %v8441_v47  ;;  %v8475_v47 = vadd.f32 %v8459_v30, %v16950_v50  ;;  %v8546_v54 = vsel %vm114_vm4, %v8516_v14, 0.0  ;;  %v8923_v13 = vmul.f32 %v16012_v60, %v8493_v52 }
 0x947   :  { %v8481_v22 = vadd.f32 %v8465_v32, %v16940_v3  ;;  %v8474_v44 = vadd.f32 %v8458_v26, %v16948_v20  ;;  %v8442_v32 = vmul.f32 %v16040_v21, %v15990_v10  ;;  %v16958_v20 = vmax.f32 %v16957_v1, 0.0 }
 0x948   :  { %8535 = vadd.xlane.f32.xlu1 %v8534_v45  ;;  %8529 = vadd.xlane.f32.xlu0 %v8528_v63  ;;  %v11588_v49 = vpop.f32.mrb[44].mxu0  ;;  %v8479_v41 = vadd.f32 %v8463_v33, %v16944_v36  ;;  %v16953_v33 = vld [vmem:[#allocation20_spill] sm:$0xff]  ;;  %v8491_v26 = vmax.f32 %v8475_v47, 0.0 }
 0x949   :  { %v8446_v12 = vmul.f32 %v11588_v49, %v15990_v10  ;;  %v8395_v24 = vpop.f32.mrb[45].mxu0  ;;  %v16095_v57 = vmax.f32 %v8481_v22, 0.0  ;;  %v16954_v45 = vmax.f32 %v16953_v33, 0.0  ;;  %v8490_v49 = vmax.f32 %v8474_v44, 0.0 }
 0x94a   :  { %v8444_v18 = vmul.f32 %v15990_v10, %v8395_v24  ;;  %v11589_v35 = vpop.f32.mrb[46].mxu0  ;;  %v8495_v23 = vmax.f32 %v8479_v41, 0.0  ;;  %v8464_v37 = vadd.f32 %v15995_v40, %v8442_v32  ;;  %v16955_v41 = vld [vmem:[#allocation11_spill] sm:$0xff]  ;;  %v8921_v43 = vmul.f32 %v16012_v60, %v8491_v26 }
 0x94b   :  { %v8468_v16 = vadd.f32 %v15995_v40, %v8446_v12  ;;  %v8447_v62 = vmul.f32 %v11589_v35, %v15990_v10  ;;  %v8398_v34 = vpop.f32.mrb[47].mxu0  ;;  %v8950_v12 = vsel %vm114_vm4, %v8922_v55, 0.0  ;;  %v16119_v19 = vmul.f32 %v16022_v4, %v16095_v57 }
 0x94c   :  { %v8466_v51 = vadd.f32 %v15995_v40, %v8444_v18  ;;  %v8445_v53 = vmul.f32 %v15990_v10, %v8398_v34  ;;  %8942 = vadd.xlane.f32.xlu1 %v8941_v6  ;;  %8936 = vadd.xlane.f32.xlu0 %v8935_v29  ;;  %v16111_v18 = vmul.f32 %v16012_v60, %v16095_v57  ;;  %v8953_v34 = vsel %vm114_vm4, %v8923_v13, 0.0 }
 0x94d   :  { %v8484_v39 = vadd.f32 %v8468_v16, %v16942_v2  ;;  %v8469_v7 = vadd.f32 %v15995_v40, %v8447_v62  ;;  %v16126_v16 = vmul.f32 %v16017_v0, %v8495_v23  ;;  %v9256_v6 = vmul.f32 %v16022_v4, %v8492_v56 }
 0x94e   :  { %v8482_v25 = vadd.f32 %v8466_v51, %v16946_v48  ;;  %v8467_v11 = vadd.f32 %v15995_v40, %v8445_v53  ;;  %v9257_v29 = vmul.f32 %v16022_v4, %v8493_v52  ;;  %v16135_v30 = vmul.f32 %v16012_v60, %v8495_v23 }
 0x94f   :  { %v16097_v38 = vmax.f32 %v8484_v39, 0.0  ;;  %v8485_v59 = vadd.f32 %v8469_v7, %v16952_v15  ;;  %v8440_v51 = vmul.f32 %v15990_v10, %v16043_v27  ;;  %v16144_v3 = vmul.f32 %v16022_v4, %v8495_v23 }
 0x950   :  { %9276 = vadd.xlane.f32.xlu1 %v9275_v5  ;;  %9270 = vadd.xlane.f32.xlu0 %v9269_v28  ;;  %v8498_v61 = vmax.f32 %v8482_v25, 0.0  ;;  %v8483_v63 = vadd.f32 %v8467_v11, %v16954_v45  ;;  %v8513_v22 = vmul.f32 %v16017_v0, %v8490_v49  ;;  %v9284_v2 = vsel %vm114_vm4, %v9256_v6, 0.0 }
 0x951   :  { %v8501_v24 = vmax.f32 %v8485_v59, 0.0  ;;  %v16115_v35 = vmul.f32 %v16012_v60, %v16097_v38  ;;  %v16123_v21 = vmul.f32 %v16022_v4, %v16097_v38  ;;  %v9287_v39 = vsel %vm114_vm4, %v9257_v29, 0.0 }
 0x952   :  { %v8499_v46 = vmax.f32 %v8483_v63, 0.0  ;;  %v16129_v62 = vmul.f32 %v16017_v0, %v8498_v61  ;;  %v16140_v53 = vmul.f32 %v16012_v60, %v8498_v61  ;;  %v16147_v56 = vmul.f32 %v16022_v4, %v8498_v61 }
 0x953   :  { %v16150_v52 = vmul.f32 %v16017_v0, %v8501_v24  ;;  %v16154_v10 = vmul.f32 %v16012_v60, %v8501_v24  ;;  %v16157_v27 = vmul.f32 %v16022_v4, %v8501_v24  ;;  %v8514_v7 = vmul.f32 %v16017_v0, %v8491_v26 }
 0x954   :  { %8544 = vadd.xlane.f32.xlu0 %v8543_v9  ;;  %8547 = vadd.xlane.f32.xlu1 %v8546_v54  ;;  %v16160_v17 = vmul.f32 %v16017_v0, %v8499_v46  ;;  %v16166_v31 = vmul.f32 %v16012_v60, %v8499_v46  ;;  %v16169_v36 = vmul.f32 %v16022_v4, %v8499_v46  ;;  %v16956_v58 = vmax.f32 %v16955_v41, 0.0 }
 0x955   :  { %v8462_v25 = vadd.f32 %v15995_v40, %v8440_v51  ;;  %v8537_v11 = vsel %vm114_vm4, %v8513_v22, 0.0  ;;  %v8540_v5 = vsel %vm114_vm4, %v8514_v7, 0.0  ;;  %v8920_v28 = vmul.f32 %v16012_v60, %v8490_v49  ;;  %v12351_v22 = vld [vmem:[%s16602_s15 + $0x14] ss:$8 sps:$4 sm:$0xff]   ;;  %v16266_v7 = vpop.permute.xlu1 %8606 }
 0x956   :  { %v8480_v48 = vadd.f32 %v8464_v37, %v16956_v58  ;;  %v8947_v50 = vsel %vm114_vm4, %v8921_v43, 0.0  ;;  %v9254_v40 = vmul.f32 %v16022_v4, %v8490_v49  ;;  %v9255_v47 = vmul.f32 %v16022_v4, %v8491_v26 }
 0x957   :  { %v8478_v44 = vadd.f32 %v8462_v25, %v16958_v20  ;;  %v8944_v42 = vsel %vm114_vm4, %v8920_v28, 0.0  ;;  %v8523_v24 = vmul.f32 %v16017_v0, %v16097_v38  ;;  %v8552_v38 = vsel %vm114_vm4, %v16126_v16, 0.0 }
 0x958   :  { %8951 = vadd.xlane.f32.xlu0 %v8950_v12  ;;  %8954 = vadd.xlane.f32.xlu1 %v8953_v34  ;;  %v8496_v14 = vmax.f32 %v8480_v48, 0.0  ;;  %v9278_v8 = vsel %vm114_vm4, %v9254_v40, 0.0  ;;  %v9281_v15 = vsel %vm114_vm4, %v9255_v47, 0.0  ;;  %v8520_v12 = vmul.f32 %v16017_v0, %v16095_v57 }
 0x959   :  { %v8494_v55 = vmax.f32 %v8478_v44, 0.0  ;;  %v8974_v34 = vsel %vm114_vm4, %v16115_v35, 0.0  ;;  %v9299_v57 = vsel %vm114_vm4, %v16119_v19, 0.0  ;;  %v8561_v6 = vsel %vm114_vm4, %v16129_v62, 0.0  ;;  %v16271_v41 = vpop.permute.xlu1 %9013 }
 0x95a   :  { %v8926_v59 = vmul.f32 %v16012_v60, %v8496_v14  ;;  %v8519_v23 = vmul.f32 %v16017_v0, %v8496_v14  ;;  %v9260_v45 = vmul.f32 %v16022_v4, %v8496_v14  ;;  %v8558_v46 = vsel %vm114_vm4, %v8520_v12, 0.0 }
 0x95b   :  { %v8517_v63 = vmul.f32 %v16017_v0, %v8494_v55  ;;  %v9258_v13 = vmul.f32 %v16022_v4, %v8494_v55  ;;  %v8924_v49 = vmul.f32 %v16012_v60, %v8494_v55  ;;  %v8567_v4 = vsel %vm114_vm4, %v8523_v24, 0.0 }
 0x95c   :  { %9285 = vadd.xlane.f32.xlu0 %v9284_v2  ;;  %9288 = vadd.xlane.f32.xlu1 %v9287_v39  ;;  %v8962_v61 = vsel %vm114_vm4, %v8926_v59, 0.0  ;;  %v8555_v33 = vsel %vm114_vm4, %v8519_v23, 0.0  ;;  %v9296_v9 = vsel %vm114_vm4, %v9260_v45, 0.0  ;;  %v8965_v60 = vsel %vm114_vm4, %v16111_v18, 0.0  ;;  %v12355_v2 = vld [vmem:[%s16602_s15 + $0x30] ss:$8 sps:$4 sm:$0xff]  }
 0x95d   :  { %v8549_v54 = vsel %vm114_vm4, %v8517_v63, 0.0  ;;  %v9290_v26 = vsel %vm114_vm4, %v9258_v13, 0.0  ;;  %v8956_v32 = vsel %vm114_vm4, %v8924_v49, 0.0  ;;  %v9308_v0 = vsel %vm114_vm4, %v16123_v21, 0.0  ;;  %v12357_v39 = vld [vmem:[%s16602_s15 + $0x34] ss:$8 sps:$4 sm:$0xff]  }
 0x95e   :  { %v8959_v18 = vsel %vm114_vm4, %v16135_v30, 0.0  ;;  %v8968_v35 = vsel %vm114_vm4, %v16140_v53, 0.0  ;;  %v9293_v19 = vsel %vm114_vm4, %v16144_v3, 0.0  ;;  %v9302_v21 = vsel %vm114_vm4, %v16147_v56, 0.0  ;;  %v10241_v53 = vld [vmem:[%s16596_s8 + $0x1] ss:$0 sm:$0xff] }
 0x95f   :  { %v8570_v16 = vsel %vm114_vm4, %v16150_v52, 0.0  ;;  %v8977_v62 = vsel %vm114_vm4, %v16154_v10, 0.0  ;;  %v9311_v29 = vsel %vm114_vm4, %v16157_v27, 0.0  ;;  %v8564_v30 = vsel %vm114_vm4, %v16160_v17, 0.0  ;;  %v12346_v3 = vld [vmem:[%s16602_s15] ss:$8 sps:$4 sm:$0xff]  }
 0x960   :  { %8538 = vadd.xlane.f32.xlu0 %v8537_v11  ;;  %8541 = vadd.xlane.f32.xlu1 %v8540_v5  ;;  %v8971_v51 = vsel %vm114_vm4, %v16166_v31, 0.0  ;;  %v9305_v37 = vsel %vm114_vm4, %v16169_v36, 0.0  ;;  %v12348_v56 = vld [vmem:[%s16602_s15 + $0x4] ss:$8 sps:$4 sm:$0xff]   ;;  %v12349_v52 = vld [vmem:[%s16602_s15 + $0x10] ss:$8 sps:$4 sm:$0xff]   ;;  %v16268_v31 = vpop.permute.xlu0 %8580  ;;  %v8659_v20 = vlaneseq }
 0x961   :  { %8834 = vmatprep.subr.bf16.mxu1 %v12348_v56  ;;  %v10243_v10 = vld [vmem:[%s16597_s9 + $0x1] ss:$0 sm:$0xff]  ;;  %v12354_v17 = vld [vmem:[%s16602_s15 + $0x24] ss:$8 sps:$4 sm:$0xff]   ;;  %v16959_v36 = vmov 0.0  }
 0x962   :  { %8835 = vmatpush1.bf16.msra.mxu1 %v12346_v3  ;;  %v12352_v27 = vld [vmem:[%s16602_s15 + $0x20] ss:$8 sps:$4 sm:$0xff]   ;;  %v16288_v23 = vand.u32 127, %v8659_v20 }
 0x963   :  { %8836 = vmatprep.subr.bf16.mxu1 %v12351_v22 }
 0x964   :  { %8945 = vadd.xlane.f32.xlu0 %v8944_v42  ;;  %8948 = vadd.xlane.f32.xlu1 %v8947_v50  ;;  %v16273_v58 = vpop.permute.xlu0 %8987 }
 0x966   :  { %8837 = vmatpush1.bf16.msra.mxu1 %v12349_v52 }
 0x967   :  { %8838 = vmatprep.subr.bf16.mxu1 %v12354_v17 }
 0x968   :  { %9279 = vadd.xlane.f32.xlu0 %v9278_v8  ;;  %9282 = vadd.xlane.f32.xlu1 %v9281_v15 }
 0x96a   :  { %8839 = vmatpush1.bf16.msra.mxu1 %v12352_v27 }
 0x96b   :  { %8840 = vmatprep.subr.bf16.mxu1 %v12357_v39 }
 0x96c   :  { %8963 = vadd.xlane.f32.xlu1 %v8962_v61  ;;  %8556 = vadd.xlane.f32.xlu0 %v8555_v33 }
 0x96e   :  { %8841 = vmatpush1.bf16.msra.mxu1 %v12355_v2 }
 0x96f   :  { %11590 = vmatprep.subr.bf16.mxu1 %v16959_v36 }
 0x970   :  { %9297 = vadd.xlane.f32.xlu0 %v9296_v9  ;;  %8550 = vadd.xlane.f32.xlu1 %v8549_v54 }
 0x974   :  { %9291 = vadd.xlane.f32.xlu0 %v9290_v26  ;;  %8957 = vadd.xlane.f32.xlu1 %v8956_v32 }
 0x978   :  { %8559 = vadd.xlane.f32.xlu1 %v8558_v46  ;;  %8568 = vadd.xlane.f32.xlu0 %v8567_v4 }
 0x97c   :  { %8966 = vadd.xlane.f32.xlu1 %v8965_v60  ;;  %8975 = vadd.xlane.f32.xlu0 %v8974_v34  ;;  %v16303_v34 = vshrl.u32 %v8659_v20, 7 }
 0x980   :  { %9300 = vadd.xlane.f32.xlu1 %v9299_v57  ;;  %9309 = vadd.xlane.f32.xlu0 %v9308_v0  ;;  %v8706_v57 = vadd.s32 4294967280, %v16288_v23 }
 0x984   :  { %8553 = vadd.xlane.f32.xlu1 %v8552_v38  ;;  %8562 = vadd.xlane.f32.xlu0 %v8561_v6 }
 0x988   :  { %8960 = vadd.xlane.f32.xlu1 %v8959_v18  ;;  %8969 = vadd.xlane.f32.xlu0 %v8968_v35  ;;  %v8699_v35 = vadd.s32 4294967288, %v16288_v23 }
 0x98a   :  { %v16316_v52 = vsub.s32 %v8699_v35, %v16303_v34 }
 0x98c   :  { %9294 = vadd.xlane.f32.xlu1 %v9293_v19  ;;  %9303 = vadd.xlane.f32.xlu0 %v9302_v21 }
 0x990   :  { %8571 = vadd.xlane.f32.xlu1 %v8570_v16 }
 0x994   :  { %8978 = vadd.xlane.f32.xlu1 %v8977_v62 }
 0x998   :  { %9312 = vadd.xlane.f32.xlu1 %v9311_v29 }
 0x99c   :  { %8565 = vadd.xlane.f32.xlu1 %v8564_v30  ;;  %v8713_v30 = vadd.s32 4294967272, %v16288_v23 }
 0x9a0   :  { %8972 = vadd.xlane.f32.xlu1 %v8971_v51  ;;  %v16310_v51 = vsub.s32 %v16288_v23, %v16303_v34 }
 0x9a2   :  { %9322 = vperm.xlu0 %12263, %v10241_v53   ;;  %v16313_v53 = vsub.s32 %v8706_v57, %v16303_v34  ;;  %v8720_v57 = vadd.s32 4294967264, %v16288_v23 }
 0x9a4   :  { %9306 = vadd.xlane.f32.xlu1 %v9305_v37 }
 0x9b5   :  { %9349 = vperm.xlu1 %12264, %v10243_v10  }
 0x9c9   :  { %v8940_v48 = vpop.xlane.xlu1 %8939  ;;  %v8533_v25 = vpop.xlane.xlu0 %8532 }
 0x9ca   :  { %v8585_v14 = vmul.f32 %v16268_v31, %v8533_v25  ;;  %v8992_v1 = vmul.f32 %v16273_v58, %v8940_v48 }
 0x9cc   :  { %v8611_v50 = vadd.f32 %v16266_v7, %v8585_v14  ;;  %v9018_v15 = vadd.f32 %v16271_v41, %v8992_v1 }
 0x9cd   :  { %v16275_v11 = vpop.xlane.xlu0 %9273  ;;  %v8934_v5 = vpop.xlane.xlu1 %8933 }
 0x9ce   :  { %v8990_v47 = vmul.f32 %v16273_v58, %v8934_v5  ;;  %v8627_v45 = vmax.f32 %v8611_v50, 0.0  ;;  %v9034_v60 = vmax.f32 %v9018_v15, 0.0  ;;  %v16323_v5 = vsub.s32 %v8713_v30, %v16303_v34 }
 0x9d0   :  { %v9016_v13 = vadd.f32 %v16271_v41, %v8990_v47 }
 0x9d1   :  { %v16277_v28 = vpop.xlane.xlu1 %9267  ;;  %v8527_v43 = vpop.xlane.xlu0 %8526 }
 0x9d2   :  { %v8583_v59 = vmul.f32 %v16268_v31, %v8527_v43  ;;  %v9032_v0 = vmax.f32 %v9016_v13, 0.0 }
 0x9d4   :  { %v8609_v24 = vadd.f32 %v16266_v7, %v8583_v59 }
 0x9d5   :  { %v8536_v44 = vpop.xlane.xlu1 %8535  ;;  %v8530_v42 = vpop.xlane.xlu0 %8529 }
 0x9d6   :  { %v8586_v40 = vmul.f32 %v16268_v31, %v8536_v44  ;;  %v8584_v55 = vmul.f32 %v16268_v31, %v8530_v42  ;;  %v8625_v19 = vmax.f32 %v8609_v24, 0.0 }
 0x9d8   :  { %v8612_v8 = vadd.f32 %v16266_v7, %v8586_v40  ;;  %v8610_v49 = vadd.f32 %v16266_v7, %v8584_v55 }
 0x9d9   :  { %v8943_v61 = vpop.xlane.xlu1 %8942  ;;  %v8937_v33 = vpop.xlane.xlu0 %8936 }
 0x9da   :  { %v8628_v63 = vmax.f32 %v8612_v8, 0.0  ;;  %v8993_v9 = vmul.f32 %v16273_v58, %v8943_v61  ;;  %v8991_v54 = vmul.f32 %v16273_v58, %v8937_v33  ;;  %v8626_v38 = vmax.f32 %v8610_v49, 0.0 }
 0x9dc   :  { %v16294_v26 = vpack.c.bf16 %v8628_v63, %v8627_v45  ;;  %v9019_v32 = vadd.f32 %v16271_v41, %v8993_v9  ;;  %v9017_v12 = vadd.f32 %v16271_v41, %v8991_v54  ;;  %v8641_v37 = vpack.c.bf16 %v8626_v38, %v8625_v19 }
 0x9dd   :  { %v16299_v46 = vpop.xlane.xlu1 %9276  ;;  %v16301_v4 = vpop.xlane.xlu0 %9270 }
 0x9de   :  { %v9035_v6 = vmax.f32 %v9019_v32, 0.0  ;;  %v9033_v18 = vmax.f32 %v9017_v12, 0.0  ;;  %v8677_v14 = vunpack.c.l.b16 %v8641_v37  ;;  %v8678_v1 = vunpack.c.h.b16 %v8641_v37 }
 0x9df   :  { %v8679_v61 = vunpack.c.l.b16 %v16294_v26 }
 0x9e0   :  { %v9049_v21 = vpack.c.bf16 %v9035_v6, %v9034_v60  ;;  %v9048_v16 = vpack.c.bf16 %v9033_v18, %v9032_v0  ;;  %v8698_v33 = vrot.slane %v8677_v14, %v16310_v51  ;;  %v8703_v45 = vrot.slane %v8678_v1, %v16316_v52 }
 0x9e1   :  { %v8545_v62 = vpop.xlane.xlu0 %8544  ;;  %v8548_v29 = vpop.xlane.xlu1 %8547  ;;  %v8734_v60 = vadd.s32 4294967248, %v16288_v23  ;;  %v8710_v0 = vrot.slane %v8679_v61, %v16313_v53  ;;  %v8727_v6 = vadd.s32 4294967256, %v16288_v23 }
 0x9e2   :  { %v9074_v3 = vunpack.c.l.b16 %v9049_v21  ;;  %v9072_v56 = vunpack.c.l.b16 %v9048_v16  ;;  %v9075_v22 = vunpack.c.h.b16 %v9049_v21  ;;  %v9073_v10 = vunpack.c.h.b16 %v9048_v16 }
 0x9e3   :  { %v8589_v27 = vmul.f32 %v16268_v31, %v8545_v62  ;;  %v8590_v39 = vmul.f32 %v16268_v31, %v8548_v29  ;;  %v8705_v35 = vsel %vm8704_vm6, %v8703_v45, %v8698_v33 }
 0x9e4   :  { %v9100_v17 = vrot.slane %v9074_v3, %v16313_v53  ;;  %v9091_v2 = vrot.slane %v9072_v56, %v16310_v51  ;;  %v9095_v43 = vrot.slane %v9073_v10, %v16316_v52  ;;  %v9105_v20 = vrot.slane %v9075_v22, %v16323_v5 }
 0x9e5   :  { %v8952_v48 = vpop.xlane.xlu0 %8951  ;;  %v8955_v25 = vpop.xlane.xlu1 %8954  ;;  %v8615_v42 = vadd.f32 %v16266_v7, %v8589_v27  ;;  %v8616_v40 = vadd.f32 %v16266_v7, %v8590_v39  ;;  %v8680_v22 = vunpack.c.h.b16 %v16294_v26  ;;  %v8741_v10 = vadd.s32 4294967240, %v16288_v23 }
 0x9e6   :  { %v9096_v44 = vsel %vm8704_vm6, %v9095_v43, %v9091_v2  ;;  %v8996_v47 = vmul.f32 %v16273_v58, %v8952_v48  ;;  %v8997_v55 = vmul.f32 %v16273_v58, %v8955_v25  ;;  %v16359_v27 = vsub.s32 %v8720_v57, %v16303_v34 }
 0x9e7   :  { %v9101_v50 = vsel %vm8711_vm7, %v9100_v17, %v9096_v44  ;;  %v8631_v63 = vmax.f32 %v8615_v42, 0.0  ;;  %v8632_v9 = vmax.f32 %v8616_v40, 0.0  ;;  %v16362_v17 = vsub.s32 %v8727_v6, %v16303_v34 }
 0x9e8   :  { %v16338_v59 = vsel %vm8718_vm8, %v9105_v20, %v9101_v50  ;;  %v9022_v54 = vadd.f32 %v16271_v41, %v8996_v47  ;;  %v9023_v13 = vadd.f32 %v16271_v41, %v8997_v55  ;;  %v8712_v25 = vsel %vm8711_vm7, %v8710_v0, %v8705_v35 }
 0x9e9   :  { %v16333_v8 = vpop.xlane.xlu0 %9285  ;;  %v16335_v15 = vpop.xlane.xlu1 %9288  ;;  %v8644_v19 = vpack.c.bf16 %v8632_v9, %v8631_v63  ;;  %v16368_v43 = vsub.s32 %v8734_v60, %v16303_v34  ;;  %v8717_v40 = vrot.slane %v8680_v22, %v16323_v5  ;;  %v16376_v47 = vsub.s32 %v8741_v10, %v16303_v34 }
 0x9ea   :  { %v9038_v21 = vmax.f32 %v9022_v54, 0.0  ;;  %v9039_v16 = vmax.f32 %v9023_v13, 0.0 }
 0x9eb   :  { %v8683_v14 = vunpack.c.l.b16 %v8644_v19  ;;  %v8684_v55 = vunpack.c.h.b16 %v8644_v19  ;;  %v8719_v9 = vsel %vm8718_vm8, %v8717_v40, %v8712_v25 }
 0x9ec   :  { %v9051_v26 = vpack.c.bf16 %v9039_v16, %v9038_v21 }
 0x9ed   :  { %v8539_v49 = vpop.xlane.xlu0 %8538  ;;  %v8542_v32 = vpop.xlane.xlu1 %8541  ;;  %v8738_v63 = vrot.slane %v8683_v14, %v16368_v43  ;;  %v8745_v60 = vrot.slane %v8684_v55, %v16376_v47 }
 0x9ee   :  { %v8587_v12 = vmul.f32 %v16268_v31, %v8539_v49  ;;  %v8588_v24 = vmul.f32 %v16268_v31, %v8542_v32  ;;  %v9078_v49 = vunpack.c.l.b16 %v9051_v26  ;;  %v9079_v57 = vunpack.c.h.b16 %v9051_v26 }
 0x9f0   :  { %v8613_v38 = vadd.f32 %v16266_v7, %v8587_v12  ;;  %v8614_v18 = vadd.f32 %v16266_v7, %v8588_v24  ;;  %v9120_v16 = vrot.slane %v9078_v49, %v16368_v43 }
 0x9f1   :  { %v8946_v62 = vpop.xlane.xlu0 %8945  ;;  %v8949_v29 = vpop.xlane.xlu1 %8948 }
 0x9f2   :  { %v8629_v30 = vmax.f32 %v8613_v38, 0.0  ;;  %v8630_v37 = vmax.f32 %v8614_v18, 0.0  ;;  %v8994_v3 = vmul.f32 %v16273_v58, %v8946_v62  ;;  %v8995_v56 = vmul.f32 %v16273_v58, %v8949_v29 }
 0x9f3   :  { %v9125_v29 = vrot.slane %v9079_v57, %v16376_v47 }
 0x9f4   :  { %v8643_v2 = vpack.c.bf16 %v8630_v37, %v8629_v30  ;;  %v9020_v39 = vadd.f32 %v16271_v41, %v8994_v3  ;;  %v9021_v48 = vadd.f32 %v16271_v41, %v8995_v56 }
 0x9f5   :  { %v16370_v1 = vpop.xlane.xlu0 %9279  ;;  %v16372_v23 = vpop.xlane.xlu1 %9282 }
 0x9f6   :  { %v8681_v20 = vunpack.c.l.b16 %v8643_v2  ;;  %v8682_v44 = vunpack.c.h.b16 %v8643_v2  ;;  %v9036_v42 = vmax.f32 %v9020_v39, 0.0  ;;  %v9037_v50 = vmax.f32 %v9021_v48, 0.0 }
 0x9f8   :  { %v8724_v61 = vrot.slane %v8681_v20, %v16359_v27  ;;  %v8731_v33 = vrot.slane %v8682_v44, %v16362_v17  ;;  %v9050_v45 = vpack.c.bf16 %v9037_v50, %v9036_v42 }
 0x9f9   :  { %v8964_v54 = vpop.xlane.xlu1 %8963  ;;  %v8557_v13 = vpop.xlane.xlu0 %8556 }
 0x9fa   :  { %v8726_v32 = vsel %vm8725_vm9, %v8724_v61, %v8719_v9  ;;  %v9076_v12 = vunpack.c.l.b16 %v9050_v45  ;;  %v9077_v24 = vunpack.c.h.b16 %v9050_v45  ;;  %v8593_v61 = vmul.f32 %v16268_v31, %v8557_v13 }
 0x9fb   :  { %v8733_v0 = vsel %vm8732_vm10, %v8731_v33, %v8726_v32  ;;  %v9000_v49 = vmul.f32 %v16273_v58, %v8964_v54 }
 0x9fc   :  { %v8740_v38 = vsel %vm8739_vm11, %v8738_v63, %v8733_v0  ;;  %v9110_v6 = vrot.slane %v9076_v12, %v16359_v27  ;;  %v9115_v18 = vrot.slane %v9077_v24, %v16362_v17  ;;  %v8619_v57 = vadd.f32 %v16266_v7, %v8593_v61 }
 0x9fd   :  { %v16389_v35 = vsel %vm8746_vm12, %v8745_v60, %v8740_v38  ;;  %v16391_v19 = vpop.xlane.xlu0 %9297  ;;  %v8551_v21 = vpop.xlane.xlu1 %8550 }
 0x9fe   :  { %v9111_v62 = vsel %vm8725_vm9, %v9110_v6, %v16338_v59  ;;  %v8591_v59 = vmul.f32 %v16268_v31, %v8551_v21  ;;  %v9026_v21 = vadd.f32 %v16271_v41, %v9000_v49 }
 0x9ff   :  { %v9116_v30 = vsel %vm8732_vm10, %v9115_v18, %v9111_v62 }
 0xa00   :  { %v9121_v37 = vsel %vm8739_vm11, %v9120_v16, %v9116_v30  ;;  %v8617_v40 = vadd.f32 %v16266_v7, %v8591_v59 }
 0xa01   :  { %v8958_v3 = vpop.xlane.xlu1 %8957  ;;  %v16400_v56 = vsel %vm8746_vm12, %v9125_v29, %v9121_v37  ;;  %v16402_v22 = vpop.xlane.xlu0 %9291  ;;  %v8635_v29 = vmax.f32 %v8619_v57, 0.0 }
 0xa02   :  { %v8998_v20 = vmul.f32 %v16273_v58, %v8958_v3  ;;  %v8633_v24 = vmax.f32 %v8617_v40, 0.0 }
 0xa04   :  { %v9024_v63 = vadd.f32 %v16271_v41, %v8998_v20 }
 0xa05   :  { %v8560_v10 = vpop.xlane.xlu1 %8559  ;;  %v8569_v2 = vpop.xlane.xlu0 %8568 }
 0xa06   :  { %v8594_v44 = vmul.f32 %v16268_v31, %v8560_v10  ;;  %v9040_v6 = vmax.f32 %v9024_v63, 0.0  ;;  %v9042_v10 = vmax.f32 %v9026_v21, 0.0 }
 0xa08   :  { %v8620_v32 = vadd.f32 %v16266_v7, %v8594_v44 }
 0xa09   :  { %v8967_v39 = vpop.xlane.xlu1 %8966  ;;  %v8976_v25 = vpop.xlane.xlu0 %8975 }
 0xa0a   :  { %v9001_v33 = vmul.f32 %v16273_v58, %v8967_v39  ;;  %v8636_v16 = vmax.f32 %v8620_v32, 0.0  ;;  %v9004_v61 = vmul.f32 %v16273_v58, %v8976_v25 }
 0xa0c   :  { %v9027_v13 = vadd.f32 %v16271_v41, %v9001_v33  ;;  %v8646_v39 = vpack.c.bf16 %v8636_v16, %v8635_v29  ;;  %v9030_v21 = vadd.f32 %v16271_v41, %v9004_v61 }
 0xa0d   :  { %v16404_v48 = vpop.xlane.xlu1 %9300  ;;  %v16410_v42 = vpop.xlane.xlu0 %9309 }
 0xa0e   :  { %v9043_v30 = vmax.f32 %v9027_v13, 0.0  ;;  %v8687_v63 = vunpack.c.l.b16 %v8646_v39 }
 0xa10   :  { %v9053_v40 = vpack.c.bf16 %v9043_v30, %v9042_v10  ;;  %v8760_v16 = vrot.slane %v8687_v63, %v16313_v53 }
 0xa11   :  { %v8554_v14 = vpop.xlane.xlu1 %8553  ;;  %v8563_v0 = vpop.xlane.xlu0 %8562 }
 0xa12   :  { %v8592_v26 = vmul.f32 %v16268_v31, %v8554_v14  ;;  %v9082_v13 = vunpack.c.l.b16 %v9053_v40 }
 0xa14   :  { %v8618_v50 = vadd.f32 %v16266_v7, %v8592_v26  ;;  %v9139_v10 = vrot.slane %v9082_v13, %v16313_v53 }
 0xa15   :  { %v8961_v55 = vpop.xlane.xlu1 %8960  ;;  %v8970_v59 = vpop.xlane.xlu0 %8969 }
 0xa16   :  { %v8999_v45 = vmul.f32 %v16273_v58, %v8961_v55  ;;  %v8634_v9 = vmax.f32 %v8618_v50, 0.0  ;;  %v8597_v50 = vmul.f32 %v16268_v31, %v8569_v2  ;;  %v9002_v49 = vmul.f32 %v16273_v58, %v8970_v59 }
 0xa18   :  { %v9025_v12 = vadd.f32 %v16271_v41, %v8999_v45  ;;  %v8645_v18 = vpack.c.bf16 %v8634_v9, %v8633_v24  ;;  %v8595_v9 = vmul.f32 %v16268_v31, %v8563_v0  ;;  %v8623_v25 = vadd.f32 %v16266_v7, %v8597_v50 }
 0xa19   :  { %v16421_v60 = vpop.xlane.xlu1 %9294  ;;  %v9046_v50 = vmax.f32 %v9030_v21, 0.0 }
 0xa1a   :  { %v9041_v38 = vmax.f32 %v9025_v12, 0.0  ;;  %v8685_v37 = vunpack.c.l.b16 %v8645_v18  ;;  %v8686_v3 = vunpack.c.h.b16 %v8645_v18  ;;  %v9083_v18 = vunpack.c.h.b16 %v9053_v40 }
 0xa1c   :  { %v9052_v62 = vpack.c.bf16 %v9041_v38, %v9040_v6  ;;  %v8751_v33 = vrot.slane %v8685_v37, %v16310_v51  ;;  %v8755_v45 = vrot.slane %v8686_v3, %v16316_v52  ;;  %v9304_v38 = vpop.xlane.xlu0 %9303  ;;  %v8688_v6 = vunpack.c.h.b16 %v8646_v39 }
 0xa1d   :  { %v8572_v54 = vpop.xlane.xlu1 %8571 }
 0xa1e   :  { %v9080_v14 = vunpack.c.l.b16 %v9052_v62  ;;  %v9081_v26 = vunpack.c.h.b16 %v9052_v62  ;;  %v8598_v20 = vmul.f32 %v16268_v31, %v8572_v54  ;;  %v8756_v0 = vsel %vm8704_vm6, %v8755_v45, %v8751_v33 }
 0xa1f   :  { %v8621_v62 = vadd.f32 %v16266_v7, %v8595_v9  ;;  %v9028_v54 = vadd.f32 %v16271_v41, %v9002_v49  ;;  %v8761_v39 = vsel %vm8711_vm7, %v8760_v16, %v8756_v0 }
 0xa20   :  { %v9130_v32 = vrot.slane %v9080_v14, %v16310_v51  ;;  %v9134_v12 = vrot.slane %v9081_v26, %v16316_v52  ;;  %v8624_v2 = vadd.f32 %v16266_v7, %v8598_v20  ;;  %v8765_v26 = vrot.slane %v8688_v6, %v16323_v5 }
 0xa21   :  { %v8979_v44 = vpop.xlane.xlu1 %8978  ;;  %v9323_v59 = vpop.permute.xlu0 %9322  ;;  %v8639_v20 = vmax.f32 %v8623_v25, 0.0  ;;  %v8637_v40 = vmax.f32 %v8621_v62, 0.0  ;;  %v9044_v61 = vmax.f32 %v9028_v54, 0.0 }
 0xa22   :  { %v9005_v55 = vmul.f32 %v16273_v58, %v8979_v44  ;;  %v9135_v29 = vsel %vm8704_vm6, %v9134_v12, %v9130_v32  ;;  %v8640_v30 = vmax.f32 %v8624_v2, 0.0  ;;  %v9144_v44 = vrot.slane %v9083_v18, %v16323_v5 }
 0xa23   :  { %v8766_v9 = vsel %vm8718_vm8, %v8765_v26, %v8761_v39  ;;  %v9325_v32 = vmul.f32 %v9323_v59, %v16277_v28  ;;  %v9326_v2 = vmul.f32 %v9323_v59, %v16301_v4  ;;  %v9328_v13 = vmul.f32 %v9323_v59, %v16299_v46 }
 0xa24   :  { %v9031_v24 = vadd.f32 %v16271_v41, %v9005_v55  ;;  %v9140_v55 = vsel %vm8711_vm7, %v9139_v10, %v9135_v29  ;;  %v8648_v45 = vpack.c.bf16 %v8640_v30, %v8639_v20  ;;  %v9330_v6 = vmul.f32 %v9323_v59, %v16372_v23 }
 0xa25   :  { %v9313_v57 = vpop.xlane.xlu1 %9312  ;;  %v9145_v25 = vsel %vm8718_vm8, %v9144_v44, %v9140_v55  ;;  %v9331_v28 = vmul.f32 %v9323_v59, %v16333_v8  ;;  %v9333_v62 = vmul.f32 %v9323_v59, %v16402_v22  ;;  %v9334_v23 = vmul.f32 %v9323_v59, %v16421_v60 }
 0xa26   :  { %v9047_v37 = vmax.f32 %v9031_v24, 0.0  ;;  %v9327_v24 = vmul.f32 %v9323_v59, %v16275_v11  ;;  %v8691_v0 = vunpack.c.l.b16 %v8648_v45  ;;  %v8692_v4 = vunpack.c.h.b16 %v8648_v45 }
 0xa27   :  { %v9336_v8 = vmul.f32 %v9323_v59, %v16404_v48  ;;  %v9337_v10 = vmul.f32 %v9323_v59, %v9304_v38 }
 0xa28   :  { %v9055_v63 = vpack.c.bf16 %v9047_v37, %v9046_v50  ;;  %v8780_v22 = vrot.slane %v8691_v0, %v16368_v43  ;;  %v8785_v39 = vrot.slane %v8692_v4, %v16376_v47 }
 0xa29   :  { %v8566_v3 = vpop.xlane.xlu1 %8565 }
 0xa2a   :  { %v8596_v14 = vmul.f32 %v16268_v31, %v8566_v3  ;;  %v9086_v16 = vunpack.c.l.b16 %v9055_v63  ;;  %v9087_v54 = vunpack.c.h.b16 %v9055_v63 }
 0xa2c   :  { %v8622_v33 = vadd.f32 %v16266_v7, %v8596_v14  ;;  %v9329_v7 = vmul.f32 %v9323_v59, %v16370_v1  ;;  %v9340_v1 = vmul.f32 %v9323_v59, %v9313_v57  ;;  %v9159_v14 = vrot.slane %v9086_v16, %v16368_v43 }
 0xa2d   :  { %v8973_v49 = vpop.xlane.xlu1 %8972  ;;  %v9339_v57 = vmul.f32 %v9323_v59, %v16410_v42  ;;  %v9164_v60 = vrot.slane %v9087_v54, %v16376_v47 }
 0xa2e   :  { %v8638_v31 = vmax.f32 %v8622_v33, 0.0  ;;  %v9003_v12 = vmul.f32 %v16273_v58, %v8973_v49  ;;  %v9332_v58 = vmul.f32 %v9323_v59, %v16335_v15 }
 0xa30   :  { %v8647_v18 = vpack.c.bf16 %v8638_v31, %v8637_v40  ;;  %v9029_v21 = vadd.f32 %v16271_v41, %v9003_v12  ;;  %v9335_v41 = vmul.f32 %v9323_v59, %v16391_v19 }
 0xa31   :  { %v9307_v11 = vpop.xlane.xlu1 %9306 }
 0xa32   :  { %v8689_v29 = vunpack.c.l.b16 %v8647_v18  ;;  %v8690_v46 = vunpack.c.h.b16 %v8647_v18  ;;  %v9045_v30 = vmax.f32 %v9029_v21, 0.0  ;;  %v9338_v50 = vmul.f32 %v9323_v59, %v9307_v11  ;;  %v12358_v59 = vld [vmem:[%s16598_s10] sm:$0xff]  }
 0xa34   :  { %v8770_v15 = vrot.slane %v8689_v29, %v16359_v27  ;;  %v8775_v37 = vrot.slane %v8690_v46, %v16362_v17  ;;  %v9054_v3 = vpack.c.bf16 %v9045_v30, %v9044_v61 }
 0xa35   :  { %v9350_v26 = vpop.permute.xlu1 %9349 }
 0xa36   :  { %v8771_v19 = vsel %vm8725_vm9, %v8770_v15, %v8766_v9  ;;  %v9084_v48 = vunpack.c.l.b16 %v9054_v3  ;;  %v9085_v20 = vunpack.c.h.b16 %v9054_v3  ;;  %v9352_v40 = vadd.f32 %v9350_v26, %v9325_v32 }
 0xa37   :  { %v8776_v44 = vsel %vm8732_vm10, %v8775_v37, %v8771_v19  ;;  %v9353_v38 = vadd.f32 %v9350_v26, %v9326_v2  ;;  %v9354_v45 = vadd.f32 %v9350_v26, %v9327_v24  ;;  %v9355_v63 = vadd.f32 %v9350_v26, %v9328_v13 }
 0xa38   :  { %v8781_v55 = vsel %vm8739_vm11, %v8780_v22, %v8776_v44  ;;  %v9149_v61 = vrot.slane %v9084_v48, %v16359_v27  ;;  %v9154_v33 = vrot.slane %v9085_v20, %v16362_v17  ;;  %v9356_v49 = vadd.f32 %v9350_v26, %v9329_v7 }
 0xa39   :  { %v8786_v42 = vsel %vm8746_vm12, %v8785_v39, %v8781_v55  ;;  %v9357_v31 = vadd.f32 %v9350_v26, %v9330_v6  ;;  %v9358_v32 = vadd.f32 %v9350_v26, %v9331_v28  ;;  %v9359_v2 = vadd.f32 %v9350_v26, %v9332_v58  ;;  %v12359_v28 = vld [vmem:[%s16598_s10 + $0x8] sm:$0xff]   ;;  %v12360_v39 = vld [vmem:[%s16598_s10 + $0x10] sm:$0xff]  }
 0xa3a   :  { %v9150_v9 = vsel %vm8725_vm9, %v9149_v61, %v9145_v25  ;;  %v8788_v12 = vsel %vm8787_vm13, %v8786_v42, %v16389_v35  ;;  %v9360_v24 = vadd.f32 %v9350_v26, %v9333_v62  ;;  %v9361_v0 = vadd.f32 %v9350_v26, %v9334_v23  ;;  %v12361_v61 = vld [vmem:[%s16598_s10 + $0x18] sm:$0xff]  }
 0xa3b   :  { %v9155_v18 = vsel %vm8732_vm10, %v9154_v33, %v9150_v9  ;;  %v8789_v21 = vpack.c.b16 %v8788_v12, %v8788_v12  ;;  %v9362_v7 = vadd.f32 %v9350_v26, %v9335_v41  ;;  %v9363_v6 = vadd.f32 %v9350_v26, %v9336_v8 }
 0xa3c   :  { %v9160_v13 = vsel %vm8739_vm11, %v9159_v14, %v9155_v18  ;;  %v9364_v4 = vadd.f32 %v9350_v26, %v9337_v10  ;;  %v9365_v25 = vadd.f32 %v9350_v26, %v9338_v50  ;;  %v9366_v16 = vadd.f32 %v9350_v26, %v9339_v57 }
 0xa3d   :  { %10227 = vmatmul.mubr.msk.bf16.vlgmr.msra.gmra.mrb[48].mxu1 %vm8830_vm14, %v8789_v21  ;;  %v9165_v35 = vsel %vm8746_vm12, %v9164_v60, %v9160_v13  ;;  %v9367_v11 = vadd.f32 %v9350_v26, %v9340_v1  ;;  %v9368_v58 = vmax.f32 %v9352_v40, 0.0  ;;  %v9369_v62 = vmax.f32 %v9353_v38, 0.0 }
 0xa3e   :  { %11591 = vmatpush3.bf16.msra.mxu1 %v12358_v59  ;;  %11598 = vmatprep.mubr.msk.bf16.mxu1 %vm12402_vm15, %v16959_v36  ;;  %v9370_v54 = vmax.f32 %v9354_v45, 0.0  ;;  %v9371_v29 = vmax.f32 %v9355_v63, 0.0  ;;  %v9372_v46 = vmax.f32 %v9356_v49, 0.0  ;;  %v9373_v30 = vmax.f32 %v9357_v31, 0.0 }
 0xa3f   :  { %11592 = vmatprep.subr.bf16.mxu1 %v16959_v36  ;;  %v9374_v23 = vmax.f32 %v9358_v32, 0.0  ;;  %v9375_v41 = vmax.f32 %v9359_v2, 0.0  ;;  %v9376_v1 = vmax.f32 %v9360_v24, 0.0  ;;  %v9377_v8 = vmax.f32 %v9361_v0, 0.0 }
 0xa40   :  { %v9378_v15 = vmax.f32 %v9362_v7, 0.0  ;;  %v9379_v37 = vmax.f32 %v9363_v6, 0.0  ;;  %v9166_v3 = vsel %vm8787_vm13, %v9165_v35, %v16400_v56  ;;  %v9380_v10 = vmax.f32 %v9364_v4, 0.0  ;;  %v12362_v7 = vld [vmem:[%s16598_s10 + $0x20] sm:$0xff]  }
 0xa41   :  { %v9381_v22 = vmax.f32 %v9365_v25, 0.0  ;;  %v9382_v14 = vmax.f32 %v9366_v16, 0.0  ;;  %v9384_v26 = vpack.c.bf16 %v9369_v62, %v9368_v58  ;;  %v9385_v57 = vpack.c.bf16 %v9371_v29, %v9370_v54 }
 0xa42   :  { %11593 = vmatpush3.bf16.msra.mxu1 %v12359_v28  ;;  %v9387_v60 = vpack.c.bf16 %v9375_v41, %v9374_v23  ;;  %v9383_v19 = vmax.f32 %v9367_v11, 0.0  ;;  %v9386_v48 = vpack.c.bf16 %v9373_v30, %v9372_v46  ;;  %v9388_v20 = vpack.c.bf16 %v9377_v8, %v9376_v1  ;;  %v12363_v23 = vld [vmem:[%s16598_s10 + $0x28] sm:$0xff]  }
 0xa43   :  { %11594 = vmatprep.subr.bf16.mxu1 %v16959_v36  ;;  %v9389_v44 = vpack.c.bf16 %v9379_v37, %v9378_v15  ;;  %v9409_v50 = vunpack.c.l.b16 %v9384_v26  ;;  %v9410_v40 = vunpack.c.h.b16 %v9384_v26  ;;  %v9411_v56 = vunpack.c.l.b16 %v9385_v57  ;;  %v12365_v26 = vld [vmem:[%s16598_s10 + $0x38] sm:$0xff]  }
 0xa44   :  { %v9390_v38 = vpack.c.bf16 %v9381_v22, %v9380_v10  ;;  %v9412_v55 = vunpack.c.h.b16 %v9385_v57  ;;  %v9167_v33 = vpack.c.b16 %v9166_v3, %v9166_v3  ;;  %v9417_v45 = vunpack.c.l.b16 %v9388_v20  ;;  %v12364_v22 = vld [vmem:[%s16598_s10 + $0x30] sm:$0xff]  }
 0xa45   :  { %v9418_v42 = vunpack.c.h.b16 %v9388_v20  ;;  %v9419_v63 = vunpack.c.l.b16 %v9389_v44  ;;  %v9391_v49 = vpack.c.bf16 %v9383_v19, %v9382_v14  ;;  %v9413_v31 = vunpack.c.l.b16 %v9386_v48  ;;  %v8877_v20 = vld [vmem:[%s16604_s17] sm:$0x3] }
 0xa46   :  { %11595 = vmatpush3.bf16.msra.mxu1 %v12360_v39  ;;  %v9414_v9 = vunpack.c.h.b16 %v9386_v48  ;;  %v9415_v12 = vunpack.c.l.b16 %v9387_v60  ;;  %v9420_v59 = vunpack.c.h.b16 %v9389_v44  ;;  %v9428_v32 = vrot.slane %v9409_v50, %v16310_v51 }
 0xa47   :  { %11596 = vmatprep.subr.bf16.mxu1 %v16959_v36  ;;  %v9432_v2 = vrot.slane %v9410_v40, %v16316_v52  ;;  %v9437_v18 = vrot.slane %v9411_v56, %v16313_v53  ;;  %v9416_v21 = vunpack.c.h.b16 %v9387_v60  ;;  %v9421_v24 = vunpack.c.l.b16 %v9390_v38 }
 0xa48   :  { %v9422_v0 = vunpack.c.h.b16 %v9390_v38  ;;  %v9442_v13 = vrot.slane %v9412_v55, %v16323_v5  ;;  %v9467_v4 = vrot.slane %v9417_v45, %v16310_v51  ;;  %v9471_v35 = vrot.slane %v9418_v42, %v16316_v52 }
 0xa49   :  { %v9433_v6 = vsel %vm8704_vm6, %v9432_v2, %v9428_v32  ;;  %v9476_v25 = vrot.slane %v9419_v63, %v16313_v53  ;;  %v9423_v16 = vunpack.c.l.b16 %v9391_v49  ;;  %v9447_v28 = vrot.slane %v9413_v31, %v16359_v27 }
 0xa4a   :  { %11597 = vmatpush3.bf16.msra.mxu1 %v12361_v61  ;;  %v9438_v11 = vsel %vm8711_vm7, %v9437_v18, %v9433_v6  ;;  %v9452_v58 = vrot.slane %v9414_v9, %v16362_v17  ;;  %v9457_v54 = vrot.slane %v9415_v12, %v16368_v43  ;;  %v9472_v29 = vsel %vm8704_vm6, %v9471_v35, %v9467_v4  ;;  %v10237_v12 = vld [vmem:[%s16599_s11] ss:$0 sm:$0xff]  ;;  %s12403_s11 = smov [#allocation7]  }
 0xa4b   :  { %11602 = vmatprep.subr.bf16.mxu1 %v16959_v36  ;;  %v9443_v62 = vsel %vm8718_vm8, %v9442_v13, %v9438_v11  ;;  %v9481_v51 = vrot.slane %v9420_v59, %v16323_v5  ;;  %v9462_v52 = vrot.slane %v9416_v21, %v16376_v47  ;;  %v9477_v46 = vsel %vm8711_vm7, %v9476_v25, %v9472_v29  ;;  %v10228_v25 = vld [vmem:[#allocation6] ss:$0 sm:$0xff]  ;;  %s9593_s17 = sshll.u32 %s12403_s11, 4  ;;  %s9594_s17 = int_to_ptr.vmem [resolvable:$true] %s9593_s17 }
 0xa4c   :  { %v9448_v53 = vsel %vm8725_vm9, %v9447_v28, %v9443_v62  ;;  %v9486_v30 = vrot.slane %v9421_v24, %v16359_v27  ;;  %v9491_v1 = vrot.slane %v9422_v0, %v16362_v17  ;;  %v9424_v8 = vunpack.c.h.b16 %v9391_v49  ;;  %s12376_s2 = scalar_lea.vmem %s9594_s17, 32  ;;  %p12381_p1 = scmp.lt.s32.totalorder %s9594_s17, %s9594_s17 }
 0xa4d   :  { %11599 = vmatmul.mubr.msk.bf16.vlgmr.msra.gmra.mrb[52].mxu1 %vm8830_vm14, %v9167_v33  ;;  %v9453_v5 = vsel %vm8732_vm10, %v9452_v58, %v9448_v53  ;;  %v9482_v41 = vsel %vm8718_vm8, %v9481_v51, %v9477_v46  ;;  %v9496_v10 = vrot.slane %v9423_v16, %v16368_v43  ;;  %v8661_v60 = vsub.s32 0, %v16303_v34  ;;  %p12377_p0 = scmp.ne.s32.totalorder %s9594_s17, %s12376_s2  ;;  %p12382_p2 = scmp.lt.s32.totalorder %s12376_s2, %s12376_s2 }
 0xa4e   :  { %11603 = vmatpush3.bf16.msra.mxu1 %v12362_v7  ;;  %11610 = vmatprep.mubr.msk.bf16.mxu1 %vm12402_vm15, %v16959_v36  ;;  %v9458_v15 = vsel %vm8739_vm11, %v9457_v54, %v9453_v5  ;;  %v9487_v27 = vsel %vm8725_vm9, %v9486_v30, %v9482_v41  ;;  %v9501_v39 = vrot.slane %v9424_v8, %v16376_v47  ;;  %v8657_v47 = vld [vmem:[%s16603_s16] sm:$0x3]  ;;  %v8665_v19 = vsub.s32 1, %v16303_v34 }
 0xa4f   :  { %11604 = vmatprep.subr.bf16.mxu1 %v16959_v36  ;;  %v9463_v37 = vsel %vm8746_vm12, %v9462_v52, %v9458_v15  ;;  %v9492_v3 = vsel %vm8732_vm10, %v9491_v1, %v9487_v27  ;;  %v8662_v48 = vrot.slane %v8657_v47, %v8661_v60  ;;  %v8882_v40 = vrot.slane %v8877_v20, %v8661_v60  ;;  %p12383_p3 = por %p12382_p2, %p12381_p1 }
 0xa50   :  { %v9497_v17 = vsel %vm8739_vm11, %v9496_v10, %v9492_v3  ;;  %v8886_v55 = vrot.slane %v8877_v20, %v8665_v19 }
 0xa51   :  { %v9502_v14 = vsel %vm8746_vm12, %v9501_v39, %v9497_v17  ;;  %p12384_p4 = pnand %p12383_p3, %p12377_p0 }
 0xa52   :  { %11605 = vmatpush3.bf16.msra.mxu1 %v12363_v23  ;;  %v9503_v43 = vsel %vm8787_vm13, %v9502_v14, %v9463_v37 }
 0xa53   :  { %11606 = vmatprep.subr.bf16.mxu1 %v16959_v36  ;;  %v9504_v57 = vpack.c.b16 %v9503_v43, %v9503_v43 }
 0xa56   :  { %11607 = vmatpush3.bf16.msra.mxu1 %v12364_v22 }
 0xa57   :  { %11608 = vmatprep.subr.bf16.mxu1 %v16959_v36  ;;  %v8666_v36 = vrot.slane %v8657_v47, %v8665_v19 }
 0xa5a   :  { %11609 = vmatpush3.bf16.msra.mxu1 %v12365_v26 }
 0xa5d   :  { %11611 = vmatmul.mubr.msk.bf16.vlgmr.msra.gmra.mrb[52].mxu1 %vm8830_vm14, %v9504_v57 }
 0xb10   :  { %v8868_v44 = vpop.f32.mrb[48].mxu1 }
 0xb11   :  { %v8869_v50 = vadd.f32 %v8868_v44, %v8662_v48  ;;  %v8870_v56 = vpop.f32.mrb[49].mxu1 }
 0xb12   :  { %v8871_v38 = vadd.f32 %v8870_v56, %v8666_v36  ;;  %v8872_v61 = vpop.f32.mrb[50].mxu1 }
 0xb13   :  { %v8875_v33 = vmax.f32 %v8869_v50, 0.0  ;;  %v8873_v45 = vpop.f32.mrb[51].mxu1 }
 0xb14   :  { %v8876_v42 = vmax.f32 %v8871_v38, 0.0 }
 0xb15   :  { %v8889_v63 = vmul.f32 %v8882_v40, %v8875_v33 }
 0xb16   :  { %v8890_v49 = vmul.f32 %v8886_v55, %v8876_v42 }
 0xb17   :  { %v8892_v34 = vsel %vm8891_vm0, %v8889_v63, 0.0 }
 0xb18   :  { %v8893_v31 = vsel %vm8891_vm0, %v8890_v49, 0.0 }
 0xb19   :  { %v8894_v9 = vadd.f32 %v8893_v31, %v8892_v34 }
 0xb30   :  { %v9566_v59 = vpop.f32.mrb[52].mxu1 }
 0xb31   :  { %v11630_v32 = vadd.f32 %v10237_v12, %v9566_v59  ;;  %v11612_v2 = vpop.f32.mrb[53].mxu1 }
 0xb32   :  { %v9569_v18 = vpop.f32.mrb[54].mxu1 }
 0xb33   :  { %v11613_v21 = vpop.f32.mrb[55].mxu1  ;;  %v9573_v24 = vsel %vm8891_vm0, %v11630_v32, -inf }
 0xb34   :  { %9574 = vmax.xlane.f32.xlu1 %v9573_v24 }
 0xbc1   :  { %v9575_v0 = vpop.xlane.xlu1 %9574 }
 0xbc2   :  { %v9576_v13 = vsub.f32 %v11630_v32, %v9575_v0 }
 0xbc4   :  { %v9577_v7 = vmul.f32 1.442695, %v9576_v13 }
 0xbc6   :  { %12366 = vpow2.f32 %v9577_v7 }
 0xbd0   :  { %v12367_v6 = vpop.eup %12366 }
 0xbd1   :  { %v9579_v4 = vsel %vm8891_vm0, %v12367_v6, 0.0 }
 0xbd2   :  { %9580 = vadd.xlane.f32.xlu0 %v9579_v4 }
 0xbd6   :  { %8895 = vadd.xlane.f32.xlu0 %v8894_v9 }
 0xc5f   :  { %v9581_v35 = vpop.xlane.xlu0 %9580 }
 0xc60   :  { %12368 = vrcp.f32 %v9581_v35 }
 0xc63   :  { %v8896_v16 = vpop.xlane.xlu0 %8895 }
 0xc64   :  { %v8904_v11 = vadd.f32 %v10228_v25, %v8896_v16 }
 0xc66   :  { %12370 = vtanh.f32 %v8904_v11 }
 0xc6a   :  { %v12369_v28 = vpop.eup %12368 }
 0xc6b   :  { %v9583_v58 = vmul.f32 %v12369_v28, %v12367_v6 }
 0xc6d   :  { %9584 = vst [vmem:[#allocation7] sm:$0x3] %v9583_v58 }
 0xc6e   :  { %12387 = shalt.err (!%p12384_p4)
}
 0xc6f   :  { %s12388_s6 = scalar_lea.hbm %s16606_s20, 32 }
 0xc70   :  { %p12389_p5 = scmp.ne.s32.totalorder %s16606_s20, %s12388_s6  ;;  %p12392_p6 = scmp.lt.u32.totalorder %s12388_s6, %s16606_s20 }
 0xc72   :  { %p12394_p7 = pnand %p12392_p6, %p12389_p5 }
 0xc74   :  { %12397 = shalt.err (!%p12394_p7)
}
 0xc75   :  { %9596 = dma.vmem_to_hbm [thread:$0]  %s9594_s17, 32, %s16606_s20, [#allocation8]   ;;  %v12371_v62 = vpop.eup %12370 }
 0xc76   :  { %8907 = vst.msk [vmem:[%s16605_s19] sm:$0x3] %vm8906_vm1, %v12371_v62 }
 0xc77   :  { %12398 = dma.done.wait [#allocation8], 32  }
 0xc78   :  { %12399 = vsyncadd [#allocation8], 4294967264 }
 0xc79   :  { %9602 = vsyncpa [#allocation8], 1 }

</bundles_post_ra>
